<compile_context>
chip_gen: v7x
topology: tpu7x:2x2x1
jax: 0.10.0
libtpu: 0.0.40
codegen_flags: <defaults>
</compile_context>

<pallas_src>
import jax
import jax.numpy as jnp
from jax import lax
from jax.experimental import pallas as pl
from jax.experimental.pallas import tpu as pltpu

LANE = 128        # one packed gate tile: 4 gates x 32-lane slots
SLOT = 32         # per-gate lane slot (H <= 32)
VOCAB = 21        # 20 amino acids + padding_idx 0
VOCAB_PAD = 32    # vocab rows padded; pep vocab block starts at row/lane 32
SUBLANE = 8

VMEM_SPEC = pl.BlockSpec(memory_space=pltpu.MemorySpace.VMEM)

_SQRT_2_OVER_PI = 0.7978845608028654


def _gelu(x):
    return 0.5 * x * (1.0 + jnp.tanh(_SQRT_2_OVER_PI * (x + 0.044715 * (x * x * x))))


def _sigmoid(x):
    # exact: sigmoid(x) = 0.5 * tanh(x/2) + 0.5 -> single EUP op per vreg pass
    return 0.5 * jnp.tanh(0.5 * x) + 0.5


# ---------------------------------------------------------------------------
# Fused kernel
# ---------------------------------------------------------------------------
def fused_kernel(
    tcr_tok_ref, pep_tok_ref, tcr_len_ref, pep_len_ref,
    table_ref, b0_ref,
    t_whh0_ref, t_wih1_ref, t_whh1_ref, t_b1_ref,
    p_whh0_ref, p_wih1_ref, p_whh1_ref, p_b1_ref,
    w2a_ref, w2b_ref, b2_ref, w3_ref, b3_ref, wo_ref, bo_ref,
    out_ref,
    gin_ref,
):
    Bp = out_ref.shape[0]
    TB = tcr_tok_ref.shape[0]
    T = TB // Bp

    # --- hoisted: fused embedding + layer-0 input projection (+bias) for BOTH
    #     chains as one matmul.  One-hot lanes 0:32 select the tcr token row of
    #     the fused table (emb_tcr @ wih0_tcr -> cols 0:128), lanes 32:64 select
    #     the pep row (emb_pep @ wih0_pep -> cols 128:256).  padding_idx 0 rows
    #     of the tables are zero, matching nn.Embedding(padding_idx=0). ---
    tok_t = tcr_tok_ref[...]                      # (T*Bp, 1) i32
    tok_p = pep_tok_ref[...] + VOCAB_PAD
    lanes = lax.broadcasted_iota(jnp.int32, (TB, LANE), 1)
    onehot = ((lanes == tok_t) | (lanes == tok_p)).astype(jnp.float32)
    gin_ref[...] = (jnp.dot(onehot, table_ref[...],
                            preferred_element_type=jnp.float32) + b0_ref[...])

    # --- loop invariants hoisted out of the recurrence ---
    b1t = jnp.broadcast_to(t_b1_ref[...], (Bp, LANE))
    b1p = jnp.broadcast_to(p_b1_ref[...], (Bp, LANE))
    last_tt = tcr_len_ref[...] - 1                # (Bp, 1)
    last_tp = pep_len_ref[...] - 1
    z = jnp.zeros((Bp, LANE), jnp.float32)

    def cell(g, c):
        # packed pre-activations: lanes [0:32)=i, [32:64)=f, [64:96)=g~, [96:128)=o
        sg = _sigmoid(g)                          # i/f/o activations, whole vreg
        tg = jnp.tanh(g)                          # g~ activation, whole vreg
        f = pltpu.roll(sg, 96, axis=1)            # lanes 0:H <- sigmoid(f)
        gg = pltpu.roll(tg, 64, axis=1)           # lanes 0:H <- tanh(g~)
        o = pltpu.roll(sg, 32, axis=1)            # lanes 0:H <- sigmoid(o)
        c_new = f * c + sg * gg                   # sg lanes 0:H == sigmoid(i)
        h_new = o * jnp.tanh(c_new)
        # only lanes 0:H are meaningful; the rest stay bounded and hit zero
        # weight rows in every downstream matmul.
        return h_new, c_new

    def step(t, carry):
        h0t, c0t, h1t, c1t, lht, h0p, c0p, h1p, c1p, lhp = carry
        row = pl.multiple_of(t * Bp, Bp)
        g_in = gin_ref[pl.ds(row, Bp), :]         # (Bp, 256): [tcr | pep]

        # layer 0 — two independent chains interleaved (latency hiding)
        g0t = g_in[:, :LANE] + jnp.dot(h0t, t_whh0_ref[...],
                                       preferred_element_type=jnp.float32)
        g0p = g_in[:, LANE:] + jnp.dot(h0p, p_whh0_ref[...],
                                       preferred_element_type=jnp.float32)
        h0t, c0t = cell(g0t, c0t)
        h0p, c0p = cell(g0p, c0p)

        # layer 1 (nn.LSTM inter-layer dropout is train-only -> identity here)
        g1t = (jnp.dot(h0t, t_wih1_ref[...], preferred_element_type=jnp.float32)
               + jnp.dot(h1t, t_whh1_ref[...], preferred_element_type=jnp.float32)
               + b1t)
        g1p = (jnp.dot(h0p, p_wih1_ref[...], preferred_element_type=jnp.float32)
               + jnp.dot(h1p, p_whh1_ref[...], preferred_element_type=jnp.float32)
               + b1p)
        h1t, c1t = cell(g1t, c1t)
        h1p, c1p = cell(g1p, c1p)

        # packed-sequence "last cell": layer-2 hidden state at t == len - 1
        lht = jnp.where(last_tt == t, h1t, lht)
        lhp = jnp.where(last_tp == t, h1p, lhp)
        return h0t, c0t, h1t, c1t, lht, h0p, c0p, h1p, c1p, lhp

    carry = lax.fori_loop(0, T, step, (z,) * 10, unroll=True)
    tcr_h, pep_h = carry[4], carry[9]

    # MLP head.  cat([tcr_h, pep_h]) @ W2 is expressed as a sum of two matmuls so
    # no lane concatenation / relayout is needed.  Dropout2/3 are eval-identity.
    h2 = _gelu(jnp.dot(tcr_h, w2a_ref[...], preferred_element_type=jnp.float32)
               + jnp.dot(pep_h, w2b_ref[...], preferred_element_type=jnp.float32)
               + b2_ref[...])
    h3 = _gelu(jnp.dot(h2, w3_ref[...], preferred_element_type=jnp.float32)
               + b3_ref[...])
    # degenerate (.., 1) matmul replaced by VPU multiply + lane reduction
    logit = jnp.sum(h3 * wo_ref[...], axis=1, keepdims=True) + bo_ref[...]
    out_ref[...] = _sigmoid(logit)


# ---------------------------------------------------------------------------
# Wrapper
# ---------------------------------------------------------------------------
@jax.jit
def forward(kparams, tcrs, tcr_lens, peps, pep_lens):
    B, T_tcr = tcrs.shape
    _, T_pep = peps.shape
    T = max(T_tcr, T_pep)
    Bp = max(SUBLANE, ((B + SUBLANE - 1) // SUBLANE) * SUBLANE)

    def tok_col(tok):
        # pad batch rows to Bp, time to T (token 0 = padding_idx), then
        # time-major flatten: row t*Bp + b <-> (t, b)
        tokp = jnp.zeros((Bp, T), jnp.int32).at[:B, :tok.shape[1]].set(
            tok.astype(jnp.int32))
        return tokp.T.reshape(T * Bp, 1)

    def len_col(lens):
        # padded batch rows get len=1 (their output is sliced away)
        return jnp.ones((Bp, 1), jnp.int32).at[:B, 0].set(lens.astype(jnp.int32))

    out = pl.pallas_call(
        fused_kernel,
        out_shape=jax.ShapeDtypeStruct((Bp, 1), jnp.float32),
        in_specs=[VMEM_SPEC] * 21,
        out_specs=VMEM_SPEC,
        scratch_shapes=[pltpu.VMEM((T * Bp, 2 * LANE), jnp.float32)],
    )(
        tok_col(tcrs), tok_col(peps), len_col(tcr_lens), len_col(pep_lens),
        kparams["table"], kparams["b0"],
        kparams["t_whh0"], kparams["t_wih1"], kparams["t_whh1"], kparams["t_b1"],
        kparams["p_whh0"], kparams["p_wih1"], kparams["p_whh1"], kparams["p_b1"],
        kparams["w2a"], kparams["w2b"], kparams["b2"],
        kparams["w3"], kparams["b3"], kparams["wo"], kparams["bo"],
    )
    return out[:B]


# ---------------------------------------------------------------------------
# Parameters: logical (torch-equivalent, x @ W layout) + packed kernel layout
# ---------------------------------------------------------------------------
def make_params(key, embedding_dim, lstm_dim):
    H = lstm_dim
    ks = iter(jax.random.split(key, 24))
    s = 0.1

    def rnd(shape):
        return jax.random.normal(next(ks), shape, jnp.float32) * s

    def lstm(in_dim):
        # bias = bias_ih + bias_hh folded into one vector
        return rnd((in_dim, 4 * H)), rnd((H, 4 * H)), rnd((4 * H,))

    t_wih0, t_whh0, t_b0 = lstm(embedding_dim)
    t_wih1, t_whh1, t_b1 = lstm(H)
    p_wih0, p_whh0, p_b0 = lstm(embedding_dim)
    p_wih1, p_whh1, p_b1 = lstm(H)
    return {
        # nn.Embedding(21, E, padding_idx=0): row 0 forced to zero
        "tcr_emb": rnd((VOCAB, embedding_dim)).at[0].set(0.0),
        "pep_emb": rnd((VOCAB, embedding_dim)).at[0].set(0.0),
        "t_wih0": t_wih0, "t_whh0": t_whh0, "t_b0": t_b0,
        "t_wih1": t_wih1, "t_whh1": t_whh1, "t_b1": t_b1,
        "p_wih0": p_wih0, "p_whh0": p_whh0, "p_b0": p_b0,
        "p_wih1": p_wih1, "p_whh1": p_whh1, "p_b1": p_b1,
        "w2": rnd((2 * H, 8 * H)), "b2": rnd((8 * H,)),
        "w3": rnd((8 * H, 2 * H)), "b3": rnd((2 * H,)),
        "wo": rnd((2 * H, 1)), "bo": jnp.zeros((1,), jnp.float32),
    }


def pad_for_kernel(p):
    """Re-layout logical params for the packed-gate / fused-embedding kernel."""
    H = p["t_whh0"].shape[0]
    assert H <= SLOT, "kernel packs each gate into a 32-lane slot (lstm_dim <= 32)"
    hp = jax.lax.Precision.HIGHEST

    def gate_cols(w):
        # (..., 4H) -> (..., 128): gate g's H columns land at lanes [g*32, g*32+H)
        out = jnp.zeros(w.shape[:-1] + (LANE,), w.dtype)
        for g in range(4):
            out = out.at[..., g * SLOT:g * SLOT + H].set(w[..., g * H:(g + 1) * H])
        return out

    def row_pad(w, rows):
        return jnp.zeros((rows,) + w.shape[1:], w.dtype).at[: w.shape[0]].set(w)

    # fused embedding -> layer-0 gate table, both chains block-placed:
    #   rows 0:VOCAB           (tcr token)        -> cols   0:128
    #   rows VOCAB_PAD:+VOCAB  (pep token + 32)   -> cols 128:256
    tcr_tab = gate_cols(jnp.dot(p["tcr_emb"], p["t_wih0"], precision=hp))
    pep_tab = gate_cols(jnp.dot(p["pep_emb"], p["p_wih0"], precision=hp))
    table = jnp.zeros((LANE, 2 * LANE), jnp.float32)
    table = table.at[:VOCAB, :LANE].set(tcr_tab)
    table = table.at[VOCAB_PAD:VOCAB_PAD + VOCAB, LANE:].set(pep_tab)
    b0 = jnp.concatenate(
        [gate_cols(p["t_b0"][None, :]), gate_cols(p["p_b0"][None, :])], axis=-1)

    w2 = p["w2"]  # (2H, 8H): rows 0:H act on tcr features, rows H:2H on pep
    return {
        "table": table, "b0": b0,
        "t_whh0": row_pad(gate_cols(p["t_whh0"]), LANE),
        "t_wih1": row_pad(gate_cols(p["t_wih1"]), LANE),
        "t_whh1": row_pad(gate_cols(p["t_whh1"]), LANE),
        "t_b1": gate_cols(p["t_b1"][None, :]),
        "p_whh0": row_pad(gate_cols(p["p_whh0"]), LANE),
        "p_wih1": row_pad(gate_cols(p["p_wih1"]), LANE),
        "p_whh1": row_pad(gate_cols(p["p_whh1"]), LANE),
        "p_b1": gate_cols(p["p_b1"][None, :]),
        "w2a": row_pad(w2[:H], LANE),
        "w2b": row_pad(w2[H:], LANE),
        "b2": p["b2"][None, :],
        "w3": jnp.zeros((w2.shape[1], LANE), jnp.float32).at[:, :2 * H].set(p["w3"]),
        "b3": jnp.zeros((1, LANE), jnp.float32).at[0, :2 * H].set(p["b3"]),
        "wo": jnp.zeros((1, LANE), jnp.float32).at[0, :2 * H].set(p["wo"][:, 0]),
        "bo": p["bo"][None, :],
    }


# ---------------------------------------------------------------------------
# Pure-JAX reference (eval-mode, same packed-sequence semantics)
# ---------------------------------------------------------------------------
def reference_forward(p, tcrs, tcr_lens, peps, pep_lens):
    H = p["t_whh0"].shape[0]
    hp = jax.lax.Precision.HIGHEST

    def cell(x, h, c, wih, whh, b):
        g = jnp.dot(x, wih, precision=hp) + jnp.dot(h, whh, precision=hp) + b
        i = jax.nn.sigmoid(g[:, :H])
        f = jax.nn.sigmoid(g[:, H:2 * H])
        gg = jnp.tanh(g[:, 2 * H:3 * H])
        o = jax.nn.sigmoid(g[:, 3 * H:])
        c = f * c + i * gg
        return o * jnp.tanh(c), c

    def lstm_last(emb, toks, lens, wih0, whh0, b0, wih1, whh1, b1):
        x = emb[toks]                                    # (B, T, E)
        B, T, _ = x.shape
        h0 = c0 = h1 = c1 = jnp.zeros((B, H), jnp.float32)
        last = jnp.zeros((B, H), jnp.float32)
        for t in range(T):
            h0, c0 = cell(x[:, t], h0, c0, wih0, whh0, b0)
            h1, c1 = cell(h0, h1, c1, wih1, whh1, b1)
            last = jnp.where((lens - 1)[:, None] == t, h1, last)
        return last

    tcr_h = lstm_last(p["tcr_emb"], tcrs, tcr_lens,
                      p["t_wih0"], p["t_whh0"], p["t_b0"],
                      p["t_wih1"], p["t_whh1"], p["t_b1"])
    pep_h = lstm_last(p["pep_emb"], peps, pep_lens,
                      p["p_wih0"], p["p_whh0"], p["p_b0"],
                      p["p_wih1"], p["p_whh1"], p["p_b1"])
    cat = jnp.concatenate([tcr_h, pep_h], axis=1)
    h2 = _gelu(jnp.dot(cat, p["w2"], precision=hp) + p["b2"])
    h3 = _gelu(jnp.dot(h2, p["w3"], precision=hp) + p["b3"])
    logit = jnp.dot(h3, p["wo"], precision=hp) + p["bo"]
    return jax.nn.sigmoid(logit)


if __name__ == "__main__":
    key = jax.random.PRNGKey(0)
    kp, k1, k2 = jax.random.split(key, 3)

    B = 2
    T_TCR, T_PEP = 10, 8
    EMBED_DIM, LSTM_DIM = 10, 32       # dropout=0.1 -> identity at inference

    params = make_params(kp, EMBED_DIM, LSTM_DIM)
    kparams = pad_for_kernel(params)

    tcrs = jax.random.randint(k1, (B, T_TCR), 1, VOCAB)
    peps = jax.random.randint(k2, (B, T_PEP), 1, VOCAB)
    tcr_lens = jnp.array([10, 6], dtype=jnp.int32)
    pep_lens = jnp.array([8, 5], dtype=jnp.int32)
    # zero-out padded positions (padding_idx = 0), mirroring the padded torch input
    tcrs = jnp.where(jnp.arange(T_TCR)[None, :] < tcr_lens[:, None], tcrs, 0).astype(jnp.int32)
    peps = jnp.where(jnp.arange(T_PEP)[None, :] < pep_lens[:, None], peps, 0).astype(jnp.int32)

    out = forward(kparams, tcrs, tcr_lens, peps, pep_lens)
    out = jax.block_until_ready(out)
    ref = reference_forward(params, tcrs, tcr_lens, peps, pep_lens)

    assert out.shape == (B, 1)
    assert bool(jnp.all(jnp.isfinite(out)))
    err = float(jnp.max(jnp.abs(out - ref)))
    assert err < 5e-3, f"kernel vs reference mismatch: {err}"
    print("KERNEL_OK")
</pallas_src>

<mosaic_0001>
module attributes {stable_mosaic.version = 11 : i64} {
  func.func @fused_kernel(%arg0: memref<80x1xi32, #tpu.memory_space<vmem>>, %arg1: memref<80x1xi32, #tpu.memory_space<vmem>>, %arg2: memref<8x1xi32, #tpu.memory_space<vmem>>, %arg3: memref<8x1xi32, #tpu.memory_space<vmem>>, %arg4: memref<128x256xf32, #tpu.memory_space<vmem>>, %arg5: memref<1x256xf32, #tpu.memory_space<vmem>>, %arg6: memref<128x128xf32, #tpu.memory_space<vmem>>, %arg7: memref<128x128xf32, #tpu.memory_space<vmem>>, %arg8: memref<128x128xf32, #tpu.memory_space<vmem>>, %arg9: memref<1x128xf32, #tpu.memory_space<vmem>>, %arg10: memref<128x128xf32, #tpu.memory_space<vmem>>, %arg11: memref<128x128xf32, #tpu.memory_space<vmem>>, %arg12: memref<128x128xf32, #tpu.memory_space<vmem>>, %arg13: memref<1x128xf32, #tpu.memory_space<vmem>>, %arg14: memref<128x256xf32, #tpu.memory_space<vmem>>, %arg15: memref<128x256xf32, #tpu.memory_space<vmem>>, %arg16: memref<1x256xf32, #tpu.memory_space<vmem>>, %arg17: memref<256x128xf32, #tpu.memory_space<vmem>>, %arg18: memref<1x128xf32, #tpu.memory_space<vmem>>, %arg19: memref<1x128xf32, #tpu.memory_space<vmem>>, %arg20: memref<1x1xf32, #tpu.memory_space<vmem>>, %arg21: memref<8x1xf32, #tpu.memory_space<vmem>>, %arg22: memref<80x256xf32, #tpu.memory_space<vmem>>) attributes {dimension_semantics = [], scalar_prefetch = 0 : i64, scratch_operands = 1 : i64, tpu.core_type = #tpu.core_type<tc>} {
    %c0 = arith.constant 0 : index
    %c0_0 = arith.constant 0 : index
    %0 = vector.load %arg0[%c0, %c0_0] : memref<80x1xi32, #tpu.memory_space<vmem>>, vector<80x1xi32>
    %c0_1 = arith.constant 0 : index
    %c0_2 = arith.constant 0 : index
    %1 = vector.load %arg1[%c0_1, %c0_2] : memref<80x1xi32, #tpu.memory_space<vmem>>, vector<80x1xi32>
    %c32_i32 = arith.constant 32 : i32
    %2 = vector.broadcast %c32_i32 : i32 to vector<80x1xi32>
    %3 = arith.addi %1, %2 : vector<80x1xi32>
    %4 = tpu.iota {dimensions = array<i32: 1>} : vector<80x128xi32>
    %5 = vector.broadcast %0 : vector<80x1xi32> to vector<80x128xi32>
    %6 = arith.cmpi eq, %4, %5 : vector<80x128xi32>
    %7 = vector.broadcast %3 : vector<80x1xi32> to vector<80x128xi32>
    %8 = arith.cmpi eq, %4, %7 : vector<80x128xi32>
    %9 = arith.ori %6, %8 : vector<80x128xi1>
    %10 = arith.extui %9 : vector<80x128xi1> to vector<80x128xi32>
    %11 = arith.sitofp %10 : vector<80x128xi32> to vector<80x128xf32>
    %c0_3 = arith.constant 0 : index
    %c0_4 = arith.constant 0 : index
    %12 = vector.load %arg4[%c0_3, %c0_4] : memref<128x256xf32, #tpu.memory_space<vmem>>, vector<128x256xf32>
    %cst = arith.constant dense<0.000000e+00> : vector<80x256xf32>
    %13 = tpu.matmul %11, %12, %cst {dimension_numbers = #tpu.dot_dimension_numbers<[1], [0], [0], [1], [0, 0, 1, 1], [], []>} : vector<80x128xf32>, vector<128x256xf32>, vector<80x256xf32> -> vector<80x256xf32>
    %c0_5 = arith.constant 0 : index
    %c0_6 = arith.constant 0 : index
    %14 = vector.load %arg5[%c0_5, %c0_6] : memref<1x256xf32, #tpu.memory_space<vmem>>, vector<1x256xf32>
    %15 = vector.broadcast %14 : vector<1x256xf32> to vector<80x256xf32>
    %16 = arith.addf %13, %15 : vector<80x256xf32>
    %c0_7 = arith.constant 0 : index
    %c0_8 = arith.constant 0 : index
    %17 = vector.load %arg22[%c0_7, %c0_8] : memref<80x256xf32, #tpu.memory_space<vmem>>, vector<80x256xf32>
    tpu.vector_store %arg22[%c0_7, %c0_8], %16 {strides = array<i32>} : memref<80x256xf32, #tpu.memory_space<vmem>>, vector<80x256xf32>,
    %c0_9 = arith.constant 0 : index
    %c0_10 = arith.constant 0 : index
    %18 = vector.load %arg9[%c0_9, %c0_10] : memref<1x128xf32, #tpu.memory_space<vmem>>, vector<1x128xf32>
    %19 = vector.shape_cast %18 : vector<1x128xf32> to vector<1x128xf32>
    %20 = vector.broadcast %19 : vector<1x128xf32> to vector<8x128xf32>
    %c0_11 = arith.constant 0 : index
    %c0_12 = arith.constant 0 : index
    %21 = vector.load %arg13[%c0_11, %c0_12] : memref<1x128xf32, #tpu.memory_space<vmem>>, vector<1x128xf32>
    %22 = vector.shape_cast %21 : vector<1x128xf32> to vector<1x128xf32>
    %23 = vector.broadcast %22 : vector<1x128xf32> to vector<8x128xf32>
    %c0_13 = arith.constant 0 : index
    %c0_14 = arith.constant 0 : index
    %24 = vector.load %arg2[%c0_13, %c0_14] : memref<8x1xi32, #tpu.memory_space<vmem>>, vector<8x1xi32>
    %c1_i32 = arith.constant 1 : i32
    %25 = vector.broadcast %c1_i32 : i32 to vector<8x1xi32>
    %26 = arith.subi %24, %25 : vector<8x1xi32>
    %c0_15 = arith.constant 0 : index
    %c0_16 = arith.constant 0 : index
    %27 = vector.load %arg3[%c0_15, %c0_16] : memref<8x1xi32, #tpu.memory_space<vmem>>, vector<8x1xi32>
    %c1_i32_17 = arith.constant 1 : i32
    %28 = vector.broadcast %c1_i32_17 : i32 to vector<8x1xi32>
    %29 = arith.subi %27, %28 : vector<8x1xi32>
    %cst_18 = arith.constant 0.000000e+00 : f32
    %30 = vector.broadcast %cst_18 : f32 to vector<8x128xf32>
    %c0_i32 = arith.constant 0 : i32
    %c8_i32 = arith.constant 8 : i32
    %31 = arith.muli %c0_i32, %c8_i32 : i32
    %32 = tpu.assume_multiple %31, 8 : i32
    %33 = arith.index_cast %32 : i32 to index
    %c0_19 = arith.constant 0 : index
    %34 = vector.load %arg22[%33, %c0_19] : memref<80x256xf32, #tpu.memory_space<vmem>>, vector<8x256xf32>
    %35 = vector.extract_strided_slice %34 {offsets = [0, 0], sizes = [8, 128], strides = [1, 1]} : vector<8x256xf32> to vector<8x128xf32>
    %c0_20 = arith.constant 0 : index
    %c0_21 = arith.constant 0 : index
    %36 = vector.load %arg6[%c0_20, %c0_21] : memref<128x128xf32, #tpu.memory_space<vmem>>, vector<128x128xf32>
    %cst_22 = arith.constant dense<0.000000e+00> : vector<8x128xf32>
    %37 = tpu.matmul %30, %36, %cst_22 {dimension_numbers = #tpu.dot_dimension_numbers<[1], [0], [0], [1], [0, 0, 1, 1], [], []>} : vector<8x128xf32>, vector<128x128xf32>, vector<8x128xf32> -> vector<8x128xf32>
    %38 = arith.addf %35, %37 : vector<8x128xf32>
    %39 = vector.extract_strided_slice %34 {offsets = [0, 128], sizes = [8, 128], strides = [1, 1]} : vector<8x256xf32> to vector<8x128xf32>
    %c0_23 = arith.constant 0 : index
    %c0_24 = arith.constant 0 : index
    %40 = vector.load %arg10[%c0_23, %c0_24] : memref<128x128xf32, #tpu.memory_space<vmem>>, vector<128x128xf32>
    %cst_25 = arith.constant dense<0.000000e+00> : vector<8x128xf32>
    %41 = tpu.matmul %30, %40, %cst_25 {dimension_numbers = #tpu.dot_dimension_numbers<[1], [0], [0], [1], [0, 0, 1, 1], [], []>} : vector<8x128xf32>, vector<128x128xf32>, vector<8x128xf32> -> vector<8x128xf32>
    %42 = arith.addf %39, %41 : vector<8x128xf32>
    %cst_26 = arith.constant 5.000000e-01 : f32
    %43 = vector.broadcast %cst_26 : f32 to vector<8x128xf32>
    %44 = arith.mulf %43, %38 : vector<8x128xf32>
    %45 = math.tanh %44 : vector<8x128xf32>
    %cst_27 = arith.constant 5.000000e-01 : f32
    %46 = vector.broadcast %cst_27 : f32 to vector<8x128xf32>
    %47 = arith.mulf %46, %45 : vector<8x128xf32>
    %cst_28 = arith.constant 5.000000e-01 : f32
    %48 = vector.broadcast %cst_28 : f32 to vector<8x128xf32>
    %49 = arith.addf %47, %48 : vector<8x128xf32>
    %50 = math.tanh %38 : vector<8x128xf32>
    %c96_i32 = arith.constant 96 : i32
    %51 = tpu.dynamic_rotate %49 by %c96_i32 dim 1 : vector<8x128xf32>, i32 -> vector<8x128xf32>
    %c64_i32 = arith.constant 64 : i32
    %52 = tpu.dynamic_rotate %50 by %c64_i32 dim 1 : vector<8x128xf32>, i32 -> vector<8x128xf32>
    %c32_i32_29 = arith.constant 32 : i32
    %53 = tpu.dynamic_rotate %49 by %c32_i32_29 dim 1 : vector<8x128xf32>, i32 -> vector<8x128xf32>
    %54 = arith.mulf %51, %30 : vector<8x128xf32>
    %55 = arith.mulf %49, %52 : vector<8x128xf32>
    %56 = arith.addf %54, %55 : vector<8x128xf32>
    %57 = math.tanh %56 : vector<8x128xf32>
    %58 = arith.mulf %53, %57 : vector<8x128xf32>
    %cst_30 = arith.constant 5.000000e-01 : f32
    %59 = vector.broadcast %cst_30 : f32 to vector<8x128xf32>
    %60 = arith.mulf %59, %42 : vector<8x128xf32>
    %61 = math.tanh %60 : vector<8x128xf32>
    %cst_31 = arith.constant 5.000000e-01 : f32
    %62 = vector.broadcast %cst_31 : f32 to vector<8x128xf32>
    %63 = arith.mulf %62, %61 : vector<8x128xf32>
    %cst_32 = arith.constant 5.000000e-01 : f32
    %64 = vector.broadcast %cst_32 : f32 to vector<8x128xf32>
    %65 = arith.addf %63, %64 : vector<8x128xf32>
    %66 = math.tanh %42 : vector<8x128xf32>
    %c96_i32_33 = arith.constant 96 : i32
    %67 = tpu.dynamic_rotate %65 by %c96_i32_33 dim 1 : vector<8x128xf32>, i32 -> vector<8x128xf32>
    %c64_i32_34 = arith.constant 64 : i32
    %68 = tpu.dynamic_rotate %66 by %c64_i32_34 dim 1 : vector<8x128xf32>, i32 -> vector<8x128xf32>
    %c32_i32_35 = arith.constant 32 : i32
    %69 = tpu.dynamic_rotate %65 by %c32_i32_35 dim 1 : vector<8x128xf32>, i32 -> vector<8x128xf32>
    %70 = arith.mulf %67, %30 : vector<8x128xf32>
    %71 = arith.mulf %65, %68 : vector<8x128xf32>
    %72 = arith.addf %70, %71 : vector<8x128xf32>
    %73 = math.tanh %72 : vector<8x128xf32>
    %74 = arith.mulf %69, %73 : vector<8x128xf32>
    %c0_36 = arith.constant 0 : index
    %c0_37 = arith.constant 0 : index
    %75 = vector.load %arg7[%c0_36, %c0_37] : memref<128x128xf32, #tpu.memory_space<vmem>>, vector<128x128xf32>
    %cst_38 = arith.constant dense<0.000000e+00> : vector<8x128xf32>
    %76 = tpu.matmul %58, %75, %cst_38 {dimension_numbers = #tpu.dot_dimension_numbers<[1], [0], [0], [1], [0, 0, 1, 1], [], []>} : vector<8x128xf32>, vector<128x128xf32>, vector<8x128xf32> -> vector<8x128xf32>
    %c0_39 = arith.constant 0 : index
    %c0_40 = arith.constant 0 : index
    %77 = vector.load %arg8[%c0_39, %c0_40] : memref<128x128xf32, #tpu.memory_space<vmem>>, vector<128x128xf32>
    %cst_41 = arith.constant dense<0.000000e+00> : vector<8x128xf32>
    %78 = tpu.matmul %30, %77, %cst_41 {dimension_numbers = #tpu.dot_dimension_numbers<[1], [0], [0], [1], [0, 0, 1, 1], [], []>} : vector<8x128xf32>, vector<128x128xf32>, vector<8x128xf32> -> vector<8x128xf32>
    %79 = arith.addf %76, %78 : vector<8x128xf32>
    %80 = arith.addf %79, %20 : vector<8x128xf32>
    %c0_42 = arith.constant 0 : index
    %c0_43 = arith.constant 0 : index
    %81 = vector.load %arg11[%c0_42, %c0_43] : memref<128x128xf32, #tpu.memory_space<vmem>>, vector<128x128xf32>
    %cst_44 = arith.constant dense<0.000000e+00> : vector<8x128xf32>
    %82 = tpu.matmul %74, %81, %cst_44 {dimension_numbers = #tpu.dot_dimension_numbers<[1], [0], [0], [1], [0, 0, 1, 1], [], []>} : vector<8x128xf32>, vector<128x128xf32>, vector<8x128xf32> -> vector<8x128xf32>
    %c0_45 = arith.constant 0 : index
    %c0_46 = arith.constant 0 : index
    %83 = vector.load %arg12[%c0_45, %c0_46] : memref<128x128xf32, #tpu.memory_space<vmem>>, vector<128x128xf32>
    %cst_47 = arith.constant dense<0.000000e+00> : vector<8x128xf32>
    %84 = tpu.matmul %30, %83, %cst_47 {dimension_numbers = #tpu.dot_dimension_numbers<[1], [0], [0], [1], [0, 0, 1, 1], [], []>} : vector<8x128xf32>, vector<128x128xf32>, vector<8x128xf32> -> vector<8x128xf32>
    %85 = arith.addf %82, %84 : vector<8x128xf32>
    %86 = arith.addf %85, %23 : vector<8x128xf32>
    %cst_48 = arith.constant 5.000000e-01 : f32
    %87 = vector.broadcast %cst_48 : f32 to vector<8x128xf32>
    %88 = arith.mulf %87, %80 : vector<8x128xf32>
    %89 = math.tanh %88 : vector<8x128xf32>
    %cst_49 = arith.constant 5.000000e-01 : f32
    %90 = vector.broadcast %cst_49 : f32 to vector<8x128xf32>
    %91 = arith.mulf %90, %89 : vector<8x128xf32>
    %cst_50 = arith.constant 5.000000e-01 : f32
    %92 = vector.broadcast %cst_50 : f32 to vector<8x128xf32>
    %93 = arith.addf %91, %92 : vector<8x128xf32>
    %94 = math.tanh %80 : vector<8x128xf32>
    %c96_i32_51 = arith.constant 96 : i32
    %95 = tpu.dynamic_rotate %93 by %c96_i32_51 dim 1 : vector<8x128xf32>, i32 -> vector<8x128xf32>
    %c64_i32_52 = arith.constant 64 : i32
    %96 = tpu.dynamic_rotate %94 by %c64_i32_52 dim 1 : vector<8x128xf32>, i32 -> vector<8x128xf32>
    %c32_i32_53 = arith.constant 32 : i32
    %97 = tpu.dynamic_rotate %93 by %c32_i32_53 dim 1 : vector<8x128xf32>, i32 -> vector<8x128xf32>
    %98 = arith.mulf %95, %30 : vector<8x128xf32>
    %99 = arith.mulf %93, %96 : vector<8x128xf32>
    %100 = arith.addf %98, %99 : vector<8x128xf32>
    %101 = math.tanh %100 : vector<8x128xf32>
    %102 = arith.mulf %97, %101 : vector<8x128xf32>
    %cst_54 = arith.constant 5.000000e-01 : f32
    %103 = vector.broadcast %cst_54 : f32 to vector<8x128xf32>
    %104 = arith.mulf %103, %86 : vector<8x128xf32>
    %105 = math.tanh %104 : vector<8x128xf32>
    %cst_55 = arith.constant 5.000000e-01 : f32
    %106 = vector.broadcast %cst_55 : f32 to vector<8x128xf32>
    %107 = arith.mulf %106, %105 : vector<8x128xf32>
    %cst_56 = arith.constant 5.000000e-01 : f32
    %108 = vector.broadcast %cst_56 : f32 to vector<8x128xf32>
    %109 = arith.addf %107, %108 : vector<8x128xf32>
    %110 = math.tanh %86 : vector<8x128xf32>
    %c96_i32_57 = arith.constant 96 : i32
    %111 = tpu.dynamic_rotate %109 by %c96_i32_57 dim 1 : vector<8x128xf32>, i32 -> vector<8x128xf32>
    %c64_i32_58 = arith.constant 64 : i32
    %112 = tpu.dynamic_rotate %110 by %c64_i32_58 dim 1 : vector<8x128xf32>, i32 -> vector<8x128xf32>
    %c32_i32_59 = arith.constant 32 : i32
    %113 = tpu.dynamic_rotate %109 by %c32_i32_59 dim 1 : vector<8x128xf32>, i32 -> vector<8x128xf32>
    %114 = arith.mulf %111, %30 : vector<8x128xf32>
    %115 = arith.mulf %109, %112 : vector<8x128xf32>
    %116 = arith.addf %114, %115 : vector<8x128xf32>
    %117 = math.tanh %116 : vector<8x128xf32>
    %118 = arith.mulf %113, %117 : vector<8x128xf32>
    %119 = vector.broadcast %c0_i32 : i32 to vector<8x1xi32>
    %120 = arith.cmpi eq, %26, %119 : vector<8x1xi32>
    %121 = vector.shape_cast %120 : vector<8x1xi1> to vector<8x1xi1>
    %122 = vector.broadcast %121 : vector<8x1xi1> to vector<8x128xi1>
    %123 = arith.select %122, %102, %30 : vector<8x128xi1>, vector<8x128xf32>
    %124 = vector.broadcast %c0_i32 : i32 to vector<8x1xi32>
    %125 = arith.cmpi eq, %29, %124 : vector<8x1xi32>
    %126 = vector.shape_cast %125 : vector<8x1xi1> to vector<8x1xi1>
    %127 = vector.broadcast %126 : vector<8x1xi1> to vector<8x128xi1>
    %128 = arith.select %127, %118, %30 : vector<8x128xi1>, vector<8x128xf32>
    %c1_i32_60 = arith.constant 1 : i32
    %c8_i32_61 = arith.constant 8 : i32
    %129 = arith.muli %c1_i32_60, %c8_i32_61 : i32
    %130 = tpu.assume_multiple %129, 8 : i32
    %131 = arith.index_cast %130 : i32 to index
    %c0_62 = arith.constant 0 : index
    %132 = vector.load %arg22[%131, %c0_62] : memref<80x256xf32, #tpu.memory_space<vmem>>, vector<8x256xf32>
    %133 = vector.extract_strided_slice %132 {offsets = [0, 0], sizes = [8, 128], strides = [1, 1]} : vector<8x256xf32> to vector<8x128xf32>
    %c0_63 = arith.constant 0 : index
    %c0_64 = arith.constant 0 : index
    %134 = vector.load %arg6[%c0_63, %c0_64] : memref<128x128xf32, #tpu.memory_space<vmem>>, vector<128x128xf32>
    %cst_65 = arith.constant dense<0.000000e+00> : vector<8x128xf32>
    %135 = tpu.matmul %58, %134, %cst_65 {dimension_numbers = #tpu.dot_dimension_numbers<[1], [0], [0], [1], [0, 0, 1, 1], [], []>} : vector<8x128xf32>, vector<128x128xf32>, vector<8x128xf32> -> vector<8x128xf32>
    %136 = arith.addf %133, %135 : vector<8x128xf32>
    %137 = vector.extract_strided_slice %132 {offsets = [0, 128], sizes = [8, 128], strides = [1, 1]} : vector<8x256xf32> to vector<8x128xf32>
    %c0_66 = arith.constant 0 : index
    %c0_67 = arith.constant 0 : index
    %138 = vector.load %arg10[%c0_66, %c0_67] : memref<128x128xf32, #tpu.memory_space<vmem>>, vector<128x128xf32>
    %cst_68 = arith.constant dense<0.000000e+00> : vector<8x128xf32>
    %139 = tpu.matmul %74, %138, %cst_68 {dimension_numbers = #tpu.dot_dimension_numbers<[1], [0], [0], [1], [0, 0, 1, 1], [], []>} : vector<8x128xf32>, vector<128x128xf32>, vector<8x128xf32> -> vector<8x128xf32>
    %140 = arith.addf %137, %139 : vector<8x128xf32>
    %cst_69 = arith.constant 5.000000e-01 : f32
    %141 = vector.broadcast %cst_69 : f32 to vector<8x128xf32>
    %142 = arith.mulf %141, %136 : vector<8x128xf32>
    %143 = math.tanh %142 : vector<8x128xf32>
    %cst_70 = arith.constant 5.000000e-01 : f32
    %144 = vector.broadcast %cst_70 : f32 to vector<8x128xf32>
    %145 = arith.mulf %144, %143 : vector<8x128xf32>
    %cst_71 = arith.constant 5.000000e-01 : f32
    %146 = vector.broadcast %cst_71 : f32 to vector<8x128xf32>
    %147 = arith.addf %145, %146 : vector<8x128xf32>
    %148 = math.tanh %136 : vector<8x128xf32>
    %c96_i32_72 = arith.constant 96 : i32
    %149 = tpu.dynamic_rotate %147 by %c96_i32_72 dim 1 : vector<8x128xf32>, i32 -> vector<8x128xf32>
    %c64_i32_73 = arith.constant 64 : i32
    %150 = tpu.dynamic_rotate %148 by %c64_i32_73 dim 1 : vector<8x128xf32>, i32 -> vector<8x128xf32>
    %c32_i32_74 = arith.constant 32 : i32
    %151 = tpu.dynamic_rotate %147 by %c32_i32_74 dim 1 : vector<8x128xf32>, i32 -> vector<8x128xf32>
    %152 = arith.mulf %149, %56 : vector<8x128xf32>
    %153 = arith.mulf %147, %150 : vector<8x128xf32>
    %154 = arith.addf %152, %153 : vector<8x128xf32>
    %155 = math.tanh %154 : vector<8x128xf32>
    %156 = arith.mulf %151, %155 : vector<8x128xf32>
    %cst_75 = arith.constant 5.000000e-01 : f32
    %157 = vector.broadcast %cst_75 : f32 to vector<8x128xf32>
    %158 = arith.mulf %157, %140 : vector<8x128xf32>
    %159 = math.tanh %158 : vector<8x128xf32>
    %cst_76 = arith.constant 5.000000e-01 : f32
    %160 = vector.broadcast %cst_76 : f32 to vector<8x128xf32>
    %161 = arith.mulf %160, %159 : vector<8x128xf32>
    %cst_77 = arith.constant 5.000000e-01 : f32
    %162 = vector.broadcast %cst_77 : f32 to vector<8x128xf32>
    %163 = arith.addf %161, %162 : vector<8x128xf32>
    %164 = math.tanh %140 : vector<8x128xf32>
    %c96_i32_78 = arith.constant 96 : i32
    %165 = tpu.dynamic_rotate %163 by %c96_i32_78 dim 1 : vector<8x128xf32>, i32 -> vector<8x128xf32>
    %c64_i32_79 = arith.constant 64 : i32
    %166 = tpu.dynamic_rotate %164 by %c64_i32_79 dim 1 : vector<8x128xf32>, i32 -> vector<8x128xf32>
    %c32_i32_80 = arith.constant 32 : i32
    %167 = tpu.dynamic_rotate %163 by %c32_i32_80 dim 1 : vector<8x128xf32>, i32 -> vector<8x128xf32>
    %168 = arith.mulf %165, %72 : vector<8x128xf32>
    %169 = arith.mulf %163, %166 : vector<8x128xf32>
    %170 = arith.addf %168, %169 : vector<8x128xf32>
    %171 = math.tanh %170 : vector<8x128xf32>
    %172 = arith.mulf %167, %171 : vector<8x128xf32>
    %c0_81 = arith.constant 0 : index
    %c0_82 = arith.constant 0 : index
    %173 = vector.load %arg7[%c0_81, %c0_82] : memref<128x128xf32, #tpu.memory_space<vmem>>, vector<128x128xf32>
    %cst_83 = arith.constant dense<0.000000e+00> : vector<8x128xf32>
    %174 = tpu.matmul %156, %173, %cst_83 {dimension_numbers = #tpu.dot_dimension_numbers<[1], [0], [0], [1], [0, 0, 1, 1], [], []>} : vector<8x128xf32>, vector<128x128xf32>, vector<8x128xf32> -> vector<8x128xf32>
    %c0_84 = arith.constant 0 : index
    %c0_85 = arith.constant 0 : index
    %175 = vector.load %arg8[%c0_84, %c0_85] : memref<128x128xf32, #tpu.memory_space<vmem>>, vector<128x128xf32>
    %cst_86 = arith.constant dense<0.000000e+00> : vector<8x128xf32>
    %176 = tpu.matmul %102, %175, %cst_86 {dimension_numbers = #tpu.dot_dimension_numbers<[1], [0], [0], [1], [0, 0, 1, 1], [], []>} : vector<8x128xf32>, vector<128x128xf32>, vector<8x128xf32> -> vector<8x128xf32>
    %177 = arith.addf %174, %176 : vector<8x128xf32>
    %178 = arith.addf %177, %20 : vector<8x128xf32>
    %c0_87 = arith.constant 0 : index
    %c0_88 = arith.constant 0 : index
    %179 = vector.load %arg11[%c0_87, %c0_88] : memref<128x128xf32, #tpu.memory_space<vmem>>, vector<128x128xf32>
    %cst_89 = arith.constant dense<0.000000e+00> : vector<8x128xf32>
    %180 = tpu.matmul %172, %179, %cst_89 {dimension_numbers = #tpu.dot_dimension_numbers<[1], [0], [0], [1], [0, 0, 1, 1], [], []>} : vector<8x128xf32>, vector<128x128xf32>, vector<8x128xf32> -> vector<8x128xf32>
    %c0_90 = arith.constant 0 : index
    %c0_91 = arith.constant 0 : index
    %181 = vector.load %arg12[%c0_90, %c0_91] : memref<128x128xf32, #tpu.memory_space<vmem>>, vector<128x128xf32>
    %cst_92 = arith.constant dense<0.000000e+00> : vector<8x128xf32>
    %182 = tpu.matmul %118, %181, %cst_92 {dimension_numbers = #tpu.dot_dimension_numbers<[1], [0], [0], [1], [0, 0, 1, 1], [], []>} : vector<8x128xf32>, vector<128x128xf32>, vector<8x128xf32> -> vector<8x128xf32>
    %183 = arith.addf %180, %182 : vector<8x128xf32>
    %184 = arith.addf %183, %23 : vector<8x128xf32>
    %cst_93 = arith.constant 5.000000e-01 : f32
    %185 = vector.broadcast %cst_93 : f32 to vector<8x128xf32>
    %186 = arith.mulf %185, %178 : vector<8x128xf32>
    %187 = math.tanh %186 : vector<8x128xf32>
    %cst_94 = arith.constant 5.000000e-01 : f32
    %188 = vector.broadcast %cst_94 : f32 to vector<8x128xf32>
    %189 = arith.mulf %188, %187 : vector<8x128xf32>
    %cst_95 = arith.constant 5.000000e-01 : f32
    %190 = vector.broadcast %cst_95 : f32 to vector<8x128xf32>
    %191 = arith.addf %189, %190 : vector<8x128xf32>
    %192 = math.tanh %178 : vector<8x128xf32>
    %c96_i32_96 = arith.constant 96 : i32
    %193 = tpu.dynamic_rotate %191 by %c96_i32_96 dim 1 : vector<8x128xf32>, i32 -> vector<8x128xf32>
    %c64_i32_97 = arith.constant 64 : i32
    %194 = tpu.dynamic_rotate %192 by %c64_i32_97 dim 1 : vector<8x128xf32>, i32 -> vector<8x128xf32>
    %c32_i32_98 = arith.constant 32 : i32
    %195 = tpu.dynamic_rotate %191 by %c32_i32_98 dim 1 : vector<8x128xf32>, i32 -> vector<8x128xf32>
    %196 = arith.mulf %193, %100 : vector<8x128xf32>
    %197 = arith.mulf %191, %194 : vector<8x128xf32>
    %198 = arith.addf %196, %197 : vector<8x128xf32>
    %199 = math.tanh %198 : vector<8x128xf32>
    %200 = arith.mulf %195, %199 : vector<8x128xf32>
    %cst_99 = arith.constant 5.000000e-01 : f32
    %201 = vector.broadcast %cst_99 : f32 to vector<8x128xf32>
    %202 = arith.mulf %201, %184 : vector<8x128xf32>
    %203 = math.tanh %202 : vector<8x128xf32>
    %cst_100 = arith.constant 5.000000e-01 : f32
    %204 = vector.broadcast %cst_100 : f32 to vector<8x128xf32>
    %205 = arith.mulf %204, %203 : vector<8x128xf32>
    %cst_101 = arith.constant 5.000000e-01 : f32
    %206 = vector.broadcast %cst_101 : f32 to vector<8x128xf32>
    %207 = arith.addf %205, %206 : vector<8x128xf32>
    %208 = math.tanh %184 : vector<8x128xf32>
    %c96_i32_102 = arith.constant 96 : i32
    %209 = tpu.dynamic_rotate %207 by %c96_i32_102 dim 1 : vector<8x128xf32>, i32 -> vector<8x128xf32>
    %c64_i32_103 = arith.constant 64 : i32
    %210 = tpu.dynamic_rotate %208 by %c64_i32_103 dim 1 : vector<8x128xf32>, i32 -> vector<8x128xf32>
    %c32_i32_104 = arith.constant 32 : i32
    %211 = tpu.dynamic_rotate %207 by %c32_i32_104 dim 1 : vector<8x128xf32>, i32 -> vector<8x128xf32>
    %212 = arith.mulf %209, %116 : vector<8x128xf32>
    %213 = arith.mulf %207, %210 : vector<8x128xf32>
    %214 = arith.addf %212, %213 : vector<8x128xf32>
    %215 = math.tanh %214 : vector<8x128xf32>
    %216 = arith.mulf %211, %215 : vector<8x128xf32>
    %217 = vector.broadcast %c1_i32_60 : i32 to vector<8x1xi32>
    %218 = arith.cmpi eq, %26, %217 : vector<8x1xi32>
    %219 = vector.shape_cast %218 : vector<8x1xi1> to vector<8x1xi1>
    %220 = vector.broadcast %219 : vector<8x1xi1> to vector<8x128xi1>
    %221 = arith.select %220, %200, %123 : vector<8x128xi1>, vector<8x128xf32>
    %222 = vector.broadcast %c1_i32_60 : i32 to vector<8x1xi32>
    %223 = arith.cmpi eq, %29, %222 : vector<8x1xi32>
    %224 = vector.shape_cast %223 : vector<8x1xi1> to vector<8x1xi1>
    %225 = vector.broadcast %224 : vector<8x1xi1> to vector<8x128xi1>
    %226 = arith.select %225, %216, %128 : vector<8x128xi1>, vector<8x128xf32>
    %c2_i32 = arith.constant 2 : i32
    %c8_i32_105 = arith.constant 8 : i32
    %227 = arith.muli %c2_i32, %c8_i32_105 : i32
    %228 = tpu.assume_multiple %227, 8 : i32
    %229 = arith.index_cast %228 : i32 to index
    %c0_106 = arith.constant 0 : index
    %230 = vector.load %arg22[%229, %c0_106] : memref<80x256xf32, #tpu.memory_space<vmem>>, vector<8x256xf32>
    %231 = vector.extract_strided_slice %230 {offsets = [0, 0], sizes = [8, 128], strides = [1, 1]} : vector<8x256xf32> to vector<8x128xf32>
    %c0_107 = arith.constant 0 : index
    %c0_108 = arith.constant 0 : index
    %232 = vector.load %arg6[%c0_107, %c0_108] : memref<128x128xf32, #tpu.memory_space<vmem>>, vector<128x128xf32>
    %cst_109 = arith.constant dense<0.000000e+00> : vector<8x128xf32>
    %233 = tpu.matmul %156, %232, %cst_109 {dimension_numbers = #tpu.dot_dimension_numbers<[1], [0], [0], [1], [0, 0, 1, 1], [], []>} : vector<8x128xf32>, vector<128x128xf32>, vector<8x128xf32> -> vector<8x128xf32>
    %234 = arith.addf %231, %233 : vector<8x128xf32>
    %235 = vector.extract_strided_slice %230 {offsets = [0, 128], sizes = [8, 128], strides = [1, 1]} : vector<8x256xf32> to vector<8x128xf32>
    %c0_110 = arith.constant 0 : index
    %c0_111 = arith.constant 0 : index
    %236 = vector.load %arg10[%c0_110, %c0_111] : memref<128x128xf32, #tpu.memory_space<vmem>>, vector<128x128xf32>
    %cst_112 = arith.constant dense<0.000000e+00> : vector<8x128xf32>
    %237 = tpu.matmul %172, %236, %cst_112 {dimension_numbers = #tpu.dot_dimension_numbers<[1], [0], [0], [1], [0, 0, 1, 1], [], []>} : vector<8x128xf32>, vector<128x128xf32>, vector<8x128xf32> -> vector<8x128xf32>
    %238 = arith.addf %235, %237 : vector<8x128xf32>
    %cst_113 = arith.constant 5.000000e-01 : f32
    %239 = vector.broadcast %cst_113 : f32 to vector<8x128xf32>
    %240 = arith.mulf %239, %234 : vector<8x128xf32>
    %241 = math.tanh %240 : vector<8x128xf32>
    %cst_114 = arith.constant 5.000000e-01 : f32
    %242 = vector.broadcast %cst_114 : f32 to vector<8x128xf32>
    %243 = arith.mulf %242, %241 : vector<8x128xf32>
    %cst_115 = arith.constant 5.000000e-01 : f32
    %244 = vector.broadcast %cst_115 : f32 to vector<8x128xf32>
    %245 = arith.addf %243, %244 : vector<8x128xf32>
    %246 = math.tanh %234 : vector<8x128xf32>
    %c96_i32_116 = arith.constant 96 : i32
    %247 = tpu.dynamic_rotate %245 by %c96_i32_116 dim 1 : vector<8x128xf32>, i32 -> vector<8x128xf32>
    %c64_i32_117 = arith.constant 64 : i32
    %248 = tpu.dynamic_rotate %246 by %c64_i32_117 dim 1 : vector<8x128xf32>, i32 -> vector<8x128xf32>
    %c32_i32_118 = arith.constant 32 : i32
    %249 = tpu.dynamic_rotate %245 by %c32_i32_118 dim 1 : vector<8x128xf32>, i32 -> vector<8x128xf32>
    %250 = arith.mulf %247, %154 : vector<8x128xf32>
    %251 = arith.mulf %245, %248 : vector<8x128xf32>
    %252 = arith.addf %250, %251 : vector<8x128xf32>
    %253 = math.tanh %252 : vector<8x128xf32>
    %254 = arith.mulf %249, %253 : vector<8x128xf32>
    %cst_119 = arith.constant 5.000000e-01 : f32
    %255 = vector.broadcast %cst_119 : f32 to vector<8x128xf32>
    %256 = arith.mulf %255, %238 : vector<8x128xf32>
    %257 = math.tanh %256 : vector<8x128xf32>
    %cst_120 = arith.constant 5.000000e-01 : f32
    %258 = vector.broadcast %cst_120 : f32 to vector<8x128xf32>
    %259 = arith.mulf %258, %257 : vector<8x128xf32>
    %cst_121 = arith.constant 5.000000e-01 : f32
    %260 = vector.broadcast %cst_121 : f32 to vector<8x128xf32>
    %261 = arith.addf %259, %260 : vector<8x128xf32>
    %262 = math.tanh %238 : vector<8x128xf32>
    %c96_i32_122 = arith.constant 96 : i32
    %263 = tpu.dynamic_rotate %261 by %c96_i32_122 dim 1 : vector<8x128xf32>, i32 -> vector<8x128xf32>
    %c64_i32_123 = arith.constant 64 : i32
    %264 = tpu.dynamic_rotate %262 by %c64_i32_123 dim 1 : vector<8x128xf32>, i32 -> vector<8x128xf32>
    %c32_i32_124 = arith.constant 32 : i32
    %265 = tpu.dynamic_rotate %261 by %c32_i32_124 dim 1 : vector<8x128xf32>, i32 -> vector<8x128xf32>
    %266 = arith.mulf %263, %170 : vector<8x128xf32>
    %267 = arith.mulf %261, %264 : vector<8x128xf32>
    %268 = arith.addf %266, %267 : vector<8x128xf32>
    %269 = math.tanh %268 : vector<8x128xf32>
    %270 = arith.mulf %265, %269 : vector<8x128xf32>
    %c0_125 = arith.constant 0 : index
    %c0_126 = arith.constant 0 : index
    %271 = vector.load %arg7[%c0_125, %c0_126] : memref<128x128xf32, #tpu.memory_space<vmem>>, vector<128x128xf32>
    %cst_127 = arith.constant dense<0.000000e+00> : vector<8x128xf32>
    %272 = tpu.matmul %254, %271, %cst_127 {dimension_numbers = #tpu.dot_dimension_numbers<[1], [0], [0], [1], [0, 0, 1, 1], [], []>} : vector<8x128xf32>, vector<128x128xf32>, vector<8x128xf32> -> vector<8x128xf32>
    %c0_128 = arith.constant 0 : index
    %c0_129 = arith.constant 0 : index
    %273 = vector.load %arg8[%c0_128, %c0_129] : memref<128x128xf32, #tpu.memory_space<vmem>>, vector<128x128xf32>
    %cst_130 = arith.constant dense<0.000000e+00> : vector<8x128xf32>
    %274 = tpu.matmul %200, %273, %cst_130 {dimension_numbers = #tpu.dot_dimension_numbers<[1], [0], [0], [1], [0, 0, 1, 1], [], []>} : vector<8x128xf32>, vector<128x128xf32>, vector<8x128xf32> -> vector<8x128xf32>
    %275 = arith.addf %272, %274 : vector<8x128xf32>
    %276 = arith.addf %275, %20 : vector<8x128xf32>
    %c0_131 = arith.constant 0 : index
    %c0_132 = arith.constant 0 : index
    %277 = vector.load %arg11[%c0_131, %c0_132] : memref<128x128xf32, #tpu.memory_space<vmem>>, vector<128x128xf32>
    %cst_133 = arith.constant dense<0.000000e+00> : vector<8x128xf32>
    %278 = tpu.matmul %270, %277, %cst_133 {dimension_numbers = #tpu.dot_dimension_numbers<[1], [0], [0], [1], [0, 0, 1, 1], [], []>} : vector<8x128xf32>, vector<128x128xf32>, vector<8x128xf32> -> vector<8x128xf32>
    %c0_134 = arith.constant 0 : index
    %c0_135 = arith.constant 0 : index
    %279 = vector.load %arg12[%c0_134, %c0_135] : memref<128x128xf32, #tpu.memory_space<vmem>>, vector<128x128xf32>
    %cst_136 = arith.constant dense<0.000000e+00> : vector<8x128xf32>
    %280 = tpu.matmul %216, %279, %cst_136 {dimension_numbers = #tpu.dot_dimension_numbers<[1], [0], [0], [1], [0, 0, 1, 1], [], []>} : vector<8x128xf32>, vector<128x128xf32>, vector<8x128xf32> -> vector<8x128xf32>
    %281 = arith.addf %278, %280 : vector<8x128xf32>
    %282 = arith.addf %281, %23 : vector<8x128xf32>
    %cst_137 = arith.constant 5.000000e-01 : f32
    %283 = vector.broadcast %cst_137 : f32 to vector<8x128xf32>
    %284 = arith.mulf %283, %276 : vector<8x128xf32>
    %285 = math.tanh %284 : vector<8x128xf32>
    %cst_138 = arith.constant 5.000000e-01 : f32
    %286 = vector.broadcast %cst_138 : f32 to vector<8x128xf32>
    %287 = arith.mulf %286, %285 : vector<8x128xf32>
    %cst_139 = arith.constant 5.000000e-01 : f32
    %288 = vector.broadcast %cst_139 : f32 to vector<8x128xf32>
    %289 = arith.addf %287, %288 : vector<8x128xf32>
    %290 = math.tanh %276 : vector<8x128xf32>
    %c96_i32_140 = arith.constant 96 : i32
    %291 = tpu.dynamic_rotate %289 by %c96_i32_140 dim 1 : vector<8x128xf32>, i32 -> vector<8x128xf32>
    %c64_i32_141 = arith.constant 64 : i32
    %292 = tpu.dynamic_rotate %290 by %c64_i32_141 dim 1 : vector<8x128xf32>, i32 -> vector<8x128xf32>
    %c32_i32_142 = arith.constant 32 : i32
    %293 = tpu.dynamic_rotate %289 by %c32_i32_142 dim 1 : vector<8x128xf32>, i32 -> vector<8x128xf32>
    %294 = arith.mulf %291, %198 : vector<8x128xf32>
    %295 = arith.mulf %289, %292 : vector<8x128xf32>
    %296 = arith.addf %294, %295 : vector<8x128xf32>
    %297 = math.tanh %296 : vector<8x128xf32>
    %298 = arith.mulf %293, %297 : vector<8x128xf32>
    %cst_143 = arith.constant 5.000000e-01 : f32
    %299 = vector.broadcast %cst_143 : f32 to vector<8x128xf32>
    %300 = arith.mulf %299, %282 : vector<8x128xf32>
    %301 = math.tanh %300 : vector<8x128xf32>
    %cst_144 = arith.constant 5.000000e-01 : f32
    %302 = vector.broadcast %cst_144 : f32 to vector<8x128xf32>
    %303 = arith.mulf %302, %301 : vector<8x128xf32>
    %cst_145 = arith.constant 5.000000e-01 : f32
    %304 = vector.broadcast %cst_145 : f32 to vector<8x128xf32>
    %305 = arith.addf %303, %304 : vector<8x128xf32>
    %306 = math.tanh %282 : vector<8x128xf32>
    %c96_i32_146 = arith.constant 96 : i32
    %307 = tpu.dynamic_rotate %305 by %c96_i32_146 dim 1 : vector<8x128xf32>, i32 -> vector<8x128xf32>
    %c64_i32_147 = arith.constant 64 : i32
    %308 = tpu.dynamic_rotate %306 by %c64_i32_147 dim 1 : vector<8x128xf32>, i32 -> vector<8x128xf32>
    %c32_i32_148 = arith.constant 32 : i32
    %309 = tpu.dynamic_rotate %305 by %c32_i32_148 dim 1 : vector<8x128xf32>, i32 -> vector<8x128xf32>
    %310 = arith.mulf %307, %214 : vector<8x128xf32>
    %311 = arith.mulf %305, %308 : vector<8x128xf32>
    %312 = arith.addf %310, %311 : vector<8x128xf32>
    %313 = math.tanh %312 : vector<8x128xf32>
    %314 = arith.mulf %309, %313 : vector<8x128xf32>
    %315 = vector.broadcast %c2_i32 : i32 to vector<8x1xi32>
    %316 = arith.cmpi eq, %26, %315 : vector<8x1xi32>
    %317 = vector.shape_cast %316 : vector<8x1xi1> to vector<8x1xi1>
    %318 = vector.broadcast %317 : vector<8x1xi1> to vector<8x128xi1>
    %319 = arith.select %318, %298, %221 : vector<8x128xi1>, vector<8x128xf32>
    %320 = vector.broadcast %c2_i32 : i32 to vector<8x1xi32>
    %321 = arith.cmpi eq, %29, %320 : vector<8x1xi32>
    %322 = vector.shape_cast %321 : vector<8x1xi1> to vector<8x1xi1>
    %323 = vector.broadcast %322 : vector<8x1xi1> to vector<8x128xi1>
    %324 = arith.select %323, %314, %226 : vector<8x128xi1>, vector<8x128xf32>
    %c3_i32 = arith.constant 3 : i32
    %c8_i32_149 = arith.constant 8 : i32
    %325 = arith.muli %c3_i32, %c8_i32_149 : i32
    %326 = tpu.assume_multiple %325, 8 : i32
    %327 = arith.index_cast %326 : i32 to index
    %c0_150 = arith.constant 0 : index
    %328 = vector.load %arg22[%327, %c0_150] : memref<80x256xf32, #tpu.memory_space<vmem>>, vector<8x256xf32>
    %329 = vector.extract_strided_slice %328 {offsets = [0, 0], sizes = [8, 128], strides = [1, 1]} : vector<8x256xf32> to vector<8x128xf32>
    %c0_151 = arith.constant 0 : index
    %c0_152 = arith.constant 0 : index
    %330 = vector.load %arg6[%c0_151, %c0_152] : memref<128x128xf32, #tpu.memory_space<vmem>>, vector<128x128xf32>
    %cst_153 = arith.constant dense<0.000000e+00> : vector<8x128xf32>
    %331 = tpu.matmul %254, %330, %cst_153 {dimension_numbers = #tpu.dot_dimension_numbers<[1], [0], [0], [1], [0, 0, 1, 1], [], []>} : vector<8x128xf32>, vector<128x128xf32>, vector<8x128xf32> -> vector<8x128xf32>
    %332 = arith.addf %329, %331 : vector<8x128xf32>
    %333 = vector.extract_strided_slice %328 {offsets = [0, 128], sizes = [8, 128], strides = [1, 1]} : vector<8x256xf32> to vector<8x128xf32>
    %c0_154 = arith.constant 0 : index
    %c0_155 = arith.constant 0 : index
    %334 = vector.load %arg10[%c0_154, %c0_155] : memref<128x128xf32, #tpu.memory_space<vmem>>, vector<128x128xf32>
    %cst_156 = arith.constant dense<0.000000e+00> : vector<8x128xf32>
    %335 = tpu.matmul %270, %334, %cst_156 {dimension_numbers = #tpu.dot_dimension_numbers<[1], [0], [0], [1], [0, 0, 1, 1], [], []>} : vector<8x128xf32>, vector<128x128xf32>, vector<8x128xf32> -> vector<8x128xf32>
    %336 = arith.addf %333, %335 : vector<8x128xf32>
    %cst_157 = arith.constant 5.000000e-01 : f32
    %337 = vector.broadcast %cst_157 : f32 to vector<8x128xf32>
    %338 = arith.mulf %337, %332 : vector<8x128xf32>
    %339 = math.tanh %338 : vector<8x128xf32>
    %cst_158 = arith.constant 5.000000e-01 : f32
    %340 = vector.broadcast %cst_158 : f32 to vector<8x128xf32>
    %341 = arith.mulf %340, %339 : vector<8x128xf32>
    %cst_159 = arith.constant 5.000000e-01 : f32
    %342 = vector.broadcast %cst_159 : f32 to vector<8x128xf32>
    %343 = arith.addf %341, %342 : vector<8x128xf32>
    %344 = math.tanh %332 : vector<8x128xf32>
    %c96_i32_160 = arith.constant 96 : i32
    %345 = tpu.dynamic_rotate %343 by %c96_i32_160 dim 1 : vector<8x128xf32>, i32 -> vector<8x128xf32>
    %c64_i32_161 = arith.constant 64 : i32
    %346 = tpu.dynamic_rotate %344 by %c64_i32_161 dim 1 : vector<8x128xf32>, i32 -> vector<8x128xf32>
    %c32_i32_162 = arith.constant 32 : i32
    %347 = tpu.dynamic_rotate %343 by %c32_i32_162 dim 1 : vector<8x128xf32>, i32 -> vector<8x128xf32>
    %348 = arith.mulf %345, %252 : vector<8x128xf32>
    %349 = arith.mulf %343, %346 : vector<8x128xf32>
    %350 = arith.addf %348, %349 : vector<8x128xf32>
    %351 = math.tanh %350 : vector<8x128xf32>
    %352 = arith.mulf %347, %351 : vector<8x128xf32>
    %cst_163 = arith.constant 5.000000e-01 : f32
    %353 = vector.broadcast %cst_163 : f32 to vector<8x128xf32>
    %354 = arith.mulf %353, %336 : vector<8x128xf32>
    %355 = math.tanh %354 : vector<8x128xf32>
    %cst_164 = arith.constant 5.000000e-01 : f32
    %356 = vector.broadcast %cst_164 : f32 to vector<8x128xf32>
    %357 = arith.mulf %356, %355 : vector<8x128xf32>
    %cst_165 = arith.constant 5.000000e-01 : f32
    %358 = vector.broadcast %cst_165 : f32 to vector<8x128xf32>
    %359 = arith.addf %357, %358 : vector<8x128xf32>
    %360 = math.tanh %336 : vector<8x128xf32>
    %c96_i32_166 = arith.constant 96 : i32
    %361 = tpu.dynamic_rotate %359 by %c96_i32_166 dim 1 : vector<8x128xf32>, i32 -> vector<8x128xf32>
    %c64_i32_167 = arith.constant 64 : i32
    %362 = tpu.dynamic_rotate %360 by %c64_i32_167 dim 1 : vector<8x128xf32>, i32 -> vector<8x128xf32>
    %c32_i32_168 = arith.constant 32 : i32
    %363 = tpu.dynamic_rotate %359 by %c32_i32_168 dim 1 : vector<8x128xf32>, i32 -> vector<8x128xf32>
    %364 = arith.mulf %361, %268 : vector<8x128xf32>
    %365 = arith.mulf %359, %362 : vector<8x128xf32>
    %366 = arith.addf %364, %365 : vector<8x128xf32>
    %367 = math.tanh %366 : vector<8x128xf32>
    %368 = arith.mulf %363, %367 : vector<8x128xf32>
    %c0_169 = arith.constant 0 : index
    %c0_170 = arith.constant 0 : index
    %369 = vector.load %arg7[%c0_169, %c0_170] : memref<128x128xf32, #tpu.memory_space<vmem>>, vector<128x128xf32>
    %cst_171 = arith.constant dense<0.000000e+00> : vector<8x128xf32>
    %370 = tpu.matmul %352, %369, %cst_171 {dimension_numbers = #tpu.dot_dimension_numbers<[1], [0], [0], [1], [0, 0, 1, 1], [], []>} : vector<8x128xf32>, vector<128x128xf32>, vector<8x128xf32> -> vector<8x128xf32>
    %c0_172 = arith.constant 0 : index
    %c0_173 = arith.constant 0 : index
    %371 = vector.load %arg8[%c0_172, %c0_173] : memref<128x128xf32, #tpu.memory_space<vmem>>, vector<128x128xf32>
    %cst_174 = arith.constant dense<0.000000e+00> : vector<8x128xf32>
    %372 = tpu.matmul %298, %371, %cst_174 {dimension_numbers = #tpu.dot_dimension_numbers<[1], [0], [0], [1], [0, 0, 1, 1], [], []>} : vector<8x128xf32>, vector<128x128xf32>, vector<8x128xf32> -> vector<8x128xf32>
    %373 = arith.addf %370, %372 : vector<8x128xf32>
    %374 = arith.addf %373, %20 : vector<8x128xf32>
    %c0_175 = arith.constant 0 : index
    %c0_176 = arith.constant 0 : index
    %375 = vector.load %arg11[%c0_175, %c0_176] : memref<128x128xf32, #tpu.memory_space<vmem>>, vector<128x128xf32>
    %cst_177 = arith.constant dense<0.000000e+00> : vector<8x128xf32>
    %376 = tpu.matmul %368, %375, %cst_177 {dimension_numbers = #tpu.dot_dimension_numbers<[1], [0], [0], [1], [0, 0, 1, 1], [], []>} : vector<8x128xf32>, vector<128x128xf32>, vector<8x128xf32> -> vector<8x128xf32>
    %c0_178 = arith.constant 0 : index
    %c0_179 = arith.constant 0 : index
    %377 = vector.load %arg12[%c0_178, %c0_179] : memref<128x128xf32, #tpu.memory_space<vmem>>, vector<128x128xf32>
    %cst_180 = arith.constant dense<0.000000e+00> : vector<8x128xf32>
    %378 = tpu.matmul %314, %377, %cst_180 {dimension_numbers = #tpu.dot_dimension_numbers<[1], [0], [0], [1], [0, 0, 1, 1], [], []>} : vector<8x128xf32>, vector<128x128xf32>, vector<8x128xf32> -> vector<8x128xf32>
    %379 = arith.addf %376, %378 : vector<8x128xf32>
    %380 = arith.addf %379, %23 : vector<8x128xf32>
    %cst_181 = arith.constant 5.000000e-01 : f32
    %381 = vector.broadcast %cst_181 : f32 to vector<8x128xf32>
    %382 = arith.mulf %381, %374 : vector<8x128xf32>
    %383 = math.tanh %382 : vector<8x128xf32>
    %cst_182 = arith.constant 5.000000e-01 : f32
    %384 = vector.broadcast %cst_182 : f32 to vector<8x128xf32>
    %385 = arith.mulf %384, %383 : vector<8x128xf32>
    %cst_183 = arith.constant 5.000000e-01 : f32
    %386 = vector.broadcast %cst_183 : f32 to vector<8x128xf32>
    %387 = arith.addf %385, %386 : vector<8x128xf32>
    %388 = math.tanh %374 : vector<8x128xf32>
    %c96_i32_184 = arith.constant 96 : i32
    %389 = tpu.dynamic_rotate %387 by %c96_i32_184 dim 1 : vector<8x128xf32>, i32 -> vector<8x128xf32>
    %c64_i32_185 = arith.constant 64 : i32
    %390 = tpu.dynamic_rotate %388 by %c64_i32_185 dim 1 : vector<8x128xf32>, i32 -> vector<8x128xf32>
    %c32_i32_186 = arith.constant 32 : i32
    %391 = tpu.dynamic_rotate %387 by %c32_i32_186 dim 1 : vector<8x128xf32>, i32 -> vector<8x128xf32>
    %392 = arith.mulf %389, %296 : vector<8x128xf32>
    %393 = arith.mulf %387, %390 : vector<8x128xf32>
    %394 = arith.addf %392, %393 : vector<8x128xf32>
    %395 = math.tanh %394 : vector<8x128xf32>
    %396 = arith.mulf %391, %395 : vector<8x128xf32>
    %cst_187 = arith.constant 5.000000e-01 : f32
    %397 = vector.broadcast %cst_187 : f32 to vector<8x128xf32>
    %398 = arith.mulf %397, %380 : vector<8x128xf32>
    %399 = math.tanh %398 : vector<8x128xf32>
    %cst_188 = arith.constant 5.000000e-01 : f32
    %400 = vector.broadcast %cst_188 : f32 to vector<8x128xf32>
    %401 = arith.mulf %400, %399 : vector<8x128xf32>
    %cst_189 = arith.constant 5.000000e-01 : f32
    %402 = vector.broadcast %cst_189 : f32 to vector<8x128xf32>
    %403 = arith.addf %401, %402 : vector<8x128xf32>
    %404 = math.tanh %380 : vector<8x128xf32>
    %c96_i32_190 = arith.constant 96 : i32
    %405 = tpu.dynamic_rotate %403 by %c96_i32_190 dim 1 : vector<8x128xf32>, i32 -> vector<8x128xf32>
    %c64_i32_191 = arith.constant 64 : i32
    %406 = tpu.dynamic_rotate %404 by %c64_i32_191 dim 1 : vector<8x128xf32>, i32 -> vector<8x128xf32>
    %c32_i32_192 = arith.constant 32 : i32
    %407 = tpu.dynamic_rotate %403 by %c32_i32_192 dim 1 : vector<8x128xf32>, i32 -> vector<8x128xf32>
    %408 = arith.mulf %405, %312 : vector<8x128xf32>
    %409 = arith.mulf %403, %406 : vector<8x128xf32>
    %410 = arith.addf %408, %409 : vector<8x128xf32>
    %411 = math.tanh %410 : vector<8x128xf32>
    %412 = arith.mulf %407, %411 : vector<8x128xf32>
    %413 = vector.broadcast %c3_i32 : i32 to vector<8x1xi32>
    %414 = arith.cmpi eq, %26, %413 : vector<8x1xi32>
    %415 = vector.shape_cast %414 : vector<8x1xi1> to vector<8x1xi1>
    %416 = vector.broadcast %415 : vector<8x1xi1> to vector<8x128xi1>
    %417 = arith.select %416, %396, %319 : vector<8x128xi1>, vector<8x128xf32>
    %418 = vector.broadcast %c3_i32 : i32 to vector<8x1xi32>
    %419 = arith.cmpi eq, %29, %418 : vector<8x1xi32>
    %420 = vector.shape_cast %419 : vector<8x1xi1> to vector<8x1xi1>
    %421 = vector.broadcast %420 : vector<8x1xi1> to vector<8x128xi1>
    %422 = arith.select %421, %412, %324 : vector<8x128xi1>, vector<8x128xf32>
    %c4_i32 = arith.constant 4 : i32
    %c8_i32_193 = arith.constant 8 : i32
    %423 = arith.muli %c4_i32, %c8_i32_193 : i32
    %424 = tpu.assume_multiple %423, 8 : i32
    %425 = arith.index_cast %424 : i32 to index
    %c0_194 = arith.constant 0 : index
    %426 = vector.load %arg22[%425, %c0_194] : memref<80x256xf32, #tpu.memory_space<vmem>>, vector<8x256xf32>
    %427 = vector.extract_strided_slice %426 {offsets = [0, 0], sizes = [8, 128], strides = [1, 1]} : vector<8x256xf32> to vector<8x128xf32>
    %c0_195 = arith.constant 0 : index
    %c0_196 = arith.constant 0 : index
    %428 = vector.load %arg6[%c0_195, %c0_196] : memref<128x128xf32, #tpu.memory_space<vmem>>, vector<128x128xf32>
    %cst_197 = arith.constant dense<0.000000e+00> : vector<8x128xf32>
    %429 = tpu.matmul %352, %428, %cst_197 {dimension_numbers = #tpu.dot_dimension_numbers<[1], [0], [0], [1], [0, 0, 1, 1], [], []>} : vector<8x128xf32>, vector<128x128xf32>, vector<8x128xf32> -> vector<8x128xf32>
    %430 = arith.addf %427, %429 : vector<8x128xf32>
    %431 = vector.extract_strided_slice %426 {offsets = [0, 128], sizes = [8, 128], strides = [1, 1]} : vector<8x256xf32> to vector<8x128xf32>
    %c0_198 = arith.constant 0 : index
    %c0_199 = arith.constant 0 : index
    %432 = vector.load %arg10[%c0_198, %c0_199] : memref<128x128xf32, #tpu.memory_space<vmem>>, vector<128x128xf32>
    %cst_200 = arith.constant dense<0.000000e+00> : vector<8x128xf32>
    %433 = tpu.matmul %368, %432, %cst_200 {dimension_numbers = #tpu.dot_dimension_numbers<[1], [0], [0], [1], [0, 0, 1, 1], [], []>} : vector<8x128xf32>, vector<128x128xf32>, vector<8x128xf32> -> vector<8x128xf32>
    %434 = arith.addf %431, %433 : vector<8x128xf32>
    %cst_201 = arith.constant 5.000000e-01 : f32
    %435 = vector.broadcast %cst_201 : f32 to vector<8x128xf32>
    %436 = arith.mulf %435, %430 : vector<8x128xf32>
    %437 = math.tanh %436 : vector<8x128xf32>
    %cst_202 = arith.constant 5.000000e-01 : f32
    %438 = vector.broadcast %cst_202 : f32 to vector<8x128xf32>
    %439 = arith.mulf %438, %437 : vector<8x128xf32>
    %cst_203 = arith.constant 5.000000e-01 : f32
    %440 = vector.broadcast %cst_203 : f32 to vector<8x128xf32>
    %441 = arith.addf %439, %440 : vector<8x128xf32>
    %442 = math.tanh %430 : vector<8x128xf32>
    %c96_i32_204 = arith.constant 96 : i32
    %443 = tpu.dynamic_rotate %441 by %c96_i32_204 dim 1 : vector<8x128xf32>, i32 -> vector<8x128xf32>
    %c64_i32_205 = arith.constant 64 : i32
    %444 = tpu.dynamic_rotate %442 by %c64_i32_205 dim 1 : vector<8x128xf32>, i32 -> vector<8x128xf32>
    %c32_i32_206 = arith.constant 32 : i32
    %445 = tpu.dynamic_rotate %441 by %c32_i32_206 dim 1 : vector<8x128xf32>, i32 -> vector<8x128xf32>
    %446 = arith.mulf %443, %350 : vector<8x128xf32>
    %447 = arith.mulf %441, %444 : vector<8x128xf32>
    %448 = arith.addf %446, %447 : vector<8x128xf32>
    %449 = math.tanh %448 : vector<8x128xf32>
    %450 = arith.mulf %445, %449 : vector<8x128xf32>
    %cst_207 = arith.constant 5.000000e-01 : f32
    %451 = vector.broadcast %cst_207 : f32 to vector<8x128xf32>
    %452 = arith.mulf %451, %434 : vector<8x128xf32>
    %453 = math.tanh %452 : vector<8x128xf32>
    %cst_208 = arith.constant 5.000000e-01 : f32
    %454 = vector.broadcast %cst_208 : f32 to vector<8x128xf32>
    %455 = arith.mulf %454, %453 : vector<8x128xf32>
    %cst_209 = arith.constant 5.000000e-01 : f32
    %456 = vector.broadcast %cst_209 : f32 to vector<8x128xf32>
    %457 = arith.addf %455, %456 : vector<8x128xf32>
    %458 = math.tanh %434 : vector<8x128xf32>
    %c96_i32_210 = arith.constant 96 : i32
    %459 = tpu.dynamic_rotate %457 by %c96_i32_210 dim 1 : vector<8x128xf32>, i32 -> vector<8x128xf32>
    %c64_i32_211 = arith.constant 64 : i32
    %460 = tpu.dynamic_rotate %458 by %c64_i32_211 dim 1 : vector<8x128xf32>, i32 -> vector<8x128xf32>
    %c32_i32_212 = arith.constant 32 : i32
    %461 = tpu.dynamic_rotate %457 by %c32_i32_212 dim 1 : vector<8x128xf32>, i32 -> vector<8x128xf32>
    %462 = arith.mulf %459, %366 : vector<8x128xf32>
    %463 = arith.mulf %457, %460 : vector<8x128xf32>
    %464 = arith.addf %462, %463 : vector<8x128xf32>
    %465 = math.tanh %464 : vector<8x128xf32>
    %466 = arith.mulf %461, %465 : vector<8x128xf32>
    %c0_213 = arith.constant 0 : index
    %c0_214 = arith.constant 0 : index
    %467 = vector.load %arg7[%c0_213, %c0_214] : memref<128x128xf32, #tpu.memory_space<vmem>>, vector<128x128xf32>
    %cst_215 = arith.constant dense<0.000000e+00> : vector<8x128xf32>
    %468 = tpu.matmul %450, %467, %cst_215 {dimension_numbers = #tpu.dot_dimension_numbers<[1], [0], [0], [1], [0, 0, 1, 1], [], []>} : vector<8x128xf32>, vector<128x128xf32>, vector<8x128xf32> -> vector<8x128xf32>
    %c0_216 = arith.constant 0 : index
    %c0_217 = arith.constant 0 : index
    %469 = vector.load %arg8[%c0_216, %c0_217] : memref<128x128xf32, #tpu.memory_space<vmem>>, vector<128x128xf32>
    %cst_218 = arith.constant dense<0.000000e+00> : vector<8x128xf32>
    %470 = tpu.matmul %396, %469, %cst_218 {dimension_numbers = #tpu.dot_dimension_numbers<[1], [0], [0], [1], [0, 0, 1, 1], [], []>} : vector<8x128xf32>, vector<128x128xf32>, vector<8x128xf32> -> vector<8x128xf32>
    %471 = arith.addf %468, %470 : vector<8x128xf32>
    %472 = arith.addf %471, %20 : vector<8x128xf32>
    %c0_219 = arith.constant 0 : index
    %c0_220 = arith.constant 0 : index
    %473 = vector.load %arg11[%c0_219, %c0_220] : memref<128x128xf32, #tpu.memory_space<vmem>>, vector<128x128xf32>
    %cst_221 = arith.constant dense<0.000000e+00> : vector<8x128xf32>
    %474 = tpu.matmul %466, %473, %cst_221 {dimension_numbers = #tpu.dot_dimension_numbers<[1], [0], [0], [1], [0, 0, 1, 1], [], []>} : vector<8x128xf32>, vector<128x128xf32>, vector<8x128xf32> -> vector<8x128xf32>
    %c0_222 = arith.constant 0 : index
    %c0_223 = arith.constant 0 : index
    %475 = vector.load %arg12[%c0_222, %c0_223] : memref<128x128xf32, #tpu.memory_space<vmem>>, vector<128x128xf32>
    %cst_224 = arith.constant dense<0.000000e+00> : vector<8x128xf32>
    %476 = tpu.matmul %412, %475, %cst_224 {dimension_numbers = #tpu.dot_dimension_numbers<[1], [0], [0], [1], [0, 0, 1, 1], [], []>} : vector<8x128xf32>, vector<128x128xf32>, vector<8x128xf32> -> vector<8x128xf32>
    %477 = arith.addf %474, %476 : vector<8x128xf32>
    %478 = arith.addf %477, %23 : vector<8x128xf32>
    %cst_225 = arith.constant 5.000000e-01 : f32
    %479 = vector.broadcast %cst_225 : f32 to vector<8x128xf32>
    %480 = arith.mulf %479, %472 : vector<8x128xf32>
    %481 = math.tanh %480 : vector<8x128xf32>
    %cst_226 = arith.constant 5.000000e-01 : f32
    %482 = vector.broadcast %cst_226 : f32 to vector<8x128xf32>
    %483 = arith.mulf %482, %481 : vector<8x128xf32>
    %cst_227 = arith.constant 5.000000e-01 : f32
    %484 = vector.broadcast %cst_227 : f32 to vector<8x128xf32>
    %485 = arith.addf %483, %484 : vector<8x128xf32>
    %486 = math.tanh %472 : vector<8x128xf32>
    %c96_i32_228 = arith.constant 96 : i32
    %487 = tpu.dynamic_rotate %485 by %c96_i32_228 dim 1 : vector<8x128xf32>, i32 -> vector<8x128xf32>
    %c64_i32_229 = arith.constant 64 : i32
    %488 = tpu.dynamic_rotate %486 by %c64_i32_229 dim 1 : vector<8x128xf32>, i32 -> vector<8x128xf32>
    %c32_i32_230 = arith.constant 32 : i32
    %489 = tpu.dynamic_rotate %485 by %c32_i32_230 dim 1 : vector<8x128xf32>, i32 -> vector<8x128xf32>
    %490 = arith.mulf %487, %394 : vector<8x128xf32>
    %491 = arith.mulf %485, %488 : vector<8x128xf32>
    %492 = arith.addf %490, %491 : vector<8x128xf32>
    %493 = math.tanh %492 : vector<8x128xf32>
    %494 = arith.mulf %489, %493 : vector<8x128xf32>
    %cst_231 = arith.constant 5.000000e-01 : f32
    %495 = vector.broadcast %cst_231 : f32 to vector<8x128xf32>
    %496 = arith.mulf %495, %478 : vector<8x128xf32>
    %497 = math.tanh %496 : vector<8x128xf32>
    %cst_232 = arith.constant 5.000000e-01 : f32
    %498 = vector.broadcast %cst_232 : f32 to vector<8x128xf32>
    %499 = arith.mulf %498, %497 : vector<8x128xf32>
    %cst_233 = arith.constant 5.000000e-01 : f32
    %500 = vector.broadcast %cst_233 : f32 to vector<8x128xf32>
    %501 = arith.addf %499, %500 : vector<8x128xf32>
    %502 = math.tanh %478 : vector<8x128xf32>
    %c96_i32_234 = arith.constant 96 : i32
    %503 = tpu.dynamic_rotate %501 by %c96_i32_234 dim 1 : vector<8x128xf32>, i32 -> vector<8x128xf32>
    %c64_i32_235 = arith.constant 64 : i32
    %504 = tpu.dynamic_rotate %502 by %c64_i32_235 dim 1 : vector<8x128xf32>, i32 -> vector<8x128xf32>
    %c32_i32_236 = arith.constant 32 : i32
    %505 = tpu.dynamic_rotate %501 by %c32_i32_236 dim 1 : vector<8x128xf32>, i32 -> vector<8x128xf32>
    %506 = arith.mulf %503, %410 : vector<8x128xf32>
    %507 = arith.mulf %501, %504 : vector<8x128xf32>
    %508 = arith.addf %506, %507 : vector<8x128xf32>
    %509 = math.tanh %508 : vector<8x128xf32>
    %510 = arith.mulf %505, %509 : vector<8x128xf32>
    %511 = vector.broadcast %c4_i32 : i32 to vector<8x1xi32>
    %512 = arith.cmpi eq, %26, %511 : vector<8x1xi32>
    %513 = vector.shape_cast %512 : vector<8x1xi1> to vector<8x1xi1>
    %514 = vector.broadcast %513 : vector<8x1xi1> to vector<8x128xi1>
    %515 = arith.select %514, %494, %417 : vector<8x128xi1>, vector<8x128xf32>
    %516 = vector.broadcast %c4_i32 : i32 to vector<8x1xi32>
    %517 = arith.cmpi eq, %29, %516 : vector<8x1xi32>
    %518 = vector.shape_cast %517 : vector<8x1xi1> to vector<8x1xi1>
    %519 = vector.broadcast %518 : vector<8x1xi1> to vector<8x128xi1>
    %520 = arith.select %519, %510, %422 : vector<8x128xi1>, vector<8x128xf32>
    %c5_i32 = arith.constant 5 : i32
    %c8_i32_237 = arith.constant 8 : i32
    %521 = arith.muli %c5_i32, %c8_i32_237 : i32
    %522 = tpu.assume_multiple %521, 8 : i32
    %523 = arith.index_cast %522 : i32 to index
    %c0_238 = arith.constant 0 : index
    %524 = vector.load %arg22[%523, %c0_238] : memref<80x256xf32, #tpu.memory_space<vmem>>, vector<8x256xf32>
    %525 = vector.extract_strided_slice %524 {offsets = [0, 0], sizes = [8, 128], strides = [1, 1]} : vector<8x256xf32> to vector<8x128xf32>
    %c0_239 = arith.constant 0 : index
    %c0_240 = arith.constant 0 : index
    %526 = vector.load %arg6[%c0_239, %c0_240] : memref<128x128xf32, #tpu.memory_space<vmem>>, vector<128x128xf32>
    %cst_241 = arith.constant dense<0.000000e+00> : vector<8x128xf32>
    %527 = tpu.matmul %450, %526, %cst_241 {dimension_numbers = #tpu.dot_dimension_numbers<[1], [0], [0], [1], [0, 0, 1, 1], [], []>} : vector<8x128xf32>, vector<128x128xf32>, vector<8x128xf32> -> vector<8x128xf32>
    %528 = arith.addf %525, %527 : vector<8x128xf32>
    %529 = vector.extract_strided_slice %524 {offsets = [0, 128], sizes = [8, 128], strides = [1, 1]} : vector<8x256xf32> to vector<8x128xf32>
    %c0_242 = arith.constant 0 : index
    %c0_243 = arith.constant 0 : index
    %530 = vector.load %arg10[%c0_242, %c0_243] : memref<128x128xf32, #tpu.memory_space<vmem>>, vector<128x128xf32>
    %cst_244 = arith.constant dense<0.000000e+00> : vector<8x128xf32>
    %531 = tpu.matmul %466, %530, %cst_244 {dimension_numbers = #tpu.dot_dimension_numbers<[1], [0], [0], [1], [0, 0, 1, 1], [], []>} : vector<8x128xf32>, vector<128x128xf32>, vector<8x128xf32> -> vector<8x128xf32>
    %532 = arith.addf %529, %531 : vector<8x128xf32>
    %cst_245 = arith.constant 5.000000e-01 : f32
    %533 = vector.broadcast %cst_245 : f32 to vector<8x128xf32>
    %534 = arith.mulf %533, %528 : vector<8x128xf32>
    %535 = math.tanh %534 : vector<8x128xf32>
    %cst_246 = arith.constant 5.000000e-01 : f32
    %536 = vector.broadcast %cst_246 : f32 to vector<8x128xf32>
    %537 = arith.mulf %536, %535 : vector<8x128xf32>
    %cst_247 = arith.constant 5.000000e-01 : f32
    %538 = vector.broadcast %cst_247 : f32 to vector<8x128xf32>
    %539 = arith.addf %537, %538 : vector<8x128xf32>
    %540 = math.tanh %528 : vector<8x128xf32>
    %c96_i32_248 = arith.constant 96 : i32
    %541 = tpu.dynamic_rotate %539 by %c96_i32_248 dim 1 : vector<8x128xf32>, i32 -> vector<8x128xf32>
    %c64_i32_249 = arith.constant 64 : i32
    %542 = tpu.dynamic_rotate %540 by %c64_i32_249 dim 1 : vector<8x128xf32>, i32 -> vector<8x128xf32>
    %c32_i32_250 = arith.constant 32 : i32
    %543 = tpu.dynamic_rotate %539 by %c32_i32_250 dim 1 : vector<8x128xf32>, i32 -> vector<8x128xf32>
    %544 = arith.mulf %541, %448 : vector<8x128xf32>
    %545 = arith.mulf %539, %542 : vector<8x128xf32>
    %546 = arith.addf %544, %545 : vector<8x128xf32>
    %547 = math.tanh %546 : vector<8x128xf32>
    %548 = arith.mulf %543, %547 : vector<8x128xf32>
    %cst_251 = arith.constant 5.000000e-01 : f32
    %549 = vector.broadcast %cst_251 : f32 to vector<8x128xf32>
    %550 = arith.mulf %549, %532 : vector<8x128xf32>
    %551 = math.tanh %550 : vector<8x128xf32>
    %cst_252 = arith.constant 5.000000e-01 : f32
    %552 = vector.broadcast %cst_252 : f32 to vector<8x128xf32>
    %553 = arith.mulf %552, %551 : vector<8x128xf32>
    %cst_253 = arith.constant 5.000000e-01 : f32
    %554 = vector.broadcast %cst_253 : f32 to vector<8x128xf32>
    %555 = arith.addf %553, %554 : vector<8x128xf32>
    %556 = math.tanh %532 : vector<8x128xf32>
    %c96_i32_254 = arith.constant 96 : i32
    %557 = tpu.dynamic_rotate %555 by %c96_i32_254 dim 1 : vector<8x128xf32>, i32 -> vector<8x128xf32>
    %c64_i32_255 = arith.constant 64 : i32
    %558 = tpu.dynamic_rotate %556 by %c64_i32_255 dim 1 : vector<8x128xf32>, i32 -> vector<8x128xf32>
    %c32_i32_256 = arith.constant 32 : i32
    %559 = tpu.dynamic_rotate %555 by %c32_i32_256 dim 1 : vector<8x128xf32>, i32 -> vector<8x128xf32>
    %560 = arith.mulf %557, %464 : vector<8x128xf32>
    %561 = arith.mulf %555, %558 : vector<8x128xf32>
    %562 = arith.addf %560, %561 : vector<8x128xf32>
    %563 = math.tanh %562 : vector<8x128xf32>
    %564 = arith.mulf %559, %563 : vector<8x128xf32>
    %c0_257 = arith.constant 0 : index
    %c0_258 = arith.constant 0 : index
    %565 = vector.load %arg7[%c0_257, %c0_258] : memref<128x128xf32, #tpu.memory_space<vmem>>, vector<128x128xf32>
    %cst_259 = arith.constant dense<0.000000e+00> : vector<8x128xf32>
    %566 = tpu.matmul %548, %565, %cst_259 {dimension_numbers = #tpu.dot_dimension_numbers<[1], [0], [0], [1], [0, 0, 1, 1], [], []>} : vector<8x128xf32>, vector<128x128xf32>, vector<8x128xf32> -> vector<8x128xf32>
    %c0_260 = arith.constant 0 : index
    %c0_261 = arith.constant 0 : index
    %567 = vector.load %arg8[%c0_260, %c0_261] : memref<128x128xf32, #tpu.memory_space<vmem>>, vector<128x128xf32>
    %cst_262 = arith.constant dense<0.000000e+00> : vector<8x128xf32>
    %568 = tpu.matmul %494, %567, %cst_262 {dimension_numbers = #tpu.dot_dimension_numbers<[1], [0], [0], [1], [0, 0, 1, 1], [], []>} : vector<8x128xf32>, vector<128x128xf32>, vector<8x128xf32> -> vector<8x128xf32>
    %569 = arith.addf %566, %568 : vector<8x128xf32>
    %570 = arith.addf %569, %20 : vector<8x128xf32>
    %c0_263 = arith.constant 0 : index
    %c0_264 = arith.constant 0 : index
    %571 = vector.load %arg11[%c0_263, %c0_264] : memref<128x128xf32, #tpu.memory_space<vmem>>, vector<128x128xf32>
    %cst_265 = arith.constant dense<0.000000e+00> : vector<8x128xf32>
    %572 = tpu.matmul %564, %571, %cst_265 {dimension_numbers = #tpu.dot_dimension_numbers<[1], [0], [0], [1], [0, 0, 1, 1], [], []>} : vector<8x128xf32>, vector<128x128xf32>, vector<8x128xf32> -> vector<8x128xf32>
    %c0_266 = arith.constant 0 : index
    %c0_267 = arith.constant 0 : index
    %573 = vector.load %arg12[%c0_266, %c0_267] : memref<128x128xf32, #tpu.memory_space<vmem>>, vector<128x128xf32>
    %cst_268 = arith.constant dense<0.000000e+00> : vector<8x128xf32>
    %574 = tpu.matmul %510, %573, %cst_268 {dimension_numbers = #tpu.dot_dimension_numbers<[1], [0], [0], [1], [0, 0, 1, 1], [], []>} : vector<8x128xf32>, vector<128x128xf32>, vector<8x128xf32> -> vector<8x128xf32>
    %575 = arith.addf %572, %574 : vector<8x128xf32>
    %576 = arith.addf %575, %23 : vector<8x128xf32>
    %cst_269 = arith.constant 5.000000e-01 : f32
    %577 = vector.broadcast %cst_269 : f32 to vector<8x128xf32>
    %578 = arith.mulf %577, %570 : vector<8x128xf32>
    %579 = math.tanh %578 : vector<8x128xf32>
    %cst_270 = arith.constant 5.000000e-01 : f32
    %580 = vector.broadcast %cst_270 : f32 to vector<8x128xf32>
    %581 = arith.mulf %580, %579 : vector<8x128xf32>
    %cst_271 = arith.constant 5.000000e-01 : f32
    %582 = vector.broadcast %cst_271 : f32 to vector<8x128xf32>
    %583 = arith.addf %581, %582 : vector<8x128xf32>
    %584 = math.tanh %570 : vector<8x128xf32>
    %c96_i32_272 = arith.constant 96 : i32
    %585 = tpu.dynamic_rotate %583 by %c96_i32_272 dim 1 : vector<8x128xf32>, i32 -> vector<8x128xf32>
    %c64_i32_273 = arith.constant 64 : i32
    %586 = tpu.dynamic_rotate %584 by %c64_i32_273 dim 1 : vector<8x128xf32>, i32 -> vector<8x128xf32>
    %c32_i32_274 = arith.constant 32 : i32
    %587 = tpu.dynamic_rotate %583 by %c32_i32_274 dim 1 : vector<8x128xf32>, i32 -> vector<8x128xf32>
    %588 = arith.mulf %585, %492 : vector<8x128xf32>
    %589 = arith.mulf %583, %586 : vector<8x128xf32>
    %590 = arith.addf %588, %589 : vector<8x128xf32>
    %591 = math.tanh %590 : vector<8x128xf32>
    %592 = arith.mulf %587, %591 : vector<8x128xf32>
    %cst_275 = arith.constant 5.000000e-01 : f32
    %593 = vector.broadcast %cst_275 : f32 to vector<8x128xf32>
    %594 = arith.mulf %593, %576 : vector<8x128xf32>
    %595 = math.tanh %594 : vector<8x128xf32>
    %cst_276 = arith.constant 5.000000e-01 : f32
    %596 = vector.broadcast %cst_276 : f32 to vector<8x128xf32>
    %597 = arith.mulf %596, %595 : vector<8x128xf32>
    %cst_277 = arith.constant 5.000000e-01 : f32
    %598 = vector.broadcast %cst_277 : f32 to vector<8x128xf32>
    %599 = arith.addf %597, %598 : vector<8x128xf32>
    %600 = math.tanh %576 : vector<8x128xf32>
    %c96_i32_278 = arith.constant 96 : i32
    %601 = tpu.dynamic_rotate %599 by %c96_i32_278 dim 1 : vector<8x128xf32>, i32 -> vector<8x128xf32>
    %c64_i32_279 = arith.constant 64 : i32
    %602 = tpu.dynamic_rotate %600 by %c64_i32_279 dim 1 : vector<8x128xf32>, i32 -> vector<8x128xf32>
    %c32_i32_280 = arith.constant 32 : i32
    %603 = tpu.dynamic_rotate %599 by %c32_i32_280 dim 1 : vector<8x128xf32>, i32 -> vector<8x128xf32>
    %604 = arith.mulf %601, %508 : vector<8x128xf32>
    %605 = arith.mulf %599, %602 : vector<8x128xf32>
    %606 = arith.addf %604, %605 : vector<8x128xf32>
    %607 = math.tanh %606 : vector<8x128xf32>
    %608 = arith.mulf %603, %607 : vector<8x128xf32>
    %609 = vector.broadcast %c5_i32 : i32 to vector<8x1xi32>
    %610 = arith.cmpi eq, %26, %609 : vector<8x1xi32>
    %611 = vector.shape_cast %610 : vector<8x1xi1> to vector<8x1xi1>
    %612 = vector.broadcast %611 : vector<8x1xi1> to vector<8x128xi1>
    %613 = arith.select %612, %592, %515 : vector<8x128xi1>, vector<8x128xf32>
    %614 = vector.broadcast %c5_i32 : i32 to vector<8x1xi32>
    %615 = arith.cmpi eq, %29, %614 : vector<8x1xi32>
    %616 = vector.shape_cast %615 : vector<8x1xi1> to vector<8x1xi1>
    %617 = vector.broadcast %616 : vector<8x1xi1> to vector<8x128xi1>
    %618 = arith.select %617, %608, %520 : vector<8x128xi1>, vector<8x128xf32>
    %c6_i32 = arith.constant 6 : i32
    %c8_i32_281 = arith.constant 8 : i32
    %619 = arith.muli %c6_i32, %c8_i32_281 : i32
    %620 = tpu.assume_multiple %619, 8 : i32
    %621 = arith.index_cast %620 : i32 to index
    %c0_282 = arith.constant 0 : index
    %622 = vector.load %arg22[%621, %c0_282] : memref<80x256xf32, #tpu.memory_space<vmem>>, vector<8x256xf32>
    %623 = vector.extract_strided_slice %622 {offsets = [0, 0], sizes = [8, 128], strides = [1, 1]} : vector<8x256xf32> to vector<8x128xf32>
    %c0_283 = arith.constant 0 : index
    %c0_284 = arith.constant 0 : index
    %624 = vector.load %arg6[%c0_283, %c0_284] : memref<128x128xf32, #tpu.memory_space<vmem>>, vector<128x128xf32>
    %cst_285 = arith.constant dense<0.000000e+00> : vector<8x128xf32>
    %625 = tpu.matmul %548, %624, %cst_285 {dimension_numbers = #tpu.dot_dimension_numbers<[1], [0], [0], [1], [0, 0, 1, 1], [], []>} : vector<8x128xf32>, vector<128x128xf32>, vector<8x128xf32> -> vector<8x128xf32>
    %626 = arith.addf %623, %625 : vector<8x128xf32>
    %627 = vector.extract_strided_slice %622 {offsets = [0, 128], sizes = [8, 128], strides = [1, 1]} : vector<8x256xf32> to vector<8x128xf32>
    %c0_286 = arith.constant 0 : index
    %c0_287 = arith.constant 0 : index
    %628 = vector.load %arg10[%c0_286, %c0_287] : memref<128x128xf32, #tpu.memory_space<vmem>>, vector<128x128xf32>
    %cst_288 = arith.constant dense<0.000000e+00> : vector<8x128xf32>
    %629 = tpu.matmul %564, %628, %cst_288 {dimension_numbers = #tpu.dot_dimension_numbers<[1], [0], [0], [1], [0, 0, 1, 1], [], []>} : vector<8x128xf32>, vector<128x128xf32>, vector<8x128xf32> -> vector<8x128xf32>
    %630 = arith.addf %627, %629 : vector<8x128xf32>
    %cst_289 = arith.constant 5.000000e-01 : f32
    %631 = vector.broadcast %cst_289 : f32 to vector<8x128xf32>
    %632 = arith.mulf %631, %626 : vector<8x128xf32>
    %633 = math.tanh %632 : vector<8x128xf32>
    %cst_290 = arith.constant 5.000000e-01 : f32
    %634 = vector.broadcast %cst_290 : f32 to vector<8x128xf32>
    %635 = arith.mulf %634, %633 : vector<8x128xf32>
    %cst_291 = arith.constant 5.000000e-01 : f32
    %636 = vector.broadcast %cst_291 : f32 to vector<8x128xf32>
    %637 = arith.addf %635, %636 : vector<8x128xf32>
    %638 = math.tanh %626 : vector<8x128xf32>
    %c96_i32_292 = arith.constant 96 : i32
    %639 = tpu.dynamic_rotate %637 by %c96_i32_292 dim 1 : vector<8x128xf32>, i32 -> vector<8x128xf32>
    %c64_i32_293 = arith.constant 64 : i32
    %640 = tpu.dynamic_rotate %638 by %c64_i32_293 dim 1 : vector<8x128xf32>, i32 -> vector<8x128xf32>
    %c32_i32_294 = arith.constant 32 : i32
    %641 = tpu.dynamic_rotate %637 by %c32_i32_294 dim 1 : vector<8x128xf32>, i32 -> vector<8x128xf32>
    %642 = arith.mulf %639, %546 : vector<8x128xf32>
    %643 = arith.mulf %637, %640 : vector<8x128xf32>
    %644 = arith.addf %642, %643 : vector<8x128xf32>
    %645 = math.tanh %644 : vector<8x128xf32>
    %646 = arith.mulf %641, %645 : vector<8x128xf32>
    %cst_295 = arith.constant 5.000000e-01 : f32
    %647 = vector.broadcast %cst_295 : f32 to vector<8x128xf32>
    %648 = arith.mulf %647, %630 : vector<8x128xf32>
    %649 = math.tanh %648 : vector<8x128xf32>
    %cst_296 = arith.constant 5.000000e-01 : f32
    %650 = vector.broadcast %cst_296 : f32 to vector<8x128xf32>
    %651 = arith.mulf %650, %649 : vector<8x128xf32>
    %cst_297 = arith.constant 5.000000e-01 : f32
    %652 = vector.broadcast %cst_297 : f32 to vector<8x128xf32>
    %653 = arith.addf %651, %652 : vector<8x128xf32>
    %654 = math.tanh %630 : vector<8x128xf32>
    %c96_i32_298 = arith.constant 96 : i32
    %655 = tpu.dynamic_rotate %653 by %c96_i32_298 dim 1 : vector<8x128xf32>, i32 -> vector<8x128xf32>
    %c64_i32_299 = arith.constant 64 : i32
    %656 = tpu.dynamic_rotate %654 by %c64_i32_299 dim 1 : vector<8x128xf32>, i32 -> vector<8x128xf32>
    %c32_i32_300 = arith.constant 32 : i32
    %657 = tpu.dynamic_rotate %653 by %c32_i32_300 dim 1 : vector<8x128xf32>, i32 -> vector<8x128xf32>
    %658 = arith.mulf %655, %562 : vector<8x128xf32>
    %659 = arith.mulf %653, %656 : vector<8x128xf32>
    %660 = arith.addf %658, %659 : vector<8x128xf32>
    %661 = math.tanh %660 : vector<8x128xf32>
    %662 = arith.mulf %657, %661 : vector<8x128xf32>
    %c0_301 = arith.constant 0 : index
    %c0_302 = arith.constant 0 : index
    %663 = vector.load %arg7[%c0_301, %c0_302] : memref<128x128xf32, #tpu.memory_space<vmem>>, vector<128x128xf32>
    %cst_303 = arith.constant dense<0.000000e+00> : vector<8x128xf32>
    %664 = tpu.matmul %646, %663, %cst_303 {dimension_numbers = #tpu.dot_dimension_numbers<[1], [0], [0], [1], [0, 0, 1, 1], [], []>} : vector<8x128xf32>, vector<128x128xf32>, vector<8x128xf32> -> vector<8x128xf32>
    %c0_304 = arith.constant 0 : index
    %c0_305 = arith.constant 0 : index
    %665 = vector.load %arg8[%c0_304, %c0_305] : memref<128x128xf32, #tpu.memory_space<vmem>>, vector<128x128xf32>
    %cst_306 = arith.constant dense<0.000000e+00> : vector<8x128xf32>
    %666 = tpu.matmul %592, %665, %cst_306 {dimension_numbers = #tpu.dot_dimension_numbers<[1], [0], [0], [1], [0, 0, 1, 1], [], []>} : vector<8x128xf32>, vector<128x128xf32>, vector<8x128xf32> -> vector<8x128xf32>
    %667 = arith.addf %664, %666 : vector<8x128xf32>
    %668 = arith.addf %667, %20 : vector<8x128xf32>
    %c0_307 = arith.constant 0 : index
    %c0_308 = arith.constant 0 : index
    %669 = vector.load %arg11[%c0_307, %c0_308] : memref<128x128xf32, #tpu.memory_space<vmem>>, vector<128x128xf32>
    %cst_309 = arith.constant dense<0.000000e+00> : vector<8x128xf32>
    %670 = tpu.matmul %662, %669, %cst_309 {dimension_numbers = #tpu.dot_dimension_numbers<[1], [0], [0], [1], [0, 0, 1, 1], [], []>} : vector<8x128xf32>, vector<128x128xf32>, vector<8x128xf32> -> vector<8x128xf32>
    %c0_310 = arith.constant 0 : index
    %c0_311 = arith.constant 0 : index
    %671 = vector.load %arg12[%c0_310, %c0_311] : memref<128x128xf32, #tpu.memory_space<vmem>>, vector<128x128xf32>
    %cst_312 = arith.constant dense<0.000000e+00> : vector<8x128xf32>
    %672 = tpu.matmul %608, %671, %cst_312 {dimension_numbers = #tpu.dot_dimension_numbers<[1], [0], [0], [1], [0, 0, 1, 1], [], []>} : vector<8x128xf32>, vector<128x128xf32>, vector<8x128xf32> -> vector<8x128xf32>
    %673 = arith.addf %670, %672 : vector<8x128xf32>
    %674 = arith.addf %673, %23 : vector<8x128xf32>
    %cst_313 = arith.constant 5.000000e-01 : f32
    %675 = vector.broadcast %cst_313 : f32 to vector<8x128xf32>
    %676 = arith.mulf %675, %668 : vector<8x128xf32>
    %677 = math.tanh %676 : vector<8x128xf32>
    %cst_314 = arith.constant 5.000000e-01 : f32
    %678 = vector.broadcast %cst_314 : f32 to vector<8x128xf32>
    %679 = arith.mulf %678, %677 : vector<8x128xf32>
    %cst_315 = arith.constant 5.000000e-01 : f32
    %680 = vector.broadcast %cst_315 : f32 to vector<8x128xf32>
    %681 = arith.addf %679, %680 : vector<8x128xf32>
    %682 = math.tanh %668 : vector<8x128xf32>
    %c96_i32_316 = arith.constant 96 : i32
    %683 = tpu.dynamic_rotate %681 by %c96_i32_316 dim 1 : vector<8x128xf32>, i32 -> vector<8x128xf32>
    %c64_i32_317 = arith.constant 64 : i32
    %684 = tpu.dynamic_rotate %682 by %c64_i32_317 dim 1 : vector<8x128xf32>, i32 -> vector<8x128xf32>
    %c32_i32_318 = arith.constant 32 : i32
    %685 = tpu.dynamic_rotate %681 by %c32_i32_318 dim 1 : vector<8x128xf32>, i32 -> vector<8x128xf32>
    %686 = arith.mulf %683, %590 : vector<8x128xf32>
    %687 = arith.mulf %681, %684 : vector<8x128xf32>
    %688 = arith.addf %686, %687 : vector<8x128xf32>
    %689 = math.tanh %688 : vector<8x128xf32>
    %690 = arith.mulf %685, %689 : vector<8x128xf32>
    %cst_319 = arith.constant 5.000000e-01 : f32
    %691 = vector.broadcast %cst_319 : f32 to vector<8x128xf32>
    %692 = arith.mulf %691, %674 : vector<8x128xf32>
    %693 = math.tanh %692 : vector<8x128xf32>
    %cst_320 = arith.constant 5.000000e-01 : f32
    %694 = vector.broadcast %cst_320 : f32 to vector<8x128xf32>
    %695 = arith.mulf %694, %693 : vector<8x128xf32>
    %cst_321 = arith.constant 5.000000e-01 : f32
    %696 = vector.broadcast %cst_321 : f32 to vector<8x128xf32>
    %697 = arith.addf %695, %696 : vector<8x128xf32>
    %698 = math.tanh %674 : vector<8x128xf32>
    %c96_i32_322 = arith.constant 96 : i32
    %699 = tpu.dynamic_rotate %697 by %c96_i32_322 dim 1 : vector<8x128xf32>, i32 -> vector<8x128xf32>
    %c64_i32_323 = arith.constant 64 : i32
    %700 = tpu.dynamic_rotate %698 by %c64_i32_323 dim 1 : vector<8x128xf32>, i32 -> vector<8x128xf32>
    %c32_i32_324 = arith.constant 32 : i32
    %701 = tpu.dynamic_rotate %697 by %c32_i32_324 dim 1 : vector<8x128xf32>, i32 -> vector<8x128xf32>
    %702 = arith.mulf %699, %606 : vector<8x128xf32>
    %703 = arith.mulf %697, %700 : vector<8x128xf32>
    %704 = arith.addf %702, %703 : vector<8x128xf32>
    %705 = math.tanh %704 : vector<8x128xf32>
    %706 = arith.mulf %701, %705 : vector<8x128xf32>
    %707 = vector.broadcast %c6_i32 : i32 to vector<8x1xi32>
    %708 = arith.cmpi eq, %26, %707 : vector<8x1xi32>
    %709 = vector.shape_cast %708 : vector<8x1xi1> to vector<8x1xi1>
    %710 = vector.broadcast %709 : vector<8x1xi1> to vector<8x128xi1>
    %711 = arith.select %710, %690, %613 : vector<8x128xi1>, vector<8x128xf32>
    %712 = vector.broadcast %c6_i32 : i32 to vector<8x1xi32>
    %713 = arith.cmpi eq, %29, %712 : vector<8x1xi32>
    %714 = vector.shape_cast %713 : vector<8x1xi1> to vector<8x1xi1>
    %715 = vector.broadcast %714 : vector<8x1xi1> to vector<8x128xi1>
    %716 = arith.select %715, %706, %618 : vector<8x128xi1>, vector<8x128xf32>
    %c7_i32 = arith.constant 7 : i32
    %c8_i32_325 = arith.constant 8 : i32
    %717 = arith.muli %c7_i32, %c8_i32_325 : i32
    %718 = tpu.assume_multiple %717, 8 : i32
    %719 = arith.index_cast %718 : i32 to index
    %c0_326 = arith.constant 0 : index
    %720 = vector.load %arg22[%719, %c0_326] : memref<80x256xf32, #tpu.memory_space<vmem>>, vector<8x256xf32>
    %721 = vector.extract_strided_slice %720 {offsets = [0, 0], sizes = [8, 128], strides = [1, 1]} : vector<8x256xf32> to vector<8x128xf32>
    %c0_327 = arith.constant 0 : index
    %c0_328 = arith.constant 0 : index
    %722 = vector.load %arg6[%c0_327, %c0_328] : memref<128x128xf32, #tpu.memory_space<vmem>>, vector<128x128xf32>
    %cst_329 = arith.constant dense<0.000000e+00> : vector<8x128xf32>
    %723 = tpu.matmul %646, %722, %cst_329 {dimension_numbers = #tpu.dot_dimension_numbers<[1], [0], [0], [1], [0, 0, 1, 1], [], []>} : vector<8x128xf32>, vector<128x128xf32>, vector<8x128xf32> -> vector<8x128xf32>
    %724 = arith.addf %721, %723 : vector<8x128xf32>
    %725 = vector.extract_strided_slice %720 {offsets = [0, 128], sizes = [8, 128], strides = [1, 1]} : vector<8x256xf32> to vector<8x128xf32>
    %c0_330 = arith.constant 0 : index
    %c0_331 = arith.constant 0 : index
    %726 = vector.load %arg10[%c0_330, %c0_331] : memref<128x128xf32, #tpu.memory_space<vmem>>, vector<128x128xf32>
    %cst_332 = arith.constant dense<0.000000e+00> : vector<8x128xf32>
    %727 = tpu.matmul %662, %726, %cst_332 {dimension_numbers = #tpu.dot_dimension_numbers<[1], [0], [0], [1], [0, 0, 1, 1], [], []>} : vector<8x128xf32>, vector<128x128xf32>, vector<8x128xf32> -> vector<8x128xf32>
    %728 = arith.addf %725, %727 : vector<8x128xf32>
    %cst_333 = arith.constant 5.000000e-01 : f32
    %729 = vector.broadcast %cst_333 : f32 to vector<8x128xf32>
    %730 = arith.mulf %729, %724 : vector<8x128xf32>
    %731 = math.tanh %730 : vector<8x128xf32>
    %cst_334 = arith.constant 5.000000e-01 : f32
    %732 = vector.broadcast %cst_334 : f32 to vector<8x128xf32>
    %733 = arith.mulf %732, %731 : vector<8x128xf32>
    %cst_335 = arith.constant 5.000000e-01 : f32
    %734 = vector.broadcast %cst_335 : f32 to vector<8x128xf32>
    %735 = arith.addf %733, %734 : vector<8x128xf32>
    %736 = math.tanh %724 : vector<8x128xf32>
    %c96_i32_336 = arith.constant 96 : i32
    %737 = tpu.dynamic_rotate %735 by %c96_i32_336 dim 1 : vector<8x128xf32>, i32 -> vector<8x128xf32>
    %c64_i32_337 = arith.constant 64 : i32
    %738 = tpu.dynamic_rotate %736 by %c64_i32_337 dim 1 : vector<8x128xf32>, i32 -> vector<8x128xf32>
    %c32_i32_338 = arith.constant 32 : i32
    %739 = tpu.dynamic_rotate %735 by %c32_i32_338 dim 1 : vector<8x128xf32>, i32 -> vector<8x128xf32>
    %740 = arith.mulf %737, %644 : vector<8x128xf32>
    %741 = arith.mulf %735, %738 : vector<8x128xf32>
    %742 = arith.addf %740, %741 : vector<8x128xf32>
    %743 = math.tanh %742 : vector<8x128xf32>
    %744 = arith.mulf %739, %743 : vector<8x128xf32>
    %cst_339 = arith.constant 5.000000e-01 : f32
    %745 = vector.broadcast %cst_339 : f32 to vector<8x128xf32>
    %746 = arith.mulf %745, %728 : vector<8x128xf32>
    %747 = math.tanh %746 : vector<8x128xf32>
    %cst_340 = arith.constant 5.000000e-01 : f32
    %748 = vector.broadcast %cst_340 : f32 to vector<8x128xf32>
    %749 = arith.mulf %748, %747 : vector<8x128xf32>
    %cst_341 = arith.constant 5.000000e-01 : f32
    %750 = vector.broadcast %cst_341 : f32 to vector<8x128xf32>
    %751 = arith.addf %749, %750 : vector<8x128xf32>
    %752 = math.tanh %728 : vector<8x128xf32>
    %c96_i32_342 = arith.constant 96 : i32
    %753 = tpu.dynamic_rotate %751 by %c96_i32_342 dim 1 : vector<8x128xf32>, i32 -> vector<8x128xf32>
    %c64_i32_343 = arith.constant 64 : i32
    %754 = tpu.dynamic_rotate %752 by %c64_i32_343 dim 1 : vector<8x128xf32>, i32 -> vector<8x128xf32>
    %c32_i32_344 = arith.constant 32 : i32
    %755 = tpu.dynamic_rotate %751 by %c32_i32_344 dim 1 : vector<8x128xf32>, i32 -> vector<8x128xf32>
    %756 = arith.mulf %753, %660 : vector<8x128xf32>
    %757 = arith.mulf %751, %754 : vector<8x128xf32>
    %758 = arith.addf %756, %757 : vector<8x128xf32>
    %759 = math.tanh %758 : vector<8x128xf32>
    %760 = arith.mulf %755, %759 : vector<8x128xf32>
    %c0_345 = arith.constant 0 : index
    %c0_346 = arith.constant 0 : index
    %761 = vector.load %arg7[%c0_345, %c0_346] : memref<128x128xf32, #tpu.memory_space<vmem>>, vector<128x128xf32>
    %cst_347 = arith.constant dense<0.000000e+00> : vector<8x128xf32>
    %762 = tpu.matmul %744, %761, %cst_347 {dimension_numbers = #tpu.dot_dimension_numbers<[1], [0], [0], [1], [0, 0, 1, 1], [], []>} : vector<8x128xf32>, vector<128x128xf32>, vector<8x128xf32> -> vector<8x128xf32>
    %c0_348 = arith.constant 0 : index
    %c0_349 = arith.constant 0 : index
    %763 = vector.load %arg8[%c0_348, %c0_349] : memref<128x128xf32, #tpu.memory_space<vmem>>, vector<128x128xf32>
    %cst_350 = arith.constant dense<0.000000e+00> : vector<8x128xf32>
    %764 = tpu.matmul %690, %763, %cst_350 {dimension_numbers = #tpu.dot_dimension_numbers<[1], [0], [0], [1], [0, 0, 1, 1], [], []>} : vector<8x128xf32>, vector<128x128xf32>, vector<8x128xf32> -> vector<8x128xf32>
    %765 = arith.addf %762, %764 : vector<8x128xf32>
    %766 = arith.addf %765, %20 : vector<8x128xf32>
    %c0_351 = arith.constant 0 : index
    %c0_352 = arith.constant 0 : index
    %767 = vector.load %arg11[%c0_351, %c0_352] : memref<128x128xf32, #tpu.memory_space<vmem>>, vector<128x128xf32>
    %cst_353 = arith.constant dense<0.000000e+00> : vector<8x128xf32>
    %768 = tpu.matmul %760, %767, %cst_353 {dimension_numbers = #tpu.dot_dimension_numbers<[1], [0], [0], [1], [0, 0, 1, 1], [], []>} : vector<8x128xf32>, vector<128x128xf32>, vector<8x128xf32> -> vector<8x128xf32>
    %c0_354 = arith.constant 0 : index
    %c0_355 = arith.constant 0 : index
    %769 = vector.load %arg12[%c0_354, %c0_355] : memref<128x128xf32, #tpu.memory_space<vmem>>, vector<128x128xf32>
    %cst_356 = arith.constant dense<0.000000e+00> : vector<8x128xf32>
    %770 = tpu.matmul %706, %769, %cst_356 {dimension_numbers = #tpu.dot_dimension_numbers<[1], [0], [0], [1], [0, 0, 1, 1], [], []>} : vector<8x128xf32>, vector<128x128xf32>, vector<8x128xf32> -> vector<8x128xf32>
    %771 = arith.addf %768, %770 : vector<8x128xf32>
    %772 = arith.addf %771, %23 : vector<8x128xf32>
    %cst_357 = arith.constant 5.000000e-01 : f32
    %773 = vector.broadcast %cst_357 : f32 to vector<8x128xf32>
    %774 = arith.mulf %773, %766 : vector<8x128xf32>
    %775 = math.tanh %774 : vector<8x128xf32>
    %cst_358 = arith.constant 5.000000e-01 : f32
    %776 = vector.broadcast %cst_358 : f32 to vector<8x128xf32>
    %777 = arith.mulf %776, %775 : vector<8x128xf32>
    %cst_359 = arith.constant 5.000000e-01 : f32
    %778 = vector.broadcast %cst_359 : f32 to vector<8x128xf32>
    %779 = arith.addf %777, %778 : vector<8x128xf32>
    %780 = math.tanh %766 : vector<8x128xf32>
    %c96_i32_360 = arith.constant 96 : i32
    %781 = tpu.dynamic_rotate %779 by %c96_i32_360 dim 1 : vector<8x128xf32>, i32 -> vector<8x128xf32>
    %c64_i32_361 = arith.constant 64 : i32
    %782 = tpu.dynamic_rotate %780 by %c64_i32_361 dim 1 : vector<8x128xf32>, i32 -> vector<8x128xf32>
    %c32_i32_362 = arith.constant 32 : i32
    %783 = tpu.dynamic_rotate %779 by %c32_i32_362 dim 1 : vector<8x128xf32>, i32 -> vector<8x128xf32>
    %784 = arith.mulf %781, %688 : vector<8x128xf32>
    %785 = arith.mulf %779, %782 : vector<8x128xf32>
    %786 = arith.addf %784, %785 : vector<8x128xf32>
    %787 = math.tanh %786 : vector<8x128xf32>
    %788 = arith.mulf %783, %787 : vector<8x128xf32>
    %cst_363 = arith.constant 5.000000e-01 : f32
    %789 = vector.broadcast %cst_363 : f32 to vector<8x128xf32>
    %790 = arith.mulf %789, %772 : vector<8x128xf32>
    %791 = math.tanh %790 : vector<8x128xf32>
    %cst_364 = arith.constant 5.000000e-01 : f32
    %792 = vector.broadcast %cst_364 : f32 to vector<8x128xf32>
    %793 = arith.mulf %792, %791 : vector<8x128xf32>
    %cst_365 = arith.constant 5.000000e-01 : f32
    %794 = vector.broadcast %cst_365 : f32 to vector<8x128xf32>
    %795 = arith.addf %793, %794 : vector<8x128xf32>
    %796 = math.tanh %772 : vector<8x128xf32>
    %c96_i32_366 = arith.constant 96 : i32
    %797 = tpu.dynamic_rotate %795 by %c96_i32_366 dim 1 : vector<8x128xf32>, i32 -> vector<8x128xf32>
    %c64_i32_367 = arith.constant 64 : i32
    %798 = tpu.dynamic_rotate %796 by %c64_i32_367 dim 1 : vector<8x128xf32>, i32 -> vector<8x128xf32>
    %c32_i32_368 = arith.constant 32 : i32
    %799 = tpu.dynamic_rotate %795 by %c32_i32_368 dim 1 : vector<8x128xf32>, i32 -> vector<8x128xf32>
    %800 = arith.mulf %797, %704 : vector<8x128xf32>
    %801 = arith.mulf %795, %798 : vector<8x128xf32>
    %802 = arith.addf %800, %801 : vector<8x128xf32>
    %803 = math.tanh %802 : vector<8x128xf32>
    %804 = arith.mulf %799, %803 : vector<8x128xf32>
    %805 = vector.broadcast %c7_i32 : i32 to vector<8x1xi32>
    %806 = arith.cmpi eq, %26, %805 : vector<8x1xi32>
    %807 = vector.shape_cast %806 : vector<8x1xi1> to vector<8x1xi1>
    %808 = vector.broadcast %807 : vector<8x1xi1> to vector<8x128xi1>
    %809 = arith.select %808, %788, %711 : vector<8x128xi1>, vector<8x128xf32>
    %810 = vector.broadcast %c7_i32 : i32 to vector<8x1xi32>
    %811 = arith.cmpi eq, %29, %810 : vector<8x1xi32>
    %812 = vector.shape_cast %811 : vector<8x1xi1> to vector<8x1xi1>
    %813 = vector.broadcast %812 : vector<8x1xi1> to vector<8x128xi1>
    %814 = arith.select %813, %804, %716 : vector<8x128xi1>, vector<8x128xf32>
    %c8_i32_369 = arith.constant 8 : i32
    %c8_i32_370 = arith.constant 8 : i32
    %815 = arith.muli %c8_i32_369, %c8_i32_370 : i32
    %816 = tpu.assume_multiple %815, 8 : i32
    %817 = arith.index_cast %816 : i32 to index
    %c0_371 = arith.constant 0 : index
    %818 = vector.load %arg22[%817, %c0_371] : memref<80x256xf32, #tpu.memory_space<vmem>>, vector<8x256xf32>
    %819 = vector.extract_strided_slice %818 {offsets = [0, 0], sizes = [8, 128], strides = [1, 1]} : vector<8x256xf32> to vector<8x128xf32>
    %c0_372 = arith.constant 0 : index
    %c0_373 = arith.constant 0 : index
    %820 = vector.load %arg6[%c0_372, %c0_373] : memref<128x128xf32, #tpu.memory_space<vmem>>, vector<128x128xf32>
    %cst_374 = arith.constant dense<0.000000e+00> : vector<8x128xf32>
    %821 = tpu.matmul %744, %820, %cst_374 {dimension_numbers = #tpu.dot_dimension_numbers<[1], [0], [0], [1], [0, 0, 1, 1], [], []>} : vector<8x128xf32>, vector<128x128xf32>, vector<8x128xf32> -> vector<8x128xf32>
    %822 = arith.addf %819, %821 : vector<8x128xf32>
    %823 = vector.extract_strided_slice %818 {offsets = [0, 128], sizes = [8, 128], strides = [1, 1]} : vector<8x256xf32> to vector<8x128xf32>
    %c0_375 = arith.constant 0 : index
    %c0_376 = arith.constant 0 : index
    %824 = vector.load %arg10[%c0_375, %c0_376] : memref<128x128xf32, #tpu.memory_space<vmem>>, vector<128x128xf32>
    %cst_377 = arith.constant dense<0.000000e+00> : vector<8x128xf32>
    %825 = tpu.matmul %760, %824, %cst_377 {dimension_numbers = #tpu.dot_dimension_numbers<[1], [0], [0], [1], [0, 0, 1, 1], [], []>} : vector<8x128xf32>, vector<128x128xf32>, vector<8x128xf32> -> vector<8x128xf32>
    %826 = arith.addf %823, %825 : vector<8x128xf32>
    %cst_378 = arith.constant 5.000000e-01 : f32
    %827 = vector.broadcast %cst_378 : f32 to vector<8x128xf32>
    %828 = arith.mulf %827, %822 : vector<8x128xf32>
    %829 = math.tanh %828 : vector<8x128xf32>
    %cst_379 = arith.constant 5.000000e-01 : f32
    %830 = vector.broadcast %cst_379 : f32 to vector<8x128xf32>
    %831 = arith.mulf %830, %829 : vector<8x128xf32>
    %cst_380 = arith.constant 5.000000e-01 : f32
    %832 = vector.broadcast %cst_380 : f32 to vector<8x128xf32>
    %833 = arith.addf %831, %832 : vector<8x128xf32>
    %834 = math.tanh %822 : vector<8x128xf32>
    %c96_i32_381 = arith.constant 96 : i32
    %835 = tpu.dynamic_rotate %833 by %c96_i32_381 dim 1 : vector<8x128xf32>, i32 -> vector<8x128xf32>
    %c64_i32_382 = arith.constant 64 : i32
    %836 = tpu.dynamic_rotate %834 by %c64_i32_382 dim 1 : vector<8x128xf32>, i32 -> vector<8x128xf32>
    %c32_i32_383 = arith.constant 32 : i32
    %837 = tpu.dynamic_rotate %833 by %c32_i32_383 dim 1 : vector<8x128xf32>, i32 -> vector<8x128xf32>
    %838 = arith.mulf %835, %742 : vector<8x128xf32>
    %839 = arith.mulf %833, %836 : vector<8x128xf32>
    %840 = arith.addf %838, %839 : vector<8x128xf32>
    %841 = math.tanh %840 : vector<8x128xf32>
    %842 = arith.mulf %837, %841 : vector<8x128xf32>
    %cst_384 = arith.constant 5.000000e-01 : f32
    %843 = vector.broadcast %cst_384 : f32 to vector<8x128xf32>
    %844 = arith.mulf %843, %826 : vector<8x128xf32>
    %845 = math.tanh %844 : vector<8x128xf32>
    %cst_385 = arith.constant 5.000000e-01 : f32
    %846 = vector.broadcast %cst_385 : f32 to vector<8x128xf32>
    %847 = arith.mulf %846, %845 : vector<8x128xf32>
    %cst_386 = arith.constant 5.000000e-01 : f32
    %848 = vector.broadcast %cst_386 : f32 to vector<8x128xf32>
    %849 = arith.addf %847, %848 : vector<8x128xf32>
    %850 = math.tanh %826 : vector<8x128xf32>
    %c96_i32_387 = arith.constant 96 : i32
    %851 = tpu.dynamic_rotate %849 by %c96_i32_387 dim 1 : vector<8x128xf32>, i32 -> vector<8x128xf32>
    %c64_i32_388 = arith.constant 64 : i32
    %852 = tpu.dynamic_rotate %850 by %c64_i32_388 dim 1 : vector<8x128xf32>, i32 -> vector<8x128xf32>
    %c32_i32_389 = arith.constant 32 : i32
    %853 = tpu.dynamic_rotate %849 by %c32_i32_389 dim 1 : vector<8x128xf32>, i32 -> vector<8x128xf32>
    %854 = arith.mulf %851, %758 : vector<8x128xf32>
    %855 = arith.mulf %849, %852 : vector<8x128xf32>
    %856 = arith.addf %854, %855 : vector<8x128xf32>
    %857 = math.tanh %856 : vector<8x128xf32>
    %858 = arith.mulf %853, %857 : vector<8x128xf32>
    %c0_390 = arith.constant 0 : index
    %c0_391 = arith.constant 0 : index
    %859 = vector.load %arg7[%c0_390, %c0_391] : memref<128x128xf32, #tpu.memory_space<vmem>>, vector<128x128xf32>
    %cst_392 = arith.constant dense<0.000000e+00> : vector<8x128xf32>
    %860 = tpu.matmul %842, %859, %cst_392 {dimension_numbers = #tpu.dot_dimension_numbers<[1], [0], [0], [1], [0, 0, 1, 1], [], []>} : vector<8x128xf32>, vector<128x128xf32>, vector<8x128xf32> -> vector<8x128xf32>
    %c0_393 = arith.constant 0 : index
    %c0_394 = arith.constant 0 : index
    %861 = vector.load %arg8[%c0_393, %c0_394] : memref<128x128xf32, #tpu.memory_space<vmem>>, vector<128x128xf32>
    %cst_395 = arith.constant dense<0.000000e+00> : vector<8x128xf32>
    %862 = tpu.matmul %788, %861, %cst_395 {dimension_numbers = #tpu.dot_dimension_numbers<[1], [0], [0], [1], [0, 0, 1, 1], [], []>} : vector<8x128xf32>, vector<128x128xf32>, vector<8x128xf32> -> vector<8x128xf32>
    %863 = arith.addf %860, %862 : vector<8x128xf32>
    %864 = arith.addf %863, %20 : vector<8x128xf32>
    %c0_396 = arith.constant 0 : index
    %c0_397 = arith.constant 0 : index
    %865 = vector.load %arg11[%c0_396, %c0_397] : memref<128x128xf32, #tpu.memory_space<vmem>>, vector<128x128xf32>
    %cst_398 = arith.constant dense<0.000000e+00> : vector<8x128xf32>
    %866 = tpu.matmul %858, %865, %cst_398 {dimension_numbers = #tpu.dot_dimension_numbers<[1], [0], [0], [1], [0, 0, 1, 1], [], []>} : vector<8x128xf32>, vector<128x128xf32>, vector<8x128xf32> -> vector<8x128xf32>
    %c0_399 = arith.constant 0 : index
    %c0_400 = arith.constant 0 : index
    %867 = vector.load %arg12[%c0_399, %c0_400] : memref<128x128xf32, #tpu.memory_space<vmem>>, vector<128x128xf32>
    %cst_401 = arith.constant dense<0.000000e+00> : vector<8x128xf32>
    %868 = tpu.matmul %804, %867, %cst_401 {dimension_numbers = #tpu.dot_dimension_numbers<[1], [0], [0], [1], [0, 0, 1, 1], [], []>} : vector<8x128xf32>, vector<128x128xf32>, vector<8x128xf32> -> vector<8x128xf32>
    %869 = arith.addf %866, %868 : vector<8x128xf32>
    %870 = arith.addf %869, %23 : vector<8x128xf32>
    %cst_402 = arith.constant 5.000000e-01 : f32
    %871 = vector.broadcast %cst_402 : f32 to vector<8x128xf32>
    %872 = arith.mulf %871, %864 : vector<8x128xf32>
    %873 = math.tanh %872 : vector<8x128xf32>
    %cst_403 = arith.constant 5.000000e-01 : f32
    %874 = vector.broadcast %cst_403 : f32 to vector<8x128xf32>
    %875 = arith.mulf %874, %873 : vector<8x128xf32>
    %cst_404 = arith.constant 5.000000e-01 : f32
    %876 = vector.broadcast %cst_404 : f32 to vector<8x128xf32>
    %877 = arith.addf %875, %876 : vector<8x128xf32>
    %878 = math.tanh %864 : vector<8x128xf32>
    %c96_i32_405 = arith.constant 96 : i32
    %879 = tpu.dynamic_rotate %877 by %c96_i32_405 dim 1 : vector<8x128xf32>, i32 -> vector<8x128xf32>
    %c64_i32_406 = arith.constant 64 : i32
    %880 = tpu.dynamic_rotate %878 by %c64_i32_406 dim 1 : vector<8x128xf32>, i32 -> vector<8x128xf32>
    %c32_i32_407 = arith.constant 32 : i32
    %881 = tpu.dynamic_rotate %877 by %c32_i32_407 dim 1 : vector<8x128xf32>, i32 -> vector<8x128xf32>
    %882 = arith.mulf %879, %786 : vector<8x128xf32>
    %883 = arith.mulf %877, %880 : vector<8x128xf32>
    %884 = arith.addf %882, %883 : vector<8x128xf32>
    %885 = math.tanh %884 : vector<8x128xf32>
    %886 = arith.mulf %881, %885 : vector<8x128xf32>
    %cst_408 = arith.constant 5.000000e-01 : f32
    %887 = vector.broadcast %cst_408 : f32 to vector<8x128xf32>
    %888 = arith.mulf %887, %870 : vector<8x128xf32>
    %889 = math.tanh %888 : vector<8x128xf32>
    %cst_409 = arith.constant 5.000000e-01 : f32
    %890 = vector.broadcast %cst_409 : f32 to vector<8x128xf32>
    %891 = arith.mulf %890, %889 : vector<8x128xf32>
    %cst_410 = arith.constant 5.000000e-01 : f32
    %892 = vector.broadcast %cst_410 : f32 to vector<8x128xf32>
    %893 = arith.addf %891, %892 : vector<8x128xf32>
    %894 = math.tanh %870 : vector<8x128xf32>
    %c96_i32_411 = arith.constant 96 : i32
    %895 = tpu.dynamic_rotate %893 by %c96_i32_411 dim 1 : vector<8x128xf32>, i32 -> vector<8x128xf32>
    %c64_i32_412 = arith.constant 64 : i32
    %896 = tpu.dynamic_rotate %894 by %c64_i32_412 dim 1 : vector<8x128xf32>, i32 -> vector<8x128xf32>
    %c32_i32_413 = arith.constant 32 : i32
    %897 = tpu.dynamic_rotate %893 by %c32_i32_413 dim 1 : vector<8x128xf32>, i32 -> vector<8x128xf32>
    %898 = arith.mulf %895, %802 : vector<8x128xf32>
    %899 = arith.mulf %893, %896 : vector<8x128xf32>
    %900 = arith.addf %898, %899 : vector<8x128xf32>
    %901 = math.tanh %900 : vector<8x128xf32>
    %902 = arith.mulf %897, %901 : vector<8x128xf32>
    %903 = vector.broadcast %c8_i32_369 : i32 to vector<8x1xi32>
    %904 = arith.cmpi eq, %26, %903 : vector<8x1xi32>
    %905 = vector.shape_cast %904 : vector<8x1xi1> to vector<8x1xi1>
    %906 = vector.broadcast %905 : vector<8x1xi1> to vector<8x128xi1>
    %907 = arith.select %906, %886, %809 : vector<8x128xi1>, vector<8x128xf32>
    %908 = vector.broadcast %c8_i32_369 : i32 to vector<8x1xi32>
    %909 = arith.cmpi eq, %29, %908 : vector<8x1xi32>
    %910 = vector.shape_cast %909 : vector<8x1xi1> to vector<8x1xi1>
    %911 = vector.broadcast %910 : vector<8x1xi1> to vector<8x128xi1>
    %912 = arith.select %911, %902, %814 : vector<8x128xi1>, vector<8x128xf32>
    %c9_i32 = arith.constant 9 : i32
    %c8_i32_414 = arith.constant 8 : i32
    %913 = arith.muli %c9_i32, %c8_i32_414 : i32
    %914 = tpu.assume_multiple %913, 8 : i32
    %915 = arith.index_cast %914 : i32 to index
    %c0_415 = arith.constant 0 : index
    %916 = vector.load %arg22[%915, %c0_415] : memref<80x256xf32, #tpu.memory_space<vmem>>, vector<8x256xf32>
    %917 = vector.extract_strided_slice %916 {offsets = [0, 0], sizes = [8, 128], strides = [1, 1]} : vector<8x256xf32> to vector<8x128xf32>
    %c0_416 = arith.constant 0 : index
    %c0_417 = arith.constant 0 : index
    %918 = vector.load %arg6[%c0_416, %c0_417] : memref<128x128xf32, #tpu.memory_space<vmem>>, vector<128x128xf32>
    %cst_418 = arith.constant dense<0.000000e+00> : vector<8x128xf32>
    %919 = tpu.matmul %842, %918, %cst_418 {dimension_numbers = #tpu.dot_dimension_numbers<[1], [0], [0], [1], [0, 0, 1, 1], [], []>} : vector<8x128xf32>, vector<128x128xf32>, vector<8x128xf32> -> vector<8x128xf32>
    %920 = arith.addf %917, %919 : vector<8x128xf32>
    %921 = vector.extract_strided_slice %916 {offsets = [0, 128], sizes = [8, 128], strides = [1, 1]} : vector<8x256xf32> to vector<8x128xf32>
    %c0_419 = arith.constant 0 : index
    %c0_420 = arith.constant 0 : index
    %922 = vector.load %arg10[%c0_419, %c0_420] : memref<128x128xf32, #tpu.memory_space<vmem>>, vector<128x128xf32>
    %cst_421 = arith.constant dense<0.000000e+00> : vector<8x128xf32>
    %923 = tpu.matmul %858, %922, %cst_421 {dimension_numbers = #tpu.dot_dimension_numbers<[1], [0], [0], [1], [0, 0, 1, 1], [], []>} : vector<8x128xf32>, vector<128x128xf32>, vector<8x128xf32> -> vector<8x128xf32>
    %924 = arith.addf %921, %923 : vector<8x128xf32>
    %cst_422 = arith.constant 5.000000e-01 : f32
    %925 = vector.broadcast %cst_422 : f32 to vector<8x128xf32>
    %926 = arith.mulf %925, %920 : vector<8x128xf32>
    %927 = math.tanh %926 : vector<8x128xf32>
    %cst_423 = arith.constant 5.000000e-01 : f32
    %928 = vector.broadcast %cst_423 : f32 to vector<8x128xf32>
    %929 = arith.mulf %928, %927 : vector<8x128xf32>
    %cst_424 = arith.constant 5.000000e-01 : f32
    %930 = vector.broadcast %cst_424 : f32 to vector<8x128xf32>
    %931 = arith.addf %929, %930 : vector<8x128xf32>
    %932 = math.tanh %920 : vector<8x128xf32>
    %c96_i32_425 = arith.constant 96 : i32
    %933 = tpu.dynamic_rotate %931 by %c96_i32_425 dim 1 : vector<8x128xf32>, i32 -> vector<8x128xf32>
    %c64_i32_426 = arith.constant 64 : i32
    %934 = tpu.dynamic_rotate %932 by %c64_i32_426 dim 1 : vector<8x128xf32>, i32 -> vector<8x128xf32>
    %c32_i32_427 = arith.constant 32 : i32
    %935 = tpu.dynamic_rotate %931 by %c32_i32_427 dim 1 : vector<8x128xf32>, i32 -> vector<8x128xf32>
    %936 = arith.mulf %933, %840 : vector<8x128xf32>
    %937 = arith.mulf %931, %934 : vector<8x128xf32>
    %938 = arith.addf %936, %937 : vector<8x128xf32>
    %939 = math.tanh %938 : vector<8x128xf32>
    %940 = arith.mulf %935, %939 : vector<8x128xf32>
    %cst_428 = arith.constant 5.000000e-01 : f32
    %941 = vector.broadcast %cst_428 : f32 to vector<8x128xf32>
    %942 = arith.mulf %941, %924 : vector<8x128xf32>
    %943 = math.tanh %942 : vector<8x128xf32>
    %cst_429 = arith.constant 5.000000e-01 : f32
    %944 = vector.broadcast %cst_429 : f32 to vector<8x128xf32>
    %945 = arith.mulf %944, %943 : vector<8x128xf32>
    %cst_430 = arith.constant 5.000000e-01 : f32
    %946 = vector.broadcast %cst_430 : f32 to vector<8x128xf32>
    %947 = arith.addf %945, %946 : vector<8x128xf32>
    %948 = math.tanh %924 : vector<8x128xf32>
    %c96_i32_431 = arith.constant 96 : i32
    %949 = tpu.dynamic_rotate %947 by %c96_i32_431 dim 1 : vector<8x128xf32>, i32 -> vector<8x128xf32>
    %c64_i32_432 = arith.constant 64 : i32
    %950 = tpu.dynamic_rotate %948 by %c64_i32_432 dim 1 : vector<8x128xf32>, i32 -> vector<8x128xf32>
    %c32_i32_433 = arith.constant 32 : i32
    %951 = tpu.dynamic_rotate %947 by %c32_i32_433 dim 1 : vector<8x128xf32>, i32 -> vector<8x128xf32>
    %952 = arith.mulf %949, %856 : vector<8x128xf32>
    %953 = arith.mulf %947, %950 : vector<8x128xf32>
    %954 = arith.addf %952, %953 : vector<8x128xf32>
    %955 = math.tanh %954 : vector<8x128xf32>
    %956 = arith.mulf %951, %955 : vector<8x128xf32>
    %c0_434 = arith.constant 0 : index
    %c0_435 = arith.constant 0 : index
    %957 = vector.load %arg7[%c0_434, %c0_435] : memref<128x128xf32, #tpu.memory_space<vmem>>, vector<128x128xf32>
    %cst_436 = arith.constant dense<0.000000e+00> : vector<8x128xf32>
    %958 = tpu.matmul %940, %957, %cst_436 {dimension_numbers = #tpu.dot_dimension_numbers<[1], [0], [0], [1], [0, 0, 1, 1], [], []>} : vector<8x128xf32>, vector<128x128xf32>, vector<8x128xf32> -> vector<8x128xf32>
    %c0_437 = arith.constant 0 : index
    %c0_438 = arith.constant 0 : index
    %959 = vector.load %arg8[%c0_437, %c0_438] : memref<128x128xf32, #tpu.memory_space<vmem>>, vector<128x128xf32>
    %cst_439 = arith.constant dense<0.000000e+00> : vector<8x128xf32>
    %960 = tpu.matmul %886, %959, %cst_439 {dimension_numbers = #tpu.dot_dimension_numbers<[1], [0], [0], [1], [0, 0, 1, 1], [], []>} : vector<8x128xf32>, vector<128x128xf32>, vector<8x128xf32> -> vector<8x128xf32>
    %961 = arith.addf %958, %960 : vector<8x128xf32>
    %962 = arith.addf %961, %20 : vector<8x128xf32>
    %c0_440 = arith.constant 0 : index
    %c0_441 = arith.constant 0 : index
    %963 = vector.load %arg11[%c0_440, %c0_441] : memref<128x128xf32, #tpu.memory_space<vmem>>, vector<128x128xf32>
    %cst_442 = arith.constant dense<0.000000e+00> : vector<8x128xf32>
    %964 = tpu.matmul %956, %963, %cst_442 {dimension_numbers = #tpu.dot_dimension_numbers<[1], [0], [0], [1], [0, 0, 1, 1], [], []>} : vector<8x128xf32>, vector<128x128xf32>, vector<8x128xf32> -> vector<8x128xf32>
    %c0_443 = arith.constant 0 : index
    %c0_444 = arith.constant 0 : index
    %965 = vector.load %arg12[%c0_443, %c0_444] : memref<128x128xf32, #tpu.memory_space<vmem>>, vector<128x128xf32>
    %cst_445 = arith.constant dense<0.000000e+00> : vector<8x128xf32>
    %966 = tpu.matmul %902, %965, %cst_445 {dimension_numbers = #tpu.dot_dimension_numbers<[1], [0], [0], [1], [0, 0, 1, 1], [], []>} : vector<8x128xf32>, vector<128x128xf32>, vector<8x128xf32> -> vector<8x128xf32>
    %967 = arith.addf %964, %966 : vector<8x128xf32>
    %968 = arith.addf %967, %23 : vector<8x128xf32>
    %cst_446 = arith.constant 5.000000e-01 : f32
    %969 = vector.broadcast %cst_446 : f32 to vector<8x128xf32>
    %970 = arith.mulf %969, %962 : vector<8x128xf32>
    %971 = math.tanh %970 : vector<8x128xf32>
    %cst_447 = arith.constant 5.000000e-01 : f32
    %972 = vector.broadcast %cst_447 : f32 to vector<8x128xf32>
    %973 = arith.mulf %972, %971 : vector<8x128xf32>
    %cst_448 = arith.constant 5.000000e-01 : f32
    %974 = vector.broadcast %cst_448 : f32 to vector<8x128xf32>
    %975 = arith.addf %973, %974 : vector<8x128xf32>
    %976 = math.tanh %962 : vector<8x128xf32>
    %c96_i32_449 = arith.constant 96 : i32
    %977 = tpu.dynamic_rotate %975 by %c96_i32_449 dim 1 : vector<8x128xf32>, i32 -> vector<8x128xf32>
    %c64_i32_450 = arith.constant 64 : i32
    %978 = tpu.dynamic_rotate %976 by %c64_i32_450 dim 1 : vector<8x128xf32>, i32 -> vector<8x128xf32>
    %c32_i32_451 = arith.constant 32 : i32
    %979 = tpu.dynamic_rotate %975 by %c32_i32_451 dim 1 : vector<8x128xf32>, i32 -> vector<8x128xf32>
    %980 = arith.mulf %977, %884 : vector<8x128xf32>
    %981 = arith.mulf %975, %978 : vector<8x128xf32>
    %982 = arith.addf %980, %981 : vector<8x128xf32>
    %983 = math.tanh %982 : vector<8x128xf32>
    %984 = arith.mulf %979, %983 : vector<8x128xf32>
    %cst_452 = arith.constant 5.000000e-01 : f32
    %985 = vector.broadcast %cst_452 : f32 to vector<8x128xf32>
    %986 = arith.mulf %985, %968 : vector<8x128xf32>
    %987 = math.tanh %986 : vector<8x128xf32>
    %cst_453 = arith.constant 5.000000e-01 : f32
    %988 = vector.broadcast %cst_453 : f32 to vector<8x128xf32>
    %989 = arith.mulf %988, %987 : vector<8x128xf32>
    %cst_454 = arith.constant 5.000000e-01 : f32
    %990 = vector.broadcast %cst_454 : f32 to vector<8x128xf32>
    %991 = arith.addf %989, %990 : vector<8x128xf32>
    %992 = math.tanh %968 : vector<8x128xf32>
    %c96_i32_455 = arith.constant 96 : i32
    %993 = tpu.dynamic_rotate %991 by %c96_i32_455 dim 1 : vector<8x128xf32>, i32 -> vector<8x128xf32>
    %c64_i32_456 = arith.constant 64 : i32
    %994 = tpu.dynamic_rotate %992 by %c64_i32_456 dim 1 : vector<8x128xf32>, i32 -> vector<8x128xf32>
    %c32_i32_457 = arith.constant 32 : i32
    %995 = tpu.dynamic_rotate %991 by %c32_i32_457 dim 1 : vector<8x128xf32>, i32 -> vector<8x128xf32>
    %996 = arith.mulf %993, %900 : vector<8x128xf32>
    %997 = arith.mulf %991, %994 : vector<8x128xf32>
    %998 = arith.addf %996, %997 : vector<8x128xf32>
    %999 = math.tanh %998 : vector<8x128xf32>
    %1000 = arith.mulf %995, %999 : vector<8x128xf32>
    %1001 = vector.broadcast %c9_i32 : i32 to vector<8x1xi32>
    %1002 = arith.cmpi eq, %26, %1001 : vector<8x1xi32>
    %1003 = vector.shape_cast %1002 : vector<8x1xi1> to vector<8x1xi1>
    %1004 = vector.broadcast %1003 : vector<8x1xi1> to vector<8x128xi1>
    %1005 = arith.select %1004, %984, %907 : vector<8x128xi1>, vector<8x128xf32>
    %1006 = vector.broadcast %c9_i32 : i32 to vector<8x1xi32>
    %1007 = arith.cmpi eq, %29, %1006 : vector<8x1xi32>
    %1008 = vector.shape_cast %1007 : vector<8x1xi1> to vector<8x1xi1>
    %1009 = vector.broadcast %1008 : vector<8x1xi1> to vector<8x128xi1>
    %1010 = arith.select %1009, %1000, %912 : vector<8x128xi1>, vector<8x128xf32>
    %c10_i32 = arith.constant 10 : i32
    %c0_458 = arith.constant 0 : index
    %c0_459 = arith.constant 0 : index
    %1011 = vector.load %arg14[%c0_458, %c0_459] : memref<128x256xf32, #tpu.memory_space<vmem>>, vector<128x256xf32>
    %cst_460 = arith.constant dense<0.000000e+00> : vector<8x256xf32>
    %1012 = tpu.matmul %1005, %1011, %cst_460 {dimension_numbers = #tpu.dot_dimension_numbers<[1], [0], [0], [1], [0, 0, 1, 1], [], []>} : vector<8x128xf32>, vector<128x256xf32>, vector<8x256xf32> -> vector<8x256xf32>
    %c0_461 = arith.constant 0 : index
    %c0_462 = arith.constant 0 : index
    %1013 = vector.load %arg15[%c0_461, %c0_462] : memref<128x256xf32, #tpu.memory_space<vmem>>, vector<128x256xf32>
    %cst_463 = arith.constant dense<0.000000e+00> : vector<8x256xf32>
    %1014 = tpu.matmul %1010, %1013, %cst_463 {dimension_numbers = #tpu.dot_dimension_numbers<[1], [0], [0], [1], [0, 0, 1, 1], [], []>} : vector<8x128xf32>, vector<128x256xf32>, vector<8x256xf32> -> vector<8x256xf32>
    %1015 = arith.addf %1012, %1014 : vector<8x256xf32>
    %c0_464 = arith.constant 0 : index
    %c0_465 = arith.constant 0 : index
    %1016 = vector.load %arg16[%c0_464, %c0_465] : memref<1x256xf32, #tpu.memory_space<vmem>>, vector<1x256xf32>
    %1017 = vector.broadcast %1016 : vector<1x256xf32> to vector<8x256xf32>
    %1018 = arith.addf %1015, %1017 : vector<8x256xf32>
    %cst_466 = arith.constant 5.000000e-01 : f32
    %1019 = vector.broadcast %cst_466 : f32 to vector<8x256xf32>
    %1020 = arith.mulf %1019, %1018 : vector<8x256xf32>
    %1021 = arith.mulf %1018, %1018 : vector<8x256xf32>
    %1022 = arith.mulf %1021, %1018 : vector<8x256xf32>
    %cst_467 = arith.constant 4.471500e-02 : f32
    %1023 = vector.broadcast %cst_467 : f32 to vector<8x256xf32>
    %1024 = arith.mulf %1023, %1022 : vector<8x256xf32>
    %1025 = arith.addf %1018, %1024 : vector<8x256xf32>
    %cst_468 = arith.constant 0.797884583 : f32
    %1026 = vector.broadcast %cst_468 : f32 to vector<8x256xf32>
    %1027 = arith.mulf %1026, %1025 : vector<8x256xf32>
    %1028 = math.tanh %1027 : vector<8x256xf32>
    %cst_469 = arith.constant 1.000000e+00 : f32
    %1029 = vector.broadcast %cst_469 : f32 to vector<8x256xf32>
    %1030 = arith.addf %1029, %1028 : vector<8x256xf32>
    %1031 = arith.mulf %1020, %1030 : vector<8x256xf32>
    %c0_470 = arith.constant 0 : index
    %c0_471 = arith.constant 0 : index
    %1032 = vector.load %arg17[%c0_470, %c0_471] : memref<256x128xf32, #tpu.memory_space<vmem>>, vector<256x128xf32>
    %cst_472 = arith.constant dense<0.000000e+00> : vector<8x128xf32>
    %1033 = tpu.matmul %1031, %1032, %cst_472 {dimension_numbers = #tpu.dot_dimension_numbers<[1], [0], [0], [1], [0, 0, 1, 1], [], []>} : vector<8x256xf32>, vector<256x128xf32>, vector<8x128xf32> -> vector<8x128xf32>
    %c0_473 = arith.constant 0 : index
    %c0_474 = arith.constant 0 : index
    %1034 = vector.load %arg18[%c0_473, %c0_474] : memref<1x128xf32, #tpu.memory_space<vmem>>, vector<1x128xf32>
    %1035 = vector.broadcast %1034 : vector<1x128xf32> to vector<8x128xf32>
    %1036 = arith.addf %1033, %1035 : vector<8x128xf32>
    %cst_475 = arith.constant 5.000000e-01 : f32
    %1037 = vector.broadcast %cst_475 : f32 to vector<8x128xf32>
    %1038 = arith.mulf %1037, %1036 : vector<8x128xf32>
    %1039 = arith.mulf %1036, %1036 : vector<8x128xf32>
    %1040 = arith.mulf %1039, %1036 : vector<8x128xf32>
    %cst_476 = arith.constant 4.471500e-02 : f32
    %1041 = vector.broadcast %cst_476 : f32 to vector<8x128xf32>
    %1042 = arith.mulf %1041, %1040 : vector<8x128xf32>
    %1043 = arith.addf %1036, %1042 : vector<8x128xf32>
    %cst_477 = arith.constant 0.797884583 : f32
    %1044 = vector.broadcast %cst_477 : f32 to vector<8x128xf32>
    %1045 = arith.mulf %1044, %1043 : vector<8x128xf32>
    %1046 = math.tanh %1045 : vector<8x128xf32>
    %cst_478 = arith.constant 1.000000e+00 : f32
    %1047 = vector.broadcast %cst_478 : f32 to vector<8x128xf32>
    %1048 = arith.addf %1047, %1046 : vector<8x128xf32>
    %1049 = arith.mulf %1038, %1048 : vector<8x128xf32>
    %c0_479 = arith.constant 0 : index
    %c0_480 = arith.constant 0 : index
    %1050 = vector.load %arg19[%c0_479, %c0_480] : memref<1x128xf32, #tpu.memory_space<vmem>>, vector<1x128xf32>
    %1051 = vector.broadcast %1050 : vector<1x128xf32> to vector<8x128xf32>
    %1052 = arith.mulf %1049, %1051 : vector<8x128xf32>
    %cst_481 = arith.constant dense<0.000000e+00> : vector<8xf32>
    %1053 = vector.multi_reduction <add>, %1052, %cst_481 [1] : vector<8x128xf32> to vector<8xf32>
    %1054 = vector.shape_cast %1053 : vector<8xf32> to vector<8x1xf32>
    %c0_482 = arith.constant 0 : index
    %c0_483 = arith.constant 0 : index
    %1055 = vector.load %arg20[%c0_482, %c0_483] : memref<1x1xf32, #tpu.memory_space<vmem>>, vector<1x1xf32>
    %1056 = vector.broadcast %1055 : vector<1x1xf32> to vector<8x1xf32>
    %1057 = arith.addf %1054, %1056 : vector<8x1xf32>
    %cst_484 = arith.constant 5.000000e-01 : f32
    %1058 = vector.broadcast %cst_484 : f32 to vector<8x1xf32>
    %1059 = arith.mulf %1058, %1057 : vector<8x1xf32>
    %1060 = math.tanh %1059 : vector<8x1xf32>
    %cst_485 = arith.constant 5.000000e-01 : f32
    %1061 = vector.broadcast %cst_485 : f32 to vector<8x1xf32>
    %1062 = arith.mulf %1061, %1060 : vector<8x1xf32>
    %cst_486 = arith.constant 5.000000e-01 : f32
    %1063 = vector.broadcast %cst_486 : f32 to vector<8x1xf32>
    %1064 = arith.addf %1062, %1063 : vector<8x1xf32>
    %c0_487 = arith.constant 0 : index
    %c0_488 = arith.constant 0 : index
    %1065 = vector.load %arg21[%c0_487, %c0_488] : memref<8x1xf32, #tpu.memory_space<vmem>>, vector<8x1xf32>
    tpu.vector_store %arg21[%c0_487, %c0_488], %1064 {strides = array<i32>} : memref<8x1xf32, #tpu.memory_space<vmem>>, vector<8x1xf32>,
    return
  }
}

</mosaic_0001>

<bundles_post_ra>
// kernel: forward.1
= control target key start
LH: loop header
LB: loop body
LE: loop exit
PB: predicated region body
PF: predicated region fallthrough
CT: control target
= control target key end

     0   :  { %s13611_s0 = inlined_call_operand.vmem [shape: s32[80,1], index: 0, kind: input, shape index: {}]   ;;  %s13612_s1 = inlined_call_operand.vmem [shape: s32[80,1], index: 1, kind: input, shape index: {}]   ;;  %s13613_s2 = inlined_call_operand.vmem [shape: s32[8,1], index: 2, kind: input, shape index: {}]   ;;  %s13614_s3 = inlined_call_operand.vmem [shape: s32[8,1], index: 3, kind: input, shape index: {}]   ;;  %s13615_s4 = inlined_call_operand.vmem [shape: f32[128,256], index: 4, kind: input, shape index: {}]   ;;  %s13616_s5 = inlined_call_operand.vmem [shape: f32[1,256], index: 5, kind: input, shape index: {}]   ;;  %s13617_s6 = inlined_call_operand.hbm [shape: f32[128,128], index: 6, kind: input, shape index: {}]   ;;  %s13618_s7 = inlined_call_operand.hbm [shape: f32[128,128], index: 7, kind: input, shape index: {}]   ;;  %s13619_s8 = inlined_call_operand.hbm [shape: f32[128,128], index: 8, kind: input, shape index: {}]   ;;  %s13620_s9 = inlined_call_operand.vmem [shape: f32[1,128], index: 9, kind: input, shape index: {}]   ;;  %s13621_s10 = inlined_call_operand.hbm [shape: f32[128,128], index: 10, kind: input, shape index: {}]   ;;  %s13622_s11 = inlined_call_operand.hbm [shape: f32[128,128], index: 11, kind: input, shape index: {}]   ;;  %s13623_s12 = inlined_call_operand.hbm [shape: f32[128,128], index: 12, kind: input, shape index: {}]   ;;  %s13624_s13 = inlined_call_operand.vmem [shape: f32[1,128], index: 13, kind: input, shape index: {}]   ;;  %s13625_s14 = inlined_call_operand.hbm [shape: f32[128,256], index: 14, kind: input, shape index: {}]   ;;  %s13626_s15 = inlined_call_operand.hbm [shape: f32[128,256], index: 15, kind: input, shape index: {}]   ;;  %s13627_s16 = inlined_call_operand.vmem [shape: f32[1,256], index: 16, kind: input, shape index: {}]   ;;  %s13628_s17 = inlined_call_operand.hbm [shape: f32[256,128], index: 17, kind: input, shape index: {}]   ;;  %s13629_s18 = inlined_call_operand.vmem [shape: f32[1,128], index: 18, kind: input, shape index: {}]   ;;  %s13630_s19 = inlined_call_operand.vmem [shape: f32[1,128], index: 19, kind: input, shape index: {}]   ;;  %s13631_s20 = inlined_call_operand.<no memory space> [shape: f32[1,1], index: 20, kind: input, shape index: {}]   ;;  %s13632_s21 = inlined_call_operand.vmem [shape: f32[8,1], index: 21, kind: output, shape index: {}]  }
   0x1   :  { %13679 = sst [smem:[#allocation50_spill]] %s13611_s0  ;;  %v26_v0 = vstv %s13631_s20 }
   0x2   :  { %13680 = sst [smem:[#allocation51_spill]] %s13612_s1  ;;  %27 = vst [vmem:[#allocation3] sm:$0x1] %v26_v0 }
   0x3   :  { %13681 = sst [smem:[#allocation52_spill]] %s13613_s2 }
   0x4   :  { %13682 = sst [smem:[#allocation53_spill]] %s13614_s3 }
   0x5   :  { %13683 = sst [smem:[#allocation54_spill]] %s13615_s4 }
   0x6   :  { %13684 = sst [smem:[#allocation55_spill]] %s13616_s5 }
   0x7   :  { %28 = vsyncpa [#allocation5], 0 }
   0x8   :  { %29 = vsyncpa [#allocation7], 0 }
   0x9   :  { %30 = vsyncpa [#allocation10], 0 }
   0xa   :  { %31 = vsyncpa [#allocation13], 0 }
   0xb   :  { %32 = vsyncpa [#allocation16], 0  ;;  %s11342_s26 = smov [#allocation6]   ;;  %s11343_s3 = smov [#allocation9]  }
   0xc   :  { %s62_s27 = sshll.u32 %s11342_s26, 4  ;;  %s88_s28 = sshll.u32 %s11343_s3, 4  ;;  %s63_s27 = int_to_ptr.vmem [resolvable:$true] %s62_s27  ;;  %s11476_s28 = int_to_ptr.vmem [resolvable:$true] %s88_s28 }
   0xd   :  { %s11134_s4 = scalar_lea.hbm %s13618_s7, 2048 }
   0xe   :  { %p11135_p0 = scmp.ne.s32.totalorder %s13618_s7, %s11134_s4  ;;  %p11138_p1 = scmp.lt.u32.totalorder %s11134_s4, %s13618_s7 }
  0x10   :  { %p11140_p2 = pnand %p11138_p1, %p11135_p0 }
  0x12   :  { %11143 = shalt.err (!%p11140_p2)
}
  0x13   :  { %s11144_s23 = scalar_lea.vmem %s63_s27, 2048  ;;  %p11149_p4 = scmp.lt.s32.totalorder %s63_s27, %s63_s27 }
  0x14   :  { %p11145_p3 = scmp.ne.s32.totalorder %s63_s27, %s11144_s23  ;;  %p11150_p5 = scmp.lt.s32.totalorder %s11144_s23, %s11144_s23 }
  0x16   :  { %p11151_p6 = por %p11150_p5, %p11149_p4 }
  0x18   :  { %p11152_p7 = pnand %p11151_p6, %p11145_p3 }
  0x1a   :  { %11155 = shalt.err (!%p11152_p7)
}
  0x1b   :  { %s11344_s1 = smov 128   ;;  %s11345_s24 = smov 8  }
  0x1c   :  { %68 = dma.hbm_to_vmem [thread:$0]  %s13618_s7, 2048, %s63_s27, [#allocation7], %s11344_s1, %s11344_s1, %s11345_s24  }
  0x1d   :  { %s11156_s29 = scalar_lea.hbm %s13621_s10, 2048 }
  0x1e   :  { %p11157_p8 = scmp.ne.s32.totalorder %s13621_s10, %s11156_s29  ;;  %p11160_p9 = scmp.lt.u32.totalorder %s11156_s29, %s13621_s10 }
  0x20   :  { %p11162_p10 = pnand %p11160_p9, %p11157_p8 }
  0x22   :  { %11165 = shalt.err (!%p11162_p10)
}
  0x23   :  { %s11166_s20 = scalar_lea.vmem %s11476_s28, 2048  ;;  %p11171_p12 = scmp.lt.s32.totalorder %s11476_s28, %s11476_s28 }
  0x24   :  { %p11167_p11 = scmp.ne.s32.totalorder %s11476_s28, %s11166_s20  ;;  %p11172_p13 = scmp.lt.s32.totalorder %s11166_s20, %s11166_s20 }
  0x26   :  { %p11173_p0 = por %p11172_p13, %p11171_p12 }
  0x28   :  { %p11174_p1 = pnand %p11173_p0, %p11167_p11 }
  0x2a   :  { %11177 = shalt.err (!%p11174_p1)
}
  0x2b   :  { %94 = dma.hbm_to_vmem [thread:$0]  %s13621_s10, 2048, %s11476_s28, [#allocation10], %s11344_s1, %s11344_s1, %s11345_s24  }
  0x2c   :  { %s11346_s22 = smov [#allocation12]   ;;  %s11178_s26 = scalar_lea.hbm %s13623_s12, 2048 }
  0x2d   :  { %s112_s23 = sshll.u32 %s11346_s22, 4  ;;  %p11179_p2 = scmp.ne.s32.totalorder %s13623_s12, %s11178_s26  ;;  %s113_s23 = int_to_ptr.vmem [resolvable:$true] %s112_s23 }
  0x2e   :  { %p11182_p3 = scmp.lt.u32.totalorder %s11178_s26, %s13623_s12 }
  0x30   :  { %p11184_p4 = pnand %p11182_p3, %p11179_p2 }
  0x32   :  { %11187 = shalt.err (!%p11184_p4)
}
  0x33   :  { %s11188_s30 = scalar_lea.vmem %s113_s23, 2048  ;;  %p11193_p6 = scmp.lt.s32.totalorder %s113_s23, %s113_s23 }
  0x34   :  { %p11189_p5 = scmp.ne.s32.totalorder %s113_s23, %s11188_s30  ;;  %p11194_p7 = scmp.lt.s32.totalorder %s11188_s30, %s11188_s30 }
  0x36   :  { %p11195_p8 = por %p11194_p7, %p11193_p6 }
  0x38   :  { %p11196_p9 = pnand %p11195_p8, %p11189_p5 }
  0x3a   :  { %11199 = shalt.err (!%p11196_p9)
}
  0x3b   :  { %118 = dma.hbm_to_vmem [thread:$0]  %s13623_s12, 2048, %s113_s23, [#allocation13], %s11344_s1, %s11344_s1, %s11345_s24  }
  0x3c   :  { %s11347_s5 = smov [#allocation15]   ;;  %s11348_s7 = smov [#allocation4]  }
  0x3d   :  { %s138_s20 = sshll.u32 %s11347_s5, 4  ;;  %s50_s27 = sshll.u32 %s11348_s7, 4  ;;  %s139_s20 = int_to_ptr.vmem [resolvable:$true] %s138_s20  ;;  %s51_s27 = int_to_ptr.vmem [resolvable:$true] %s50_s27 }
  0x3e   :  { %s11200_s25 = scalar_lea.hbm %s13626_s15, 4096 }
  0x3f   :  { %p11201_p10 = scmp.ne.s32.totalorder %s13626_s15, %s11200_s25  ;;  %p11204_p11 = scmp.lt.u32.totalorder %s11200_s25, %s13626_s15 }
  0x41   :  { %p11206_p12 = pnand %p11204_p11, %p11201_p10 }
  0x43   :  { %11209 = shalt.err (!%p11206_p12)
}
  0x44   :  { %s11210_s12 = scalar_lea.vmem %s139_s20, 4096  ;;  %p11215_p0 = scmp.lt.s32.totalorder %s139_s20, %s139_s20 }
  0x45   :  { %p11211_p13 = scmp.ne.s32.totalorder %s139_s20, %s11210_s12  ;;  %p11216_p1 = scmp.lt.s32.totalorder %s11210_s12, %s11210_s12 }
  0x47   :  { %p11217_p2 = por %p11216_p1, %p11215_p0 }
  0x49   :  { %p11218_p3 = pnand %p11217_p2, %p11211_p13 }
  0x4b   :  { %11221 = shalt.err (!%p11218_p3)
}
  0x4c   :  { %s11349_s23 = smov 256   ;;  %s11350_s4 = smov 16  }
  0x4d   :  { %144 = dma.hbm_to_vmem [thread:$0]  %s13626_s15, 4096, %s139_s20, [#allocation16], %s11349_s23, %s11349_s23, %s11350_s4  }
  0x4e   :  { %s11222_s7 = scalar_lea.hbm %s13617_s6, 2048 }
  0x4f   :  { %p11223_p4 = scmp.ne.s32.totalorder %s13617_s6, %s11222_s7  ;;  %p11226_p5 = scmp.lt.u32.totalorder %s11222_s7, %s13617_s6 }
  0x51   :  { %p11228_p6 = pnand %p11226_p5, %p11223_p4 }
  0x53   :  { %11231 = shalt.err (!%p11228_p6)
}
  0x54   :  { %s11232_s3 = scalar_lea.vmem %s51_s27, 2048  ;;  %p11237_p8 = scmp.lt.s32.totalorder %s51_s27, %s51_s27 }
  0x55   :  { %p11233_p7 = scmp.ne.s32.totalorder %s51_s27, %s11232_s3  ;;  %p11238_p9 = scmp.lt.s32.totalorder %s11232_s3, %s11232_s3 }
  0x57   :  { %p11239_p10 = por %p11238_p9, %p11237_p8 }
  0x59   :  { %p11240_p11 = pnand %p11239_p10, %p11233_p7 }
  0x5b   :  { %11243 = shalt.err (!%p11240_p11)
}
  0x5c   :  { %56 = dma.hbm_to_vmem [thread:$0]  %s13617_s6, 2048, %s51_s27, [#allocation5], %s11344_s1, %s11344_s1, %s11345_s24  }
  0x5d   :  { %s11351_s29 = smov [#allocation8]   ;;  %s11352_s12 = smov [#allocation11]  }
  0x5e   :  { %s74_s0 = sshll.u32 %s11351_s29, 4  ;;  %s100_s30 = sshll.u32 %s11352_s12, 4  ;;  %s75_s0 = int_to_ptr.vmem [resolvable:$true] %s74_s0  ;;  %s101_s30 = int_to_ptr.vmem [resolvable:$true] %s100_s30 }
  0x5f   :  { %s11244_s5 = scalar_lea.hbm %s13619_s8, 2048 }
  0x60   :  { %p11245_p12 = scmp.ne.s32.totalorder %s13619_s8, %s11244_s5  ;;  %p11248_p13 = scmp.lt.u32.totalorder %s11244_s5, %s13619_s8 }
  0x62   :  { %p11250_p0 = pnand %p11248_p13, %p11245_p12 }
  0x64   :  { %11253 = shalt.err (!%p11250_p0)
}
  0x65   :  { %s11254_s6 = scalar_lea.vmem %s75_s0, 2048  ;;  %p11259_p2 = scmp.lt.s32.totalorder %s75_s0, %s75_s0 }
  0x66   :  { %p11255_p1 = scmp.ne.s32.totalorder %s75_s0, %s11254_s6  ;;  %p11260_p3 = scmp.lt.s32.totalorder %s11254_s6, %s11254_s6 }
  0x68   :  { %p11261_p4 = por %p11260_p3, %p11259_p2 }
  0x6a   :  { %p11262_p5 = pnand %p11261_p4, %p11255_p1 }
  0x6c   :  { %11265 = shalt.err (!%p11262_p5)
}
  0x6d   :  { %80 = dma.hbm_to_vmem [thread:$0]  %s13619_s8, 2048, %s75_s0, [#allocation7], %s11344_s1, %s11344_s1, %s11345_s24  }
  0x6e   :  { %s11266_s20 = scalar_lea.hbm %s13622_s11, 2048 }
  0x6f   :  { %p11267_p6 = scmp.ne.s32.totalorder %s13622_s11, %s11266_s20  ;;  %p11270_p7 = scmp.lt.u32.totalorder %s11266_s20, %s13622_s11 }
  0x71   :  { %p11272_p8 = pnand %p11270_p7, %p11267_p6 }
  0x73   :  { %11275 = shalt.err (!%p11272_p8)
}
  0x74   :  { %s11276_s5 = scalar_lea.vmem %s101_s30, 2048  ;;  %p11281_p10 = scmp.lt.s32.totalorder %s101_s30, %s101_s30 }
  0x75   :  { %p11277_p9 = scmp.ne.s32.totalorder %s101_s30, %s11276_s5  ;;  %p11282_p11 = scmp.lt.s32.totalorder %s11276_s5, %s11276_s5 }
  0x77   :  { %p11283_p12 = por %p11282_p11, %p11281_p10 }
  0x79   :  { %p11284_p13 = pnand %p11283_p12, %p11277_p9 }
  0x7b   :  { %11287 = shalt.err (!%p11284_p13)
}
  0x7c   :  { %106 = dma.hbm_to_vmem [thread:$0]  %s13622_s11, 2048, %s101_s30, [#allocation10], %s11344_s1, %s11344_s1, %s11345_s24  }
  0x7d   :  { %s11353_s7 = smov [#allocation14]   ;;  %s11354_s2 = smov [#allocation17]  }
  0x7e   :  { %s126_s22 = sshll.u32 %s11353_s7, 4  ;;  %s152_s25 = sshll.u32 %s11354_s2, 4  ;;  %s127_s22 = int_to_ptr.vmem [resolvable:$true] %s126_s22  ;;  %s153_s25 = int_to_ptr.vmem [resolvable:$true] %s152_s25 }
  0x7f   :  { %s11288_s26 = scalar_lea.hbm %s13625_s14, 4096 }
  0x80   :  { %p11289_p0 = scmp.ne.s32.totalorder %s13625_s14, %s11288_s26  ;;  %p11292_p1 = scmp.lt.u32.totalorder %s11288_s26, %s13625_s14 }
  0x82   :  { %p11294_p2 = pnand %p11292_p1, %p11289_p0 }
  0x84   :  { %11297 = shalt.err (!%p11294_p2)
}
  0x85   :  { %s11298_s11 = scalar_lea.vmem %s127_s22, 4096  ;;  %p11303_p4 = scmp.lt.s32.totalorder %s127_s22, %s127_s22 }
  0x86   :  { %p11299_p3 = scmp.ne.s32.totalorder %s127_s22, %s11298_s11  ;;  %p11304_p5 = scmp.lt.s32.totalorder %s11298_s11, %s11298_s11 }
  0x88   :  { %p11305_p6 = por %p11304_p5, %p11303_p4 }
  0x8a   :  { %p11306_p7 = pnand %p11305_p6, %p11299_p3 }
  0x8c   :  { %11309 = shalt.err (!%p11306_p7)
}
  0x8d   :  { %132 = dma.hbm_to_vmem [thread:$0]  %s13625_s14, 4096, %s127_s22, [#allocation13], %s11349_s23, %s11349_s23, %s11350_s4  }
  0x8e   :  { %s11310_s5 = scalar_lea.hbm %s13628_s17, 4096 }
  0x8f   :  { %p11311_p8 = scmp.ne.s32.totalorder %s13628_s17, %s11310_s5  ;;  %p11314_p9 = scmp.lt.u32.totalorder %s11310_s5, %s13628_s17 }
  0x91   :  { %p11316_p10 = pnand %p11314_p9, %p11311_p8 }
  0x93   :  { %11319 = shalt.err (!%p11316_p10)
}
  0x94   :  { %s11320_s6 = scalar_lea.vmem %s153_s25, 4096  ;;  %p11325_p12 = scmp.lt.s32.totalorder %s153_s25, %s153_s25 }
  0x95   :  { %p11321_p11 = scmp.ne.s32.totalorder %s153_s25, %s11320_s6  ;;  %p11326_p13 = scmp.lt.s32.totalorder %s11320_s6, %s11320_s6 }
  0x97   :  { %p11327_p0 = por %p11326_p13, %p11325_p12 }
  0x99   :  { %p11328_p1 = pnand %p11327_p0, %p11321_p11 }
  0x9b   :  { %11331 = shalt.err (!%p11328_p1)
}
  0x9c   :  { %158 = dma.hbm_to_vmem [thread:$0]  %s13628_s17, 4096, %s153_s25, [#allocation16], %s11344_s1, %s11344_s1, %s11345_s24  }
  0x9d   :  { %11332 = dma.done.wait [#allocation5], 2048  }
  0x9e   :  { %11333 = vsyncadd [#allocation5], 4294965248 }
  0x9f   :  { %11334 = dma.done.wait [#allocation7], 4096  }
  0xa0   :  { %11335 = vsyncadd [#allocation7], 4294963200 }
  0xa1   :  { %11336 = dma.done.wait [#allocation10], 4096  }
  0xa2   :  { %11337 = vsyncadd [#allocation10], 4294963200 }
  0xa3   :  { %11338 = dma.done.wait [#allocation13], 6144  }
  0xa4   :  { %11339 = vsyncadd [#allocation13], 4294961152 }
  0xa5   :  { %11340 = dma.done.wait [#allocation16], 8192  }
  0xa6   :  { %11341 = vsyncadd [#allocation16], 4294959104  ;;  %v13638_v1 = vmov 0   ;;  %v13644_v2 = vmov 0.0|0.0   ;;  %vm11357_vm0 = vmmov 0   ;;  %v13640_v3 = vmov 0.0  }
  0xa7   :  { %10879 = vset.pattern.permute.xlu1 %v13638_v1  ;;  %10878 = vset.pattern.permute.xlu0 %v13638_v1  ;;  %s13685_s24 = sld [smem:[#allocation50_spill]]  ;;  %s13686_s26 = sld [smem:[#allocation51_spill]]  ;;  %v546_v14 = vld [vmem:[#allocation4] sm:$0xff]  ;;  %v547_v15 = vld [vmem:[#allocation4 + $0x8] sm:$0xff]  ;;  %v548_v16 = vld [vmem:[#allocation4 + $0x10] sm:$0xff] }
  0xa8   :  { %9319 = vmatprep.subr.bf16.mxu1 %v13644_v2  ;;  %7219 = vmatprep.mubr.msk.f32.mxu1 %vm11357_vm0, %v13640_v3  ;;  %v549_v17 = vld [vmem:[#allocation4 + $0x18] sm:$0xff]  ;;  %v11645_v18 = vpack.c.bf16 %v547_v15, %v546_v14  ;;  %v550_v23 = vld [vmem:[#allocation4 + $0x20] sm:$0xff]  ;;  %v551_v24 = vld [vmem:[#allocation4 + $0x28] sm:$0xff]  ;;  %s13687_s6 = sld [smem:[#allocation54_spill]]  ;;  %s13691_s5 = sld [smem:[#allocation55_spill]] }
  0xa9   :  { %442 = vmatprep.mubr.f32.mxu0 %v13640_v3  ;;  %v11654_v22 = vpack.c.bf16 %v549_v17, %v548_v16  ;;  %v11682_v35 = vpack.c.bf16 %v551_v24, %v550_v23  ;;  %v552_v36 = vld [vmem:[#allocation4 + $0x30] sm:$0xff]  ;;  %v553_v37 = vld [vmem:[#allocation4 + $0x38] sm:$0xff]  ;;  %v554_v51 = vld [vmem:[#allocation4 + $0x40] sm:$0xff]  ;;  %s11360_s8 = smov 64   ;;  %s11361_s0 = smov 96  }
  0xaa   :  { %9321 = vmatpush3.bf16.msra.mxu1 %v11645_v18  ;;  %v11710_v50 = vpack.c.bf16 %v553_v37, %v552_v36  ;;  %v555_v53 = vld [vmem:[#allocation4 + $0x48] sm:$0xff]  ;;  %v556_v63 = vld [vmem:[#allocation4 + $0x50] sm:$0xff]  ;;  %v558_v14 = vld [vmem:[#allocation4 + $0x60] sm:$0xff]  ;;  %s11362_s7 = smov 32   ;;  %s13809_s11 = sld [smem:[#allocation53_spill]] }
  0xab   :  { %9322 = vmatprep.subr.bf16.mxu1 %v13644_v2  ;;  %v11732_v62 = vpack.c.bf16 %v555_v53, %v554_v51  ;;  %v559_v16 = vld [vmem:[#allocation4 + $0x68] sm:$0xff]  ;;  %v635_v51 = vld [vmem:[#allocation9 + $0x10] sm:$0xff] }
  0xad   :  { %v193_v4 = vld [vmem:[%s13685_s24 + $0x8] sm:$0xff]  ;;  %v192_v5 = vld [vmem:[%s13685_s24] sm:$0xff]  ;;  %v204_v10 = vld [vmem:[%s13686_s26 + $0x10] sm:$0xff] }
  0xae   :  { %v203_v6 = vld [vmem:[%s13686_s26 + $0x8] sm:$0xff]  ;;  %228 = vperm.xlu1 %10879, %v193_v4   ;;  %225 = vperm.xlu0 %10878, %v192_v5   ;;  %v202_v8 = vld [vmem:[%s13686_s26] sm:$0xff]  ;;  %v214_v11 = vadd.s32 32, %v204_v10  ;;  %v194_v12 = vld [vmem:[%s13685_s24 + $0x10] sm:$0xff] }
  0xaf   :  { %v213_v7 = vadd.s32 32, %v203_v6  ;;  %v212_v9 = vadd.s32 32, %v202_v8  ;;  %v205_v13 = vld [vmem:[%s13686_s26 + $0x18] sm:$0xff]  ;;  %v206_v21 = vld [vmem:[%s13686_s26 + $0x20] sm:$0xff]  ;;  %v335_v25 = vld [vmem:[%s13687_s6 + $0x8] sm:$0xff]  ;;  %9324 = vmatpush3.bf16.msra.mxu1 %v11654_v22 }
  0xb0   :  { %v215_v19 = vadd.s32 32, %v205_v13  ;;  %v195_v20 = vld [vmem:[%s13685_s24 + $0x18] sm:$0xff]  ;;  %v196_v27 = vld [vmem:[%s13685_s24 + $0x20] sm:$0xff]  ;;  %v207_v28 = vld [vmem:[%s13686_s26 + $0x28] sm:$0xff]  ;;  %v216_v31 = vadd.s32 32, %v206_v21  ;;  %9325 = vmatprep.subr.bf16.mxu1 %v13644_v2 }
  0xb1   :  { %v337_v26 = vld [vmem:[%s13687_s6 + $0x18] sm:$0xff]  ;;  %v334_v30 = vld [vmem:[%s13687_s6] sm:$0xff]  ;;  %v336_v32 = vld [vmem:[%s13687_s6 + $0x10] sm:$0xff]  ;;  %v217_v45 = vadd.s32 32, %v207_v28 }
  0xb2   :  { %268 = vperm.xlu1 %10879, %v213_v7   ;;  %265 = vperm.xlu0 %10878, %v212_v9   ;;  %v9287_v29 = vpack.c.bf16 %v337_v26, %v335_v25  ;;  %v339_v33 = vld [vmem:[%s13687_s6 + $0x28] sm:$0xff]  ;;  %v341_v34 = vld [vmem:[%s13687_s6 + $0x38] sm:$0xff]  ;;  %v9289_v38 = vpack.c.bf16 %v336_v32, %v334_v30  ;;  %v338_v40 = vld [vmem:[%s13687_s6 + $0x20] sm:$0xff] }
  0xb3   :  { %v9291_v39 = vpack.c.bf16 %v341_v34, %v339_v33  ;;  %v340_v41 = vld [vmem:[%s13687_s6 + $0x30] sm:$0xff]  ;;  %v343_v42 = vld [vmem:[%s13687_s6 + $0x48] sm:$0xff]  ;;  %v345_v43 = vld [vmem:[%s13687_s6 + $0x58] sm:$0xff]  ;;  %9327 = vmatpush3.bf16.msra.mxu1 %v11682_v35 }
  0xb4   :  { %9288 = vmatprep.subr.bf16.mxu0 %v9287_v29  ;;  %v9293_v44 = vpack.c.bf16 %v340_v41, %v338_v40  ;;  %v342_v46 = vld [vmem:[%s13687_s6 + $0x40] sm:$0xff]  ;;  %v344_v47 = vld [vmem:[%s13687_s6 + $0x50] sm:$0xff]  ;;  %v197_v48 = vld [vmem:[%s13685_s24 + $0x28] sm:$0xff]  ;;  %v9295_v52 = vpack.c.bf16 %v345_v43, %v343_v42  ;;  %9328 = vmatprep.subr.bf16.mxu1 %v13644_v2 }
  0xb5   :  { %9290 = vmatpush1.bf16.msra.mxu0 %v9289_v38  ;;  %v208_v49 = vld [vmem:[%s13686_s26 + $0x30] sm:$0xff]  ;;  %v347_v54 = vld [vmem:[%s13687_s6 + $0x68] sm:$0xff]  ;;  %v349_v55 = vld [vmem:[%s13687_s6 + $0x78] sm:$0xff]  ;;  %v9297_v56 = vpack.c.bf16 %v344_v47, %v342_v46 }
  0xb6   :  { %271 = vperm.xlu1 %10879, %v214_v11   ;;  %231 = vperm.xlu0 %10878, %v194_v12   ;;  %v218_v57 = vadd.s32 32, %v208_v49  ;;  %v346_v58 = vld [vmem:[%s13687_s6 + $0x60] sm:$0xff]  ;;  %v348_v59 = vld [vmem:[%s13687_s6 + $0x70] sm:$0xff]  ;;  %v209_v61 = vld [vmem:[%s13686_s26 + $0x38] sm:$0xff]  ;;  %v9299_v0 = vpack.c.bf16 %v349_v55, %v347_v54 }
  0xb7   :  { %9292 = vmatprep.subr.bf16.mxu0 %v9291_v39  ;;  %v198_v60 = vld [vmem:[%s13685_s24 + $0x30] sm:$0xff]  ;;  %9330 = vmatpush3.bf16.msra.mxu1 %v11710_v50  ;;  %v557_v4 = vld [vmem:[#allocation4 + $0x58] sm:$0xff]  ;;  %v351_v5 = vld [vmem:[%s13687_s6 + $0x88] sm:$0xff]  ;;  %v9301_v7 = vpack.c.bf16 %v348_v59, %v346_v58  ;;  %v219_v8 = vadd.s32 32, %v209_v61 }
  0xb8   :  { %9331 = vmatprep.subr.bf16.mxu1 %v13644_v2  ;;  %v353_v6 = vld [vmem:[%s13687_s6 + $0x98] sm:$0xff]  ;;  %v350_v9 = vld [vmem:[%s13687_s6 + $0x80] sm:$0xff]  ;;  %v352_v10 = vld [vmem:[%s13687_s6 + $0x90] sm:$0xff]  ;;  %v11754_v13 = vpack.c.bf16 %v557_v4, %v556_v63 }
  0xb9   :  { %9294 = vmatpush1.bf16.msra.mxu0 %v9293_v44  ;;  %v199_v11 = vld [vmem:[%s13685_s24 + $0x38] sm:$0xff]  ;;  %v210_v12 = vld [vmem:[%s13686_s26 + $0x40] sm:$0xff]  ;;  %v9303_v15 = vpack.c.bf16 %v353_v6, %v351_v5  ;;  %v355_v17 = vld [vmem:[%s13687_s6 + $0xa8] sm:$0xff] }
  0xba   :  { %274 = vperm.xlu1 %10879, %v215_v19   ;;  %234 = vperm.xlu0 %10878, %v195_v20   ;;  %v357_v19 = vld [vmem:[%s13687_s6 + $0xb8] sm:$0xff]  ;;  %v9305_v20 = vpack.c.bf16 %v352_v10, %v350_v9  ;;  %v220_v21 = vadd.s32 32, %v210_v12  ;;  %v354_v23 = vld [vmem:[%s13687_s6 + $0xa0] sm:$0xff]  ;;  %v356_v24 = vld [vmem:[%s13687_s6 + $0xb0] sm:$0xff] }
  0xbb   :  { %9296 = vmatprep.subr.bf16.mxu0 %v9295_v52  ;;  %9333 = vmatpush3.bf16.msra.mxu1 %v11732_v62  ;;  %v200_v25 = vld [vmem:[%s13685_s24 + $0x40] sm:$0xff]  ;;  %v211_v26 = vld [vmem:[%s13686_s26 + $0x48] sm:$0xff]  ;;  %v560_v28 = vld [vmem:[#allocation4 + $0x70] sm:$0xff]  ;;  %v9307_v29 = vpack.c.bf16 %v357_v19, %v355_v17  ;;  %v9309_v33 = vpack.c.bf16 %v356_v24, %v354_v23 }
  0xbc   :  { %9334 = vmatprep.subr.bf16.mxu1 %v13644_v2  ;;  %v561_v30 = vld [vmem:[#allocation4 + $0x78] sm:$0xff]  ;;  %v221_v34 = vadd.s32 32, %v211_v26  ;;  %v360_v37 = vld [vmem:[%s13687_s6 + $0xd0] sm:$0xff]  ;;  %v201_v38 = vld [vmem:[%s13685_s24 + $0x48] sm:$0xff] }
  0xbd   :  { %9298 = vmatpush1.bf16.msra.mxu0 %v9297_v56  ;;  %v361_v32 = vld [vmem:[%s13687_s6 + $0xd8] sm:$0xff]  ;;  %v358_v36 = vld [vmem:[%s13687_s6 + $0xc0] sm:$0xff]  ;;  %v11795_v39 = vpack.c.bf16 %v561_v30, %v560_v28  ;;  %v363_v41 = vld [vmem:[%s13687_s6 + $0xe8] sm:$0xff] }
  0xbe   :  { %277 = vperm.xlu1 %10879, %v216_v31   ;;  %237 = vperm.xlu0 %10878, %v196_v27   ;;  %v11776_v27 = vpack.c.bf16 %v559_v16, %v558_v14  ;;  %v359_v31 = vld [vmem:[%s13687_s6 + $0xc8] sm:$0xff]  ;;  %v365_v42 = vld [vmem:[%s13687_s6 + $0xf8] sm:$0xff]  ;;  %v362_v47 = vld [vmem:[%s13687_s6 + $0xe0] sm:$0xff]  ;;  %v222_v14 = vlaneseq }
  0xbf   :  { %9300 = vmatprep.subr.bf16.mxu0 %v9299_v0  ;;  %9336 = vmatpush3.bf16.msra.mxu1 %v11754_v13  ;;  %v9311_v40 = vpack.c.bf16 %v361_v32, %v359_v31  ;;  %v633_v43 = vld [vmem:[#allocation9] sm:$0xff]  ;;  %v634_v44 = vld [vmem:[#allocation9 + $0x8] sm:$0xff]  ;;  %v9315_v46 = vpack.c.bf16 %v365_v42, %v363_v41  ;;  %v636_v52 = vld [vmem:[#allocation9 + $0x18] sm:$0xff] }
  0xc0   :  { %9337 = vmatprep.subr.bf16.mxu1 %v13644_v2  ;;  %v11811_v49 = vpack.c.bf16 %v634_v44, %v633_v43  ;;  %v11816_v54 = vpack.c.bf16 %v636_v52, %v635_v51  ;;  %v637_v55 = vld [vmem:[#allocation9 + $0x20] sm:$0xff]  ;;  %v638_v56 = vld [vmem:[#allocation9 + $0x28] sm:$0xff]  ;;  %v639_v58 = vld [vmem:[#allocation9 + $0x30] sm:$0xff]  ;;  %v11852_v17 = vand.u32 127, %v222_v14 }
  0xc1   :  { %9302 = vmatpush1.bf16.msra.mxu0 %v9301_v7  ;;  %v640_v59 = vld [vmem:[#allocation9 + $0x38] sm:$0xff]  ;;  %v641_v61 = vld [vmem:[#allocation9 + $0x40] sm:$0xff]  ;;  %v642_v63 = vld [vmem:[#allocation9 + $0x48] sm:$0xff] }
  0xc2   :  { %280 = vperm.xlu1 %10879, %v217_v45   ;;  %240 = vperm.xlu0 %10878, %v197_v48   ;;  %v9313_v45 = vpack.c.bf16 %v360_v37, %v358_v36  ;;  %v364_v48 = vld [vmem:[%s13687_s6 + $0xf0] sm:$0xff]  ;;  %v11831_v0 = vpack.c.bf16 %v642_v63, %v641_v61  ;;  %v644_v5 = vld [vmem:[#allocation9 + $0x58] sm:$0xff]  ;;  %v645_v7 = vld [vmem:[#allocation9 + $0x60] sm:$0xff]  ;;  %s13811_s6 = sld [smem:[#allocation52_spill]] }
  0xc3   :  { %9304 = vmatprep.subr.bf16.mxu0 %v9303_v15  ;;  %9339 = vmatpush3.bf16.msra.mxu1 %v11776_v27  ;;  %v9317_v53 = vpack.c.bf16 %v364_v48, %v362_v47  ;;  %v643_v4 = vld [vmem:[#allocation9 + $0x50] sm:$0xff]  ;;  %v768_v44 = vld [vmem:[#allocation8] sm:$0xff]  ;;  %v771_v48 = vld [vmem:[#allocation8 + $0x18] sm:$0xff] }
  0xc4   :  { %9340 = vmatprep.subr.bf16.mxu1 %v13644_v2  ;;  %v11835_v6 = vpack.c.bf16 %v644_v5, %v643_v4  ;;  %v647_v10 = vld [vmem:[#allocation9 + $0x70] sm:$0xff]  ;;  %v772_v52 = vld [vmem:[#allocation8 + $0x20] sm:$0xff]  ;;  %v753_v63 = vld [vmem:[#allocation6 + $0x8] sm:$0xff] }
  0xc5   :  { %9306 = vmatpush1.bf16.msra.mxu0 %v9305_v20  ;;  %v754_v4 = vld [vmem:[#allocation6 + $0x10] sm:$0xff]  ;;  %v755_v5 = vld [vmem:[#allocation6 + $0x18] sm:$0xff] }
  0xc6   :  { %283 = vperm.xlu1 %10879, %v218_v57   ;;  %243 = vperm.xlu0 %10878, %v198_v60   ;;  %v11823_v57 = vpack.c.bf16 %v638_v56, %v637_v55  ;;  %v11827_v60 = vpack.c.bf16 %v640_v59, %v639_v58  ;;  %v774_v56 = vld [vmem:[#allocation8 + $0x30] sm:$0xff]  ;;  %v775_v58 = vld [vmem:[#allocation8 + $0x38] sm:$0xff]  ;;  %v752_v59 = vld [vmem:[#allocation6] sm:$0xff] }
  0xc7   :  { %9308 = vmatprep.subr.bf16.mxu0 %v9307_v29  ;;  %9342 = vmatpush3.bf16.msra.mxu1 %v11795_v39  ;;  %v11898_v61 = vpack.c.bf16 %v775_v58, %v774_v56  ;;  %v951_v58 = vld [vmem:[#allocation12 + $0x50] sm:$0xff] }
  0xc8   :  { %9343 = vmatprep.subr.bf16.mxu1 %v13644_v2 }
  0xc9   :  { %9310 = vmatpush1.bf16.msra.mxu0 %v9309_v33 }
  0xca   :  { %286 = vperm.xlu1 %10879, %v219_v8   ;;  %246 = vperm.xlu0 %10878, %v199_v11   ;;  %v646_v8 = vld [vmem:[#allocation9 + $0x68] sm:$0xff]  ;;  %v648_v11 = vld [vmem:[#allocation9 + $0x78] sm:$0xff] }
  0xcb   :  { %9312 = vmatprep.subr.bf16.mxu0 %v9311_v40  ;;  %7220 = vmatmul.mubr.f32.vlgmr.msra.gmra.mrb[0].mxu1 %v13640_v3  ;;  %v11839_v9 = vpack.c.bf16 %v646_v8, %v645_v7  ;;  %v11843_v12 = vpack.c.bf16 %v648_v11, %v647_v10  ;;  %v776_v7 = vld [vmem:[#allocation8 + $0x40] sm:$0xff]  ;;  %v777_v8 = vld [vmem:[#allocation8 + $0x48] sm:$0xff]  ;;  %v11901_v10 = vpack.c.bf16 %v753_v63, %v752_v59  ;;  %v952_v59 = vld [vmem:[#allocation12 + $0x58] sm:$0xff] }
  0xcc   :  { %9345 = vmatpush3.bf16.msra.mxu1 %v11811_v49  ;;  %7254 = vmatprep.mubr.msk.f32.mxu1 %vm11357_vm0, %v13640_v3  ;;  %v11904_v11 = vpack.c.bf16 %v755_v5, %v754_v4  ;;  %v11955_v63 = vpack.c.bf16 %v952_v59, %v951_v58  ;;  %v953_v4 = vld [vmem:[#allocation12 + $0x60] sm:$0xff]  ;;  %v954_v5 = vld [vmem:[#allocation12 + $0x68] sm:$0xff] }
  0xcd   :  { %9314 = vmatpush1.bf16.msra.mxu0 %v9313_v45  ;;  %9346 = vmatprep.subr.bf16.mxu1 %v13644_v2  ;;  %v769_v45 = vld [vmem:[#allocation8 + $0x8] sm:$0xff] }
  0xce   :  { %289 = vperm.xlu1 %10879, %v220_v21   ;;  %249 = vperm.xlu0 %10878, %v200_v25   ;;  %v11359_v21 = vmov 1.0   ;;  %v11887_v47 = vpack.c.bf16 %v769_v45, %v768_v44  ;;  %13688 = vst [vmem:[#allocation23_spill] sm:$0xff] %v11904_v11  ;;  %v947_v45 = vld [vmem:[#allocation12 + $0x30] sm:$0xff] }
  0xcf   :  { %9316 = vmatprep.subr.bf16.mxu0 %v9315_v46  ;;  %v770_v46 = vld [vmem:[#allocation8 + $0x10] sm:$0xff] }
  0xd0   :  { %9348 = vmatpush3.bf16.msra.mxu1 %v11816_v54  ;;  %v11890_v51 = vpack.c.bf16 %v771_v48, %v770_v46  ;;  %v948_v46 = vld [vmem:[#allocation12 + $0x38] sm:$0xff] }
  0xd1   :  { %9318 = vmatpush1.bf16.msra.mxu0 %v9317_v53  ;;  %9349 = vmatprep.subr.bf16.mxu1 %v13644_v2  ;;  %v773_v53 = vld [vmem:[#allocation8 + $0x28] sm:$0xff]  ;;  %v11947_v48 = vpack.c.bf16 %v948_v46, %v947_v45 }
  0xd2   :  { %292 = vperm.xlu1 %10879, %v221_v34   ;;  %252 = vperm.xlu0 %10878, %v201_v38   ;;  %v11894_v55 = vpack.c.bf16 %v773_v53, %v772_v52  ;;  %v949_v52 = vld [vmem:[#allocation12 + $0x40] sm:$0xff]  ;;  %v950_v53 = vld [vmem:[#allocation12 + $0x48] sm:$0xff] }
  0xd3   :  { %9367 = vmatprep.subr.bf16.mxu0 %v13644_v2  ;;  %v11951_v56 = vpack.c.bf16 %v950_v53, %v949_v52 }
  0xd4   :  { %9351 = vmatpush3.bf16.msra.mxu1 %v11823_v57 }
  0xd5   :  { %9352 = vmatprep.subr.bf16.mxu1 %v13644_v2 }
  0xd8   :  { %9354 = vmatpush3.bf16.msra.mxu1 %v11827_v60 }
  0xd9   :  { %9355 = vmatprep.subr.bf16.mxu1 %v13644_v2 }
  0xdc   :  { %9357 = vmatpush3.bf16.msra.mxu1 %v11831_v0 }
  0xdd   :  { %9358 = vmatprep.subr.bf16.mxu1 %v13644_v2 }
  0xe0   :  { %9360 = vmatpush3.bf16.msra.mxu1 %v11835_v6 }
  0xe1   :  { %9361 = vmatprep.subr.bf16.mxu1 %v13644_v2 }
  0xe4   :  { %9363 = vmatpush3.bf16.msra.mxu1 %v11839_v9 }
  0xe5   :  { %9364 = vmatprep.subr.bf16.mxu1 %v13644_v2 }
  0xe8   :  { %9366 = vmatpush3.bf16.msra.mxu1 %v11843_v12 }
  0xe9   :  { %9391 = vmatprep.subr.bf16.mxu1 %v13644_v2 }
  0xeb   :  { %7255 = vmatmul.mubr.f32.vlgmr.msra.gmra.mrb[2].mxu1 %v13640_v3 }
  0xec   :  { %7324 = vmatprep.mubr.msk.f32.mxu1 %vm11357_vm0, %v13640_v3  ;;  %9393 = vmatpush3.bf16.msra.mxu1 %v11901_v10 }
  0xed   :  { %9394 = vmatprep.subr.bf16.mxu1 %v13644_v2 }
  0xf0   :  { %9396 = vmatpush3.bf16.msra.mxu1 %v11904_v11 }
  0xf1   :  { %9397 = vmatprep.subr.bf16.mxu1 %v13644_v2 }
 0x12d   :  { %v229_v15 = vpop.permute.xlu1 %228  ;;  %v226_v16 = vpop.permute.xlu0 %225 }
 0x12e   :  { %vm255_vm2 = vcmp.eq.s32.totalorder %v11852_v17, %v229_v15  ;;  %vm254_vm3 = vcmp.eq.s32.totalorder %v11852_v17, %v226_v16  ;;  %v11907_v15 = vpack.c.bf16 %v777_v8, %v776_v7  ;;  %v756_v16 = vld [vmem:[#allocation6 + $0x20] sm:$0xff]  ;;  %v11959_v7 = vpack.c.bf16 %v954_v5, %v953_v4  ;;  %v955_v8 = vld [vmem:[#allocation12 + $0x70] sm:$0xff] }
 0x131   :  { %v269_v19 = vpop.permute.xlu1 %268  ;;  %v266_v20 = vpop.permute.xlu0 %265 }
 0x132   :  { %vm294_vm1 = vcmp.eq.s32.totalorder %v11852_v17, %v266_v20  ;;  %vm295_vm4 = vcmp.eq.s32.totalorder %v11852_v17, %v269_v19  ;;  %v778_v19 = vld [vmem:[#allocation8 + $0x50] sm:$0xff]  ;;  %v779_v20 = vld [vmem:[#allocation8 + $0x58] sm:$0xff] }
 0x133   :  { %vm304_vm5 = vmor %vm254_vm3, %vm294_vm1 }
 0x134   :  { %6115 = vmatmul.mubr.msk.f32.vlgmr.msra.gmra.mrb[0].mxu0 %vm304_vm5, %v11359_v21  ;;  %vm305_vm6 = vmor %vm255_vm2, %vm295_vm4 }
 0x135   :  { %v272_v23 = vpop.permute.xlu1 %271  ;;  %v232_v24 = vpop.permute.xlu0 %231  ;;  %448 = vmatprep.mubr.f32.mxu0 %v13640_v3  ;;  %9369 = vmatpush3.bf16.msra.mxu0 %v11887_v47 }
 0x136   :  { %vm296_vm7 = vcmp.eq.s32.totalorder %v11852_v17, %v272_v23  ;;  %vm256_vm8 = vcmp.eq.s32.totalorder %v11852_v17, %v232_v24  ;;  %9370 = vmatprep.subr.bf16.mxu0 %v13644_v2  ;;  %v11915_v23 = vpack.c.bf16 %v779_v20, %v778_v19  ;;  %v780_v24 = vld [vmem:[#allocation8 + $0x60] sm:$0xff]  ;;  %v11978_v19 = vshrl.u32 %v222_v14, 7 }
 0x137   :  { %vm306_vm9 = vmor %vm256_vm8, %vm296_vm7 }
 0x138   :  { %6116 = vmatmul.mubr.msk.f32.gmra.mrb[2].mxu0 %vm305_vm6, %v11359_v21  ;;  %13690 = vst [vmem:[#allocation25_spill] sm:$0xff] %v11978_v19  ;;  %v13637_v20 = vsub.s32 0, %v11978_v19 }
 0x139   :  { %v275_v25 = vpop.permute.xlu1 %274  ;;  %v235_v26 = vpop.permute.xlu0 %234  ;;  %454 = vmatprep.mubr.f32.mxu0 %v13640_v3  ;;  %9372 = vmatpush3.bf16.msra.mxu0 %v11890_v51 }
 0x13a   :  { %vm297_vm10 = vcmp.eq.s32.totalorder %v11852_v17, %v275_v25  ;;  %vm257_vm11 = vcmp.eq.s32.totalorder %v11852_v17, %v235_v26  ;;  %9373 = vmatprep.subr.bf16.mxu0 %v13644_v2  ;;  %v781_v25 = vld [vmem:[#allocation8 + $0x68] sm:$0xff] }
 0x13b   :  { %vm307_vm12 = vmor %vm257_vm11, %vm297_vm10  ;;  %v11921_v26 = vpack.c.bf16 %v781_v25, %v780_v24  ;;  %v366_v24 = vld [vmem:[%s13691_s5] sm:$0x3]  ;;  %v13636_v25 = vsub.s32 1, %v11978_v19 }
 0x13c   :  { %6117 = vmatmul.mubr.msk.f32.gmra.mrb[4].mxu0 %vm306_vm9, %v11359_v21  ;;  %v11991_v14 = vrot.slane %v366_v24, %v13637_v20  ;;  %v767_v20 = vld [vmem:[#allocation6 + $0x78] sm:$0xff] }
 0x13d   :  { %v278_v28 = vpop.permute.xlu1 %277  ;;  %v238_v29 = vpop.permute.xlu0 %237  ;;  %460 = vmatprep.mubr.f32.mxu0 %v13640_v3  ;;  %9375 = vmatpush3.bf16.msra.mxu0 %v11894_v55 }
 0x13e   :  { %vm298_vm13 = vcmp.eq.s32.totalorder %v11852_v17, %v278_v28  ;;  %vm258_vm14 = vcmp.eq.s32.totalorder %v11852_v17, %v238_v29  ;;  %9376 = vmatprep.subr.bf16.mxu0 %v13644_v2  ;;  %v782_v28 = vld [vmem:[#allocation8 + $0x70] sm:$0xff]  ;;  %v783_v29 = vld [vmem:[#allocation8 + $0x78] sm:$0xff] }
 0x13f   :  { %vm308_vm15 = vmor %vm258_vm14, %vm298_vm13 }
 0x140   :  { %6118 = vmatmul.mubr.msk.f32.gmra.mrb[6].mxu0 %vm307_vm12, %v11359_v21 }
 0x141   :  { %v281_v30 = vpop.permute.xlu1 %280  ;;  %v241_v31 = vpop.permute.xlu0 %240  ;;  %466 = vmatprep.mubr.f32.mxu0 %v13640_v3  ;;  %9378 = vmatpush3.bf16.msra.mxu0 %v11898_v61 }
 0x142   :  { %vm299_vm1 = vcmp.eq.s32.totalorder %v11852_v17, %v281_v30  ;;  %vm259_vm2 = vcmp.eq.s32.totalorder %v11852_v17, %v241_v31  ;;  %9379 = vmatprep.subr.bf16.mxu0 %v13644_v2  ;;  %v11928_v31 = vpack.c.bf16 %v783_v29, %v782_v28  ;;  %v11996_v28 = vrot.slane %v366_v24, %v13636_v25 }
 0x143   :  { %vm309_vm3 = vmor %vm259_vm2, %vm299_vm1 }
 0x144   :  { %6119 = vmatmul.mubr.msk.f32.gmra.mrb[8].mxu0 %vm308_vm15, %v11359_v21 }
 0x145   :  { %v284_v32 = vpop.permute.xlu1 %283  ;;  %v244_v33 = vpop.permute.xlu0 %243  ;;  %472 = vmatprep.mubr.f32.mxu0 %v13640_v3  ;;  %9381 = vmatpush3.bf16.msra.mxu0 %v11907_v15 }
 0x146   :  { %vm300_vm4 = vcmp.eq.s32.totalorder %v11852_v17, %v284_v32  ;;  %vm260_vm5 = vcmp.eq.s32.totalorder %v11852_v17, %v244_v33  ;;  %9382 = vmatprep.subr.bf16.mxu0 %v13644_v2  ;;  %v941_v33 = vld [vmem:[#allocation12] sm:$0xff] }
 0x147   :  { %vm310_vm6 = vmor %vm260_vm5, %vm300_vm4 }
 0x148   :  { %6120 = vmatmul.mubr.msk.f32.gmra.mrb[10].mxu0 %vm309_vm3, %v11359_v21 }
 0x149   :  { %v287_v34 = vpop.permute.xlu1 %286  ;;  %v247_v36 = vpop.permute.xlu0 %246  ;;  %478 = vmatprep.mubr.f32.mxu0 %v13640_v3  ;;  %9384 = vmatpush3.bf16.msra.mxu0 %v11915_v23 }
 0x14a   :  { %vm301_vm7 = vcmp.eq.s32.totalorder %v11852_v17, %v287_v34  ;;  %vm261_vm8 = vcmp.eq.s32.totalorder %v11852_v17, %v247_v36  ;;  %9385 = vmatprep.subr.bf16.mxu0 %v13644_v2  ;;  %v942_v34 = vld [vmem:[#allocation12 + $0x8] sm:$0xff] }
 0x14b   :  { %vm311_vm9 = vmor %vm261_vm8, %vm301_vm7  ;;  %v11932_v36 = vpack.c.bf16 %v942_v34, %v941_v33 }
 0x14c   :  { %6121 = vmatmul.mubr.msk.f32.gmra.mrb[12].mxu0 %vm310_vm6, %v11359_v21 }
 0x14d   :  { %v290_v37 = vpop.permute.xlu1 %289  ;;  %v250_v38 = vpop.permute.xlu0 %249  ;;  %484 = vmatprep.mubr.f32.mxu0 %v13640_v3  ;;  %9387 = vmatpush3.bf16.msra.mxu0 %v11921_v26 }
 0x14e   :  { %vm302_vm10 = vcmp.eq.s32.totalorder %v11852_v17, %v290_v37  ;;  %vm262_vm11 = vcmp.eq.s32.totalorder %v11852_v17, %v250_v38  ;;  %9388 = vmatprep.subr.bf16.mxu0 %v13644_v2  ;;  %v943_v37 = vld [vmem:[#allocation12 + $0x10] sm:$0xff]  ;;  %v944_v38 = vld [vmem:[#allocation12 + $0x18] sm:$0xff] }
 0x14f   :  { %vm312_vm12 = vmor %vm262_vm11, %vm302_vm10 }
 0x150   :  { %6122 = vmatmul.mubr.msk.f32.gmra.mrb[14].mxu0 %vm311_vm9, %v11359_v21 }
 0x151   :  { %v293_v40 = vpop.permute.xlu1 %292  ;;  %v253_v41 = vpop.permute.xlu0 %252  ;;  %490 = vmatprep.mubr.f32.mxu0 %v13640_v3  ;;  %9390 = vmatpush3.bf16.msra.mxu0 %v11928_v31 }
 0x152   :  { %vm303_vm13 = vcmp.eq.s32.totalorder %v11852_v17, %v293_v40  ;;  %vm263_vm14 = vcmp.eq.s32.totalorder %v11852_v17, %v253_v41  ;;  %v757_v17 = vld [vmem:[#allocation6 + $0x28] sm:$0xff]  ;;  %9415 = vmatprep.subr.bf16.mxu0 %v13644_v2  ;;  %v11937_v40 = vpack.c.bf16 %v944_v38, %v943_v37  ;;  %v945_v41 = vld [vmem:[#allocation12 + $0x20] sm:$0xff]  ;;  %v758_v38 = vld [vmem:[#allocation6 + $0x30] sm:$0xff] }
 0x153   :  { %vm313_vm15 = vmor %vm263_vm14, %vm303_vm13 }
 0x154   :  { %6123 = vmatmul.mubr.msk.f32.gmra.mrb[16].mxu0 %vm312_vm12, %v11359_v21 }
 0x155   :  { %496 = vmatprep.mubr.f32.mxu0 %v13640_v3 }
 0x158   :  { %6124 = vmatmul.mubr.msk.f32.gmra.mrb[18].mxu0 %vm313_vm15, %v11359_v21  ;;  %v11912_v21 = vpack.c.bf16 %v757_v17, %v756_v16  ;;  %v956_v16 = vld [vmem:[#allocation12 + $0x78] sm:$0xff] }
 0x159   :  { %7289 = vmatprep.mubr.msk.f32.mxu0 %vm11357_vm0, %v13640_v3  ;;  %v11963_v17 = vpack.c.bf16 %v956_v16, %v955_v8 }
 0x15a   :  { %13689 = vst [vmem:[#allocation24_spill] sm:$0xff] %v11912_v21  ;;  %9399 = vmatpush3.bf16.msra.mxu1 %v11912_v21 }
 0x15b   :  { %9400 = vmatprep.subr.bf16.mxu1 %v13644_v2 }
 0x15c   :  { %7290 = vmatmul.mubr.f32.vlgmr.msra.gmra.mrb[20].mxu0 %v13640_v3 }
 0x15d   :  { %9417 = vmatpush3.bf16.msra.mxu0 %v11932_v36  ;;  %7359 = vmatprep.mubr.msk.f32.mxu0 %vm11357_vm0, %v13640_v3 }
 0x15e   :  { %9418 = vmatprep.subr.bf16.mxu0 %v13644_v2 }
 0x161   :  { %9420 = vmatpush3.bf16.msra.mxu0 %v11937_v40 }
 0x162   :  { %9421 = vmatprep.subr.bf16.mxu0 %v13644_v2 }
 0x19e   :  { %v11885_v42 = vpop.f32.mrb[0].mxu1 }
 0x19f   :  { %v7221_v43 = vpop.f32.mrb[1].mxu1 }
 0x1a0   :  { %v946_v43 = vld [vmem:[#allocation12 + $0x28] sm:$0xff] }
 0x1a1   :  { %v11943_v44 = vpack.c.bf16 %v946_v43, %v945_v41  ;;  %v759_v41 = vld [vmem:[#allocation6 + $0x38] sm:$0xff] }
 0x1a2   :  { %v12005_v46 = vpack.c.bf16 %v759_v41, %v758_v38 }
 0x1a3   :  { %9423 = vmatpush3.bf16.msra.mxu0 %v11943_v44 }
 0x1a4   :  { %9424 = vmatprep.subr.bf16.mxu0 %v13644_v2  ;;  %13692 = vst [vmem:[#allocation26_spill] sm:$0xff] %v12005_v46  ;;  %9402 = vmatpush3.bf16.msra.mxu1 %v12005_v46 }
 0x1a5   :  { %9403 = vmatprep.subr.bf16.mxu1 %v13644_v2 }
 0x1a7   :  { %9426 = vmatpush3.bf16.msra.mxu0 %v11947_v48 }
 0x1a8   :  { %9427 = vmatprep.subr.bf16.mxu0 %v13644_v2 }
 0x1ab   :  { %9429 = vmatpush3.bf16.msra.mxu0 %v11951_v56 }
 0x1ac   :  { %9430 = vmatprep.subr.bf16.mxu0 %v13644_v2 }
 0x1af   :  { %9432 = vmatpush3.bf16.msra.mxu0 %v11955_v63 }
 0x1b0   :  { %9433 = vmatprep.subr.bf16.mxu0 %v13644_v2 }
 0x1b3   :  { %9435 = vmatpush3.bf16.msra.mxu0 %v11959_v7 }
 0x1b4   :  { %9436 = vmatprep.subr.bf16.mxu0 %v13644_v2 }
 0x1b7   :  { %9438 = vmatpush3.bf16.msra.mxu0 %v11963_v17 }
 0x1b8   :  { %9463 = vmatprep.subr.bf16.mxu0 %v13644_v2 }
 0x1ba   :  { %7360 = vmatmul.mubr.f32.vlgmr.msra.gmra.mrb[22].mxu0 %v13640_v3 }
 0x1bb   :  { %9465 = vmatpush3.bf16.msra.mxu0 %v11645_v18  ;;  %7429 = vmatprep.mubr.msk.f32.mxu0 %vm11357_vm0, %v13640_v3 }
 0x1bc   :  { %9466 = vmatprep.subr.bf16.mxu0 %v13644_v2 }
 0x1be   :  { %v11925_v30 = vpop.f32.mrb[2].mxu1 }
 0x1bf   :  { %v7256_v32 = vpop.f32.mrb[3].mxu1  ;;  %9468 = vmatpush3.bf16.msra.mxu0 %v11654_v22 }
 0x1c0   :  { %9469 = vmatprep.subr.bf16.mxu0 %v13644_v2 }
 0x1c3   :  { %9471 = vmatpush3.bf16.msra.mxu0 %v11682_v35 }
 0x1c4   :  { %9472 = vmatprep.subr.bf16.mxu0 %v13644_v2 }
 0x1c7   :  { %9474 = vmatpush3.bf16.msra.mxu0 %v11710_v50 }
 0x1c8   :  { %9475 = vmatprep.subr.bf16.mxu0 %v13644_v2 }
 0x1cb   :  { %9477 = vmatpush3.bf16.msra.mxu0 %v11732_v62 }
 0x1cc   :  { %9478 = vmatprep.subr.bf16.mxu0 %v13644_v2 }
 0x1cf   :  { %9480 = vmatpush3.bf16.msra.mxu0 %v11754_v13 }
 0x1d0   :  { %9481 = vmatprep.subr.bf16.mxu0 %v13644_v2 }
 0x1d3   :  { %9483 = vmatpush3.bf16.msra.mxu0 %v11776_v27 }
 0x1d4   :  { %9484 = vmatprep.subr.bf16.mxu0 %v13644_v2 }
 0x1d7   :  { %9486 = vmatpush3.bf16.msra.mxu0 %v11795_v39 }
 0x1d8   :  { %9511 = vmatprep.subr.bf16.mxu0 %v13644_v2 }
 0x207   :  { %v444_v29 = vpop.f32.mrb[0].mxu0 }
 0x208   :  { %v445_v32 = vadd.f32 %v444_v29, %v11991_v14  ;;  %v446_v33 = vpop.f32.mrb[1].mxu0 }
 0x209   :  { %v447_v34 = vadd.f32 %v446_v33, %v11996_v28  ;;  %v763_v33 = vld [vmem:[#allocation6 + $0x58] sm:$0xff] }
 0x20a   :  { %v632_v37 = vadd.f32 %v11885_v42, %v445_v32  ;;  %v760_v42 = vld [vmem:[#allocation6 + $0x40] sm:$0xff]  ;;  %v762_v32 = vld [vmem:[#allocation6 + $0x50] sm:$0xff] }
 0x20b   :  { %v719_v43 = vadd.f32 %v11925_v30, %v447_v34  ;;  %v450_v45 = vpop.f32.mrb[2].mxu0  ;;  %v761_v30 = vld [vmem:[#allocation6 + $0x48] sm:$0xff] }
 0x20c   :  { %v720_v52 = vmul.f32 0.5, %v632_v37  ;;  %10880 = vtanh.f32 %v632_v37  ;;  %v12008_v53 = vadd.f32 %v450_v45, %v11991_v14  ;;  %v452_v58 = vpop.f32.mrb[3].mxu0  ;;  %v12017_v8 = vpack.c.bf16 %v761_v30, %v760_v42 }
 0x20d   :  { %v736_v59 = vmul.f32 0.5, %v719_v43  ;;  %v12012_v4 = vadd.f32 %v452_v58, %v11996_v28  ;;  %v12027_v37 = vpack.c.bf16 %v763_v33, %v762_v32  ;;  %v764_v58 = vld [vmem:[#allocation6 + $0x60] sm:$0xff] }
 0x20e   :  { %10882 = vtanh.f32 %v720_v52  ;;  %13693 = vst [vmem:[#allocation27_spill] sm:$0xff] %v12017_v8  ;;  %9405 = vmatpush3.bf16.msra.mxu1 %v12017_v8 }
 0x20f   :  { %10884 = vtanh.f32 %v736_v59  ;;  %v456_v5 = vpop.f32.mrb[4].mxu0  ;;  %9406 = vmatprep.subr.bf16.mxu1 %v13644_v2  ;;  %13696 = vst [vmem:[#allocation30_spill] sm:$0xff] %v12027_v37  ;;  %v765_v59 = vld [vmem:[#allocation6 + $0x68] sm:$0xff] }
 0x210   :  { %v12020_v16 = vadd.f32 %v456_v5, %v11991_v14  ;;  %v458_v24 = vpop.f32.mrb[5].mxu0  ;;  %v12038_v30 = vpack.c.bf16 %v765_v59, %v764_v58  ;;  %10886 = vtanh.f32 %v719_v43 }
 0x211   :  { %v12023_v29 = vadd.f32 %v458_v24, %v11996_v28 }
 0x212   :  { %13694 = vst [vmem:[#allocation28_spill] sm:$0xff] %v12020_v16  ;;  %9408 = vmatpush3.bf16.msra.mxu1 %v12027_v37  ;;  %13699 = vst [vmem:[#allocation33_spill] sm:$0xff] %v12038_v30 }
 0x213   :  { %13695 = vst [vmem:[#allocation29_spill] sm:$0xff] %v12023_v29  ;;  %v462_v34 = vpop.f32.mrb[6].mxu0  ;;  %9409 = vmatprep.subr.bf16.mxu1 %v13644_v2 }
 0x214   :  { %v12030_v38 = vadd.f32 %v462_v34, %v11991_v14  ;;  %v464_v41 = vpop.f32.mrb[7].mxu0 }
 0x215   :  { %v12033_v45 = vadd.f32 %v464_v41, %v11996_v28 }
 0x216   :  { %13697 = vst [vmem:[#allocation31_spill] sm:$0xff] %v12030_v38  ;;  %v10881_v52 = vpop.eup %10880  ;;  %9411 = vmatpush3.bf16.msra.mxu1 %v12038_v30 }
 0x217   :  { %13698 = vst [vmem:[#allocation32_spill] sm:$0xff] %v12033_v45  ;;  %727 = vrot.lane.b32.xlu1 %v10881_v52, %s11360_s8  ;;  %v468_v42 = vpop.f32.mrb[8].mxu0  ;;  %9412 = vmatprep.subr.bf16.mxu1 %v13644_v2  ;;  %v766_v52 = vld [vmem:[#allocation6 + $0x70] sm:$0xff] }
 0x218   :  { %v10883_v5 = vpop.eup %10882  ;;  %v12041_v24 = vadd.f32 %v468_v42, %v11991_v14  ;;  %v470_v32 = vpop.f32.mrb[9].mxu0  ;;  %v12048_v1 = vpack.c.bf16 %v767_v20, %v766_v52 }
 0x219   :  { %v10885_v33 = vpop.eup %10884  ;;  %v12044_v34 = vadd.f32 %v470_v32, %v11996_v28  ;;  %v722_v41 = vmul.f32 0.5, %v10883_v5 }
 0x21a   :  { %13700 = vst [vmem:[#allocation34_spill] sm:$0xff] %v12041_v24  ;;  %v738_v25 = vmul.f32 0.5, %v10885_v33  ;;  %13702 = vst [vmem:[#allocation36_spill] sm:$0xff] %v12048_v1  ;;  %9414 = vmatpush3.bf16.msra.mxu1 %v12048_v1  ;;  %v10887_v33 = vpop.eup %10886 }
 0x21b   :  { %13701 = vst [vmem:[#allocation35_spill] sm:$0xff] %v12044_v34  ;;  %v474_v58 = vpop.f32.mrb[10].mxu0  ;;  %v723_v59 = vadd.f32 0.5, %v722_v41  ;;  %9439 = vmatprep.subr.bf16.mxu1 %v13644_v2 }
 0x21c   :  { %v12051_v42 = vadd.f32 %v474_v58, %v11991_v14  ;;  %v476_v3 = vpop.f32.mrb[11].mxu0  ;;  %v12053_v19 = vadd.f32 0.5, %v738_v25 }
 0x21d   :  { %v12056_v5 = vadd.f32 %v476_v3, %v11996_v28  ;;  %725 = vrot.lane.b32.xlu0 %v723_v59, %s11361_s0 }
 0x21e   :  { %13703 = vst [vmem:[#allocation37_spill] sm:$0xff] %v12051_v42  ;;  %741 = vrot.lane.b32.xlu1 %v12053_v19, %s11361_s0 }
 0x21f   :  { %13704 = vst [vmem:[#allocation38_spill] sm:$0xff] %v12056_v5  ;;  %v480_v20 = vpop.f32.mrb[12].mxu0 }
 0x220   :  { %v12064_v43 = vadd.f32 %v480_v20, %v11991_v14  ;;  %v482_v32 = vpop.f32.mrb[13].mxu0 }
 0x221   :  { %v12067_v25 = vadd.f32 %v482_v32, %v11996_v28  ;;  %729 = vrot.lane.b32.xlu0 %v723_v59, %s11362_s7 }
 0x222   :  { %13705 = vst [vmem:[#allocation39_spill] sm:$0xff] %v12064_v43  ;;  %745 = vrot.lane.b32.xlu1 %v12053_v19, %s11362_s7 }
 0x223   :  { %13706 = vst [vmem:[#allocation40_spill] sm:$0xff] %v12067_v25  ;;  %v486_v3 = vpop.f32.mrb[14].mxu0 }
 0x224   :  { %v12073_v41 = vadd.f32 %v486_v3, %v11991_v14  ;;  %v488_v52 = vpop.f32.mrb[15].mxu0 }
 0x225   :  { %v12076_v58 = vadd.f32 %v488_v52, %v11996_v28  ;;  %743 = vrot.lane.b32.xlu0 %v10887_v33, %s11360_s8 }
 0x226   :  { %13707 = vst [vmem:[#allocation41_spill] sm:$0xff] %v12073_v41 }
 0x227   :  { %13708 = vst [vmem:[#allocation42_spill] sm:$0xff] %v12076_v58  ;;  %v492_v20 = vpop.f32.mrb[16].mxu0 }
 0x228   :  { %v12080_v32 = vadd.f32 %v492_v20, %v11991_v14  ;;  %v494_v2 = vpop.f32.mrb[17].mxu0  ;;  %v925_v20 = vld [vmem:[#allocation11] sm:$0xff] }
 0x229   :  { %v12083_v25 = vadd.f32 %v494_v2, %v11996_v28 }
 0x22a   :  { %13709 = vst [vmem:[#allocation43_spill] sm:$0xff] %v12080_v32  ;;  %v926_v32 = vld [vmem:[#allocation11 + $0x8] sm:$0xff] }
 0x22b   :  { %13710 = vst [vmem:[#allocation44_spill] sm:$0xff] %v12083_v25  ;;  %v498_v43 = vpop.f32.mrb[18].mxu0  ;;  %v12094_v24 = vpack.c.bf16 %v926_v32, %v925_v20  ;;  %v932_v20 = vld [vmem:[#allocation11 + $0x38] sm:$0xff] }
 0x22c   :  { %v12086_v5 = vadd.f32 %v498_v43, %v11991_v14  ;;  %v500_v3 = vpop.f32.mrb[19].mxu0  ;;  %v927_v43 = vld [vmem:[#allocation11 + $0x10] sm:$0xff] }
 0x22d   :  { %v12089_v41 = vadd.f32 %v500_v3, %v11996_v28  ;;  %v929_v3 = vld [vmem:[#allocation11 + $0x20] sm:$0xff] }
 0x22e   :  { %13711 = vst [vmem:[#allocation45_spill] sm:$0xff] %v12086_v5  ;;  %v928_v5 = vld [vmem:[#allocation11 + $0x18] sm:$0xff] }
 0x22f   :  { %13712 = vst [vmem:[#allocation46_spill] sm:$0xff] %v12089_v41  ;;  %v12097_v28 = vpack.c.bf16 %v928_v5, %v927_v43 }
 0x289   :  { %v728_v52 = vpop.permute.xlu1 %727 }
 0x28a   :  { %v732_v42 = vmul.f32 %v728_v52, %v723_v59  ;;  %v13713_v59 = vmov 0.0   ;;  %v930_v52 = vld [vmem:[#allocation11 + $0x28] sm:$0xff] }
 0x28b   :  { %v12109_v5 = vpack.c.bf16 %v930_v52, %v929_v3  ;;  %v933_v3 = vld [vmem:[#allocation11 + $0x40] sm:$0xff]  ;;  %v934_v52 = vld [vmem:[#allocation11 + $0x48] sm:$0xff] }
 0x28c   :  { %v12124_v45 = vpack.c.bf16 %v934_v52, %v933_v3  ;;  %v939_v3 = vld [vmem:[#allocation11 + $0x70] sm:$0xff]  ;;  %v940_v52 = vld [vmem:[#allocation11 + $0x78] sm:$0xff] }
 0x28f   :  { %v726_v58 = vpop.permute.xlu0 %725 }
 0x290   :  { %v731_v33 = vmul.f32 0.0, %v726_v58  ;;  %v13714_v58 = vmov 0.0|0.0  }
 0x292   :  { %v12091_v34 = vadd.f32 %v732_v42, %v731_v33  ;;  %v12101_v42 = vpop.f32.mrb[20].mxu0  ;;  %v931_v33 = vld [vmem:[#allocation11 + $0x30] sm:$0xff] }
 0x293   :  { %v730_v25 = vpop.permute.xlu0 %729  ;;  %v7291_v32 = vpop.f32.mrb[21].mxu0  ;;  %v12116_v43 = vpack.c.bf16 %v932_v20, %v931_v33  ;;  %v937_v20 = vld [vmem:[#allocation11 + $0x60] sm:$0xff] }
 0x294   :  { %10888 = vtanh.f32 %v12091_v34 }
 0x29e   :  { %v10889_v2 = vpop.eup %10888 }
 0x29f   :  { %v735_v14 = vmul.f32 %v10889_v2, %v730_v25  ;;  %v744_v25 = vpop.permute.xlu0 %743  ;;  %v742_v2 = vpop.permute.xlu1 %741 }
 0x2a0   :  { %v747_v32 = vmul.f32 0.0, %v742_v2  ;;  %v938_v2 = vld [vmem:[#allocation11 + $0x68] sm:$0xff] }
 0x2a1   :  { %7325 = vmatmul.mubr.f32.vlgmr.msra.gmra.mrb[4].mxu1 %v735_v14  ;;  %7430 = vmatmul.mubr.f32.vlgmr.msra.gmra.mrb[24].mxu0 %v735_v14  ;;  %v748_v14 = vmul.f32 %v744_v25, %v12053_v19  ;;  %v935_v19 = vld [vmem:[#allocation11 + $0x50] sm:$0xff]  ;;  %v936_v25 = vld [vmem:[#allocation11 + $0x58] sm:$0xff] }
 0x2a2   :  { %9441 = vmatpush3.bf16.msra.mxu1 %v12094_v24  ;;  %7394 = vmatprep.mubr.msk.f32.mxu1 %vm11357_vm0, %v13713_v59  ;;  %v12131_v33 = vpack.c.bf16 %v936_v25, %v935_v19 }
 0x2a3   :  { %9442 = vmatprep.subr.bf16.mxu1 %v13714_v58  ;;  %9513 = vmatpush3.bf16.msra.mxu0 %v11887_v47  ;;  %v12121_v41 = vadd.f32 %v748_v14, %v747_v32  ;;  %v12137_v14 = vpack.c.bf16 %v938_v2, %v937_v20  ;;  %v12143_v32 = vpack.c.bf16 %v940_v52, %v939_v3  ;;  %v746_v25 = vpop.permute.xlu1 %745  ;;  %v12155_v2 = vpop.f32.mrb[22].mxu0  ;;  %v12193_v52 = vld [vmem:[%s13620_s9] ss:$0 sm:$0xff] }
 0x2a4   :  { %9514 = vmatprep.subr.bf16.mxu0 %v13714_v58  ;;  %7499 = vmatprep.mubr.msk.f32.mxu0 %vm11357_vm0, %v13713_v59  ;;  %v7361_v3 = vpop.f32.mrb[23].mxu0  ;;  %13715 = vst [vmem:[#allocation47_spill] sm:$0xff] %v12193_v52 }
 0x2a5   :  { %10890 = vtanh.f32 %v12121_v41 }
 0x2a6   :  { %9444 = vmatpush3.bf16.msra.mxu1 %v12097_v28 }
 0x2a7   :  { %9445 = vmatprep.subr.bf16.mxu1 %v13714_v58  ;;  %9516 = vmatpush3.bf16.msra.mxu0 %v11890_v51 }
 0x2a8   :  { %9517 = vmatprep.subr.bf16.mxu0 %v13714_v58 }
 0x2aa   :  { %9447 = vmatpush3.bf16.msra.mxu1 %v12109_v5 }
 0x2ab   :  { %9448 = vmatprep.subr.bf16.mxu1 %v13714_v58  ;;  %9519 = vmatpush3.bf16.msra.mxu0 %v11894_v55 }
 0x2ac   :  { %9520 = vmatprep.subr.bf16.mxu0 %v13714_v58 }
 0x2ae   :  { %9450 = vmatpush3.bf16.msra.mxu1 %v12116_v43 }
 0x2af   :  { %9451 = vmatprep.subr.bf16.mxu1 %v13714_v58  ;;  %9522 = vmatpush3.bf16.msra.mxu0 %v11898_v61  ;;  %v10891_v19 = vpop.eup %10890 }
 0x2b0   :  { %9523 = vmatprep.subr.bf16.mxu0 %v13714_v58  ;;  %v751_v20 = vmul.f32 %v10891_v19, %v746_v25 }
 0x2b2   :  { %9453 = vmatpush3.bf16.msra.mxu1 %v12124_v45 }
 0x2b3   :  { %9454 = vmatprep.subr.bf16.mxu1 %v13714_v58  ;;  %9525 = vmatpush3.bf16.msra.mxu0 %v11907_v15 }
 0x2b4   :  { %9526 = vmatprep.subr.bf16.mxu0 %v13714_v58 }
 0x2b6   :  { %9456 = vmatpush3.bf16.msra.mxu1 %v12131_v33 }
 0x2b7   :  { %9457 = vmatprep.subr.bf16.mxu1 %v13714_v58  ;;  %9528 = vmatpush3.bf16.msra.mxu0 %v11915_v23 }
 0x2b8   :  { %9529 = vmatprep.subr.bf16.mxu0 %v13714_v58 }
 0x2ba   :  { %9459 = vmatpush3.bf16.msra.mxu1 %v12137_v14 }
 0x2bb   :  { %9460 = vmatprep.subr.bf16.mxu1 %v13714_v58  ;;  %9531 = vmatpush3.bf16.msra.mxu0 %v11921_v26 }
 0x2bc   :  { %9532 = vmatprep.subr.bf16.mxu0 %v13714_v58 }
 0x2be   :  { %9462 = vmatpush3.bf16.msra.mxu1 %v12143_v32 }
 0x2bf   :  { %9487 = vmatprep.subr.bf16.mxu1 %v13714_v58  ;;  %9534 = vmatpush3.bf16.msra.mxu0 %v11928_v31 }
 0x2c0   :  { %9559 = vmatprep.subr.bf16.mxu0 %v13714_v58 }
 0x2c1   :  { %7395 = vmatmul.mubr.f32.vlgmr.msra.gmra.mrb[6].mxu1 %v751_v20 }
 0x2c2   :  { %9489 = vmatpush3.bf16.msra.mxu1 %v11811_v49  ;;  %7464 = vmatprep.mubr.msk.f32.mxu1 %vm11357_vm0, %v13713_v59 }
 0x2c3   :  { %9490 = vmatprep.subr.bf16.mxu1 %v13714_v58 }
 0x2c6   :  { %9492 = vmatpush3.bf16.msra.mxu1 %v11816_v54 }
 0x2c7   :  { %9493 = vmatprep.subr.bf16.mxu1 %v13714_v58 }
 0x2ca   :  { %9495 = vmatpush3.bf16.msra.mxu1 %v11823_v57 }
 0x2cb   :  { %9496 = vmatprep.subr.bf16.mxu1 %v13714_v58 }
 0x2ce   :  { %9498 = vmatpush3.bf16.msra.mxu1 %v11827_v60 }
 0x2cf   :  { %9499 = vmatprep.subr.bf16.mxu1 %v13714_v58 }
 0x2d2   :  { %9501 = vmatpush3.bf16.msra.mxu1 %v11831_v0 }
 0x2d3   :  { %9502 = vmatprep.subr.bf16.mxu1 %v13714_v58 }
 0x2d6   :  { %9504 = vmatpush3.bf16.msra.mxu1 %v11835_v6 }
 0x2d7   :  { %9505 = vmatprep.subr.bf16.mxu1 %v13714_v58 }
 0x2da   :  { %9507 = vmatpush3.bf16.msra.mxu1 %v11839_v9 }
 0x2db   :  { %9508 = vmatprep.subr.bf16.mxu1 %v13714_v58 }
 0x2de   :  { %9510 = vmatpush3.bf16.msra.mxu1 %v11843_v12 }
 0x2df   :  { %9535 = vmatprep.subr.bf16.mxu1 %v13714_v58 }
 0x2e1   :  { %7465 = vmatmul.mubr.f32.vlgmr.msra.gmra.mrb[8].mxu1 %v751_v20 }
 0x2e2   :  { %9537 = vmatpush3.bf16.msra.mxu1 %v11901_v10  ;;  %7534 = vmatprep.mubr.msk.f32.mxu1 %vm11357_vm0, %v13713_v59 }
 0x2e3   :  { %9538 = vmatprep.subr.bf16.mxu1 %v13714_v58 }
 0x2e6   :  { %9540 = vmatpush3.bf16.msra.mxu1 %v11904_v11 }
 0x2e7   :  { %9541 = vmatprep.subr.bf16.mxu1 %v13714_v58 }
 0x2ea   :  { %9543 = vmatpush3.bf16.msra.mxu1 %v11912_v21 }
 0x2eb   :  { %9544 = vmatprep.subr.bf16.mxu1 %v13714_v58 }
 0x2ee   :  { %9546 = vmatpush3.bf16.msra.mxu1 %v12005_v46 }
 0x2ef   :  { %9547 = vmatprep.subr.bf16.mxu1 %v13714_v58 }
 0x2f2   :  { %9549 = vmatpush3.bf16.msra.mxu1 %v12017_v8 }
 0x2f3   :  { %9550 = vmatprep.subr.bf16.mxu1 %v13714_v58 }
 0x2f6   :  { %9552 = vmatpush3.bf16.msra.mxu1 %v12027_v37 }
 0x2f7   :  { %9553 = vmatprep.subr.bf16.mxu1 %v13714_v58 }
 0x2fa   :  { %9555 = vmatpush3.bf16.msra.mxu1 %v12038_v30 }
 0x2fb   :  { %9556 = vmatprep.subr.bf16.mxu1 %v13714_v58 }
 0x2fe   :  { %9558 = vmatpush3.bf16.msra.mxu1 %v12048_v1 }
 0x2ff   :  { %9583 = vmatprep.subr.bf16.mxu1 %v13714_v58 }
 0x374   :  { %v920_v19 = vpop.f32.mrb[4].mxu1  ;;  %v1215_v25 = vpop.f32.mrb[24].mxu0 }
 0x375   :  { %v921_v20 = vadd.f32 %v920_v19, %v12101_v42  ;;  %v1219_v3 = vadd.f32 %v1215_v25, %v12008_v53  ;;  %v7326_v38 = vpop.f32.mrb[5].mxu1  ;;  %v7431_v29 = vpop.f32.mrb[25].mxu0 }
 0x377   :  { %v924_v16 = vadd.f32 %v12193_v52, %v921_v20  ;;  %v1291_v30 = vmul.f32 0.5, %v1219_v3 }
 0x379   :  { %v1098_v37 = vmul.f32 0.5, %v924_v16  ;;  %10892 = vtanh.f32 %v924_v16  ;;  %v12206_v16 = vld [vmem:[%s13624_s13] ss:$0 sm:$0xff] }
 0x37a   :  { %10894 = vtanh.f32 %v1291_v30 }
 0x37b   :  { %10896 = vtanh.f32 %v1098_v37 }
 0x37c   :  { %10898 = vtanh.f32 %v1219_v3 }
 0x383   :  { %v10893_v1 = vpop.eup %10892 }
 0x384   :  { %v10895_v8 = vpop.eup %10894  ;;  %1105 = vrot.lane.b32.xlu1 %v10893_v1, %s11360_s8 }
 0x385   :  { %v10897_v46 = vpop.eup %10896  ;;  %v1293_v21 = vmul.f32 0.5, %v10895_v8 }
 0x386   :  { %v1100_v11 = vmul.f32 0.5, %v10897_v46  ;;  %v10899_v53 = vpop.eup %10898 }
 0x387   :  { %v1294_v42 = vadd.f32 0.5, %v1293_v21 }
 0x388   :  { %v1101_v19 = vadd.f32 0.5, %v1100_v11 }
 0x389   :  { %1296 = vrot.lane.b32.xlu1 %v1294_v42, %s11361_s0 }
 0x38a   :  { %1103 = vrot.lane.b32.xlu0 %v1101_v19, %s11361_s0 }
 0x38e   :  { %1107 = vrot.lane.b32.xlu0 %v1101_v19, %s11362_s7 }
 0x392   :  { %1298 = vrot.lane.b32.xlu0 %v10899_v53, %s11360_s8 }
 0x394   :  { %v1093_v1 = vpop.f32.mrb[6].mxu1 }
 0x395   :  { %v1094_v46 = vadd.f32 %v1093_v1, %v12155_v2  ;;  %v7396_v8 = vpop.f32.mrb[7].mxu1 }
 0x397   :  { %v1097_v11 = vadd.f32 %v12206_v16, %v1094_v46 }
 0x399   :  { %v1114_v21 = vmul.f32 0.5, %v1097_v11  ;;  %10900 = vtanh.f32 %v1097_v11 }
 0x39b   :  { %10902 = vtanh.f32 %v1114_v21 }
 0x3a3   :  { %v10901_v29 = vpop.eup %10900 }
 0x3a4   :  { %1121 = vrot.lane.b32.xlu0 %v10901_v29, %s11360_s8 }
 0x3a5   :  { %v10903_v37 = vpop.eup %10902 }
 0x3a6   :  { %v1116_v38 = vmul.f32 0.5, %v10903_v37 }
 0x3a8   :  { %v1117_v30 = vadd.f32 0.5, %v1116_v38 }
 0x3aa   :  { %1123 = vrot.lane.b32.xlu0 %v1117_v30, %s11362_s7  ;;  %1119 = vrot.lane.b32.xlu1 %v1117_v30, %s11361_s0 }
 0x3ae   :  { %1300 = vrot.lane.b32.xlu1 %v1294_v42, %s11362_s7 }
 0x3b4   :  { %v1286_v25 = vpop.f32.mrb[8].mxu1 }
 0x3b5   :  { %v1290_v2 = vadd.f32 %v1286_v25, %v12012_v4  ;;  %v7466_v20 = vpop.f32.mrb[9].mxu1 }
 0x3b7   :  { %v1307_v3 = vmul.f32 0.5, %v1290_v2  ;;  %10904 = vtanh.f32 %v1290_v2 }
 0x3b9   :  { %10906 = vtanh.f32 %v1307_v3 }
 0x3c1   :  { %v10905_v53 = vpop.eup %10904 }
 0x3c2   :  { %1314 = vrot.lane.b32.xlu0 %v10905_v53, %s11360_s8 }
 0x3c3   :  { %v10907_v1 = vpop.eup %10906 }
 0x3c4   :  { %v1309_v46 = vmul.f32 0.5, %v10907_v1 }
 0x3c6   :  { %v12216_v8 = vadd.f32 0.5, %v1309_v46 }
 0x3c8   :  { %1312 = vrot.lane.b32.xlu1 %v12216_v8, %s11361_s0 }
 0x3cc   :  { %1316 = vrot.lane.b32.xlu1 %v12216_v8, %s11362_s7 }
 0x3f6   :  { %v1106_v11 = vpop.permute.xlu1 %1105 }
 0x3f7   :  { %v1110_v4 = vmul.f32 %v1106_v11, %v1101_v19 }
 0x3fb   :  { %v1297_v3 = vpop.permute.xlu1 %1296 }
 0x3fc   :  { %v1104_v21 = vpop.permute.xlu0 %1103  ;;  %v1302_v19 = vmul.f32 %v1297_v3, %v12091_v34 }
 0x3fd   :  { %v1109_v29 = vmul.f32 0.0, %v1104_v21 }
 0x3ff   :  { %v12222_v37 = vadd.f32 %v1110_v4, %v1109_v29 }
 0x400   :  { %v1108_v38 = vpop.permute.xlu0 %1107 }
 0x401   :  { %10908 = vtanh.f32 %v12222_v37 }
 0x404   :  { %v1299_v2 = vpop.permute.xlu0 %1298 }
 0x405   :  { %v1303_v53 = vmul.f32 %v1299_v2, %v1294_v42 }
 0x407   :  { %v12233_v1 = vadd.f32 %v1303_v53, %v1302_v19 }
 0x409   :  { %10910 = vtanh.f32 %v12233_v1 }
 0x40b   :  { %v10909_v25 = vpop.eup %10908 }
 0x40c   :  { %v12225_v20 = vmul.f32 %v10909_v25, %v1108_v38 }
 0x40e   :  { %13716 = vst [vmem:[#allocation48_spill] sm:$0xff] %v12225_v20  ;;  %7500 = vmatmul.mubr.f32.vlgmr.msra.gmra.mrb[26].mxu0 %v12225_v20 }
 0x40f   :  { %9561 = vmatpush3.bf16.msra.mxu0 %v11932_v36  ;;  %7569 = vmatprep.mubr.msk.f32.mxu0 %vm11357_vm0, %v13713_v59 }
 0x410   :  { %9562 = vmatprep.subr.bf16.mxu0 %v13714_v58 }
 0x413   :  { %9564 = vmatpush3.bf16.msra.mxu0 %v11937_v40  ;;  %v10911_v4 = vpop.eup %10910 }
 0x414   :  { %9565 = vmatprep.subr.bf16.mxu0 %v13714_v58 }
 0x416   :  { %v1122_v42 = vpop.permute.xlu0 %1121 }
 0x417   :  { %9567 = vmatpush3.bf16.msra.mxu0 %v11943_v44  ;;  %v1126_v34 = vmul.f32 %v1122_v42, %v1117_v30 }
 0x418   :  { %9568 = vmatprep.subr.bf16.mxu0 %v13714_v58 }
 0x41b   :  { %9570 = vmatpush3.bf16.msra.mxu0 %v11947_v48 }
 0x41c   :  { %v1120_v46 = vpop.permute.xlu1 %1119  ;;  %9571 = vmatprep.subr.bf16.mxu0 %v13714_v58  ;;  %v1124_v25 = vpop.permute.xlu0 %1123 }
 0x41d   :  { %v1125_v11 = vmul.f32 0.0, %v1120_v46 }
 0x41f   :  { %v12242_v21 = vadd.f32 %v1126_v34, %v1125_v11  ;;  %9573 = vmatpush3.bf16.msra.mxu0 %v11951_v56  ;;  %v13718_v11 = vld [vmem:[#allocation23_spill] sm:$0xff] }
 0x420   :  { %v1301_v29 = vpop.permute.xlu1 %1300  ;;  %9574 = vmatprep.subr.bf16.mxu0 %v13714_v58 }
 0x421   :  { %10912 = vtanh.f32 %v12242_v21  ;;  %v1306_v38 = vmul.f32 %v10911_v4, %v1301_v29  ;;  %v13719_v4 = vld [vmem:[#allocation24_spill] sm:$0xff]  ;;  %v13720_v29 = vld [vmem:[#allocation26_spill] sm:$0xff] }
 0x423   :  { %7535 = vmatmul.mubr.f32.vlgmr.msra.gmra.mrb[10].mxu1 %v1306_v38  ;;  %9576 = vmatpush3.bf16.msra.mxu0 %v11955_v63 }
 0x424   :  { %9577 = vmatprep.subr.bf16.mxu0 %v13714_v58  ;;  %9585 = vmatpush3.bf16.msra.mxu1 %v12094_v24 }
 0x425   :  { %9586 = vmatprep.subr.bf16.mxu1 %v13714_v58  ;;  %7604 = vmatprep.mubr.msk.f32.mxu1 %vm11357_vm0, %v13713_v59 }
 0x427   :  { %9579 = vmatpush3.bf16.msra.mxu0 %v11959_v7 }
 0x428   :  { %9580 = vmatprep.subr.bf16.mxu0 %v13714_v58  ;;  %9588 = vmatpush3.bf16.msra.mxu1 %v12097_v28 }
 0x429   :  { %9589 = vmatprep.subr.bf16.mxu1 %v13714_v58 }
 0x42b   :  { %v10913_v30 = vpop.eup %10912  ;;  %9582 = vmatpush3.bf16.msra.mxu0 %v11963_v17 }
 0x42c   :  { %v12258_v2 = vmul.f32 %v10913_v30, %v1124_v25  ;;  %9607 = vmatprep.subr.bf16.mxu0 %v13714_v58  ;;  %9591 = vmatpush3.bf16.msra.mxu1 %v12109_v5  ;;  %v13722_v30 = vld [vmem:[#allocation30_spill] sm:$0xff]  ;;  %v13723_v25 = vld [vmem:[#allocation33_spill] sm:$0xff] }
 0x42d   :  { %9592 = vmatprep.subr.bf16.mxu1 %v13714_v58 }
 0x42e   :  { %13717 = vst [vmem:[#allocation49_spill] sm:$0xff] %v12258_v2  ;;  %7570 = vmatmul.mubr.f32.vlgmr.msra.gmra.mrb[28].mxu0 %v12258_v2 }
 0x42f   :  { %9609 = vmatpush3.bf16.msra.mxu0 %v11645_v18  ;;  %7639 = vmatprep.mubr.msk.f32.mxu0 %vm11357_vm0, %v13713_v59 }
 0x430   :  { %9610 = vmatprep.subr.bf16.mxu0 %v13714_v58  ;;  %9594 = vmatpush3.bf16.msra.mxu1 %v12116_v43 }
 0x431   :  { %9595 = vmatprep.subr.bf16.mxu1 %v13714_v58 }
 0x433   :  { %9612 = vmatpush3.bf16.msra.mxu0 %v11654_v22 }
 0x434   :  { %9613 = vmatprep.subr.bf16.mxu0 %v13714_v58  ;;  %9597 = vmatpush3.bf16.msra.mxu1 %v12124_v45  ;;  %v1315_v3 = vpop.permute.xlu0 %1314 }
 0x435   :  { %9598 = vmatprep.subr.bf16.mxu1 %v13714_v58  ;;  %v1319_v19 = vmul.f32 %v1315_v3, %v12216_v8  ;;  %v13724_v3 = vld [vmem:[#allocation36_spill] sm:$0xff] }
 0x437   :  { %9615 = vmatpush3.bf16.msra.mxu0 %v11682_v35 }
 0x438   :  { %9616 = vmatprep.subr.bf16.mxu0 %v13714_v58  ;;  %9600 = vmatpush3.bf16.msra.mxu1 %v12131_v33 }
 0x439   :  { %9601 = vmatprep.subr.bf16.mxu1 %v13714_v58 }
 0x43a   :  { %v1313_v53 = vpop.permute.xlu1 %1312 }
 0x43b   :  { %v1318_v42 = vmul.f32 %v1313_v53, %v12121_v41  ;;  %9618 = vmatpush3.bf16.msra.mxu0 %v11710_v50 }
 0x43c   :  { %9619 = vmatprep.subr.bf16.mxu0 %v13714_v58  ;;  %9603 = vmatpush3.bf16.msra.mxu1 %v12137_v14 }
 0x43d   :  { %v12283_v46 = vadd.f32 %v1319_v19, %v1318_v42  ;;  %9604 = vmatprep.subr.bf16.mxu1 %v13714_v58 }
 0x43e   :  { %v1317_v8 = vpop.permute.xlu1 %1316 }
 0x43f   :  { %10914 = vtanh.f32 %v12283_v46  ;;  %9621 = vmatpush3.bf16.msra.mxu0 %v11732_v62 }
 0x440   :  { %9622 = vmatprep.subr.bf16.mxu0 %v13714_v58  ;;  %9606 = vmatpush3.bf16.msra.mxu1 %v12143_v32 }
 0x441   :  { %9631 = vmatprep.subr.bf16.mxu1 %v13714_v58 }
 0x443   :  { %9624 = vmatpush3.bf16.msra.mxu0 %v11754_v13 }
 0x444   :  { %9625 = vmatprep.subr.bf16.mxu0 %v13714_v58 }
 0x447   :  { %9627 = vmatpush3.bf16.msra.mxu0 %v11776_v27 }
 0x448   :  { %9628 = vmatprep.subr.bf16.mxu0 %v13714_v58 }
 0x449   :  { %v10915_v41 = vpop.eup %10914 }
 0x44a   :  { %v1322_v34 = vmul.f32 %v10915_v41, %v1317_v8 }
 0x44b   :  { %9630 = vmatpush3.bf16.msra.mxu0 %v11795_v39 }
 0x44c   :  { %7605 = vmatmul.mubr.f32.vlgmr.msra.gmra.mrb[12].mxu1 %v1322_v34  ;;  %9655 = vmatprep.subr.bf16.mxu0 %v13714_v58 }
 0x44d   :  { %9633 = vmatpush3.bf16.msra.mxu1 %v11811_v49  ;;  %7674 = vmatprep.mubr.msk.f32.mxu1 %vm11357_vm0, %v13713_v59 }
 0x44e   :  { %7640 = vmatmul.mubr.f32.vlgmr.msra.gmra.mrb[30].mxu0 %v1306_v38  ;;  %9634 = vmatprep.subr.bf16.mxu1 %v13714_v58  ;;  %v13721_v38 = vld [vmem:[#allocation27_spill] sm:$0xff] }
 0x44f   :  { %9657 = vmatpush3.bf16.msra.mxu0 %v11887_v47  ;;  %7709 = vmatprep.mubr.msk.f32.mxu0 %vm11357_vm0, %v13713_v59 }
 0x450   :  { %9658 = vmatprep.subr.bf16.mxu0 %v13714_v58 }
 0x451   :  { %9636 = vmatpush3.bf16.msra.mxu1 %v11816_v54 }
 0x452   :  { %9637 = vmatprep.subr.bf16.mxu1 %v13714_v58 }
 0x453   :  { %9660 = vmatpush3.bf16.msra.mxu0 %v11890_v51 }
 0x454   :  { %9661 = vmatprep.subr.bf16.mxu0 %v13714_v58 }
 0x455   :  { %9639 = vmatpush3.bf16.msra.mxu1 %v11823_v57 }
 0x456   :  { %9640 = vmatprep.subr.bf16.mxu1 %v13714_v58 }
 0x457   :  { %9663 = vmatpush3.bf16.msra.mxu0 %v11894_v55 }
 0x458   :  { %9664 = vmatprep.subr.bf16.mxu0 %v13714_v58 }
 0x459   :  { %9642 = vmatpush3.bf16.msra.mxu1 %v11827_v60 }
 0x45a   :  { %9643 = vmatprep.subr.bf16.mxu1 %v13714_v58 }
 0x45b   :  { %9666 = vmatpush3.bf16.msra.mxu0 %v11898_v61 }
 0x45c   :  { %9667 = vmatprep.subr.bf16.mxu0 %v13714_v58 }
 0x45d   :  { %9645 = vmatpush3.bf16.msra.mxu1 %v11831_v0 }
 0x45e   :  { %9646 = vmatprep.subr.bf16.mxu1 %v13714_v58 }
 0x45f   :  { %9669 = vmatpush3.bf16.msra.mxu0 %v11907_v15 }
 0x460   :  { %9670 = vmatprep.subr.bf16.mxu0 %v13714_v58 }
 0x461   :  { %9648 = vmatpush3.bf16.msra.mxu1 %v11835_v6 }
 0x462   :  { %9649 = vmatprep.subr.bf16.mxu1 %v13714_v58 }
 0x463   :  { %9672 = vmatpush3.bf16.msra.mxu0 %v11915_v23 }
 0x464   :  { %9673 = vmatprep.subr.bf16.mxu0 %v13714_v58 }
 0x465   :  { %9651 = vmatpush3.bf16.msra.mxu1 %v11839_v9 }
 0x466   :  { %9652 = vmatprep.subr.bf16.mxu1 %v13714_v58 }
 0x467   :  { %9675 = vmatpush3.bf16.msra.mxu0 %v11921_v26 }
 0x468   :  { %9676 = vmatprep.subr.bf16.mxu0 %v13714_v58 }
 0x469   :  { %9654 = vmatpush3.bf16.msra.mxu1 %v11843_v12 }
 0x46a   :  { %9679 = vmatprep.subr.bf16.mxu1 %v13714_v58 }
 0x46b   :  { %9678 = vmatpush3.bf16.msra.mxu0 %v11928_v31 }
 0x46c   :  { %7675 = vmatmul.mubr.f32.vlgmr.msra.gmra.mrb[14].mxu1 %v1322_v34  ;;  %9703 = vmatprep.subr.bf16.mxu0 %v13714_v58 }
 0x46d   :  { %9681 = vmatpush3.bf16.msra.mxu1 %v11901_v10  ;;  %7744 = vmatprep.mubr.msk.f32.mxu1 %vm11357_vm0, %v13713_v59 }
 0x46e   :  { %9682 = vmatprep.subr.bf16.mxu1 %v13714_v58 }
 0x471   :  { %9684 = vmatpush3.bf16.msra.mxu1 %v13718_v11 }
 0x472   :  { %9685 = vmatprep.subr.bf16.mxu1 %v13714_v58 }
 0x475   :  { %9687 = vmatpush3.bf16.msra.mxu1 %v13719_v4 }
 0x476   :  { %9688 = vmatprep.subr.bf16.mxu1 %v13714_v58 }
 0x479   :  { %9690 = vmatpush3.bf16.msra.mxu1 %v13720_v29 }
 0x47a   :  { %9691 = vmatprep.subr.bf16.mxu1 %v13714_v58 }
 0x47d   :  { %9693 = vmatpush3.bf16.msra.mxu1 %v13721_v38 }
 0x47e   :  { %9694 = vmatprep.subr.bf16.mxu1 %v13714_v58 }
 0x481   :  { %9696 = vmatpush3.bf16.msra.mxu1 %v13722_v30 }
 0x482   :  { %9697 = vmatprep.subr.bf16.mxu1 %v13714_v58 }
 0x485   :  { %9699 = vmatpush3.bf16.msra.mxu1 %v13723_v25 }
 0x486   :  { %9700 = vmatprep.subr.bf16.mxu1 %v13714_v58 }
 0x489   :  { %9702 = vmatpush3.bf16.msra.mxu1 %v13724_v3 }
 0x48a   :  { %9727 = vmatprep.subr.bf16.mxu1 %v13714_v58 }
 0x4e1   :  { %v1389_v53 = vpop.f32.mrb[26].mxu0 }
 0x4e2   :  { %v7501_v19 = vpop.f32.mrb[27].mxu0 }
 0x4f6   :  { %v1459_v42 = vpop.f32.mrb[10].mxu1 }
 0x4f7   :  { %v1460_v41 = vadd.f32 %v1459_v42, %v1389_v53  ;;  %v7536_v8 = vpop.f32.mrb[11].mxu1 }
 0x4f9   :  { %v1463_v34 = vadd.f32 %v12193_v52, %v1460_v41 }
 0x4fb   :  { %v1605_v20 = vmul.f32 0.5, %v1463_v34  ;;  %10916 = vtanh.f32 %v1463_v34  ;;  %v13725_v34 = vld [vmem:[#allocation28_spill] sm:$0xff] }
 0x4fd   :  { %10918 = vtanh.f32 %v1605_v20 }
 0x501   :  { %v1530_v2 = vpop.f32.mrb[28].mxu0 }
 0x502   :  { %v7571_v30 = vpop.f32.mrb[29].mxu0 }
 0x505   :  { %v10917_v38 = vpop.eup %10916 }
 0x506   :  { %1612 = vrot.lane.b32.xlu1 %v10917_v38, %s11360_s8 }
 0x507   :  { %v10919_v25 = vpop.eup %10918 }
 0x508   :  { %v1607_v29 = vmul.f32 0.5, %v10919_v25 }
 0x50a   :  { %v1608_v3 = vadd.f32 0.5, %v1607_v29 }
 0x50c   :  { %1610 = vrot.lane.b32.xlu0 %v1608_v3, %s11361_s0 }
 0x510   :  { %1614 = vrot.lane.b32.xlu0 %v1608_v3, %s11362_s7 }
 0x51f   :  { %v1600_v19 = vpop.f32.mrb[12].mxu1 }
 0x520   :  { %v1601_v53 = vadd.f32 %v1600_v19, %v1530_v2  ;;  %v7606_v42 = vpop.f32.mrb[13].mxu1 }
 0x521   :  { %v1722_v8 = vpop.f32.mrb[30].mxu0  ;;  %v13726_v42 = vld [vmem:[#allocation29_spill] sm:$0xff] }
 0x522   :  { %v1604_v41 = vadd.f32 %v12206_v16, %v1601_v53  ;;  %v1726_v20 = vadd.f32 %v1722_v8, %v13725_v34  ;;  %v7641_v52 = vpop.f32.mrb[31].mxu0 }
 0x524   :  { %v1621_v30 = vmul.f32 0.5, %v1604_v41  ;;  %v1798_v4 = vmul.f32 0.5, %v1726_v20  ;;  %10920 = vtanh.f32 %v1726_v20 }
 0x526   :  { %10922 = vtanh.f32 %v1621_v30 }
 0x527   :  { %10924 = vtanh.f32 %v1798_v4 }
 0x528   :  { %10926 = vtanh.f32 %v1604_v41 }
 0x52e   :  { %v10921_v29 = vpop.eup %10920 }
 0x52f   :  { %1805 = vrot.lane.b32.xlu0 %v10921_v29, %s11360_s8 }
 0x530   :  { %v10923_v38 = vpop.eup %10922 }
 0x531   :  { %v10925_v25 = vpop.eup %10924  ;;  %v1623_v2 = vmul.f32 0.5, %v10923_v38 }
 0x532   :  { %v1800_v11 = vmul.f32 0.5, %v10925_v25  ;;  %v10927_v19 = vpop.eup %10926 }
 0x533   :  { %1628 = vrot.lane.b32.xlu0 %v10927_v19, %s11360_s8  ;;  %v1624_v52 = vadd.f32 0.5, %v1623_v2 }
 0x534   :  { %v1801_v53 = vadd.f32 0.5, %v1800_v11 }
 0x536   :  { %1803 = vrot.lane.b32.xlu1 %v1801_v53, %s11361_s0 }
 0x537   :  { %1630 = vrot.lane.b32.xlu0 %v1624_v52, %s11362_s7 }
 0x53a   :  { %1626 = vrot.lane.b32.xlu1 %v1624_v52, %s11361_s0 }
 0x53e   :  { %1807 = vrot.lane.b32.xlu1 %v1801_v53, %s11362_s7 }
 0x53f   :  { %v1793_v4 = vpop.f32.mrb[14].mxu1 }
 0x540   :  { %v1797_v8 = vadd.f32 %v1793_v4, %v13726_v42  ;;  %v7676_v41 = vpop.f32.mrb[15].mxu1 }
 0x542   :  { %v1814_v34 = vmul.f32 0.5, %v1797_v8  ;;  %10928 = vtanh.f32 %v1797_v8 }
 0x544   :  { %10930 = vtanh.f32 %v1814_v34 }
 0x54c   :  { %v10929_v20 = vpop.eup %10928 }
 0x54d   :  { %1821 = vrot.lane.b32.xlu0 %v10929_v20, %s11360_s8 }
 0x54e   :  { %v10931_v11 = vpop.eup %10930 }
 0x54f   :  { %v1816_v30 = vmul.f32 0.5, %v10931_v11 }
 0x551   :  { %v12365_v29 = vadd.f32 0.5, %v1816_v30 }
 0x553   :  { %1819 = vrot.lane.b32.xlu1 %v12365_v29, %s11361_s0 }
 0x557   :  { %1823 = vrot.lane.b32.xlu1 %v12365_v29, %s11362_s7 }
 0x578   :  { %v1613_v38 = vpop.permute.xlu1 %1612 }
 0x579   :  { %v1617_v2 = vmul.f32 %v1613_v38, %v1608_v3 }
 0x57e   :  { %v1611_v25 = vpop.permute.xlu0 %1610 }
 0x57f   :  { %v1616_v19 = vmul.f32 %v1611_v25, %v12222_v37 }
 0x581   :  { %v12372_v4 = vadd.f32 %v1617_v2, %v1616_v19 }
 0x582   :  { %v1615_v8 = vpop.permute.xlu0 %1614 }
 0x583   :  { %10932 = vtanh.f32 %v12372_v4 }
 0x58d   :  { %v10933_v42 = vpop.eup %10932 }
 0x58e   :  { %v12375_v41 = vmul.f32 %v10933_v42, %v1615_v8 }
 0x590   :  { %13727 = vst [vmem:[#allocation28_spill] sm:$0xff] %v12375_v41  ;;  %7710 = vmatmul.mubr.f32.vlgmr.msra.gmra.mrb[32].mxu0 %v12375_v41 }
 0x591   :  { %9705 = vmatpush3.bf16.msra.mxu0 %v11932_v36  ;;  %7779 = vmatprep.mubr.msk.f32.mxu0 %vm11357_vm0, %v13713_v59 }
 0x592   :  { %9706 = vmatprep.subr.bf16.mxu0 %v13714_v58 }
 0x595   :  { %9708 = vmatpush3.bf16.msra.mxu0 %v11937_v40 }
 0x596   :  { %9709 = vmatprep.subr.bf16.mxu0 %v13714_v58 }
 0x599   :  { %9711 = vmatpush3.bf16.msra.mxu0 %v11943_v44 }
 0x59a   :  { %9712 = vmatprep.subr.bf16.mxu0 %v13714_v58 }
 0x59d   :  { %9714 = vmatpush3.bf16.msra.mxu0 %v11947_v48 }
 0x59e   :  { %9715 = vmatprep.subr.bf16.mxu0 %v13714_v58 }
 0x5a1   :  { %9717 = vmatpush3.bf16.msra.mxu0 %v11951_v56  ;;  %v1806_v37 = vpop.permute.xlu0 %1805 }
 0x5a2   :  { %9718 = vmatprep.subr.bf16.mxu0 %v13714_v58  ;;  %v1810_v34 = vmul.f32 %v1806_v37, %v1801_v53 }
 0x5a5   :  { %9720 = vmatpush3.bf16.msra.mxu0 %v11955_v63  ;;  %v1629_v11 = vpop.permute.xlu0 %1628 }
 0x5a6   :  { %9721 = vmatprep.subr.bf16.mxu0 %v13714_v58  ;;  %v1633_v25 = vmul.f32 %v1629_v11, %v1624_v52 }
 0x5a8   :  { %v1804_v3 = vpop.permute.xlu1 %1803 }
 0x5a9   :  { %v1809_v20 = vmul.f32 %v1804_v3, %v12233_v1  ;;  %9723 = vmatpush3.bf16.msra.mxu0 %v11959_v7  ;;  %v1631_v37 = vpop.permute.xlu0 %1630 }
 0x5aa   :  { %9724 = vmatprep.subr.bf16.mxu0 %v13714_v58 }
 0x5ab   :  { %v12395_v30 = vadd.f32 %v1810_v34, %v1809_v20 }
 0x5ac   :  { %v1627_v38 = vpop.permute.xlu1 %1626 }
 0x5ad   :  { %10934 = vtanh.f32 %v12395_v30  ;;  %v1632_v2 = vmul.f32 %v1627_v38, %v12242_v21  ;;  %9726 = vmatpush3.bf16.msra.mxu0 %v11963_v17 }
 0x5ae   :  { %9751 = vmatprep.subr.bf16.mxu0 %v13714_v58 }
 0x5af   :  { %v12401_v53 = vadd.f32 %v1633_v25, %v1632_v2  ;;  %v13729_v25 = vld [vmem:[#allocation23_spill] sm:$0xff]  ;;  %v13730_v2 = vld [vmem:[#allocation24_spill] sm:$0xff] }
 0x5b0   :  { %v1808_v19 = vpop.permute.xlu1 %1807 }
 0x5b1   :  { %10936 = vtanh.f32 %v12401_v53 }
 0x5b7   :  { %v10935_v1 = vpop.eup %10934 }
 0x5b8   :  { %v1813_v42 = vmul.f32 %v10935_v1, %v1808_v19  ;;  %v13731_v1 = vld [vmem:[#allocation26_spill] sm:$0xff]  ;;  %v13732_v19 = vld [vmem:[#allocation27_spill] sm:$0xff] }
 0x5ba   :  { %7745 = vmatmul.mubr.f32.vlgmr.msra.gmra.mrb[16].mxu1 %v1813_v42 }
 0x5bb   :  { %v10937_v8 = vpop.eup %10936  ;;  %9729 = vmatpush3.bf16.msra.mxu1 %v12094_v24  ;;  %7814 = vmatprep.mubr.msk.f32.mxu1 %vm11357_vm0, %v13713_v59 }
 0x5bc   :  { %9730 = vmatprep.subr.bf16.mxu1 %v13714_v58  ;;  %v12408_v21 = vmul.f32 %v10937_v8, %v1631_v37  ;;  %v13734_v8 = vld [vmem:[#allocation33_spill] sm:$0xff]  ;;  %v13735_v37 = vld [vmem:[#allocation36_spill] sm:$0xff] }
 0x5be   :  { %13728 = vst [vmem:[#allocation29_spill] sm:$0xff] %v12408_v21  ;;  %7780 = vmatmul.mubr.f32.vlgmr.msra.gmra.mrb[34].mxu0 %v12408_v21 }
 0x5bf   :  { %9732 = vmatpush3.bf16.msra.mxu1 %v12097_v28  ;;  %9753 = vmatpush3.bf16.msra.mxu0 %v11645_v18  ;;  %v1822_v52 = vpop.permute.xlu0 %1821 }
 0x5c0   :  { %9733 = vmatprep.subr.bf16.mxu1 %v13714_v58  ;;  %9754 = vmatprep.subr.bf16.mxu0 %v13714_v58  ;;  %v1826_v34 = vmul.f32 %v1822_v52, %v12365_v29 }
 0x5c1   :  { %7849 = vmatprep.mubr.msk.f32.mxu0 %vm11357_vm0, %v13713_v59 }
 0x5c3   :  { %9735 = vmatpush3.bf16.msra.mxu1 %v12109_v5  ;;  %9756 = vmatpush3.bf16.msra.mxu0 %v11654_v22 }
 0x5c4   :  { %9736 = vmatprep.subr.bf16.mxu1 %v13714_v58  ;;  %9757 = vmatprep.subr.bf16.mxu0 %v13714_v58 }
 0x5c5   :  { %v1820_v3 = vpop.permute.xlu1 %1819 }
 0x5c6   :  { %v1825_v20 = vmul.f32 %v1820_v3, %v12283_v46 }
 0x5c7   :  { %9738 = vmatpush3.bf16.msra.mxu1 %v12116_v43  ;;  %9759 = vmatpush3.bf16.msra.mxu0 %v11682_v35 }
 0x5c8   :  { %v12425_v11 = vadd.f32 %v1826_v34, %v1825_v20  ;;  %9739 = vmatprep.subr.bf16.mxu1 %v13714_v58  ;;  %9760 = vmatprep.subr.bf16.mxu0 %v13714_v58 }
 0x5c9   :  { %v1824_v29 = vpop.permute.xlu1 %1823 }
 0x5ca   :  { %10938 = vtanh.f32 %v12425_v11 }
 0x5cb   :  { %9741 = vmatpush3.bf16.msra.mxu1 %v12124_v45  ;;  %9762 = vmatpush3.bf16.msra.mxu0 %v11710_v50 }
 0x5cc   :  { %9742 = vmatprep.subr.bf16.mxu1 %v13714_v58  ;;  %9763 = vmatprep.subr.bf16.mxu0 %v13714_v58 }
 0x5cf   :  { %9744 = vmatpush3.bf16.msra.mxu1 %v12131_v33  ;;  %9765 = vmatpush3.bf16.msra.mxu0 %v11732_v62 }
 0x5d0   :  { %9745 = vmatprep.subr.bf16.mxu1 %v13714_v58  ;;  %9766 = vmatprep.subr.bf16.mxu0 %v13714_v58 }
 0x5d3   :  { %9747 = vmatpush3.bf16.msra.mxu1 %v12137_v14  ;;  %9768 = vmatpush3.bf16.msra.mxu0 %v11754_v13 }
 0x5d4   :  { %9748 = vmatprep.subr.bf16.mxu1 %v13714_v58  ;;  %9769 = vmatprep.subr.bf16.mxu0 %v13714_v58  ;;  %v10939_v46 = vpop.eup %10938 }
 0x5d5   :  { %v1829_v38 = vmul.f32 %v10939_v46, %v1824_v29  ;;  %v13736_v29 = vld [vmem:[#allocation47_spill] sm:$0xff] }
 0x5d7   :  { %9750 = vmatpush3.bf16.msra.mxu1 %v12143_v32  ;;  %9771 = vmatpush3.bf16.msra.mxu0 %v11776_v27 }
 0x5d8   :  { %9772 = vmatprep.subr.bf16.mxu0 %v13714_v58  ;;  %9775 = vmatprep.subr.bf16.mxu1 %v13714_v58 }
 0x5da   :  { %7815 = vmatmul.mubr.f32.vlgmr.msra.gmra.mrb[18].mxu1 %v1829_v38 }
 0x5db   :  { %9774 = vmatpush3.bf16.msra.mxu0 %v11795_v39  ;;  %9777 = vmatpush3.bf16.msra.mxu1 %v11811_v49 }
 0x5dc   :  { %9778 = vmatprep.subr.bf16.mxu1 %v13714_v58  ;;  %7884 = vmatprep.mubr.msk.f32.mxu1 %vm11357_vm0, %v13713_v59 }
 0x5dd   :  { %9799 = vmatprep.subr.bf16.mxu0 %v13714_v58 }
 0x5de   :  { %7850 = vmatmul.mubr.f32.vlgmr.msra.gmra.mrb[36].mxu0 %v1813_v42  ;;  %v13733_v42 = vld [vmem:[#allocation30_spill] sm:$0xff] }
 0x5df   :  { %9780 = vmatpush3.bf16.msra.mxu1 %v11816_v54  ;;  %9801 = vmatpush3.bf16.msra.mxu0 %v11887_v47 }
 0x5e0   :  { %9781 = vmatprep.subr.bf16.mxu1 %v13714_v58  ;;  %9802 = vmatprep.subr.bf16.mxu0 %v13714_v58 }
 0x5e1   :  { %7919 = vmatprep.mubr.msk.f32.mxu0 %vm11357_vm0, %v13713_v59 }
 0x5e3   :  { %9783 = vmatpush3.bf16.msra.mxu1 %v11823_v57  ;;  %9804 = vmatpush3.bf16.msra.mxu0 %v11890_v51 }
 0x5e4   :  { %9784 = vmatprep.subr.bf16.mxu1 %v13714_v58  ;;  %9805 = vmatprep.subr.bf16.mxu0 %v13714_v58 }
 0x5e7   :  { %9786 = vmatpush3.bf16.msra.mxu1 %v11827_v60  ;;  %9807 = vmatpush3.bf16.msra.mxu0 %v11894_v55 }
 0x5e8   :  { %9787 = vmatprep.subr.bf16.mxu1 %v13714_v58  ;;  %9808 = vmatprep.subr.bf16.mxu0 %v13714_v58 }
 0x5eb   :  { %9789 = vmatpush3.bf16.msra.mxu1 %v11831_v0  ;;  %9810 = vmatpush3.bf16.msra.mxu0 %v11898_v61 }
 0x5ec   :  { %9790 = vmatprep.subr.bf16.mxu1 %v13714_v58  ;;  %9811 = vmatprep.subr.bf16.mxu0 %v13714_v58 }
 0x5ef   :  { %9792 = vmatpush3.bf16.msra.mxu1 %v11835_v6  ;;  %9813 = vmatpush3.bf16.msra.mxu0 %v11907_v15 }
 0x5f0   :  { %9793 = vmatprep.subr.bf16.mxu1 %v13714_v58  ;;  %9814 = vmatprep.subr.bf16.mxu0 %v13714_v58 }
 0x5f3   :  { %9795 = vmatpush3.bf16.msra.mxu1 %v11839_v9  ;;  %9816 = vmatpush3.bf16.msra.mxu0 %v11915_v23 }
 0x5f4   :  { %9796 = vmatprep.subr.bf16.mxu1 %v13714_v58  ;;  %9817 = vmatprep.subr.bf16.mxu0 %v13714_v58 }
 0x5f7   :  { %9798 = vmatpush3.bf16.msra.mxu1 %v11843_v12  ;;  %9819 = vmatpush3.bf16.msra.mxu0 %v11921_v26 }
 0x5f8   :  { %9820 = vmatprep.subr.bf16.mxu0 %v13714_v58  ;;  %9823 = vmatprep.subr.bf16.mxu1 %v13714_v58 }
 0x5fa   :  { %7885 = vmatmul.mubr.f32.vlgmr.msra.gmra.mrb[20].mxu1 %v1829_v38 }
 0x5fb   :  { %9822 = vmatpush3.bf16.msra.mxu0 %v11928_v31  ;;  %9825 = vmatpush3.bf16.msra.mxu1 %v11901_v10 }
 0x5fc   :  { %9826 = vmatprep.subr.bf16.mxu1 %v13714_v58  ;;  %9847 = vmatprep.subr.bf16.mxu0 %v13714_v58 }
 0x5fd   :  { %7954 = vmatprep.mubr.msk.f32.mxu1 %vm11357_vm0, %v13713_v59 }
 0x5ff   :  { %9828 = vmatpush3.bf16.msra.mxu1 %v13729_v25 }
 0x600   :  { %9829 = vmatprep.subr.bf16.mxu1 %v13714_v58 }
 0x603   :  { %9831 = vmatpush3.bf16.msra.mxu1 %v13730_v2 }
 0x604   :  { %9832 = vmatprep.subr.bf16.mxu1 %v13714_v58 }
 0x607   :  { %9834 = vmatpush3.bf16.msra.mxu1 %v13731_v1 }
 0x608   :  { %9835 = vmatprep.subr.bf16.mxu1 %v13714_v58 }
 0x60b   :  { %9837 = vmatpush3.bf16.msra.mxu1 %v13732_v19 }
 0x60c   :  { %9838 = vmatprep.subr.bf16.mxu1 %v13714_v58 }
 0x60f   :  { %9840 = vmatpush3.bf16.msra.mxu1 %v13733_v42 }
 0x610   :  { %9841 = vmatprep.subr.bf16.mxu1 %v13714_v58 }
 0x613   :  { %9843 = vmatpush3.bf16.msra.mxu1 %v13734_v8 }
 0x614   :  { %9844 = vmatprep.subr.bf16.mxu1 %v13714_v58 }
 0x617   :  { %9846 = vmatpush3.bf16.msra.mxu1 %v13735_v37 }
 0x618   :  { %9871 = vmatprep.subr.bf16.mxu1 %v13714_v58 }
 0x663   :  { %v1896_v52 = vpop.f32.mrb[32].mxu0 }
 0x664   :  { %v7711_v3 = vpop.f32.mrb[33].mxu0 }
 0x68d   :  { %v1966_v34 = vpop.f32.mrb[16].mxu1 }
 0x68e   :  { %v1967_v20 = vadd.f32 %v1966_v34, %v1896_v52  ;;  %v7746_v46 = vpop.f32.mrb[17].mxu1 }
 0x690   :  { %v1970_v38 = vadd.f32 %v13736_v29, %v1967_v20 }
 0x691   :  { %v2037_v41 = vpop.f32.mrb[34].mxu0 }
 0x692   :  { %v2112_v21 = vmul.f32 0.5, %v1970_v38  ;;  %10940 = vtanh.f32 %v1970_v38  ;;  %v7781_v42 = vpop.f32.mrb[35].mxu0  ;;  %v13737_v38 = vld [vmem:[#allocation31_spill] sm:$0xff] }
 0x694   :  { %10942 = vtanh.f32 %v2112_v21 }
 0x69c   :  { %v10941_v19 = vpop.eup %10940 }
 0x69d   :  { %2119 = vrot.lane.b32.xlu1 %v10941_v19, %s11360_s8 }
 0x69e   :  { %v10943_v8 = vpop.eup %10942 }
 0x69f   :  { %v2114_v1 = vmul.f32 0.5, %v10943_v8 }
 0x6a1   :  { %v2115_v37 = vadd.f32 0.5, %v2114_v1 }
 0x6a3   :  { %2117 = vrot.lane.b32.xlu0 %v2115_v37, %s11361_s0 }
 0x6a7   :  { %2121 = vrot.lane.b32.xlu0 %v2115_v37, %s11362_s7 }
 0x6ad   :  { %v2107_v3 = vpop.f32.mrb[18].mxu1 }
 0x6ae   :  { %v2108_v52 = vadd.f32 %v2107_v3, %v2037_v41  ;;  %v7816_v34 = vpop.f32.mrb[19].mxu1 }
 0x6b0   :  { %v2111_v20 = vadd.f32 %v12206_v16, %v2108_v52  ;;  %v13738_v52 = vld [vmem:[#allocation32_spill] sm:$0xff] }
 0x6b1   :  { %v2229_v46 = vpop.f32.mrb[36].mxu0 }
 0x6b2   :  { %v2128_v29 = vmul.f32 0.5, %v2111_v20  ;;  %v2233_v42 = vadd.f32 %v2229_v46, %v13737_v38  ;;  %v7851_v21 = vpop.f32.mrb[37].mxu0 }
 0x6b4   :  { %10944 = vtanh.f32 %v2128_v29  ;;  %v2305_v2 = vmul.f32 0.5, %v2233_v42 }
 0x6b5   :  { %10946 = vtanh.f32 %v2233_v42 }
 0x6b6   :  { %10948 = vtanh.f32 %v2305_v2 }
 0x6b7   :  { %10950 = vtanh.f32 %v2111_v20 }
 0x6be   :  { %v10945_v1 = vpop.eup %10944 }
 0x6bf   :  { %v10947_v19 = vpop.eup %10946  ;;  %v2130_v41 = vmul.f32 0.5, %v10945_v1 }
 0x6c0   :  { %v10949_v8 = vpop.eup %10948  ;;  %2312 = vrot.lane.b32.xlu0 %v10947_v19, %s11360_s8 }
 0x6c1   :  { %v2307_v25 = vmul.f32 0.5, %v10949_v8  ;;  %v10951_v3 = vpop.eup %10950  ;;  %v2131_v16 = vadd.f32 0.5, %v2130_v41 }
 0x6c3   :  { %v2308_v34 = vadd.f32 0.5, %v2307_v25 }
 0x6c4   :  { %2135 = vrot.lane.b32.xlu0 %v10951_v3, %s11360_s8 }
 0x6c5   :  { %2310 = vrot.lane.b32.xlu1 %v2308_v34, %s11361_s0 }
 0x6c8   :  { %2137 = vrot.lane.b32.xlu0 %v2131_v16, %s11362_s7 }
 0x6c9   :  { %2133 = vrot.lane.b32.xlu1 %v2131_v16, %s11361_s0 }
 0x6cd   :  { %2314 = vrot.lane.b32.xlu1 %v2308_v34, %s11362_s7  ;;  %v2300_v2 = vpop.f32.mrb[20].mxu1 }
 0x6ce   :  { %v2304_v20 = vadd.f32 %v2300_v2, %v13738_v52  ;;  %v7886_v46 = vpop.f32.mrb[21].mxu1 }
 0x6d0   :  { %v2321_v29 = vmul.f32 0.5, %v2304_v20  ;;  %10952 = vtanh.f32 %v2304_v20 }
 0x6d2   :  { %10954 = vtanh.f32 %v2321_v29 }
 0x6da   :  { %v10953_v38 = vpop.eup %10952 }
 0x6db   :  { %2328 = vrot.lane.b32.xlu0 %v10953_v38, %s11360_s8 }
 0x6dc   :  { %v10955_v25 = vpop.eup %10954 }
 0x6dd   :  { %v2323_v42 = vmul.f32 0.5, %v10955_v25 }
 0x6df   :  { %v12516_v21 = vadd.f32 0.5, %v2323_v42 }
 0x6e1   :  { %2326 = vrot.lane.b32.xlu1 %v12516_v21, %s11361_s0 }
 0x6e5   :  { %2330 = vrot.lane.b32.xlu1 %v12516_v21, %s11362_s7 }
 0x70f   :  { %v2120_v1 = vpop.permute.xlu1 %2119 }
 0x710   :  { %v2124_v8 = vmul.f32 %v2120_v1, %v2115_v37 }
 0x715   :  { %v2118_v19 = vpop.permute.xlu0 %2117 }
 0x716   :  { %v2123_v41 = vmul.f32 %v2118_v19, %v12372_v4 }
 0x718   :  { %v12523_v3 = vadd.f32 %v2124_v8, %v2123_v41 }
 0x719   :  { %v2122_v52 = vpop.permute.xlu0 %2121 }
 0x71a   :  { %10956 = vtanh.f32 %v12523_v3 }
 0x724   :  { %v10957_v2 = vpop.eup %10956 }
 0x725   :  { %v12526_v20 = vmul.f32 %v10957_v2, %v2122_v52 }
 0x727   :  { %13739 = vst [vmem:[#allocation47_spill] sm:$0xff] %v12526_v20  ;;  %7920 = vmatmul.mubr.f32.vlgmr.msra.gmra.mrb[38].mxu0 %v12526_v20 }
 0x728   :  { %9849 = vmatpush3.bf16.msra.mxu0 %v11932_v36  ;;  %7989 = vmatprep.mubr.msk.f32.mxu0 %vm11357_vm0, %v13713_v59 }
 0x729   :  { %9850 = vmatprep.subr.bf16.mxu0 %v13714_v58 }
 0x72c   :  { %9852 = vmatpush3.bf16.msra.mxu0 %v11937_v40 }
 0x72d   :  { %9853 = vmatprep.subr.bf16.mxu0 %v13714_v58 }
 0x730   :  { %9855 = vmatpush3.bf16.msra.mxu0 %v11943_v44 }
 0x731   :  { %9856 = vmatprep.subr.bf16.mxu0 %v13714_v58 }
 0x732   :  { %v2313_v4 = vpop.permute.xlu0 %2312 }
 0x733   :  { %v2317_v46 = vmul.f32 %v2313_v4, %v2308_v34 }
 0x734   :  { %9858 = vmatpush3.bf16.msra.mxu0 %v11947_v48 }
 0x735   :  { %9859 = vmatprep.subr.bf16.mxu0 %v13714_v58 }
 0x736   :  { %v2136_v38 = vpop.permute.xlu0 %2135 }
 0x737   :  { %v2311_v37 = vpop.permute.xlu1 %2310  ;;  %v2140_v1 = vmul.f32 %v2136_v38, %v2131_v16 }
 0x738   :  { %v2316_v29 = vmul.f32 %v2311_v37, %v12395_v30  ;;  %9861 = vmatpush3.bf16.msra.mxu0 %v11951_v56 }
 0x739   :  { %9862 = vmatprep.subr.bf16.mxu0 %v13714_v58 }
 0x73a   :  { %v12542_v25 = vadd.f32 %v2317_v46, %v2316_v29  ;;  %v2138_v41 = vpop.permute.xlu0 %2137 }
 0x73b   :  { %v2134_v42 = vpop.permute.xlu1 %2133 }
 0x73c   :  { %10958 = vtanh.f32 %v12542_v25  ;;  %v2139_v19 = vmul.f32 %v2134_v42, %v12401_v53  ;;  %9864 = vmatpush3.bf16.msra.mxu0 %v11955_v63  ;;  %v13741_v42 = vld [vmem:[#allocation23_spill] sm:$0xff] }
 0x73d   :  { %9865 = vmatprep.subr.bf16.mxu0 %v13714_v58 }
 0x73e   :  { %v12548_v34 = vadd.f32 %v2140_v1, %v2139_v19  ;;  %v13742_v1 = vld [vmem:[#allocation24_spill] sm:$0xff]  ;;  %v13743_v19 = vld [vmem:[#allocation26_spill] sm:$0xff] }
 0x73f   :  { %v2315_v16 = vpop.permute.xlu1 %2314 }
 0x740   :  { %10960 = vtanh.f32 %v12548_v34  ;;  %9867 = vmatpush3.bf16.msra.mxu0 %v11959_v7 }
 0x741   :  { %9868 = vmatprep.subr.bf16.mxu0 %v13714_v58 }
 0x744   :  { %9870 = vmatpush3.bf16.msra.mxu0 %v11963_v17 }
 0x745   :  { %9895 = vmatprep.subr.bf16.mxu0 %v13714_v58 }
 0x746   :  { %v10959_v30 = vpop.eup %10958 }
 0x747   :  { %v2320_v8 = vmul.f32 %v10959_v30, %v2315_v16  ;;  %v13744_v30 = vld [vmem:[#allocation27_spill] sm:$0xff]  ;;  %v13745_v16 = vld [vmem:[#allocation30_spill] sm:$0xff] }
 0x749   :  { %7955 = vmatmul.mubr.f32.vlgmr.msra.gmra.mrb[22].mxu1 %v2320_v8 }
 0x74a   :  { %v10961_v53 = vpop.eup %10960  ;;  %9873 = vmatpush3.bf16.msra.mxu1 %v12094_v24  ;;  %8024 = vmatprep.mubr.msk.f32.mxu1 %vm11357_vm0, %v13713_v59 }
 0x74b   :  { %9874 = vmatprep.subr.bf16.mxu1 %v13714_v58  ;;  %v12559_v2 = vmul.f32 %v10961_v53, %v2138_v41  ;;  %v13747_v53 = vld [vmem:[#allocation36_spill] sm:$0xff] }
 0x74d   :  { %13740 = vst [vmem:[#allocation31_spill] sm:$0xff] %v12559_v2  ;;  %7990 = vmatmul.mubr.f32.vlgmr.msra.gmra.mrb[40].mxu0 %v12559_v2  ;;  %v2329_v52 = vpop.permute.xlu0 %2328 }
 0x74e   :  { %9876 = vmatpush3.bf16.msra.mxu1 %v12097_v28  ;;  %9897 = vmatpush3.bf16.msra.mxu0 %v11645_v18  ;;  %v2333_v37 = vmul.f32 %v2329_v52, %v12516_v21 }
 0x74f   :  { %9877 = vmatprep.subr.bf16.mxu1 %v13714_v58  ;;  %9898 = vmatprep.subr.bf16.mxu0 %v13714_v58 }
 0x750   :  { %8059 = vmatprep.mubr.msk.f32.mxu0 %vm11357_vm0, %v13713_v59 }
 0x752   :  { %9879 = vmatpush3.bf16.msra.mxu1 %v12109_v5  ;;  %9900 = vmatpush3.bf16.msra.mxu0 %v11654_v22 }
 0x753   :  { %v2327_v4 = vpop.permute.xlu1 %2326  ;;  %9880 = vmatprep.subr.bf16.mxu1 %v13714_v58  ;;  %9901 = vmatprep.subr.bf16.mxu0 %v13714_v58 }
 0x754   :  { %v2332_v46 = vmul.f32 %v2327_v4, %v12425_v11 }
 0x756   :  { %v12574_v29 = vadd.f32 %v2333_v37, %v2332_v46  ;;  %9882 = vmatpush3.bf16.msra.mxu1 %v12116_v43  ;;  %9903 = vmatpush3.bf16.msra.mxu0 %v11682_v35 }
 0x757   :  { %9883 = vmatprep.subr.bf16.mxu1 %v13714_v58  ;;  %9904 = vmatprep.subr.bf16.mxu0 %v13714_v58  ;;  %v2331_v21 = vpop.permute.xlu1 %2330 }
 0x758   :  { %10962 = vtanh.f32 %v12574_v29 }
 0x75a   :  { %9885 = vmatpush3.bf16.msra.mxu1 %v12124_v45  ;;  %9906 = vmatpush3.bf16.msra.mxu0 %v11710_v50 }
 0x75b   :  { %9886 = vmatprep.subr.bf16.mxu1 %v13714_v58  ;;  %9907 = vmatprep.subr.bf16.mxu0 %v13714_v58 }
 0x75e   :  { %9888 = vmatpush3.bf16.msra.mxu1 %v12131_v33  ;;  %9909 = vmatpush3.bf16.msra.mxu0 %v11732_v62 }
 0x75f   :  { %9889 = vmatprep.subr.bf16.mxu1 %v13714_v58  ;;  %9910 = vmatprep.subr.bf16.mxu0 %v13714_v58 }
 0x762   :  { %9891 = vmatpush3.bf16.msra.mxu1 %v12137_v14  ;;  %9912 = vmatpush3.bf16.msra.mxu0 %v11754_v13  ;;  %v10963_v11 = vpop.eup %10962 }
 0x763   :  { %9892 = vmatprep.subr.bf16.mxu1 %v13714_v58  ;;  %9913 = vmatprep.subr.bf16.mxu0 %v13714_v58  ;;  %v2336_v38 = vmul.f32 %v10963_v11, %v2331_v21  ;;  %v12656_v11 = vld [vmem:[%s13620_s9] ss:$0 sm:$0xff] }
 0x764   :  { %13748 = vst [vmem:[#allocation32_spill] sm:$0xff] %v12656_v11 }
 0x766   :  { %9894 = vmatpush3.bf16.msra.mxu1 %v12143_v32  ;;  %9915 = vmatpush3.bf16.msra.mxu0 %v11776_v27 }
 0x767   :  { %9916 = vmatprep.subr.bf16.mxu0 %v13714_v58  ;;  %9919 = vmatprep.subr.bf16.mxu1 %v13714_v58 }
 0x769   :  { %8025 = vmatmul.mubr.f32.vlgmr.msra.gmra.mrb[24].mxu1 %v2336_v38 }
 0x76a   :  { %9918 = vmatpush3.bf16.msra.mxu0 %v11795_v39  ;;  %9921 = vmatpush3.bf16.msra.mxu1 %v11811_v49 }
 0x76b   :  { %9922 = vmatprep.subr.bf16.mxu1 %v13714_v58  ;;  %8094 = vmatprep.mubr.msk.f32.mxu1 %vm11357_vm0, %v13713_v59 }
 0x76c   :  { %9943 = vmatprep.subr.bf16.mxu0 %v13714_v58 }
 0x76d   :  { %8060 = vmatmul.mubr.f32.vlgmr.msra.gmra.mrb[42].mxu0 %v2320_v8  ;;  %v13746_v8 = vld [vmem:[#allocation33_spill] sm:$0xff] }
 0x76e   :  { %9924 = vmatpush3.bf16.msra.mxu1 %v11816_v54  ;;  %9945 = vmatpush3.bf16.msra.mxu0 %v11887_v47 }
 0x76f   :  { %9925 = vmatprep.subr.bf16.mxu1 %v13714_v58  ;;  %9946 = vmatprep.subr.bf16.mxu0 %v13714_v58 }
 0x770   :  { %8129 = vmatprep.mubr.msk.f32.mxu0 %vm11357_vm0, %v13713_v59 }
 0x772   :  { %9927 = vmatpush3.bf16.msra.mxu1 %v11823_v57  ;;  %9948 = vmatpush3.bf16.msra.mxu0 %v11890_v51 }
 0x773   :  { %9928 = vmatprep.subr.bf16.mxu1 %v13714_v58  ;;  %9949 = vmatprep.subr.bf16.mxu0 %v13714_v58 }
 0x776   :  { %9930 = vmatpush3.bf16.msra.mxu1 %v11827_v60  ;;  %9951 = vmatpush3.bf16.msra.mxu0 %v11894_v55 }
 0x777   :  { %9931 = vmatprep.subr.bf16.mxu1 %v13714_v58  ;;  %9952 = vmatprep.subr.bf16.mxu0 %v13714_v58 }
 0x77a   :  { %9933 = vmatpush3.bf16.msra.mxu1 %v11831_v0  ;;  %9954 = vmatpush3.bf16.msra.mxu0 %v11898_v61 }
 0x77b   :  { %9934 = vmatprep.subr.bf16.mxu1 %v13714_v58  ;;  %9955 = vmatprep.subr.bf16.mxu0 %v13714_v58 }
 0x77e   :  { %9936 = vmatpush3.bf16.msra.mxu1 %v11835_v6  ;;  %9957 = vmatpush3.bf16.msra.mxu0 %v11907_v15 }
 0x77f   :  { %9937 = vmatprep.subr.bf16.mxu1 %v13714_v58  ;;  %9958 = vmatprep.subr.bf16.mxu0 %v13714_v58 }
 0x782   :  { %9939 = vmatpush3.bf16.msra.mxu1 %v11839_v9  ;;  %9960 = vmatpush3.bf16.msra.mxu0 %v11915_v23 }
 0x783   :  { %9940 = vmatprep.subr.bf16.mxu1 %v13714_v58  ;;  %9961 = vmatprep.subr.bf16.mxu0 %v13714_v58 }
 0x786   :  { %9942 = vmatpush3.bf16.msra.mxu1 %v11843_v12  ;;  %9963 = vmatpush3.bf16.msra.mxu0 %v11921_v26 }
 0x787   :  { %9964 = vmatprep.subr.bf16.mxu0 %v13714_v58  ;;  %9967 = vmatprep.subr.bf16.mxu1 %v13714_v58 }
 0x789   :  { %8095 = vmatmul.mubr.f32.vlgmr.msra.gmra.mrb[26].mxu1 %v2336_v38 }
 0x78a   :  { %9966 = vmatpush3.bf16.msra.mxu0 %v11928_v31  ;;  %9969 = vmatpush3.bf16.msra.mxu1 %v11901_v10 }
 0x78b   :  { %9970 = vmatprep.subr.bf16.mxu1 %v13714_v58  ;;  %9991 = vmatprep.subr.bf16.mxu0 %v13714_v58 }
 0x78c   :  { %8164 = vmatprep.mubr.msk.f32.mxu1 %vm11357_vm0, %v13713_v59 }
 0x78e   :  { %9972 = vmatpush3.bf16.msra.mxu1 %v13741_v42 }
 0x78f   :  { %9973 = vmatprep.subr.bf16.mxu1 %v13714_v58 }
 0x792   :  { %9975 = vmatpush3.bf16.msra.mxu1 %v13742_v1 }
 0x793   :  { %9976 = vmatprep.subr.bf16.mxu1 %v13714_v58 }
 0x796   :  { %9978 = vmatpush3.bf16.msra.mxu1 %v13743_v19 }
 0x797   :  { %9979 = vmatprep.subr.bf16.mxu1 %v13714_v58 }
 0x79a   :  { %9981 = vmatpush3.bf16.msra.mxu1 %v13744_v30 }
 0x79b   :  { %9982 = vmatprep.subr.bf16.mxu1 %v13714_v58 }
 0x79e   :  { %9984 = vmatpush3.bf16.msra.mxu1 %v13745_v16 }
 0x79f   :  { %9985 = vmatprep.subr.bf16.mxu1 %v13714_v58 }
 0x7a2   :  { %9987 = vmatpush3.bf16.msra.mxu1 %v13746_v8 }
 0x7a3   :  { %9988 = vmatprep.subr.bf16.mxu1 %v13714_v58 }
 0x7a6   :  { %9990 = vmatpush3.bf16.msra.mxu1 %v13747_v53 }
 0x7a7   :  { %10015 = vmatprep.subr.bf16.mxu1 %v13714_v58 }
 0x7fa   :  { %v2403_v41 = vpop.f32.mrb[38].mxu0 }
 0x7fb   :  { %v7921_v52 = vpop.f32.mrb[39].mxu0 }
 0x81c   :  { %v2473_v4 = vpop.f32.mrb[22].mxu1 }
 0x81d   :  { %v2474_v37 = vadd.f32 %v2473_v4, %v2403_v41  ;;  %v7956_v46 = vpop.f32.mrb[23].mxu1 }
 0x81f   :  { %v2477_v21 = vadd.f32 %v12656_v11, %v2474_v37  ;;  %v12665_v37 = vld [vmem:[%s13624_s13] ss:$0 sm:$0xff] }
 0x820   :  { %v2544_v38 = vpop.f32.mrb[40].mxu0 }
 0x821   :  { %v2619_v20 = vmul.f32 0.5, %v2477_v21  ;;  %10964 = vtanh.f32 %v2477_v21  ;;  %v7991_v2 = vpop.f32.mrb[41].mxu0 }
 0x823   :  { %10966 = vtanh.f32 %v2619_v20 }
 0x82b   :  { %v10965_v53 = vpop.eup %10964 }
 0x82c   :  { %2626 = vrot.lane.b32.xlu1 %v10965_v53, %s11360_s8  ;;  %v13749_v53 = vld [vmem:[#allocation34_spill] sm:$0xff] }
 0x82d   :  { %v10967_v8 = vpop.eup %10966 }
 0x82e   :  { %v2621_v52 = vmul.f32 0.5, %v10967_v8 }
 0x830   :  { %v2622_v16 = vadd.f32 0.5, %v2621_v52 }
 0x832   :  { %2624 = vrot.lane.b32.xlu0 %v2622_v16, %s11361_s0 }
 0x836   :  { %2628 = vrot.lane.b32.xlu0 %v2622_v16, %s11362_s7 }
 0x83c   :  { %v2614_v41 = vpop.f32.mrb[24].mxu1 }
 0x83d   :  { %v2615_v4 = vadd.f32 %v2614_v41, %v2544_v38  ;;  %v8026_v46 = vpop.f32.mrb[25].mxu1 }
 0x83f   :  { %v2618_v20 = vadd.f32 %v12665_v37, %v2615_v4 }
 0x840   :  { %v2736_v2 = vpop.f32.mrb[42].mxu0 }
 0x841   :  { %v2635_v21 = vmul.f32 0.5, %v2618_v20  ;;  %v2740_v11 = vadd.f32 %v2736_v2, %v13749_v53  ;;  %v8061_v8 = vpop.f32.mrb[43].mxu0 }
 0x843   :  { %10968 = vtanh.f32 %v2635_v21  ;;  %v2812_v52 = vmul.f32 0.5, %v2740_v11 }
 0x844   :  { %10970 = vtanh.f32 %v2740_v11 }
 0x845   :  { %10972 = vtanh.f32 %v2812_v52 }
 0x846   :  { %10974 = vtanh.f32 %v2618_v20  ;;  %v13750_v20 = vld [vmem:[#allocation35_spill] sm:$0xff] }
 0x84d   :  { %v10969_v30 = vpop.eup %10968 }
 0x84e   :  { %v10971_v38 = vpop.eup %10970  ;;  %v2637_v19 = vmul.f32 0.5, %v10969_v30 }
 0x84f   :  { %v10973_v41 = vpop.eup %10972  ;;  %2819 = vrot.lane.b32.xlu0 %v10971_v38, %s11360_s8 }
 0x850   :  { %v2814_v46 = vmul.f32 0.5, %v10973_v41  ;;  %v10975_v1 = vpop.eup %10974  ;;  %v2638_v4 = vadd.f32 0.5, %v2637_v19 }
 0x852   :  { %v2815_v42 = vadd.f32 0.5, %v2814_v46 }
 0x853   :  { %2642 = vrot.lane.b32.xlu0 %v10975_v1, %s11360_s8 }
 0x854   :  { %2817 = vrot.lane.b32.xlu1 %v2815_v42, %s11361_s0 }
 0x857   :  { %2644 = vrot.lane.b32.xlu0 %v2638_v4, %s11362_s7 }
 0x858   :  { %2640 = vrot.lane.b32.xlu1 %v2638_v4, %s11361_s0 }
 0x85c   :  { %2821 = vrot.lane.b32.xlu1 %v2815_v42, %s11362_s7  ;;  %v2807_v11 = vpop.f32.mrb[26].mxu1 }
 0x85d   :  { %v2811_v2 = vadd.f32 %v2807_v11, %v13750_v20  ;;  %v8096_v21 = vpop.f32.mrb[27].mxu1 }
 0x85f   :  { %v2828_v53 = vmul.f32 0.5, %v2811_v2  ;;  %10976 = vtanh.f32 %v2811_v2 }
 0x861   :  { %10978 = vtanh.f32 %v2828_v53 }
 0x869   :  { %v10977_v30 = vpop.eup %10976 }
 0x86a   :  { %2835 = vrot.lane.b32.xlu0 %v10977_v30, %s11360_s8 }
 0x86b   :  { %v10979_v1 = vpop.eup %10978 }
 0x86c   :  { %v2830_v8 = vmul.f32 0.5, %v10979_v1 }
 0x86e   :  { %v12677_v52 = vadd.f32 0.5, %v2830_v8 }
 0x870   :  { %2833 = vrot.lane.b32.xlu1 %v12677_v52, %s11361_s0 }
 0x874   :  { %2837 = vrot.lane.b32.xlu1 %v12677_v52, %s11362_s7 }
 0x89e   :  { %v2627_v19 = vpop.permute.xlu1 %2626 }
 0x89f   :  { %v2631_v41 = vmul.f32 %v2627_v19, %v2622_v16 }
 0x8a4   :  { %v2625_v38 = vpop.permute.xlu0 %2624 }
 0x8a5   :  { %v2630_v46 = vmul.f32 %v2625_v38, %v12523_v3 }
 0x8a7   :  { %v12684_v11 = vadd.f32 %v2631_v41, %v2630_v46 }
 0x8a8   :  { %v2629_v2 = vpop.permute.xlu0 %2628 }
 0x8a9   :  { %10980 = vtanh.f32 %v12684_v11 }
 0x8b3   :  { %v10981_v20 = vpop.eup %10980 }
 0x8b4   :  { %v12687_v21 = vmul.f32 %v10981_v20, %v2629_v2 }
 0x8b6   :  { %13751 = vst [vmem:[#allocation34_spill] sm:$0xff] %v12687_v21  ;;  %8130 = vmatmul.mubr.f32.vlgmr.msra.gmra.mrb[44].mxu0 %v12687_v21 }
 0x8b7   :  { %9993 = vmatpush3.bf16.msra.mxu0 %v11932_v36  ;;  %8199 = vmatprep.mubr.msk.f32.mxu0 %vm11357_vm0, %v13713_v59 }
 0x8b8   :  { %9994 = vmatprep.subr.bf16.mxu0 %v13714_v58 }
 0x8bb   :  { %9996 = vmatpush3.bf16.msra.mxu0 %v11937_v40 }
 0x8bc   :  { %9997 = vmatprep.subr.bf16.mxu0 %v13714_v58 }
 0x8bf   :  { %9999 = vmatpush3.bf16.msra.mxu0 %v11943_v44 }
 0x8c0   :  { %10000 = vmatprep.subr.bf16.mxu0 %v13714_v58 }
 0x8c1   :  { %v2820_v3 = vpop.permute.xlu0 %2819 }
 0x8c2   :  { %v2824_v53 = vmul.f32 %v2820_v3, %v2815_v42 }
 0x8c3   :  { %10002 = vmatpush3.bf16.msra.mxu0 %v11947_v48 }
 0x8c4   :  { %10003 = vmatprep.subr.bf16.mxu0 %v13714_v58 }
 0x8c5   :  { %v2643_v1 = vpop.permute.xlu0 %2642 }
 0x8c6   :  { %v2818_v16 = vpop.permute.xlu1 %2817  ;;  %v2647_v38 = vmul.f32 %v2643_v1, %v2638_v4 }
 0x8c7   :  { %v2823_v30 = vmul.f32 %v2818_v16, %v12542_v25  ;;  %10005 = vmatpush3.bf16.msra.mxu0 %v11951_v56 }
 0x8c8   :  { %10006 = vmatprep.subr.bf16.mxu0 %v13714_v58 }
 0x8c9   :  { %v12703_v8 = vadd.f32 %v2824_v53, %v2823_v30  ;;  %v2645_v20 = vpop.permute.xlu0 %2644 }
 0x8ca   :  { %v2641_v19 = vpop.permute.xlu1 %2640 }
 0x8cb   :  { %10982 = vtanh.f32 %v12703_v8  ;;  %v2646_v41 = vmul.f32 %v2641_v19, %v12548_v34  ;;  %10008 = vmatpush3.bf16.msra.mxu0 %v11955_v63 }
 0x8cc   :  { %10009 = vmatprep.subr.bf16.mxu0 %v13714_v58 }
 0x8cd   :  { %v12709_v42 = vadd.f32 %v2647_v38, %v2646_v41  ;;  %v13753_v38 = vld [vmem:[#allocation23_spill] sm:$0xff]  ;;  %v13754_v41 = vld [vmem:[#allocation24_spill] sm:$0xff] }
 0x8ce   :  { %v2822_v4 = vpop.permute.xlu1 %2821 }
 0x8cf   :  { %10984 = vtanh.f32 %v12709_v42  ;;  %10011 = vmatpush3.bf16.msra.mxu0 %v11959_v7 }
 0x8d0   :  { %10012 = vmatprep.subr.bf16.mxu0 %v13714_v58 }
 0x8d3   :  { %10014 = vmatpush3.bf16.msra.mxu0 %v11963_v17 }
 0x8d4   :  { %10039 = vmatprep.subr.bf16.mxu0 %v13714_v58 }
 0x8d5   :  { %v10983_v25 = vpop.eup %10982 }
 0x8d6   :  { %v2827_v46 = vmul.f32 %v10983_v25, %v2822_v4  ;;  %v13755_v25 = vld [vmem:[#allocation26_spill] sm:$0xff]  ;;  %v13756_v4 = vld [vmem:[#allocation27_spill] sm:$0xff] }
 0x8d8   :  { %8165 = vmatmul.mubr.f32.vlgmr.msra.gmra.mrb[28].mxu1 %v2827_v46 }
 0x8d9   :  { %v10985_v34 = vpop.eup %10984  ;;  %10017 = vmatpush3.bf16.msra.mxu1 %v12094_v24  ;;  %8234 = vmatprep.mubr.msk.f32.mxu1 %vm11357_vm0, %v13713_v59 }
 0x8da   :  { %10018 = vmatprep.subr.bf16.mxu1 %v13714_v58  ;;  %v12720_v2 = vmul.f32 %v10985_v34, %v2645_v20  ;;  %v13758_v34 = vld [vmem:[#allocation33_spill] sm:$0xff]  ;;  %v13759_v20 = vld [vmem:[#allocation36_spill] sm:$0xff] }
 0x8dc   :  { %13752 = vst [vmem:[#allocation35_spill] sm:$0xff] %v12720_v2  ;;  %8200 = vmatmul.mubr.f32.vlgmr.msra.gmra.mrb[46].mxu0 %v12720_v2  ;;  %v2836_v3 = vpop.permute.xlu0 %2835 }
 0x8dd   :  { %10020 = vmatpush3.bf16.msra.mxu1 %v12097_v28  ;;  %10041 = vmatpush3.bf16.msra.mxu0 %v11645_v18  ;;  %v2840_v53 = vmul.f32 %v2836_v3, %v12677_v52 }
 0x8de   :  { %10021 = vmatprep.subr.bf16.mxu1 %v13714_v58  ;;  %10042 = vmatprep.subr.bf16.mxu0 %v13714_v58 }
 0x8df   :  { %8269 = vmatprep.mubr.msk.f32.mxu0 %vm11357_vm0, %v13713_v59 }
 0x8e1   :  { %10023 = vmatpush3.bf16.msra.mxu1 %v12109_v5  ;;  %10044 = vmatpush3.bf16.msra.mxu0 %v11654_v22 }
 0x8e2   :  { %v2834_v16 = vpop.permute.xlu1 %2833  ;;  %10024 = vmatprep.subr.bf16.mxu1 %v13714_v58  ;;  %10045 = vmatprep.subr.bf16.mxu0 %v13714_v58 }
 0x8e3   :  { %v2839_v30 = vmul.f32 %v2834_v16, %v12574_v29 }
 0x8e5   :  { %v12735_v1 = vadd.f32 %v2840_v53, %v2839_v30  ;;  %10026 = vmatpush3.bf16.msra.mxu1 %v12116_v43  ;;  %10047 = vmatpush3.bf16.msra.mxu0 %v11682_v35 }
 0x8e6   :  { %10027 = vmatprep.subr.bf16.mxu1 %v13714_v58  ;;  %10048 = vmatprep.subr.bf16.mxu0 %v13714_v58  ;;  %v2838_v52 = vpop.permute.xlu1 %2837 }
 0x8e7   :  { %10986 = vtanh.f32 %v12735_v1 }
 0x8e9   :  { %10029 = vmatpush3.bf16.msra.mxu1 %v12124_v45  ;;  %10050 = vmatpush3.bf16.msra.mxu0 %v11710_v50 }
 0x8ea   :  { %10030 = vmatprep.subr.bf16.mxu1 %v13714_v58  ;;  %10051 = vmatprep.subr.bf16.mxu0 %v13714_v58 }
 0x8ed   :  { %10032 = vmatpush3.bf16.msra.mxu1 %v12131_v33  ;;  %10053 = vmatpush3.bf16.msra.mxu0 %v11732_v62 }
 0x8ee   :  { %10033 = vmatprep.subr.bf16.mxu1 %v13714_v58  ;;  %10054 = vmatprep.subr.bf16.mxu0 %v13714_v58 }
 0x8f1   :  { %10035 = vmatpush3.bf16.msra.mxu1 %v12137_v14  ;;  %10056 = vmatpush3.bf16.msra.mxu0 %v11754_v13  ;;  %v10987_v29 = vpop.eup %10986 }
 0x8f2   :  { %10036 = vmatprep.subr.bf16.mxu1 %v13714_v58  ;;  %10057 = vmatprep.subr.bf16.mxu0 %v13714_v58  ;;  %v2843_v19 = vmul.f32 %v10987_v29, %v2838_v52  ;;  %v13760_v52 = vld [vmem:[#allocation32_spill] sm:$0xff] }
 0x8f5   :  { %10038 = vmatpush3.bf16.msra.mxu1 %v12143_v32  ;;  %10059 = vmatpush3.bf16.msra.mxu0 %v11776_v27 }
 0x8f6   :  { %10060 = vmatprep.subr.bf16.mxu0 %v13714_v58  ;;  %10063 = vmatprep.subr.bf16.mxu1 %v13714_v58 }
 0x8f8   :  { %8235 = vmatmul.mubr.f32.vlgmr.msra.gmra.mrb[30].mxu1 %v2843_v19 }
 0x8f9   :  { %10062 = vmatpush3.bf16.msra.mxu0 %v11795_v39  ;;  %10065 = vmatpush3.bf16.msra.mxu1 %v11811_v49 }
 0x8fa   :  { %10066 = vmatprep.subr.bf16.mxu1 %v13714_v58  ;;  %8304 = vmatprep.mubr.msk.f32.mxu1 %vm11357_vm0, %v13713_v59 }
 0x8fb   :  { %10087 = vmatprep.subr.bf16.mxu0 %v13714_v58 }
 0x8fc   :  { %8270 = vmatmul.mubr.f32.vlgmr.msra.gmra.mrb[48].mxu0 %v2827_v46  ;;  %v13757_v46 = vld [vmem:[#allocation30_spill] sm:$0xff] }
 0x8fd   :  { %10068 = vmatpush3.bf16.msra.mxu1 %v11816_v54  ;;  %10089 = vmatpush3.bf16.msra.mxu0 %v11887_v47 }
 0x8fe   :  { %10069 = vmatprep.subr.bf16.mxu1 %v13714_v58  ;;  %10090 = vmatprep.subr.bf16.mxu0 %v13714_v58 }
 0x8ff   :  { %8339 = vmatprep.mubr.msk.f32.mxu0 %vm11357_vm0, %v13713_v59 }
 0x901   :  { %10071 = vmatpush3.bf16.msra.mxu1 %v11823_v57  ;;  %10092 = vmatpush3.bf16.msra.mxu0 %v11890_v51 }
 0x902   :  { %10072 = vmatprep.subr.bf16.mxu1 %v13714_v58  ;;  %10093 = vmatprep.subr.bf16.mxu0 %v13714_v58 }
 0x905   :  { %10074 = vmatpush3.bf16.msra.mxu1 %v11827_v60  ;;  %10095 = vmatpush3.bf16.msra.mxu0 %v11894_v55 }
 0x906   :  { %10075 = vmatprep.subr.bf16.mxu1 %v13714_v58  ;;  %10096 = vmatprep.subr.bf16.mxu0 %v13714_v58 }
 0x909   :  { %10077 = vmatpush3.bf16.msra.mxu1 %v11831_v0  ;;  %10098 = vmatpush3.bf16.msra.mxu0 %v11898_v61 }
 0x90a   :  { %10078 = vmatprep.subr.bf16.mxu1 %v13714_v58  ;;  %10099 = vmatprep.subr.bf16.mxu0 %v13714_v58 }
 0x90d   :  { %10080 = vmatpush3.bf16.msra.mxu1 %v11835_v6  ;;  %10101 = vmatpush3.bf16.msra.mxu0 %v11907_v15 }
 0x90e   :  { %10081 = vmatprep.subr.bf16.mxu1 %v13714_v58  ;;  %10102 = vmatprep.subr.bf16.mxu0 %v13714_v58 }
 0x911   :  { %10083 = vmatpush3.bf16.msra.mxu1 %v11839_v9  ;;  %10104 = vmatpush3.bf16.msra.mxu0 %v11915_v23 }
 0x912   :  { %10084 = vmatprep.subr.bf16.mxu1 %v13714_v58  ;;  %10105 = vmatprep.subr.bf16.mxu0 %v13714_v58 }
 0x915   :  { %10086 = vmatpush3.bf16.msra.mxu1 %v11843_v12  ;;  %10107 = vmatpush3.bf16.msra.mxu0 %v11921_v26 }
 0x916   :  { %10108 = vmatprep.subr.bf16.mxu0 %v13714_v58  ;;  %10111 = vmatprep.subr.bf16.mxu1 %v13714_v58 }
 0x918   :  { %8305 = vmatmul.mubr.f32.vlgmr.msra.gmra.mrb[32].mxu1 %v2843_v19 }
 0x919   :  { %10110 = vmatpush3.bf16.msra.mxu0 %v11928_v31  ;;  %10113 = vmatpush3.bf16.msra.mxu1 %v11901_v10 }
 0x91a   :  { %10114 = vmatprep.subr.bf16.mxu1 %v13714_v58  ;;  %10135 = vmatprep.subr.bf16.mxu0 %v13714_v58 }
 0x91b   :  { %8374 = vmatprep.mubr.msk.f32.mxu1 %vm11357_vm0, %v13713_v59 }
 0x91d   :  { %10116 = vmatpush3.bf16.msra.mxu1 %v13753_v38 }
 0x91e   :  { %10117 = vmatprep.subr.bf16.mxu1 %v13714_v58 }
 0x921   :  { %10119 = vmatpush3.bf16.msra.mxu1 %v13754_v41 }
 0x922   :  { %10120 = vmatprep.subr.bf16.mxu1 %v13714_v58 }
 0x925   :  { %10122 = vmatpush3.bf16.msra.mxu1 %v13755_v25 }
 0x926   :  { %10123 = vmatprep.subr.bf16.mxu1 %v13714_v58 }
 0x929   :  { %10125 = vmatpush3.bf16.msra.mxu1 %v13756_v4 }
 0x92a   :  { %10126 = vmatprep.subr.bf16.mxu1 %v13714_v58 }
 0x92d   :  { %10128 = vmatpush3.bf16.msra.mxu1 %v13757_v46 }
 0x92e   :  { %10129 = vmatprep.subr.bf16.mxu1 %v13714_v58 }
 0x931   :  { %10131 = vmatpush3.bf16.msra.mxu1 %v13758_v34 }
 0x932   :  { %10132 = vmatprep.subr.bf16.mxu1 %v13714_v58 }
 0x935   :  { %10134 = vmatpush3.bf16.msra.mxu1 %v13759_v20 }
 0x936   :  { %10159 = vmatprep.subr.bf16.mxu1 %v13714_v58 }
 0x989   :  { %v2910_v3 = vpop.f32.mrb[44].mxu0 }
 0x98a   :  { %v8131_v16 = vpop.f32.mrb[45].mxu0 }
 0x9ab   :  { %v2980_v53 = vpop.f32.mrb[28].mxu1 }
 0x9ac   :  { %v2981_v30 = vadd.f32 %v2980_v53, %v2910_v3  ;;  %v8166_v29 = vpop.f32.mrb[29].mxu1 }
 0x9ae   :  { %v2984_v19 = vadd.f32 %v13760_v52, %v2981_v30 }
 0x9af   :  { %v3051_v21 = vpop.f32.mrb[46].mxu0 }
 0x9b0   :  { %v3126_v2 = vmul.f32 0.5, %v2984_v19  ;;  %10988 = vtanh.f32 %v2984_v19  ;;  %v8201_v46 = vpop.f32.mrb[47].mxu0  ;;  %v13761_v19 = vld [vmem:[#allocation37_spill] sm:$0xff] }
 0x9b2   :  { %10990 = vtanh.f32 %v3126_v2 }
 0x9ba   :  { %v10989_v4 = vpop.eup %10988 }
 0x9bb   :  { %3133 = vrot.lane.b32.xlu1 %v10989_v4, %s11360_s8 }
 0x9bc   :  { %v10991_v34 = vpop.eup %10990 }
 0x9bd   :  { %v3128_v25 = vmul.f32 0.5, %v10991_v34 }
 0x9bf   :  { %v3129_v20 = vadd.f32 0.5, %v3128_v25 }
 0x9c1   :  { %3131 = vrot.lane.b32.xlu0 %v3129_v20, %s11361_s0 }
 0x9c5   :  { %3135 = vrot.lane.b32.xlu0 %v3129_v20, %s11362_s7 }
 0x9cb   :  { %v3121_v16 = vpop.f32.mrb[30].mxu1 }
 0x9cc   :  { %v3122_v3 = vadd.f32 %v3121_v16, %v3051_v21  ;;  %v8236_v53 = vpop.f32.mrb[31].mxu1 }
 0x9ce   :  { %v3125_v30 = vadd.f32 %v12665_v37, %v3122_v3 }
 0x9cf   :  { %v3243_v29 = vpop.f32.mrb[48].mxu0 }
 0x9d0   :  { %v3142_v52 = vmul.f32 0.5, %v3125_v30  ;;  %v3247_v46 = vadd.f32 %v3243_v29, %v13761_v19  ;;  %v8271_v2 = vpop.f32.mrb[49].mxu0 }
 0x9d2   :  { %10992 = vtanh.f32 %v3142_v52  ;;  %v3319_v41 = vmul.f32 0.5, %v3247_v46  ;;  %v13762_v52 = vld [vmem:[#allocation38_spill] sm:$0xff] }
 0x9d3   :  { %10994 = vtanh.f32 %v3247_v46 }
 0x9d4   :  { %10996 = vtanh.f32 %v3319_v41 }
 0x9d5   :  { %10998 = vtanh.f32 %v3125_v30 }
 0x9dc   :  { %v10993_v25 = vpop.eup %10992 }
 0x9dd   :  { %v10995_v4 = vpop.eup %10994  ;;  %v3144_v21 = vmul.f32 0.5, %v10993_v25 }
 0x9de   :  { %v10997_v34 = vpop.eup %10996  ;;  %3326 = vrot.lane.b32.xlu0 %v10995_v4, %s11360_s8 }
 0x9df   :  { %v3321_v38 = vmul.f32 0.5, %v10997_v34  ;;  %v10999_v16 = vpop.eup %10998  ;;  %v3145_v3 = vadd.f32 0.5, %v3144_v21 }
 0x9e1   :  { %v3322_v53 = vadd.f32 0.5, %v3321_v38 }
 0x9e2   :  { %3149 = vrot.lane.b32.xlu0 %v10999_v16, %s11360_s8 }
 0x9e3   :  { %3324 = vrot.lane.b32.xlu1 %v3322_v53, %s11361_s0 }
 0x9e6   :  { %3151 = vrot.lane.b32.xlu0 %v3145_v3, %s11362_s7 }
 0x9e7   :  { %3147 = vrot.lane.b32.xlu1 %v3145_v3, %s11361_s0 }
 0x9eb   :  { %3328 = vrot.lane.b32.xlu1 %v3322_v53, %s11362_s7  ;;  %v3314_v41 = vpop.f32.mrb[32].mxu1 }
 0x9ec   :  { %v3318_v30 = vadd.f32 %v3314_v41, %v13762_v52  ;;  %v8306_v29 = vpop.f32.mrb[33].mxu1 }
 0x9ee   :  { %v3335_v19 = vmul.f32 0.5, %v3318_v30  ;;  %11000 = vtanh.f32 %v3318_v30 }
 0x9f0   :  { %11002 = vtanh.f32 %v3335_v19 }
 0x9f8   :  { %v11001_v46 = vpop.eup %11000 }
 0x9f9   :  { %3342 = vrot.lane.b32.xlu0 %v11001_v46, %s11360_s8 }
 0x9fa   :  { %v11003_v38 = vpop.eup %11002 }
 0x9fb   :  { %v3337_v2 = vmul.f32 0.5, %v11003_v38 }
 0x9fd   :  { %v12828_v25 = vadd.f32 0.5, %v3337_v2 }
 0x9ff   :  { %3340 = vrot.lane.b32.xlu1 %v12828_v25, %s11361_s0 }
 0xa03   :  { %3344 = vrot.lane.b32.xlu1 %v12828_v25, %s11362_s7 }
 0xa2d   :  { %v3134_v4 = vpop.permute.xlu1 %3133 }
 0xa2e   :  { %v3138_v21 = vmul.f32 %v3134_v4, %v3129_v20 }
 0xa33   :  { %v3132_v34 = vpop.permute.xlu0 %3131 }
 0xa34   :  { %v3137_v16 = vmul.f32 %v3132_v34, %v12684_v11 }
 0xa36   :  { %v12835_v41 = vadd.f32 %v3138_v21, %v3137_v16 }
 0xa37   :  { %v3136_v30 = vpop.permute.xlu0 %3135 }
 0xa38   :  { %11004 = vtanh.f32 %v12835_v41 }
 0xa42   :  { %v11005_v52 = vpop.eup %11004 }
 0xa43   :  { %v12838_v29 = vmul.f32 %v11005_v52, %v3136_v30 }
 0xa45   :  { %13763 = vst [vmem:[#allocation37_spill] sm:$0xff] %v12838_v29  ;;  %8340 = vmatmul.mubr.f32.vlgmr.msra.gmra.mrb[50].mxu0 %v12838_v29 }
 0xa46   :  { %10137 = vmatpush3.bf16.msra.mxu0 %v11932_v36  ;;  %8409 = vmatprep.mubr.msk.f32.mxu0 %vm11357_vm0, %v13713_v59 }
 0xa47   :  { %10138 = vmatprep.subr.bf16.mxu0 %v13714_v58 }
 0xa4a   :  { %10140 = vmatpush3.bf16.msra.mxu0 %v11937_v40 }
 0xa4b   :  { %10141 = vmatprep.subr.bf16.mxu0 %v13714_v58 }
 0xa4e   :  { %10143 = vmatpush3.bf16.msra.mxu0 %v11943_v44 }
 0xa4f   :  { %10144 = vmatprep.subr.bf16.mxu0 %v13714_v58 }
 0xa50   :  { %v3327_v11 = vpop.permute.xlu0 %3326 }
 0xa51   :  { %v3331_v19 = vmul.f32 %v3327_v11, %v3322_v53 }
 0xa52   :  { %10146 = vmatpush3.bf16.msra.mxu0 %v11947_v48 }
 0xa53   :  { %10147 = vmatprep.subr.bf16.mxu0 %v13714_v58 }
 0xa54   :  { %v3150_v38 = vpop.permute.xlu0 %3149 }
 0xa55   :  { %v3325_v20 = vpop.permute.xlu1 %3324  ;;  %v3154_v34 = vmul.f32 %v3150_v38, %v3145_v3 }
 0xa56   :  { %v3330_v46 = vmul.f32 %v3325_v20, %v12703_v8  ;;  %10149 = vmatpush3.bf16.msra.mxu0 %v11951_v56 }
 0xa57   :  { %10150 = vmatprep.subr.bf16.mxu0 %v13714_v58 }
 0xa58   :  { %v12854_v2 = vadd.f32 %v3331_v19, %v3330_v46  ;;  %v3152_v52 = vpop.permute.xlu0 %3151 }
 0xa59   :  { %v3148_v4 = vpop.permute.xlu1 %3147 }
 0xa5a   :  { %11006 = vtanh.f32 %v12854_v2  ;;  %v3153_v21 = vmul.f32 %v3148_v4, %v12709_v42  ;;  %10152 = vmatpush3.bf16.msra.mxu0 %v11955_v63 }
 0xa5b   :  { %10153 = vmatprep.subr.bf16.mxu0 %v13714_v58 }
 0xa5c   :  { %v12860_v53 = vadd.f32 %v3154_v34, %v3153_v21  ;;  %v13765_v34 = vld [vmem:[#allocation23_spill] sm:$0xff]  ;;  %v13766_v21 = vld [vmem:[#allocation24_spill] sm:$0xff] }
 0xa5d   :  { %v3329_v3 = vpop.permute.xlu1 %3328 }
 0xa5e   :  { %11008 = vtanh.f32 %v12860_v53  ;;  %10155 = vmatpush3.bf16.msra.mxu0 %v11959_v7 }
 0xa5f   :  { %10156 = vmatprep.subr.bf16.mxu0 %v13714_v58 }
 0xa62   :  { %10158 = vmatpush3.bf16.msra.mxu0 %v11963_v17 }
 0xa63   :  { %10183 = vmatprep.subr.bf16.mxu0 %v13714_v58 }
 0xa64   :  { %v11007_v8 = vpop.eup %11006 }
 0xa65   :  { %v3334_v16 = vmul.f32 %v11007_v8, %v3329_v3  ;;  %v13767_v8 = vld [vmem:[#allocation26_spill] sm:$0xff]  ;;  %v13768_v3 = vld [vmem:[#allocation27_spill] sm:$0xff] }
 0xa67   :  { %8375 = vmatmul.mubr.f32.vlgmr.msra.gmra.mrb[34].mxu1 %v3334_v16 }
 0xa68   :  { %v11009_v42 = vpop.eup %11008  ;;  %10161 = vmatpush3.bf16.msra.mxu1 %v12094_v24  ;;  %8444 = vmatprep.mubr.msk.f32.mxu1 %vm11357_vm0, %v13713_v59 }
 0xa69   :  { %10162 = vmatprep.subr.bf16.mxu1 %v13714_v58  ;;  %v12871_v30 = vmul.f32 %v11009_v42, %v3152_v52  ;;  %v13770_v42 = vld [vmem:[#allocation33_spill] sm:$0xff]  ;;  %v13771_v52 = vld [vmem:[#allocation36_spill] sm:$0xff] }
 0xa6b   :  { %13764 = vst [vmem:[#allocation38_spill] sm:$0xff] %v12871_v30  ;;  %8410 = vmatmul.mubr.f32.vlgmr.msra.gmra.mrb[52].mxu0 %v12871_v30  ;;  %v3343_v11 = vpop.permute.xlu0 %3342 }
 0xa6c   :  { %10164 = vmatpush3.bf16.msra.mxu1 %v12097_v28  ;;  %10185 = vmatpush3.bf16.msra.mxu0 %v11645_v18  ;;  %v3347_v19 = vmul.f32 %v3343_v11, %v12828_v25 }
 0xa6d   :  { %10165 = vmatprep.subr.bf16.mxu1 %v13714_v58  ;;  %10186 = vmatprep.subr.bf16.mxu0 %v13714_v58 }
 0xa6e   :  { %8479 = vmatprep.mubr.msk.f32.mxu0 %vm11357_vm0, %v13713_v59 }
 0xa70   :  { %10167 = vmatpush3.bf16.msra.mxu1 %v12109_v5  ;;  %10188 = vmatpush3.bf16.msra.mxu0 %v11654_v22 }
 0xa71   :  { %v3341_v20 = vpop.permute.xlu1 %3340  ;;  %10168 = vmatprep.subr.bf16.mxu1 %v13714_v58  ;;  %10189 = vmatprep.subr.bf16.mxu0 %v13714_v58 }
 0xa72   :  { %v3346_v46 = vmul.f32 %v3341_v20, %v12735_v1 }
 0xa74   :  { %v12886_v38 = vadd.f32 %v3347_v19, %v3346_v46  ;;  %10170 = vmatpush3.bf16.msra.mxu1 %v12116_v43  ;;  %10191 = vmatpush3.bf16.msra.mxu0 %v11682_v35 }
 0xa75   :  { %10171 = vmatprep.subr.bf16.mxu1 %v13714_v58  ;;  %10192 = vmatprep.subr.bf16.mxu0 %v13714_v58  ;;  %v3345_v25 = vpop.permute.xlu1 %3344 }
 0xa76   :  { %11010 = vtanh.f32 %v12886_v38 }
 0xa78   :  { %10173 = vmatpush3.bf16.msra.mxu1 %v12124_v45  ;;  %10194 = vmatpush3.bf16.msra.mxu0 %v11710_v50 }
 0xa79   :  { %10174 = vmatprep.subr.bf16.mxu1 %v13714_v58  ;;  %10195 = vmatprep.subr.bf16.mxu0 %v13714_v58 }
 0xa7c   :  { %10176 = vmatpush3.bf16.msra.mxu1 %v12131_v33  ;;  %10197 = vmatpush3.bf16.msra.mxu0 %v11732_v62 }
 0xa7d   :  { %10177 = vmatprep.subr.bf16.mxu1 %v13714_v58  ;;  %10198 = vmatprep.subr.bf16.mxu0 %v13714_v58 }
 0xa80   :  { %10179 = vmatpush3.bf16.msra.mxu1 %v12137_v14  ;;  %10200 = vmatpush3.bf16.msra.mxu0 %v11754_v13  ;;  %v11011_v1 = vpop.eup %11010 }
 0xa81   :  { %10180 = vmatprep.subr.bf16.mxu1 %v13714_v58  ;;  %10201 = vmatprep.subr.bf16.mxu0 %v13714_v58  ;;  %v3350_v4 = vmul.f32 %v11011_v1, %v3345_v25  ;;  %v13772_v25 = vld [vmem:[#allocation32_spill] sm:$0xff] }
 0xa84   :  { %10182 = vmatpush3.bf16.msra.mxu1 %v12143_v32  ;;  %10203 = vmatpush3.bf16.msra.mxu0 %v11776_v27 }
 0xa85   :  { %10204 = vmatprep.subr.bf16.mxu0 %v13714_v58  ;;  %10207 = vmatprep.subr.bf16.mxu1 %v13714_v58 }
 0xa87   :  { %8445 = vmatmul.mubr.f32.vlgmr.msra.gmra.mrb[36].mxu1 %v3350_v4 }
 0xa88   :  { %10206 = vmatpush3.bf16.msra.mxu0 %v11795_v39  ;;  %10209 = vmatpush3.bf16.msra.mxu1 %v11811_v49 }
 0xa89   :  { %10210 = vmatprep.subr.bf16.mxu1 %v13714_v58  ;;  %8514 = vmatprep.mubr.msk.f32.mxu1 %vm11357_vm0, %v13713_v59 }
 0xa8a   :  { %10231 = vmatprep.subr.bf16.mxu0 %v13714_v58 }
 0xa8b   :  { %8480 = vmatmul.mubr.f32.vlgmr.msra.gmra.mrb[54].mxu0 %v3334_v16  ;;  %v13769_v16 = vld [vmem:[#allocation30_spill] sm:$0xff] }
 0xa8c   :  { %10212 = vmatpush3.bf16.msra.mxu1 %v11816_v54  ;;  %10233 = vmatpush3.bf16.msra.mxu0 %v11887_v47 }
 0xa8d   :  { %10213 = vmatprep.subr.bf16.mxu1 %v13714_v58  ;;  %10234 = vmatprep.subr.bf16.mxu0 %v13714_v58 }
 0xa8e   :  { %8549 = vmatprep.mubr.msk.f32.mxu0 %vm11357_vm0, %v13713_v59 }
 0xa90   :  { %10215 = vmatpush3.bf16.msra.mxu1 %v11823_v57  ;;  %10236 = vmatpush3.bf16.msra.mxu0 %v11890_v51 }
 0xa91   :  { %10216 = vmatprep.subr.bf16.mxu1 %v13714_v58  ;;  %10237 = vmatprep.subr.bf16.mxu0 %v13714_v58 }
 0xa94   :  { %10218 = vmatpush3.bf16.msra.mxu1 %v11827_v60  ;;  %10239 = vmatpush3.bf16.msra.mxu0 %v11894_v55 }
 0xa95   :  { %10219 = vmatprep.subr.bf16.mxu1 %v13714_v58  ;;  %10240 = vmatprep.subr.bf16.mxu0 %v13714_v58 }
 0xa98   :  { %10221 = vmatpush3.bf16.msra.mxu1 %v11831_v0  ;;  %10242 = vmatpush3.bf16.msra.mxu0 %v11898_v61 }
 0xa99   :  { %10222 = vmatprep.subr.bf16.mxu1 %v13714_v58  ;;  %10243 = vmatprep.subr.bf16.mxu0 %v13714_v58 }
 0xa9c   :  { %10224 = vmatpush3.bf16.msra.mxu1 %v11835_v6  ;;  %10245 = vmatpush3.bf16.msra.mxu0 %v11907_v15 }
 0xa9d   :  { %10225 = vmatprep.subr.bf16.mxu1 %v13714_v58  ;;  %10246 = vmatprep.subr.bf16.mxu0 %v13714_v58 }
 0xaa0   :  { %10227 = vmatpush3.bf16.msra.mxu1 %v11839_v9  ;;  %10248 = vmatpush3.bf16.msra.mxu0 %v11915_v23 }
 0xaa1   :  { %10228 = vmatprep.subr.bf16.mxu1 %v13714_v58  ;;  %10249 = vmatprep.subr.bf16.mxu0 %v13714_v58 }
 0xaa4   :  { %10230 = vmatpush3.bf16.msra.mxu1 %v11843_v12  ;;  %10251 = vmatpush3.bf16.msra.mxu0 %v11921_v26 }
 0xaa5   :  { %10252 = vmatprep.subr.bf16.mxu0 %v13714_v58  ;;  %10255 = vmatprep.subr.bf16.mxu1 %v13714_v58 }
 0xaa7   :  { %8515 = vmatmul.mubr.f32.vlgmr.msra.gmra.mrb[38].mxu1 %v3350_v4 }
 0xaa8   :  { %10254 = vmatpush3.bf16.msra.mxu0 %v11928_v31  ;;  %10257 = vmatpush3.bf16.msra.mxu1 %v11901_v10 }
 0xaa9   :  { %10258 = vmatprep.subr.bf16.mxu1 %v13714_v58  ;;  %10279 = vmatprep.subr.bf16.mxu0 %v13714_v58 }
 0xaaa   :  { %8584 = vmatprep.mubr.msk.f32.mxu1 %vm11357_vm0, %v13713_v59 }
 0xaac   :  { %10260 = vmatpush3.bf16.msra.mxu1 %v13765_v34 }
 0xaad   :  { %10261 = vmatprep.subr.bf16.mxu1 %v13714_v58 }
 0xab0   :  { %10263 = vmatpush3.bf16.msra.mxu1 %v13766_v21 }
 0xab1   :  { %10264 = vmatprep.subr.bf16.mxu1 %v13714_v58 }
 0xab4   :  { %10266 = vmatpush3.bf16.msra.mxu1 %v13767_v8 }
 0xab5   :  { %10267 = vmatprep.subr.bf16.mxu1 %v13714_v58 }
 0xab8   :  { %10269 = vmatpush3.bf16.msra.mxu1 %v13768_v3 }
 0xab9   :  { %10270 = vmatprep.subr.bf16.mxu1 %v13714_v58 }
 0xabc   :  { %10272 = vmatpush3.bf16.msra.mxu1 %v13769_v16 }
 0xabd   :  { %10273 = vmatprep.subr.bf16.mxu1 %v13714_v58 }
 0xac0   :  { %10275 = vmatpush3.bf16.msra.mxu1 %v13770_v42 }
 0xac1   :  { %10276 = vmatprep.subr.bf16.mxu1 %v13714_v58 }
 0xac4   :  { %10278 = vmatpush3.bf16.msra.mxu1 %v13771_v52 }
 0xac5   :  { %10303 = vmatprep.subr.bf16.mxu1 %v13714_v58 }
 0xb18   :  { %v3417_v11 = vpop.f32.mrb[50].mxu0 }
 0xb19   :  { %v8341_v20 = vpop.f32.mrb[51].mxu0 }
 0xb3a   :  { %v3487_v19 = vpop.f32.mrb[34].mxu1 }
 0xb3b   :  { %v3488_v46 = vadd.f32 %v3487_v19, %v3417_v11  ;;  %v8376_v1 = vpop.f32.mrb[35].mxu1 }
 0xb3d   :  { %v3491_v4 = vadd.f32 %v13772_v25, %v3488_v46 }
 0xb3e   :  { %v3558_v29 = vpop.f32.mrb[52].mxu0 }
 0xb3f   :  { %v3633_v30 = vmul.f32 0.5, %v3491_v4  ;;  %11012 = vtanh.f32 %v3491_v4  ;;  %v8411_v16 = vpop.f32.mrb[53].mxu0  ;;  %v13773_v4 = vld [vmem:[#allocation39_spill] sm:$0xff] }
 0xb41   :  { %11014 = vtanh.f32 %v3633_v30 }
 0xb49   :  { %v11013_v3 = vpop.eup %11012 }
 0xb4a   :  { %3640 = vrot.lane.b32.xlu1 %v11013_v3, %s11360_s8 }
 0xb4b   :  { %v11015_v42 = vpop.eup %11014 }
 0xb4c   :  { %v3635_v8 = vmul.f32 0.5, %v11015_v42 }
 0xb4e   :  { %v3636_v52 = vadd.f32 0.5, %v3635_v8 }
 0xb50   :  { %3638 = vrot.lane.b32.xlu0 %v3636_v52, %s11361_s0 }
 0xb54   :  { %3642 = vrot.lane.b32.xlu0 %v3636_v52, %s11362_s7 }
 0xb5a   :  { %v3628_v20 = vpop.f32.mrb[36].mxu1 }
 0xb5b   :  { %v3629_v11 = vadd.f32 %v3628_v20, %v3558_v29  ;;  %v8446_v19 = vpop.f32.mrb[37].mxu1 }
 0xb5d   :  { %v3632_v46 = vadd.f32 %v12665_v37, %v3629_v11  ;;  %v13774_v11 = vld [vmem:[#allocation40_spill] sm:$0xff] }
 0xb5e   :  { %v3750_v1 = vpop.f32.mrb[54].mxu0 }
 0xb5f   :  { %v3649_v25 = vmul.f32 0.5, %v3632_v46  ;;  %v3754_v16 = vadd.f32 %v3750_v1, %v13773_v4  ;;  %v8481_v30 = vpop.f32.mrb[55].mxu0 }
 0xb61   :  { %11016 = vtanh.f32 %v3649_v25  ;;  %v3826_v21 = vmul.f32 0.5, %v3754_v16 }
 0xb62   :  { %11018 = vtanh.f32 %v3754_v16 }
 0xb63   :  { %11020 = vtanh.f32 %v3826_v21 }
 0xb64   :  { %11022 = vtanh.f32 %v3632_v46 }
 0xb6b   :  { %v11017_v8 = vpop.eup %11016 }
 0xb6c   :  { %v11019_v3 = vpop.eup %11018  ;;  %v3651_v29 = vmul.f32 0.5, %v11017_v8 }
 0xb6d   :  { %v11021_v42 = vpop.eup %11020  ;;  %3833 = vrot.lane.b32.xlu0 %v11019_v3, %s11360_s8 }
 0xb6e   :  { %v3828_v34 = vmul.f32 0.5, %v11021_v42  ;;  %v11023_v20 = vpop.eup %11022  ;;  %v3652_v37 = vadd.f32 0.5, %v3651_v29 }
 0xb70   :  { %v3829_v19 = vadd.f32 0.5, %v3828_v34 }
 0xb71   :  { %3656 = vrot.lane.b32.xlu0 %v11023_v20, %s11360_s8 }
 0xb72   :  { %3831 = vrot.lane.b32.xlu1 %v3829_v19, %s11361_s0 }
 0xb75   :  { %3658 = vrot.lane.b32.xlu0 %v3652_v37, %s11362_s7 }
 0xb76   :  { %3654 = vrot.lane.b32.xlu1 %v3652_v37, %s11361_s0 }
 0xb7a   :  { %3835 = vrot.lane.b32.xlu1 %v3829_v19, %s11362_s7  ;;  %v3821_v21 = vpop.f32.mrb[38].mxu1 }
 0xb7b   :  { %v3825_v46 = vadd.f32 %v3821_v21, %v13774_v11  ;;  %v8516_v1 = vpop.f32.mrb[39].mxu1 }
 0xb7d   :  { %v3842_v25 = vmul.f32 0.5, %v3825_v46  ;;  %11024 = vtanh.f32 %v3825_v46 }
 0xb7f   :  { %11026 = vtanh.f32 %v3842_v25 }
 0xb87   :  { %v11025_v4 = vpop.eup %11024 }
 0xb88   :  { %3849 = vrot.lane.b32.xlu0 %v11025_v4, %s11360_s8 }
 0xb89   :  { %v11027_v34 = vpop.eup %11026 }
 0xb8a   :  { %v3844_v16 = vmul.f32 0.5, %v11027_v34 }
 0xb8c   :  { %v12979_v30 = vadd.f32 0.5, %v3844_v16 }
 0xb8e   :  { %3847 = vrot.lane.b32.xlu1 %v12979_v30, %s11361_s0 }
 0xb92   :  { %3851 = vrot.lane.b32.xlu1 %v12979_v30, %s11362_s7 }
 0xbbc   :  { %v3641_v8 = vpop.permute.xlu1 %3640 }
 0xbbd   :  { %v3645_v42 = vmul.f32 %v3641_v8, %v3636_v52 }
 0xbc2   :  { %v3639_v3 = vpop.permute.xlu0 %3638 }
 0xbc3   :  { %v3644_v29 = vmul.f32 %v3639_v3, %v12835_v41 }
 0xbc5   :  { %v12986_v20 = vadd.f32 %v3645_v42, %v3644_v29 }
 0xbc6   :  { %v3643_v11 = vpop.permute.xlu0 %3642 }
 0xbc7   :  { %11028 = vtanh.f32 %v12986_v20 }
 0xbd1   :  { %v11029_v21 = vpop.eup %11028 }
 0xbd2   :  { %v12989_v46 = vmul.f32 %v11029_v21, %v3643_v11 }
 0xbd4   :  { %13775 = vst [vmem:[#allocation32_spill] sm:$0xff] %v12989_v46  ;;  %8550 = vmatmul.mubr.f32.vlgmr.msra.gmra.mrb[56].mxu0 %v12989_v46 }
 0xbd5   :  { %10281 = vmatpush3.bf16.msra.mxu0 %v11932_v36  ;;  %8619 = vmatprep.mubr.msk.f32.mxu0 %vm11357_vm0, %v13713_v59 }
 0xbd6   :  { %10282 = vmatprep.subr.bf16.mxu0 %v13714_v58 }
 0xbd9   :  { %10284 = vmatpush3.bf16.msra.mxu0 %v11937_v40 }
 0xbda   :  { %10285 = vmatprep.subr.bf16.mxu0 %v13714_v58 }
 0xbdd   :  { %10287 = vmatpush3.bf16.msra.mxu0 %v11943_v44 }
 0xbde   :  { %10288 = vmatprep.subr.bf16.mxu0 %v13714_v58 }
 0xbdf   :  { %v3834_v41 = vpop.permute.xlu0 %3833 }
 0xbe0   :  { %v3838_v1 = vmul.f32 %v3834_v41, %v3829_v19 }
 0xbe1   :  { %10290 = vmatpush3.bf16.msra.mxu0 %v11947_v48 }
 0xbe2   :  { %10291 = vmatprep.subr.bf16.mxu0 %v13714_v58 }
 0xbe3   :  { %v3657_v4 = vpop.permute.xlu0 %3656 }
 0xbe4   :  { %v3832_v52 = vpop.permute.xlu1 %3831  ;;  %v3661_v8 = vmul.f32 %v3657_v4, %v3652_v37 }
 0xbe5   :  { %v3837_v25 = vmul.f32 %v3832_v52, %v12854_v2  ;;  %10293 = vmatpush3.bf16.msra.mxu0 %v11951_v56 }
 0xbe6   :  { %10294 = vmatprep.subr.bf16.mxu0 %v13714_v58 }
 0xbe7   :  { %v13005_v34 = vadd.f32 %v3838_v1, %v3837_v25  ;;  %v3659_v29 = vpop.permute.xlu0 %3658 }
 0xbe8   :  { %v3655_v16 = vpop.permute.xlu1 %3654 }
 0xbe9   :  { %11030 = vtanh.f32 %v13005_v34  ;;  %v3660_v3 = vmul.f32 %v3655_v16, %v12860_v53  ;;  %10296 = vmatpush3.bf16.msra.mxu0 %v11955_v63  ;;  %v13777_v16 = vld [vmem:[#allocation23_spill] sm:$0xff] }
 0xbea   :  { %10297 = vmatprep.subr.bf16.mxu0 %v13714_v58 }
 0xbeb   :  { %v13011_v19 = vadd.f32 %v3661_v8, %v3660_v3  ;;  %v13778_v8 = vld [vmem:[#allocation24_spill] sm:$0xff]  ;;  %v13779_v3 = vld [vmem:[#allocation26_spill] sm:$0xff] }
 0xbec   :  { %v3836_v37 = vpop.permute.xlu1 %3835 }
 0xbed   :  { %11032 = vtanh.f32 %v13011_v19  ;;  %10299 = vmatpush3.bf16.msra.mxu0 %v11959_v7 }
 0xbee   :  { %10300 = vmatprep.subr.bf16.mxu0 %v13714_v58 }
 0xbf1   :  { %10302 = vmatpush3.bf16.msra.mxu0 %v11963_v17 }
 0xbf2   :  { %10327 = vmatprep.subr.bf16.mxu0 %v13714_v58 }
 0xbf3   :  { %v11031_v2 = vpop.eup %11030 }
 0xbf4   :  { %v3841_v42 = vmul.f32 %v11031_v2, %v3836_v37  ;;  %v13780_v2 = vld [vmem:[#allocation27_spill] sm:$0xff]  ;;  %v13781_v37 = vld [vmem:[#allocation30_spill] sm:$0xff] }
 0xbf6   :  { %8585 = vmatmul.mubr.f32.vlgmr.msra.gmra.mrb[40].mxu1 %v3841_v42 }
 0xbf7   :  { %v11033_v53 = vpop.eup %11032  ;;  %10305 = vmatpush3.bf16.msra.mxu1 %v12094_v24  ;;  %8654 = vmatprep.mubr.msk.f32.mxu1 %vm11357_vm0, %v13713_v59 }
 0xbf8   :  { %10306 = vmatprep.subr.bf16.mxu1 %v13714_v58  ;;  %v13022_v21 = vmul.f32 %v11033_v53, %v3659_v29  ;;  %v13783_v53 = vld [vmem:[#allocation36_spill] sm:$0xff] }
 0xbfa   :  { %13776 = vst [vmem:[#allocation39_spill] sm:$0xff] %v13022_v21  ;;  %8620 = vmatmul.mubr.f32.vlgmr.msra.gmra.mrb[58].mxu0 %v13022_v21  ;;  %v3850_v11 = vpop.permute.xlu0 %3849 }
 0xbfb   :  { %10308 = vmatpush3.bf16.msra.mxu1 %v12097_v28  ;;  %10329 = vmatpush3.bf16.msra.mxu0 %v11645_v18  ;;  %v3854_v52 = vmul.f32 %v3850_v11, %v12979_v30 }
 0xbfc   :  { %10309 = vmatprep.subr.bf16.mxu1 %v13714_v58  ;;  %10330 = vmatprep.subr.bf16.mxu0 %v13714_v58 }
 0xbfd   :  { %8689 = vmatprep.mubr.msk.f32.mxu0 %vm11357_vm0, %v13713_v59 }
 0xbff   :  { %10311 = vmatpush3.bf16.msra.mxu1 %v12109_v5  ;;  %10332 = vmatpush3.bf16.msra.mxu0 %v11654_v22 }
 0xc00   :  { %v3848_v41 = vpop.permute.xlu1 %3847  ;;  %10312 = vmatprep.subr.bf16.mxu1 %v13714_v58  ;;  %10333 = vmatprep.subr.bf16.mxu0 %v13714_v58 }
 0xc01   :  { %v3853_v1 = vmul.f32 %v3848_v41, %v12886_v38 }
 0xc03   :  { %v13037_v25 = vadd.f32 %v3854_v52, %v3853_v1  ;;  %10314 = vmatpush3.bf16.msra.mxu1 %v12116_v43  ;;  %10335 = vmatpush3.bf16.msra.mxu0 %v11682_v35 }
 0xc04   :  { %10315 = vmatprep.subr.bf16.mxu1 %v13714_v58  ;;  %10336 = vmatprep.subr.bf16.mxu0 %v13714_v58  ;;  %v3852_v30 = vpop.permute.xlu1 %3851 }
 0xc05   :  { %11034 = vtanh.f32 %v13037_v25 }
 0xc07   :  { %10317 = vmatpush3.bf16.msra.mxu1 %v12124_v45  ;;  %10338 = vmatpush3.bf16.msra.mxu0 %v11710_v50 }
 0xc08   :  { %10318 = vmatprep.subr.bf16.mxu1 %v13714_v58  ;;  %10339 = vmatprep.subr.bf16.mxu0 %v13714_v58 }
 0xc0b   :  { %10320 = vmatpush3.bf16.msra.mxu1 %v12131_v33  ;;  %10341 = vmatpush3.bf16.msra.mxu0 %v11732_v62 }
 0xc0c   :  { %10321 = vmatprep.subr.bf16.mxu1 %v13714_v58  ;;  %10342 = vmatprep.subr.bf16.mxu0 %v13714_v58 }
 0xc0f   :  { %10323 = vmatpush3.bf16.msra.mxu1 %v12137_v14  ;;  %10344 = vmatpush3.bf16.msra.mxu0 %v11754_v13  ;;  %v11035_v38 = vpop.eup %11034 }
 0xc10   :  { %10324 = vmatprep.subr.bf16.mxu1 %v13714_v58  ;;  %10345 = vmatprep.subr.bf16.mxu0 %v13714_v58  ;;  %v3857_v4 = vmul.f32 %v11035_v38, %v3852_v30  ;;  %v13119_v38 = vld [vmem:[%s13620_s9] ss:$0 sm:$0xff] }
 0xc11   :  { %13784 = vst [vmem:[#allocation40_spill] sm:$0xff] %v13119_v38 }
 0xc13   :  { %10326 = vmatpush3.bf16.msra.mxu1 %v12143_v32  ;;  %10347 = vmatpush3.bf16.msra.mxu0 %v11776_v27 }
 0xc14   :  { %10348 = vmatprep.subr.bf16.mxu0 %v13714_v58  ;;  %10351 = vmatprep.subr.bf16.mxu1 %v13714_v58 }
 0xc16   :  { %8655 = vmatmul.mubr.f32.vlgmr.msra.gmra.mrb[42].mxu1 %v3857_v4 }
 0xc17   :  { %10350 = vmatpush3.bf16.msra.mxu0 %v11795_v39  ;;  %10353 = vmatpush3.bf16.msra.mxu1 %v11811_v49 }
 0xc18   :  { %10354 = vmatprep.subr.bf16.mxu1 %v13714_v58  ;;  %8724 = vmatprep.mubr.msk.f32.mxu1 %vm11357_vm0, %v13713_v59 }
 0xc19   :  { %10375 = vmatprep.subr.bf16.mxu0 %v13714_v58 }
 0xc1a   :  { %8690 = vmatmul.mubr.f32.vlgmr.msra.gmra.mrb[60].mxu0 %v3841_v42  ;;  %v13782_v42 = vld [vmem:[#allocation33_spill] sm:$0xff] }
 0xc1b   :  { %10356 = vmatpush3.bf16.msra.mxu1 %v11816_v54  ;;  %10377 = vmatpush3.bf16.msra.mxu0 %v11887_v47 }
 0xc1c   :  { %10357 = vmatprep.subr.bf16.mxu1 %v13714_v58  ;;  %10378 = vmatprep.subr.bf16.mxu0 %v13714_v58 }
 0xc1d   :  { %8759 = vmatprep.mubr.msk.f32.mxu0 %vm11357_vm0, %v13713_v59 }
 0xc1f   :  { %10359 = vmatpush3.bf16.msra.mxu1 %v11823_v57  ;;  %10380 = vmatpush3.bf16.msra.mxu0 %v11890_v51 }
 0xc20   :  { %10360 = vmatprep.subr.bf16.mxu1 %v13714_v58  ;;  %10381 = vmatprep.subr.bf16.mxu0 %v13714_v58 }
 0xc23   :  { %10362 = vmatpush3.bf16.msra.mxu1 %v11827_v60  ;;  %10383 = vmatpush3.bf16.msra.mxu0 %v11894_v55 }
 0xc24   :  { %10363 = vmatprep.subr.bf16.mxu1 %v13714_v58  ;;  %10384 = vmatprep.subr.bf16.mxu0 %v13714_v58 }
 0xc27   :  { %10365 = vmatpush3.bf16.msra.mxu1 %v11831_v0  ;;  %10386 = vmatpush3.bf16.msra.mxu0 %v11898_v61 }
 0xc28   :  { %10366 = vmatprep.subr.bf16.mxu1 %v13714_v58  ;;  %10387 = vmatprep.subr.bf16.mxu0 %v13714_v58 }
 0xc2b   :  { %10368 = vmatpush3.bf16.msra.mxu1 %v11835_v6  ;;  %10389 = vmatpush3.bf16.msra.mxu0 %v11907_v15 }
 0xc2c   :  { %10369 = vmatprep.subr.bf16.mxu1 %v13714_v58  ;;  %10390 = vmatprep.subr.bf16.mxu0 %v13714_v58 }
 0xc2f   :  { %10371 = vmatpush3.bf16.msra.mxu1 %v11839_v9  ;;  %10392 = vmatpush3.bf16.msra.mxu0 %v11915_v23 }
 0xc30   :  { %10372 = vmatprep.subr.bf16.mxu1 %v13714_v58  ;;  %10393 = vmatprep.subr.bf16.mxu0 %v13714_v58 }
 0xc33   :  { %10374 = vmatpush3.bf16.msra.mxu1 %v11843_v12  ;;  %10395 = vmatpush3.bf16.msra.mxu0 %v11921_v26 }
 0xc34   :  { %10396 = vmatprep.subr.bf16.mxu0 %v13714_v58  ;;  %10399 = vmatprep.subr.bf16.mxu1 %v13714_v58 }
 0xc36   :  { %8725 = vmatmul.mubr.f32.vlgmr.msra.gmra.mrb[44].mxu1 %v3857_v4 }
 0xc37   :  { %10398 = vmatpush3.bf16.msra.mxu0 %v11928_v31  ;;  %10401 = vmatpush3.bf16.msra.mxu1 %v11901_v10 }
 0xc38   :  { %10402 = vmatprep.subr.bf16.mxu1 %v13714_v58  ;;  %10423 = vmatprep.subr.bf16.mxu0 %v13714_v58 }
 0xc39   :  { %8794 = vmatprep.mubr.msk.f32.mxu1 %vm11357_vm0, %v13713_v59 }
 0xc3b   :  { %10404 = vmatpush3.bf16.msra.mxu1 %v13777_v16 }
 0xc3c   :  { %10405 = vmatprep.subr.bf16.mxu1 %v13714_v58 }
 0xc3f   :  { %10407 = vmatpush3.bf16.msra.mxu1 %v13778_v8 }
 0xc40   :  { %10408 = vmatprep.subr.bf16.mxu1 %v13714_v58 }
 0xc43   :  { %10410 = vmatpush3.bf16.msra.mxu1 %v13779_v3 }
 0xc44   :  { %10411 = vmatprep.subr.bf16.mxu1 %v13714_v58 }
 0xc47   :  { %10413 = vmatpush3.bf16.msra.mxu1 %v13780_v2 }
 0xc48   :  { %10414 = vmatprep.subr.bf16.mxu1 %v13714_v58 }
 0xc4b   :  { %10416 = vmatpush3.bf16.msra.mxu1 %v13781_v37 }
 0xc4c   :  { %10417 = vmatprep.subr.bf16.mxu1 %v13714_v58 }
 0xc4f   :  { %10419 = vmatpush3.bf16.msra.mxu1 %v13782_v42 }
 0xc50   :  { %10420 = vmatprep.subr.bf16.mxu1 %v13714_v58 }
 0xc53   :  { %10422 = vmatpush3.bf16.msra.mxu1 %v13783_v53 }
 0xc54   :  { %10447 = vmatprep.subr.bf16.mxu1 %v13714_v58 }
 0xca7   :  { %v3924_v29 = vpop.f32.mrb[56].mxu0 }
 0xca8   :  { %v8551_v11 = vpop.f32.mrb[57].mxu0 }
 0xcc9   :  { %v3994_v41 = vpop.f32.mrb[40].mxu1 }
 0xcca   :  { %v3995_v52 = vadd.f32 %v3994_v41, %v3924_v29  ;;  %v8586_v1 = vpop.f32.mrb[41].mxu1 }
 0xccc   :  { %v3998_v30 = vadd.f32 %v13119_v38, %v3995_v52  ;;  %v13128_v52 = vld [vmem:[%s13624_s13] ss:$0 sm:$0xff] }
 0xccd   :  { %v4065_v4 = vpop.f32.mrb[58].mxu0 }
 0xcce   :  { %v4140_v46 = vmul.f32 0.5, %v3998_v30  ;;  %11036 = vtanh.f32 %v3998_v30  ;;  %v8621_v21 = vpop.f32.mrb[59].mxu0 }
 0xcd0   :  { %11038 = vtanh.f32 %v4140_v46 }
 0xcd8   :  { %v11037_v53 = vpop.eup %11036 }
 0xcd9   :  { %4147 = vrot.lane.b32.xlu1 %v11037_v53, %s11360_s8  ;;  %v13785_v53 = vld [vmem:[#allocation41_spill] sm:$0xff] }
 0xcda   :  { %v11039_v42 = vpop.eup %11038 }
 0xcdb   :  { %v4142_v11 = vmul.f32 0.5, %v11039_v42 }
 0xcdd   :  { %v4143_v37 = vadd.f32 0.5, %v4142_v11 }
 0xcdf   :  { %4145 = vrot.lane.b32.xlu0 %v4143_v37, %s11361_s0 }
 0xce3   :  { %4149 = vrot.lane.b32.xlu0 %v4143_v37, %s11362_s7 }
 0xce9   :  { %v4135_v29 = vpop.f32.mrb[42].mxu1 }
 0xcea   :  { %v4136_v41 = vadd.f32 %v4135_v29, %v4065_v4  ;;  %v8656_v1 = vpop.f32.mrb[43].mxu1 }
 0xcec   :  { %v4139_v46 = vadd.f32 %v13128_v52, %v4136_v41 }
 0xced   :  { %v4257_v21 = vpop.f32.mrb[60].mxu0 }
 0xcee   :  { %v4156_v30 = vmul.f32 0.5, %v4139_v46  ;;  %v4261_v38 = vadd.f32 %v4257_v21, %v13785_v53  ;;  %v8691_v42 = vpop.f32.mrb[61].mxu0 }
 0xcf0   :  { %11040 = vtanh.f32 %v4156_v30  ;;  %v4333_v11 = vmul.f32 0.5, %v4261_v38 }
 0xcf1   :  { %11042 = vtanh.f32 %v4261_v38 }
 0xcf2   :  { %11044 = vtanh.f32 %v4333_v11 }
 0xcf3   :  { %11046 = vtanh.f32 %v4139_v46  ;;  %v13786_v46 = vld [vmem:[#allocation42_spill] sm:$0xff] }
 0xcfa   :  { %v11041_v2 = vpop.eup %11040 }
 0xcfb   :  { %v11043_v4 = vpop.eup %11042  ;;  %v4158_v3 = vmul.f32 0.5, %v11041_v2 }
 0xcfc   :  { %v11045_v29 = vpop.eup %11044  ;;  %4340 = vrot.lane.b32.xlu0 %v11043_v4, %s11360_s8 }
 0xcfd   :  { %v4335_v1 = vmul.f32 0.5, %v11045_v29  ;;  %v11047_v8 = vpop.eup %11046  ;;  %v4159_v41 = vadd.f32 0.5, %v4158_v3 }
 0xcff   :  { %v4336_v16 = vadd.f32 0.5, %v4335_v1 }
 0xd00   :  { %4163 = vrot.lane.b32.xlu0 %v11047_v8, %s11360_s8 }
 0xd01   :  { %4338 = vrot.lane.b32.xlu1 %v4336_v16, %s11361_s0 }
 0xd04   :  { %4165 = vrot.lane.b32.xlu0 %v4159_v41, %s11362_s7 }
 0xd05   :  { %4161 = vrot.lane.b32.xlu1 %v4159_v41, %s11361_s0 }
 0xd09   :  { %4342 = vrot.lane.b32.xlu1 %v4336_v16, %s11362_s7  ;;  %v4328_v38 = vpop.f32.mrb[44].mxu1 }
 0xd0a   :  { %v4332_v21 = vadd.f32 %v4328_v38, %v13786_v46  ;;  %v8726_v30 = vpop.f32.mrb[45].mxu1 }
 0xd0c   :  { %v4349_v53 = vmul.f32 0.5, %v4332_v21  ;;  %11048 = vtanh.f32 %v4332_v21 }
 0xd0e   :  { %11050 = vtanh.f32 %v4349_v53 }
 0xd16   :  { %v11049_v2 = vpop.eup %11048 }
 0xd17   :  { %4356 = vrot.lane.b32.xlu0 %v11049_v2, %s11360_s8 }
 0xd18   :  { %v11051_v8 = vpop.eup %11050 }
 0xd19   :  { %v4351_v42 = vmul.f32 0.5, %v11051_v8 }
 0xd1b   :  { %v13140_v11 = vadd.f32 0.5, %v4351_v42 }
 0xd1d   :  { %4354 = vrot.lane.b32.xlu1 %v13140_v11, %s11361_s0 }
 0xd21   :  { %4358 = vrot.lane.b32.xlu1 %v13140_v11, %s11362_s7 }
 0xd4b   :  { %v4148_v3 = vpop.permute.xlu1 %4147 }
 0xd4c   :  { %v4152_v29 = vmul.f32 %v4148_v3, %v4143_v37 }
 0xd51   :  { %v4146_v4 = vpop.permute.xlu0 %4145 }
 0xd52   :  { %v4151_v1 = vmul.f32 %v4146_v4, %v12986_v20 }
 0xd54   :  { %v13147_v38 = vadd.f32 %v4152_v29, %v4151_v1 }
 0xd55   :  { %v4150_v21 = vpop.permute.xlu0 %4149 }
 0xd56   :  { %11052 = vtanh.f32 %v13147_v38 }
 0xd60   :  { %v11053_v46 = vpop.eup %11052 }
 0xd61   :  { %v13150_v30 = vmul.f32 %v11053_v46, %v4150_v21 }
 0xd63   :  { %13787 = vst [vmem:[#allocation41_spill] sm:$0xff] %v13150_v30  ;;  %8760 = vmatmul.mubr.f32.vlgmr.msra.gmra.mrb[62].mxu0 %v13150_v30 }
 0xd64   :  { %10425 = vmatpush3.bf16.msra.mxu0 %v11932_v36  ;;  %8829 = vmatprep.mubr.msk.f32.mxu0 %vm11357_vm0, %v13713_v59 }
 0xd65   :  { %10426 = vmatprep.subr.bf16.mxu0 %v13714_v58 }
 0xd68   :  { %10428 = vmatpush3.bf16.msra.mxu0 %v11937_v40 }
 0xd69   :  { %10429 = vmatprep.subr.bf16.mxu0 %v13714_v58 }
 0xd6c   :  { %10431 = vmatpush3.bf16.msra.mxu0 %v11943_v44 }
 0xd6d   :  { %10432 = vmatprep.subr.bf16.mxu0 %v13714_v58 }
 0xd6e   :  { %v4341_v20 = vpop.permute.xlu0 %4340 }
 0xd6f   :  { %v4345_v53 = vmul.f32 %v4341_v20, %v4336_v16 }
 0xd70   :  { %10434 = vmatpush3.bf16.msra.mxu0 %v11947_v48 }
 0xd71   :  { %10435 = vmatprep.subr.bf16.mxu0 %v13714_v58 }
 0xd72   :  { %v4164_v8 = vpop.permute.xlu0 %4163 }
 0xd73   :  { %v4339_v37 = vpop.permute.xlu1 %4338  ;;  %v4168_v4 = vmul.f32 %v4164_v8, %v4159_v41 }
 0xd74   :  { %v4344_v2 = vmul.f32 %v4339_v37, %v13005_v34  ;;  %10437 = vmatpush3.bf16.msra.mxu0 %v11951_v56 }
 0xd75   :  { %10438 = vmatprep.subr.bf16.mxu0 %v13714_v58 }
 0xd76   :  { %v13166_v42 = vadd.f32 %v4345_v53, %v4344_v2  ;;  %v4166_v46 = vpop.permute.xlu0 %4165 }
 0xd77   :  { %v4162_v3 = vpop.permute.xlu1 %4161 }
 0xd78   :  { %11054 = vtanh.f32 %v13166_v42  ;;  %v4167_v29 = vmul.f32 %v4162_v3, %v13011_v19  ;;  %10440 = vmatpush3.bf16.msra.mxu0 %v11955_v63 }
 0xd79   :  { %10441 = vmatprep.subr.bf16.mxu0 %v13714_v58 }
 0xd7a   :  { %v13172_v16 = vadd.f32 %v4168_v4, %v4167_v29  ;;  %v13789_v4 = vld [vmem:[#allocation23_spill] sm:$0xff]  ;;  %v13790_v29 = vld [vmem:[#allocation24_spill] sm:$0xff] }
 0xd7b   :  { %v4343_v41 = vpop.permute.xlu1 %4342 }
 0xd7c   :  { %11056 = vtanh.f32 %v13172_v16  ;;  %10443 = vmatpush3.bf16.msra.mxu0 %v11959_v7 }
 0xd7d   :  { %10444 = vmatprep.subr.bf16.mxu0 %v13714_v58 }
 0xd80   :  { %10446 = vmatpush3.bf16.msra.mxu0 %v11963_v17 }
 0xd81   :  { %10471 = vmatprep.subr.bf16.mxu0 %v13714_v58 }
 0xd82   :  { %v11055_v34 = vpop.eup %11054 }
 0xd83   :  { %v4348_v1 = vmul.f32 %v11055_v34, %v4343_v41  ;;  %v13791_v34 = vld [vmem:[#allocation26_spill] sm:$0xff]  ;;  %v13792_v41 = vld [vmem:[#allocation27_spill] sm:$0xff] }
 0xd85   :  { %8795 = vmatmul.mubr.f32.vlgmr.msra.gmra.mrb[46].mxu1 %v4348_v1 }
 0xd86   :  { %v11057_v19 = vpop.eup %11056  ;;  %10449 = vmatpush3.bf16.msra.mxu1 %v12094_v24  ;;  %8864 = vmatprep.mubr.msk.f32.mxu1 %vm11357_vm0, %v13713_v59 }
 0xd87   :  { %10450 = vmatprep.subr.bf16.mxu1 %v13714_v58  ;;  %v13183_v21 = vmul.f32 %v11057_v19, %v4166_v46  ;;  %v13794_v19 = vld [vmem:[#allocation33_spill] sm:$0xff]  ;;  %v13795_v46 = vld [vmem:[#allocation36_spill] sm:$0xff] }
 0xd89   :  { %13788 = vst [vmem:[#allocation42_spill] sm:$0xff] %v13183_v21  ;;  %8830 = vmatmul.mubr.f32.vlgmr.msra.gmra.mrb[64].mxu0 %v13183_v21  ;;  %v4357_v20 = vpop.permute.xlu0 %4356 }
 0xd8a   :  { %10452 = vmatpush3.bf16.msra.mxu1 %v12097_v28  ;;  %10473 = vmatpush3.bf16.msra.mxu0 %v11645_v18  ;;  %v4361_v53 = vmul.f32 %v4357_v20, %v13140_v11 }
 0xd8b   :  { %10453 = vmatprep.subr.bf16.mxu1 %v13714_v58  ;;  %10474 = vmatprep.subr.bf16.mxu0 %v13714_v58 }
 0xd8c   :  { %8899 = vmatprep.mubr.msk.f32.mxu0 %vm11357_vm0, %v13713_v59 }
 0xd8e   :  { %10455 = vmatpush3.bf16.msra.mxu1 %v12109_v5  ;;  %10476 = vmatpush3.bf16.msra.mxu0 %v11654_v22 }
 0xd8f   :  { %v4355_v37 = vpop.permute.xlu1 %4354  ;;  %10456 = vmatprep.subr.bf16.mxu1 %v13714_v58  ;;  %10477 = vmatprep.subr.bf16.mxu0 %v13714_v58 }
 0xd90   :  { %v4360_v2 = vmul.f32 %v4355_v37, %v13037_v25 }
 0xd92   :  { %v13198_v8 = vadd.f32 %v4361_v53, %v4360_v2  ;;  %10458 = vmatpush3.bf16.msra.mxu1 %v12116_v43  ;;  %10479 = vmatpush3.bf16.msra.mxu0 %v11682_v35 }
 0xd93   :  { %10459 = vmatprep.subr.bf16.mxu1 %v13714_v58  ;;  %10480 = vmatprep.subr.bf16.mxu0 %v13714_v58  ;;  %v4359_v11 = vpop.permute.xlu1 %4358 }
 0xd94   :  { %11058 = vtanh.f32 %v13198_v8 }
 0xd96   :  { %10461 = vmatpush3.bf16.msra.mxu1 %v12124_v45  ;;  %10482 = vmatpush3.bf16.msra.mxu0 %v11710_v50 }
 0xd97   :  { %10462 = vmatprep.subr.bf16.mxu1 %v13714_v58  ;;  %10483 = vmatprep.subr.bf16.mxu0 %v13714_v58 }
 0xd9a   :  { %10464 = vmatpush3.bf16.msra.mxu1 %v12131_v33  ;;  %10485 = vmatpush3.bf16.msra.mxu0 %v11732_v62 }
 0xd9b   :  { %10465 = vmatprep.subr.bf16.mxu1 %v13714_v58  ;;  %10486 = vmatprep.subr.bf16.mxu0 %v13714_v58 }
 0xd9e   :  { %10467 = vmatpush3.bf16.msra.mxu1 %v12137_v14  ;;  %10488 = vmatpush3.bf16.msra.mxu0 %v11754_v13  ;;  %v11059_v25 = vpop.eup %11058 }
 0xd9f   :  { %10468 = vmatprep.subr.bf16.mxu1 %v13714_v58  ;;  %10489 = vmatprep.subr.bf16.mxu0 %v13714_v58  ;;  %v4364_v3 = vmul.f32 %v11059_v25, %v4359_v11  ;;  %v13796_v11 = vld [vmem:[#allocation40_spill] sm:$0xff] }
 0xda2   :  { %10470 = vmatpush3.bf16.msra.mxu1 %v12143_v32  ;;  %10491 = vmatpush3.bf16.msra.mxu0 %v11776_v27 }
 0xda3   :  { %10492 = vmatprep.subr.bf16.mxu0 %v13714_v58  ;;  %10495 = vmatprep.subr.bf16.mxu1 %v13714_v58 }
 0xda5   :  { %8865 = vmatmul.mubr.f32.vlgmr.msra.gmra.mrb[48].mxu1 %v4364_v3 }
 0xda6   :  { %10494 = vmatpush3.bf16.msra.mxu0 %v11795_v39  ;;  %10497 = vmatpush3.bf16.msra.mxu1 %v11811_v49 }
 0xda7   :  { %10498 = vmatprep.subr.bf16.mxu1 %v13714_v58  ;;  %8934 = vmatprep.mubr.msk.f32.mxu1 %vm11357_vm0, %v13713_v59 }
 0xda8   :  { %10519 = vmatprep.subr.bf16.mxu0 %v13714_v58 }
 0xda9   :  { %8900 = vmatmul.mubr.f32.vlgmr.msra.gmra.mrb[66].mxu0 %v4348_v1  ;;  %v13793_v1 = vld [vmem:[#allocation30_spill] sm:$0xff] }
 0xdaa   :  { %10500 = vmatpush3.bf16.msra.mxu1 %v11816_v54  ;;  %10521 = vmatpush3.bf16.msra.mxu0 %v11887_v47 }
 0xdab   :  { %10501 = vmatprep.subr.bf16.mxu1 %v13714_v58  ;;  %10522 = vmatprep.subr.bf16.mxu0 %v13714_v58 }
 0xdac   :  { %8969 = vmatprep.mubr.msk.f32.mxu0 %vm11357_vm0, %v13713_v59 }
 0xdae   :  { %10503 = vmatpush3.bf16.msra.mxu1 %v11823_v57  ;;  %10524 = vmatpush3.bf16.msra.mxu0 %v11890_v51 }
 0xdaf   :  { %10504 = vmatprep.subr.bf16.mxu1 %v13714_v58  ;;  %10525 = vmatprep.subr.bf16.mxu0 %v13714_v58 }
 0xdb2   :  { %10506 = vmatpush3.bf16.msra.mxu1 %v11827_v60  ;;  %10527 = vmatpush3.bf16.msra.mxu0 %v11894_v55 }
 0xdb3   :  { %10507 = vmatprep.subr.bf16.mxu1 %v13714_v58  ;;  %10528 = vmatprep.subr.bf16.mxu0 %v13714_v58 }
 0xdb6   :  { %10509 = vmatpush3.bf16.msra.mxu1 %v11831_v0  ;;  %10530 = vmatpush3.bf16.msra.mxu0 %v11898_v61 }
 0xdb7   :  { %10510 = vmatprep.subr.bf16.mxu1 %v13714_v58  ;;  %10531 = vmatprep.subr.bf16.mxu0 %v13714_v58 }
 0xdba   :  { %10512 = vmatpush3.bf16.msra.mxu1 %v11835_v6  ;;  %10533 = vmatpush3.bf16.msra.mxu0 %v11907_v15 }
 0xdbb   :  { %10513 = vmatprep.subr.bf16.mxu1 %v13714_v58  ;;  %10534 = vmatprep.subr.bf16.mxu0 %v13714_v58 }
 0xdbe   :  { %10515 = vmatpush3.bf16.msra.mxu1 %v11839_v9  ;;  %10536 = vmatpush3.bf16.msra.mxu0 %v11915_v23 }
 0xdbf   :  { %10516 = vmatprep.subr.bf16.mxu1 %v13714_v58  ;;  %10537 = vmatprep.subr.bf16.mxu0 %v13714_v58 }
 0xdc2   :  { %10518 = vmatpush3.bf16.msra.mxu1 %v11843_v12  ;;  %10539 = vmatpush3.bf16.msra.mxu0 %v11921_v26 }
 0xdc3   :  { %10540 = vmatprep.subr.bf16.mxu0 %v13714_v58  ;;  %10543 = vmatprep.subr.bf16.mxu1 %v13714_v58 }
 0xdc5   :  { %8935 = vmatmul.mubr.f32.vlgmr.msra.gmra.mrb[50].mxu1 %v4364_v3 }
 0xdc6   :  { %10542 = vmatpush3.bf16.msra.mxu0 %v11928_v31  ;;  %10545 = vmatpush3.bf16.msra.mxu1 %v11901_v10 }
 0xdc7   :  { %10546 = vmatprep.subr.bf16.mxu1 %v13714_v58  ;;  %10567 = vmatprep.subr.bf16.mxu0 %v13714_v58 }
 0xdc8   :  { %9004 = vmatprep.mubr.msk.f32.mxu1 %vm11357_vm0, %v13713_v59 }
 0xdca   :  { %10548 = vmatpush3.bf16.msra.mxu1 %v13789_v4 }
 0xdcb   :  { %10549 = vmatprep.subr.bf16.mxu1 %v13714_v58 }
 0xdce   :  { %10551 = vmatpush3.bf16.msra.mxu1 %v13790_v29 }
 0xdcf   :  { %10552 = vmatprep.subr.bf16.mxu1 %v13714_v58 }
 0xdd2   :  { %10554 = vmatpush3.bf16.msra.mxu1 %v13791_v34 }
 0xdd3   :  { %10555 = vmatprep.subr.bf16.mxu1 %v13714_v58 }
 0xdd6   :  { %10557 = vmatpush3.bf16.msra.mxu1 %v13792_v41 }
 0xdd7   :  { %10558 = vmatprep.subr.bf16.mxu1 %v13714_v58 }
 0xdda   :  { %10560 = vmatpush3.bf16.msra.mxu1 %v13793_v1 }
 0xddb   :  { %10561 = vmatprep.subr.bf16.mxu1 %v13714_v58 }
 0xdde   :  { %10563 = vmatpush3.bf16.msra.mxu1 %v13794_v19 }
 0xddf   :  { %10564 = vmatprep.subr.bf16.mxu1 %v13714_v58 }
 0xde2   :  { %10566 = vmatpush3.bf16.msra.mxu1 %v13795_v46 }
 0xde3   :  { %10591 = vmatprep.subr.bf16.mxu1 %v13714_v58 }
 0xe36   :  { %v4431_v20 = vpop.f32.mrb[62].mxu0 }
 0xe37   :  { %v8761_v37 = vpop.f32.mrb[63].mxu0 }
 0xe58   :  { %v4501_v53 = vpop.f32.mrb[46].mxu1 }
 0xe59   :  { %v4502_v2 = vadd.f32 %v4501_v53, %v4431_v20  ;;  %v8796_v25 = vpop.f32.mrb[47].mxu1 }
 0xe5b   :  { %v4505_v3 = vadd.f32 %v13796_v11, %v4502_v2 }
 0xe5c   :  { %v4572_v30 = vpop.f32.mrb[64].mxu0 }
 0xe5d   :  { %v4647_v21 = vmul.f32 0.5, %v4505_v3  ;;  %11060 = vtanh.f32 %v4505_v3  ;;  %v8831_v1 = vpop.f32.mrb[65].mxu0  ;;  %v13797_v3 = vld [vmem:[#allocation43_spill] sm:$0xff] }
 0xe5f   :  { %11062 = vtanh.f32 %v4647_v21 }
 0xe67   :  { %v11061_v41 = vpop.eup %11060 }
 0xe68   :  { %4654 = vrot.lane.b32.xlu1 %v11061_v41, %s11360_s8 }
 0xe69   :  { %v11063_v19 = vpop.eup %11062 }
 0xe6a   :  { %v4649_v34 = vmul.f32 0.5, %v11063_v19 }
 0xe6c   :  { %v4650_v46 = vadd.f32 0.5, %v4649_v34 }
 0xe6e   :  { %4652 = vrot.lane.b32.xlu0 %v4650_v46, %s11361_s0 }
 0xe72   :  { %4656 = vrot.lane.b32.xlu0 %v4650_v46, %s11362_s7 }
 0xe78   :  { %v4642_v37 = vpop.f32.mrb[48].mxu1 }
 0xe79   :  { %v4643_v20 = vadd.f32 %v4642_v37, %v4572_v30  ;;  %v8866_v53 = vpop.f32.mrb[49].mxu1 }
 0xe7b   :  { %v4646_v2 = vadd.f32 %v13128_v52, %v4643_v20 }
 0xe7c   :  { %v4764_v25 = vpop.f32.mrb[66].mxu0 }
 0xe7d   :  { %v4663_v11 = vmul.f32 0.5, %v4646_v2  ;;  %v4768_v1 = vadd.f32 %v4764_v25, %v13797_v3  ;;  %v8901_v21 = vpop.f32.mrb[67].mxu0 }
 0xe7f   :  { %11064 = vtanh.f32 %v4663_v11  ;;  %v4840_v29 = vmul.f32 0.5, %v4768_v1  ;;  %v13798_v11 = vld [vmem:[#allocation44_spill] sm:$0xff] }
 0xe80   :  { %11066 = vtanh.f32 %v4768_v1 }
 0xe81   :  { %11068 = vtanh.f32 %v4840_v29 }
 0xe82   :  { %11070 = vtanh.f32 %v4646_v2 }
 0xe89   :  { %v11065_v34 = vpop.eup %11064 }
 0xe8a   :  { %v11067_v41 = vpop.eup %11066  ;;  %v4665_v30 = vmul.f32 0.5, %v11065_v34 }
 0xe8b   :  { %v11069_v19 = vpop.eup %11068  ;;  %4847 = vrot.lane.b32.xlu0 %v11067_v41, %s11360_s8 }
 0xe8c   :  { %v4842_v4 = vmul.f32 0.5, %v11069_v19  ;;  %v11071_v37 = vpop.eup %11070  ;;  %v4666_v20 = vadd.f32 0.5, %v4665_v30 }
 0xe8e   :  { %v4843_v53 = vadd.f32 0.5, %v4842_v4 }
 0xe8f   :  { %4670 = vrot.lane.b32.xlu0 %v11071_v37, %s11360_s8 }
 0xe90   :  { %4845 = vrot.lane.b32.xlu1 %v4843_v53, %s11361_s0 }
 0xe93   :  { %4672 = vrot.lane.b32.xlu0 %v4666_v20, %s11362_s7 }
 0xe94   :  { %4668 = vrot.lane.b32.xlu1 %v4666_v20, %s11361_s0 }
 0xe98   :  { %4849 = vrot.lane.b32.xlu1 %v4843_v53, %s11362_s7  ;;  %v4835_v29 = vpop.f32.mrb[50].mxu1 }
 0xe99   :  { %v4839_v2 = vadd.f32 %v4835_v29, %v13798_v11  ;;  %v8936_v25 = vpop.f32.mrb[51].mxu1 }
 0xe9b   :  { %v4856_v3 = vmul.f32 0.5, %v4839_v2  ;;  %11072 = vtanh.f32 %v4839_v2 }
 0xe9d   :  { %11074 = vtanh.f32 %v4856_v3 }
 0xea5   :  { %v11073_v1 = vpop.eup %11072 }
 0xea6   :  { %4863 = vrot.lane.b32.xlu0 %v11073_v1, %s11360_s8 }
 0xea7   :  { %v11075_v4 = vpop.eup %11074 }
 0xea8   :  { %v4858_v21 = vmul.f32 0.5, %v11075_v4 }
 0xeaa   :  { %v13291_v34 = vadd.f32 0.5, %v4858_v21 }
 0xeac   :  { %4861 = vrot.lane.b32.xlu1 %v13291_v34, %s11361_s0 }
 0xeb0   :  { %4865 = vrot.lane.b32.xlu1 %v13291_v34, %s11362_s7 }
 0xeda   :  { %v4655_v41 = vpop.permute.xlu1 %4654 }
 0xedb   :  { %v4659_v30 = vmul.f32 %v4655_v41, %v4650_v46 }
 0xee0   :  { %v4653_v19 = vpop.permute.xlu0 %4652 }
 0xee1   :  { %v4658_v37 = vmul.f32 %v4653_v19, %v13147_v38 }
 0xee3   :  { %v13298_v29 = vadd.f32 %v4659_v30, %v4658_v37 }
 0xee4   :  { %v4657_v2 = vpop.permute.xlu0 %4656 }
 0xee5   :  { %11076 = vtanh.f32 %v13298_v29 }
 0xeef   :  { %v11077_v11 = vpop.eup %11076 }
 0xef0   :  { %v13301_v25 = vmul.f32 %v11077_v11, %v4657_v2 }
 0xef2   :  { %8970 = vmatmul.mubr.f32.vlgmr.msra.gmra.mrb[68].mxu0 %v13301_v25 }
 0xef3   :  { %10569 = vmatpush3.bf16.msra.mxu0 %v11932_v36  ;;  %9039 = vmatprep.mubr.msk.f32.mxu0 %vm11357_vm0, %v13713_v59 }
 0xef4   :  { %10570 = vmatprep.subr.bf16.mxu0 %v13714_v58 }
 0xef7   :  { %10572 = vmatpush3.bf16.msra.mxu0 %v11937_v40 }
 0xef8   :  { %10573 = vmatprep.subr.bf16.mxu0 %v13714_v58 }
 0xefb   :  { %10575 = vmatpush3.bf16.msra.mxu0 %v11943_v44 }
 0xefc   :  { %10576 = vmatprep.subr.bf16.mxu0 %v13714_v58 }
 0xefd   :  { %v4848_v38 = vpop.permute.xlu0 %4847 }
 0xefe   :  { %v4852_v3 = vmul.f32 %v4848_v38, %v4843_v53 }
 0xeff   :  { %10578 = vmatpush3.bf16.msra.mxu0 %v11947_v48 }
 0xf00   :  { %10579 = vmatprep.subr.bf16.mxu0 %v13714_v58 }
 0xf01   :  { %v4671_v4 = vpop.permute.xlu0 %4670 }
 0xf02   :  { %v4846_v46 = vpop.permute.xlu1 %4845  ;;  %v4675_v19 = vmul.f32 %v4671_v4, %v4666_v20 }
 0xf03   :  { %v4851_v1 = vmul.f32 %v4846_v46, %v13166_v42  ;;  %10581 = vmatpush3.bf16.msra.mxu0 %v11951_v56 }
 0xf04   :  { %10582 = vmatprep.subr.bf16.mxu0 %v13714_v58 }
 0xf05   :  { %v13317_v21 = vadd.f32 %v4852_v3, %v4851_v1  ;;  %v4673_v11 = vpop.permute.xlu0 %4672 }
 0xf06   :  { %v4669_v41 = vpop.permute.xlu1 %4668 }
 0xf07   :  { %11078 = vtanh.f32 %v13317_v21  ;;  %v4674_v30 = vmul.f32 %v4669_v41, %v13172_v16  ;;  %10584 = vmatpush3.bf16.msra.mxu0 %v11955_v63 }
 0xf08   :  { %10585 = vmatprep.subr.bf16.mxu0 %v13714_v58 }
 0xf09   :  { %v13323_v53 = vadd.f32 %v4675_v19, %v4674_v30  ;;  %v13807_v30 = vld [vmem:[#allocation45_spill] sm:$0xff] }
 0xf0a   :  { %v4850_v20 = vpop.permute.xlu1 %4849 }
 0xf0b   :  { %11080 = vtanh.f32 %v13323_v53  ;;  %10587 = vmatpush3.bf16.msra.mxu0 %v11959_v7 }
 0xf0c   :  { %10588 = vmatprep.subr.bf16.mxu0 %v13714_v58 }
 0xf0f   :  { %10590 = vmatpush3.bf16.msra.mxu0 %v11963_v17 }
 0xf10   :  { %10615 = vmatprep.subr.bf16.mxu0 %v13714_v58 }
 0xf11   :  { %v11079_v42 = vpop.eup %11078 }
 0xf12   :  { %v4855_v37 = vmul.f32 %v11079_v42, %v4850_v20 }
 0xf14   :  { %9005 = vmatmul.mubr.f32.vlgmr.msra.gmra.mrb[52].mxu1 %v4855_v37 }
 0xf15   :  { %v11081_v16 = vpop.eup %11080  ;;  %10593 = vmatpush3.bf16.msra.mxu1 %v12094_v24  ;;  %9074 = vmatprep.mubr.msk.f32.mxu1 %vm11357_vm0, %v13713_v59 }
 0xf16   :  { %10594 = vmatprep.subr.bf16.mxu1 %v13714_v58  ;;  %v13334_v2 = vmul.f32 %v11081_v16, %v4673_v11 }
 0xf18   :  { %9040 = vmatmul.mubr.f32.vlgmr.msra.gmra.mrb[70].mxu0 %v13334_v2  ;;  %v4864_v38 = vpop.permute.xlu0 %4863 }
 0xf19   :  { %10596 = vmatpush3.bf16.msra.mxu1 %v12097_v28  ;;  %10617 = vmatpush3.bf16.msra.mxu0 %v11645_v18  ;;  %v4868_v3 = vmul.f32 %v4864_v38, %v13291_v34 }
 0xf1a   :  { %10597 = vmatprep.subr.bf16.mxu1 %v13714_v58  ;;  %10618 = vmatprep.subr.bf16.mxu0 %v13714_v58 }
 0xf1b   :  { %9109 = vmatprep.mubr.msk.f32.mxu0 %vm11357_vm0, %v13713_v59 }
 0xf1d   :  { %10599 = vmatpush3.bf16.msra.mxu1 %v12109_v5  ;;  %10620 = vmatpush3.bf16.msra.mxu0 %v11654_v22 }
 0xf1e   :  { %v4862_v46 = vpop.permute.xlu1 %4861  ;;  %10600 = vmatprep.subr.bf16.mxu1 %v13714_v58  ;;  %10621 = vmatprep.subr.bf16.mxu0 %v13714_v58 }
 0xf1f   :  { %v4867_v18 = vmul.f32 %v4862_v46, %v13198_v8 }
 0xf21   :  { %v13349_v1 = vadd.f32 %v4868_v3, %v4867_v18  ;;  %10602 = vmatpush3.bf16.msra.mxu1 %v12116_v43  ;;  %10623 = vmatpush3.bf16.msra.mxu0 %v11682_v35 }
 0xf22   :  { %10603 = vmatprep.subr.bf16.mxu1 %v13714_v58  ;;  %10624 = vmatprep.subr.bf16.mxu0 %v13714_v58  ;;  %v4866_v35 = vpop.permute.xlu1 %4865 }
 0xf23   :  { %11082 = vtanh.f32 %v13349_v1 }
 0xf25   :  { %10605 = vmatpush3.bf16.msra.mxu1 %v12124_v45  ;;  %10626 = vmatpush3.bf16.msra.mxu0 %v11710_v50 }
 0xf26   :  { %10606 = vmatprep.subr.bf16.mxu1 %v13714_v58  ;;  %10627 = vmatprep.subr.bf16.mxu0 %v13714_v58 }
 0xf29   :  { %10608 = vmatpush3.bf16.msra.mxu1 %v12131_v33  ;;  %10629 = vmatpush3.bf16.msra.mxu0 %v11732_v62  ;;  %v13799_v62 = vld [vmem:[#allocation23_spill] sm:$0xff] }
 0xf2a   :  { %10609 = vmatprep.subr.bf16.mxu1 %v13714_v58  ;;  %10630 = vmatprep.subr.bf16.mxu0 %v13714_v58 }
 0xf2d   :  { %10611 = vmatpush3.bf16.msra.mxu1 %v12137_v14  ;;  %10632 = vmatpush3.bf16.msra.mxu0 %v11754_v13  ;;  %v11083_v22 = vpop.eup %11082  ;;  %v13800_v13 = vld [vmem:[#allocation24_spill] sm:$0xff] }
 0xf2e   :  { %10612 = vmatprep.subr.bf16.mxu1 %v13714_v58  ;;  %10633 = vmatprep.subr.bf16.mxu0 %v13714_v58  ;;  %v4871_v50 = vmul.f32 %v11083_v22, %v4866_v35 }
 0xf31   :  { %10614 = vmatpush3.bf16.msra.mxu1 %v12143_v32  ;;  %10635 = vmatpush3.bf16.msra.mxu0 %v11776_v27  ;;  %v13801_v27 = vld [vmem:[#allocation26_spill] sm:$0xff] }
 0xf32   :  { %10636 = vmatprep.subr.bf16.mxu0 %v13714_v58  ;;  %10639 = vmatprep.subr.bf16.mxu1 %v13714_v58 }
 0xf34   :  { %9075 = vmatmul.mubr.f32.vlgmr.msra.gmra.mrb[54].mxu1 %v4871_v50 }
 0xf35   :  { %10638 = vmatpush3.bf16.msra.mxu0 %v11795_v39  ;;  %10641 = vmatpush3.bf16.msra.mxu1 %v11811_v49  ;;  %v13802_v39 = vld [vmem:[#allocation27_spill] sm:$0xff]  ;;  %v13803_v49 = vld [vmem:[#allocation30_spill] sm:$0xff] }
 0xf36   :  { %10642 = vmatprep.subr.bf16.mxu1 %v13714_v58  ;;  %9144 = vmatprep.mubr.msk.f32.mxu1 %vm11357_vm0, %v13713_v59 }
 0xf37   :  { %10663 = vmatprep.subr.bf16.mxu0 %v13714_v58 }
 0xf38   :  { %9110 = vmatmul.mubr.f32.vlgmr.msra.gmra.mrb[72].mxu0 %v4855_v37 }
 0xf39   :  { %10644 = vmatpush3.bf16.msra.mxu1 %v11816_v54  ;;  %10665 = vmatpush3.bf16.msra.mxu0 %v11887_v47  ;;  %v13804_v54 = vld [vmem:[#allocation33_spill] sm:$0xff]  ;;  %v13806_v47 = vld [vmem:[#allocation40_spill] sm:$0xff] }
 0xf3a   :  { %10645 = vmatprep.subr.bf16.mxu1 %v13714_v58  ;;  %10666 = vmatprep.subr.bf16.mxu0 %v13714_v58 }
 0xf3b   :  { %9179 = vmatprep.mubr.msk.f32.mxu0 %vm11357_vm0, %v13713_v59 }
 0xf3d   :  { %10647 = vmatpush3.bf16.msra.mxu1 %v11823_v57  ;;  %10668 = vmatpush3.bf16.msra.mxu0 %v11890_v51  ;;  %v13805_v57 = vld [vmem:[#allocation36_spill] sm:$0xff] }
 0xf3e   :  { %10648 = vmatprep.subr.bf16.mxu1 %v13714_v58  ;;  %10669 = vmatprep.subr.bf16.mxu0 %v13714_v58 }
 0xf41   :  { %10650 = vmatpush3.bf16.msra.mxu1 %v11827_v60  ;;  %10671 = vmatpush3.bf16.msra.mxu0 %v11894_v55 }
 0xf42   :  { %10651 = vmatprep.subr.bf16.mxu1 %v13714_v58  ;;  %10672 = vmatprep.subr.bf16.mxu0 %v13714_v58 }
 0xf45   :  { %10653 = vmatpush3.bf16.msra.mxu1 %v11831_v0  ;;  %10674 = vmatpush3.bf16.msra.mxu0 %v11898_v61 }
 0xf46   :  { %10654 = vmatprep.subr.bf16.mxu1 %v13714_v58  ;;  %10675 = vmatprep.subr.bf16.mxu0 %v13714_v58 }
 0xf49   :  { %10656 = vmatpush3.bf16.msra.mxu1 %v11835_v6  ;;  %10677 = vmatpush3.bf16.msra.mxu0 %v11907_v15 }
 0xf4a   :  { %10657 = vmatprep.subr.bf16.mxu1 %v13714_v58  ;;  %10678 = vmatprep.subr.bf16.mxu0 %v13714_v58 }
 0xf4d   :  { %10659 = vmatpush3.bf16.msra.mxu1 %v11839_v9  ;;  %10680 = vmatpush3.bf16.msra.mxu0 %v11915_v23 }
 0xf4e   :  { %10660 = vmatprep.subr.bf16.mxu1 %v13714_v58  ;;  %10681 = vmatprep.subr.bf16.mxu0 %v13714_v58 }
 0xf51   :  { %10662 = vmatpush3.bf16.msra.mxu1 %v11843_v12  ;;  %10683 = vmatpush3.bf16.msra.mxu0 %v11921_v26 }
 0xf52   :  { %10687 = vmatprep.subr.bf16.mxu1 %v13714_v58  ;;  %10684 = vmatprep.subr.bf16.mxu0 %v13714_v58 }
 0xf54   :  { %9145 = vmatmul.mubr.f32.vlgmr.msra.gmra.mrb[56].mxu1 %v4871_v50 }
 0xf55   :  { %10689 = vmatpush3.bf16.msra.mxu1 %v11901_v10  ;;  %10686 = vmatpush3.bf16.msra.mxu0 %v11928_v31 }
 0xf56   :  { %10690 = vmatprep.subr.bf16.mxu1 %v13714_v58  ;;  %10711 = vmatprep.subr.bf16.mxu0 %v13714_v58 }
 0xf57   :  { %9214 = vmatprep.mubr.msk.f32.mxu1 %vm11357_vm0, %v13713_v59 }
 0xf59   :  { %10692 = vmatpush3.bf16.msra.mxu1 %v13799_v62  ;;  %v13808_v62 = vld [vmem:[#allocation46_spill] sm:$0xff] }
 0xf5a   :  { %10693 = vmatprep.subr.bf16.mxu1 %v13714_v58 }
 0xf5d   :  { %10695 = vmatpush3.bf16.msra.mxu1 %v13800_v13 }
 0xf5e   :  { %10696 = vmatprep.subr.bf16.mxu1 %v13714_v58 }
 0xf61   :  { %10698 = vmatpush3.bf16.msra.mxu1 %v13801_v27 }
 0xf62   :  { %10699 = vmatprep.subr.bf16.mxu1 %v13714_v58 }
 0xf65   :  { %10701 = vmatpush3.bf16.msra.mxu1 %v13802_v39 }
 0xf66   :  { %10702 = vmatprep.subr.bf16.mxu1 %v13714_v58 }
 0xf69   :  { %10704 = vmatpush3.bf16.msra.mxu1 %v13803_v49  ;;  %v539_v49 = vld [vmem:[%s13809_s11] sm:$0xff] }
 0xf6a   :  { %10705 = vmatprep.subr.bf16.mxu1 %v13714_v58 }
 0xf6d   :  { %10707 = vmatpush3.bf16.msra.mxu1 %v13804_v54 }
 0xf6e   :  { %10708 = vmatprep.subr.bf16.mxu1 %v13714_v58 }
 0xf71   :  { %10710 = vmatpush3.bf16.msra.mxu1 %v13805_v57  ;;  %v13451_v57 = vadd.s32 4294967295, %v539_v49 }
 0xf72   :  { %10735 = vmatprep.subr.bf16.mxu1 %v13714_v58 }
 0xf73   :  { %vm1644_vm1 = vcmp.eq.s32.totalorder %v13451_v57, 1  ;;  %vm2658_vm2 = vcmp.eq.s32.totalorder %v13451_v57, 3  ;;  %vm1137_vm3 = vcmp.eq.s32.totalorder %v13451_v57, 0  ;;  %vm2151_vm4 = vcmp.eq.s32.totalorder %v13451_v57, 2 }
 0xf74   :  { %vm3165_vm5 = vcmp.eq.s32.totalorder %v13451_v57, 4  ;;  %vm5193_vm6 = vcmp.eq.s32.totalorder %v13451_v57, 8  ;;  %vm3672_vm7 = vcmp.eq.s32.totalorder %v13451_v57, 5  ;;  %vm4686_vm8 = vcmp.eq.s32.totalorder %v13451_v57, 7 }
 0xf75   :  { %vm5700_vm9 = vcmp.eq.s32.totalorder %v13451_v57, 9 }
 0xfc5   :  { %v4938_v60 = vpop.f32.mrb[68].mxu0 }
 0xfc6   :  { %v8971_v0 = vpop.f32.mrb[69].mxu0 }
 0xfe7   :  { %v5008_v6 = vpop.f32.mrb[52].mxu1 }
 0xfe8   :  { %v5009_v9 = vadd.f32 %v5008_v6, %v4938_v60  ;;  %v9006_v12 = vpop.f32.mrb[53].mxu1 }
 0xfea   :  { %v5012_v51 = vadd.f32 %v13806_v47, %v5009_v9  ;;  %v13810_v9 = vmov 0  }
 0xfeb   :  { %v5079_v55 = vpop.f32.mrb[70].mxu0  ;;  %v1645_v12 = vsel %vm1644_vm1, 1, %v13810_v9  ;;  %v2659_v47 = vsel %vm2658_vm2, 1, %v13810_v9 }
 0xfec   :  { %v5154_v61 = vmul.f32 0.5, %v5012_v51  ;;  %11084 = vtanh.f32 %v5012_v51  ;;  %v9041_v10 = vpop.f32.mrb[71].mxu0  ;;  %v1138_v51 = vsel %vm1137_vm3, 1, %v13810_v9 }
 0xfee   :  { %11086 = vtanh.f32 %v5154_v61  ;;  %v3166_v61 = vsel %vm3165_vm5, 1, %v13810_v9 }
 0xff6   :  { %v11085_v15 = vpop.eup %11084 }
 0xff7   :  { %5161 = vrot.lane.b32.xlu1 %v11085_v15, %s11360_s8 }
 0xff8   :  { %v11087_v23 = vpop.eup %11086 }
 0xff9   :  { %v5156_v26 = vmul.f32 0.5, %v11087_v23 }
 0xffb   :  { %v13430_v31 = vadd.f32 0.5, %v5156_v26 }
 0xffd   :  { %5159 = vrot.lane.b32.xlu0 %v13430_v31, %s11361_s0 }
0x1007   :  { %v5149_v8 = vpop.f32.mrb[54].mxu1 }
0x1008   :  { %v5150_v34 = vadd.f32 %v5149_v8, %v5079_v55  ;;  %v9076_v4 = vpop.f32.mrb[55].mxu1  ;;  %v2152_v55 = vsel %vm2151_vm4, 1, %v13810_v9 }
0x100a   :  { %v5153_v19 = vadd.f32 %v13128_v52, %v5150_v34 }
0x100b   :  { %v5271_v41 = vpop.f32.mrb[72].mxu0 }
0x100c   :  { %v5275_v42 = vadd.f32 %v5271_v41, %v13807_v30  ;;  %v9111_v20 = vpop.f32.mrb[73].mxu0  ;;  %v5170_v16 = vmul.f32 0.5, %v5153_v19 }
0x100e   :  { %v5347_v37 = vmul.f32 0.5, %v5275_v42  ;;  %11088 = vtanh.f32 %v5275_v42 }
0x1010   :  { %11090 = vtanh.f32 %v5347_v37 }
0x1011   :  { %11092 = vtanh.f32 %v5170_v16 }
0x1012   :  { %11094 = vtanh.f32 %v5153_v19 }
0x1018   :  { %v11089_v11 = vpop.eup %11088 }
0x1019   :  { %5354 = vrot.lane.b32.xlu1 %v11089_v11, %s11360_s8 }
0x101a   :  { %v11091_v38 = vpop.eup %11090 }
0x101b   :  { %v5349_v46 = vmul.f32 0.5, %v11091_v38  ;;  %v11093_v18 = vpop.eup %11092 }
0x101c   :  { %v5172_v52 = vmul.f32 0.5, %v11093_v18  ;;  %v11095_v22 = vpop.eup %11094 }
0x101d   :  { %v5350_v3 = vadd.f32 0.5, %v5349_v46 }
0x101e   :  { %v13442_v35 = vadd.f32 0.5, %v5172_v52 }
0x101f   :  { %5356 = vrot.lane.b32.xlu1 %v5350_v3, %s11362_s7  ;;  %5352 = vrot.lane.b32.xlu0 %v5350_v3, %s11361_s0 }
0x1023   :  { %5163 = vrot.lane.b32.xlu0 %v13430_v31, %s11362_s7  ;;  %5177 = vrot.lane.b32.xlu1 %v11095_v22, %s11360_s8 }
0x1027   :  { %5175 = vrot.lane.b32.xlu0 %v13442_v35, %s11361_s0  ;;  %v5342_v50 = vpop.f32.mrb[56].mxu1 }
0x1028   :  { %v5346_v13 = vadd.f32 %v5342_v50, %v13808_v62  ;;  %v9146_v27 = vpop.f32.mrb[57].mxu1  ;;  %v5742_v50 = vld [vmem:[#allocation15 + $0x18] sm:$0xff] }
0x1029   :  { %v5741_v27 = vld [vmem:[#allocation15 + $0x10] sm:$0xff] }
0x102a   :  { %v5363_v39 = vmul.f32 0.5, %v5346_v13  ;;  %11096 = vtanh.f32 %v5346_v13 }
0x102c   :  { %11098 = vtanh.f32 %v5363_v39 }
0x1034   :  { %v11097_v54 = vpop.eup %11096 }
0x1035   :  { %5370 = vrot.lane.b32.xlu1 %v11097_v54, %s11360_s8  ;;  %v5744_v54 = vld [vmem:[#allocation15 + $0x28] sm:$0xff] }
0x1036   :  { %v11099_v60 = vpop.eup %11098 }
0x1037   :  { %v5365_v0 = vmul.f32 0.5, %v11099_v60  ;;  %v5746_v60 = vld [vmem:[#allocation15 + $0x38] sm:$0xff] }
0x1039   :  { %v13453_v6 = vadd.f32 0.5, %v5365_v0  ;;  %v5743_v0 = vld [vmem:[#allocation15 + $0x20] sm:$0xff] }
0x103b   :  { %5372 = vrot.lane.b32.xlu1 %v13453_v6, %s11362_s7  ;;  %5368 = vrot.lane.b32.xlu0 %v13453_v6, %s11361_s0 }
0x103f   :  { %1647 = vperm.xlu1 %10879, %v1645_v12   ;;  %5179 = vrot.lane.b32.xlu0 %v13442_v35, %s11362_s7  ;;  %v5745_v12 = vld [vmem:[#allocation15 + $0x30] sm:$0xff] }
0x1043   :  { %2661 = vperm.xlu1 %10879, %v2659_v47   ;;  %1140 = vperm.xlu0 %10878, %v1138_v51   ;;  %v11133_v47 = vld [vmem:[%s13620_s9] ss:$0 sm:$0xff] }
0x1047   :  { %2154 = vperm.xlu0 %10878, %v2152_v55  }
0x104b   :  { %3168 = vperm.xlu0 %10878, %v3166_v61   ;;  %v10765_v61 = vpack.c.bf16 %v5745_v12, %v5743_v0  ;;  %v5701_v12 = vsel %vm5700_vm9, 1, %v13810_v9 }
0x1069   :  { %v5162_v15 = vpop.permute.xlu1 %5161 }
0x106a   :  { %v5166_v26 = vmul.f32 %v5162_v15, %v13430_v31  ;;  %v5750_v15 = vld [vmem:[#allocation15 + $0x58] sm:$0xff] }
0x106f   :  { %v5160_v10 = vpop.permute.xlu0 %5159 }
0x1070   :  { %v5165_v23 = vmul.f32 %v5160_v10, %v13298_v29  ;;  %v5748_v10 = vld [vmem:[#allocation15 + $0x48] sm:$0xff] }
0x1072   :  { %v13473_v8 = vadd.f32 %v5166_v26, %v5165_v23  ;;  %v10767_v26 = vpack.c.bf16 %v5750_v15, %v5748_v10 }
0x1074   :  { %11100 = vtanh.f32 %v13473_v8 }
0x107e   :  { %v11101_v42 = vpop.eup %11100 }
0x108b   :  { %v5355_v34 = vpop.permute.xlu1 %5354 }
0x108c   :  { %v5359_v41 = vmul.f32 %v5355_v34, %v5350_v3  ;;  %v5747_v34 = vld [vmem:[#allocation15 + $0x40] sm:$0xff] }
0x1091   :  { %v5353_v4 = vpop.permute.xlu0 %5352  ;;  %v5357_v29 = vpop.permute.xlu1 %5356 }
0x1092   :  { %v5358_v19 = vmul.f32 %v5353_v4, %v13317_v21  ;;  %v5749_v4 = vld [vmem:[#allocation15 + $0x50] sm:$0xff] }
0x1094   :  { %v5360_v30 = vadd.f32 %v5359_v41, %v5358_v19  ;;  %v10769_v41 = vpack.c.bf16 %v5749_v4, %v5747_v34  ;;  %v5752_v19 = vld [vmem:[#allocation15 + $0x68] sm:$0xff] }
0x1095   :  { %v5164_v20 = vpop.permute.xlu0 %5163  ;;  %v5178_v11 = vpop.permute.xlu1 %5177 }
0x1096   :  { %11102 = vtanh.f32 %v5360_v30  ;;  %v13477_v37 = vmul.f32 %v11101_v42, %v5164_v20  ;;  %v5754_v30 = vld [vmem:[#allocation15 + $0x78] sm:$0xff]  ;;  %v5751_v20 = vld [vmem:[#allocation15 + $0x60] sm:$0xff] }
0x1097   :  { %v10771_v42 = vpack.c.bf16 %v5754_v30, %v5752_v19 }
0x1098   :  { %9180 = vmatmul.mubr.f32.vlgmr.msra.gmra.mrb[74].mxu0 %v13477_v37 }
0x1099   :  { %10713 = vmatpush3.bf16.msra.mxu0 %v11932_v36  ;;  %9249 = vmatprep.mubr.msk.f32.mxu0 %vm11357_vm0, %v13713_v59  ;;  %v5176_v31 = vpop.permute.xlu0 %5175 }
0x109a   :  { %10714 = vmatprep.subr.bf16.mxu0 %v13714_v58  ;;  %v5181_v36 = vmul.f32 %v5176_v31, %v13323_v53 }
0x109d   :  { %10716 = vmatpush3.bf16.msra.mxu0 %v11937_v40  ;;  %v5182_v40 = vmul.f32 %v5178_v11, %v13442_v35  ;;  %v5740_v35 = vld [vmem:[#allocation15 + $0x8] sm:$0xff] }
0x109e   :  { %10717 = vmatprep.subr.bf16.mxu0 %v13714_v58  ;;  %v10759_v13 = vpack.c.bf16 %v5742_v50, %v5740_v35  ;;  %v5763_v50 = vld [vmem:[#allocation15 + $0xc0] sm:$0xff] }
0x10a0   :  { %v11103_v21 = vpop.eup %11102 }
0x10a1   :  { %10719 = vmatpush3.bf16.msra.mxu0 %v11943_v44  ;;  %v5362_v16 = vmul.f32 %v11103_v21, %v5357_v29  ;;  %v13496_v44 = vadd.f32 %v5182_v40, %v5181_v36  ;;  %v5753_v29 = vld [vmem:[#allocation15 + $0x70] sm:$0xff]  ;;  %v5756_v21 = vld [vmem:[#allocation15 + $0x88] sm:$0xff] }
0x10a2   :  { %10720 = vmatprep.subr.bf16.mxu0 %v13714_v58  ;;  %v10773_v31 = vpack.c.bf16 %v5753_v29, %v5751_v20  ;;  %v5962_v20 = vld [vmem:[#allocation17 + $0x88] sm:$0xff]  ;;  %v5945_v29 = vld [vmem:[#allocation17] sm:$0xff] }
0x10a3   :  { %9215 = vmatmul.mubr.f32.vlgmr.msra.gmra.mrb[58].mxu1 %v5362_v16  ;;  %11104 = vtanh.f32 %v13496_v44  ;;  %v5758_v16 = vld [vmem:[#allocation15 + $0x98] sm:$0xff] }
0x10a4   :  { %10737 = vmatpush3.bf16.msra.mxu1 %v12094_v24  ;;  %9284 = vmatprep.mubr.msk.f32.mxu1 %vm11357_vm0, %v13713_v59  ;;  %vm4179_vm0 = vcmp.eq.s32.totalorder %v13451_v57, 6  ;;  %v10775_v36 = vpack.c.bf16 %v5758_v16, %v5756_v21  ;;  %v5708_v57 = vld [vmem:[#allocation14 + $0x8] sm:$0xff] }
0x10a5   :  { %10722 = vmatpush3.bf16.msra.mxu0 %v11947_v48  ;;  %10738 = vmatprep.subr.bf16.mxu1 %v13714_v58 }
0x10a6   :  { %10723 = vmatprep.subr.bf16.mxu0 %v13714_v58 }
0x10a7   :  { %v5371_v24 = vpop.permute.xlu1 %5370 }
0x10a8   :  { %10740 = vmatpush3.bf16.msra.mxu1 %v12097_v28  ;;  %v5375_v53 = vmul.f32 %v5371_v24, %v13453_v6  ;;  %v10763_v6 = vpack.c.bf16 %v5746_v60, %v5744_v54  ;;  %v4180_v24 = vsel %vm4179_vm0, 1, %v13810_v9  ;;  %v5767_v54 = vld [vmem:[#allocation15 + $0xe0] sm:$0xff]  ;;  %v5769_v60 = vld [vmem:[#allocation15 + $0xf0] sm:$0xff] }
0x10a9   :  { %10725 = vmatpush3.bf16.msra.mxu0 %v11951_v56  ;;  %10741 = vmatprep.subr.bf16.mxu1 %v13714_v58 }
0x10aa   :  { %10726 = vmatprep.subr.bf16.mxu0 %v13714_v58 }
0x10ac   :  { %10743 = vmatpush3.bf16.msra.mxu1 %v12109_v5 }
0x10ad   :  { %10728 = vmatpush3.bf16.msra.mxu0 %v11955_v63  ;;  %v5369_v48 = vpop.permute.xlu0 %5368  ;;  %10744 = vmatprep.subr.bf16.mxu1 %v13714_v58  ;;  %v11105_v63 = vpop.eup %11104 }
0x10ae   :  { %v5374_v28 = vmul.f32 %v5369_v48, %v13349_v1  ;;  %10729 = vmatprep.subr.bf16.mxu0 %v13714_v58  ;;  %v5755_v48 = vld [vmem:[#allocation15 + $0x80] sm:$0xff] }
0x10b0   :  { %v5376_v56 = vadd.f32 %v5375_v53, %v5374_v28  ;;  %10746 = vmatpush3.bf16.msra.mxu1 %v12116_v43  ;;  %v5757_v53 = vld [vmem:[#allocation15 + $0x90] sm:$0xff] }
0x10b1   :  { %10731 = vmatpush3.bf16.msra.mxu0 %v11959_v7  ;;  %10747 = vmatprep.subr.bf16.mxu1 %v13714_v58  ;;  %v5180_v5 = vpop.permute.xlu0 %5179 }
0x10b2   :  { %10732 = vmatprep.subr.bf16.mxu0 %v13714_v58  ;;  %11106 = vtanh.f32 %v5376_v56  ;;  %v13516_v1 = vmul.f32 %v11105_v63, %v5180_v5  ;;  %v10777_v56 = vpack.c.bf16 %v5757_v53, %v5755_v48  ;;  %v5760_v63 = vld [vmem:[#allocation15 + $0xa8] sm:$0xff] }
0x10b4   :  { %10749 = vmatpush3.bf16.msra.mxu1 %v12124_v45  ;;  %v5373_v45 = vpop.permute.xlu1 %5372 }
0x10b5   :  { %10734 = vmatpush3.bf16.msra.mxu0 %v11963_v17  ;;  %10750 = vmatprep.subr.bf16.mxu1 %v13714_v58 }
0x10b6   :  { %10760 = vmatprep.subr.bf16.mxu0 %v10759_v13 }
0x10b8   :  { %9250 = vmatmul.mubr.f32.vlgmr.msra.gmra.mrb[76].mxu0 %v13516_v1  ;;  %10752 = vmatpush3.bf16.msra.mxu1 %v12131_v33 }
0x10b9   :  { %10753 = vmatprep.subr.bf16.mxu1 %v13714_v58  ;;  %5835 = vmatprep.mubr.f32.mxu0 %v13713_v59 }
0x10bc   :  { %10755 = vmatpush3.bf16.msra.mxu1 %v12137_v14  ;;  %v11107_v7 = vpop.eup %11106 }
0x10bd   :  { %10756 = vmatprep.subr.bf16.mxu1 %v13714_v58  ;;  %v5378_v17 = vmul.f32 %v11107_v7, %v5373_v45  ;;  %v5739_v58 = vld [vmem:[#allocation15] sm:$0xff]  ;;  %v5762_v7 = vld [vmem:[#allocation15 + $0xb8] sm:$0xff]  ;;  %v5194_v45 = vsel %vm5193_vm6, 1, %v13810_v9 }
0x10be   :  { %v10761_v39 = vpack.c.bf16 %v5741_v27, %v5739_v58  ;;  %v4687_v27 = vsel %vm4686_vm8, 1, %v13810_v9 }
0x10c0   :  { %10758 = vmatpush3.bf16.msra.mxu1 %v12143_v32  ;;  %v11132_v32 = vld [vmem:[%s13624_s13] ss:$0 sm:$0xff]  ;;  %10762 = vmatpush1.bf16.msra.mxu0 %v10761_v39  ;;  %v5768_v39 = vld [vmem:[#allocation15 + $0xe8] sm:$0xff] }
0x10c1   :  { %10764 = vmatprep.subr.bf16.mxu0 %v10763_v6  ;;  %v10789_v6 = vpack.c.bf16 %v5769_v60, %v5767_v54  ;;  %v5714_v54 = vld [vmem:[#allocation14 + $0x38] sm:$0xff] }
0x10c3   :  { %9285 = vmatmul.mubr.f32.vlgmr.msra.gmra.mrb[60].mxu1 %v5378_v17  ;;  %v10779_v17 = vpack.c.bf16 %v5762_v7, %v5760_v63  ;;  %v13812_v63 = vld [vmem:[#allocation49_spill] sm:$0xff] }
0x10c4   :  { %10766 = vmatpush1.bf16.msra.mxu0 %v10765_v61 }
0x10c5   :  { %10768 = vmatprep.subr.bf16.mxu0 %v10767_v26 }
0x10c8   :  { %10770 = vmatpush1.bf16.msra.mxu0 %v10769_v41 }
0x10c9   :  { %10772 = vmatprep.subr.bf16.mxu0 %v10771_v42  ;;  %v5961_v42 = vld [vmem:[#allocation17 + $0x80] sm:$0xff] }
0x10ca   :  { %v10823_v21 = vpack.c.bf16 %v5962_v20, %v5961_v42  ;;  %v5720_v42 = vld [vmem:[#allocation14 + $0x68] sm:$0xff] }
0x10cc   :  { %10774 = vmatpush1.bf16.msra.mxu0 %v10773_v31  ;;  %v5946_v31 = vld [vmem:[#allocation17 + $0x8] sm:$0xff]  ;;  %10824 = vmatprep.subr.bf16.mxu1 %v10823_v21 }
0x10cd   :  { %10776 = vmatprep.subr.bf16.mxu0 %v10775_v36  ;;  %v10825_v16 = vpack.c.bf16 %v5946_v31, %v5945_v29  ;;  %v1648_v36 = vpop.permute.xlu1 %1647  ;;  %v5719_v31 = vld [vmem:[#allocation14 + $0x60] sm:$0xff] }
0x10ce   :  { %vm1649_vm6 = vcmp.eq.s32.totalorder %v1648_v36, 1  ;;  %v5726_v36 = vld [vmem:[#allocation14 + $0x98] sm:$0xff] }
0x10cf   :  { %10826 = vmatpush3.bf16.msra.mxu1 %v10825_v16  ;;  %v5721_v16 = vld [vmem:[#allocation14 + $0x70] sm:$0xff] }
0x10d0   :  { %10778 = vmatpush1.bf16.msra.mxu0 %v10777_v56 }
0x10d1   :  { %10780 = vmatprep.subr.bf16.mxu0 %v10779_v17 }
0x116b   :  { %v5445_v43 = vpop.f32.mrb[74].mxu0 }
0x116c   :  { %v9181_v38 = vpop.f32.mrb[75].mxu0 }
0x116d   :  { %v5761_v38 = vld [vmem:[#allocation15 + $0xb0] sm:$0xff] }
0x1176   :  { %v5515_v46 = vpop.f32.mrb[58].mxu1 }
0x1177   :  { %v5516_v3 = vadd.f32 %v5515_v46, %v5445_v43  ;;  %v9216_v18 = vpop.f32.mrb[59].mxu1  ;;  %v5759_v43 = vld [vmem:[#allocation15 + $0xa0] sm:$0xff] }
0x1178   :  { %v10781_v46 = vpack.c.bf16 %v5761_v38, %v5759_v43  ;;  %v3673_v18 = vsel %vm3672_vm7, 1, %v13810_v9  ;;  %v13813_v43 = vld [vmem:[#allocation29_spill] sm:$0xff] }
0x1179   :  { %v13531_v51 = vadd.f32 %v11133_v47, %v5516_v3  ;;  %v5710_v47 = vld [vmem:[#allocation14 + $0x18] sm:$0xff] }
0x117a   :  { %10782 = vmatpush1.bf16.msra.mxu0 %v10781_v46  ;;  %v10791_v61 = vpack.c.bf16 %v5710_v47, %v5708_v57  ;;  %v13814_v46 = vld [vmem:[#allocation31_spill] sm:$0xff] }
0x117b   :  { %v5661_v23 = vmul.f32 0.5, %v13531_v51 }
0x118b   :  { %v5586_v33 = vpop.f32.mrb[76].mxu0 }
0x118c   :  { %v9251_v52 = vpop.f32.mrb[77].mxu0 }
0x118d   :  { %v5764_v52 = vld [vmem:[#allocation15 + $0xc8] sm:$0xff] }
0x1196   :  { %v5656_v22 = vpop.f32.mrb[60].mxu1 }
0x1197   :  { %v5657_v62 = vadd.f32 %v5656_v22, %v5586_v33  ;;  %v9286_v14 = vpop.f32.mrb[61].mxu1  ;;  %v537_v33 = vld [vmem:[%s13811_s6] sm:$0xff] }
0x1198   :  { %v5766_v22 = vld [vmem:[#allocation15 + $0xd8] sm:$0xff]  ;;  %v6127_v13 = vadd.s32 4294967295, %v537_v33  ;;  %v13815_v33 = vld [vmem:[#allocation35_spill] sm:$0xff] }
0x1199   :  { %v5660_v49 = vadd.f32 %v11132_v32, %v5657_v62  ;;  %v10783_v35 = vpack.c.bf16 %v5766_v22, %v5764_v52  ;;  %v5765_v62 = vld [vmem:[#allocation15 + $0xd0] sm:$0xff]  ;;  %v5770_v32 = vld [vmem:[#allocation15 + $0xf8] sm:$0xff] }
0x119a   :  { %v10785_v58 = vpack.c.bf16 %v5765_v62, %v5763_v50  ;;  %vm1637_vm10 = vcmp.eq.s32.totalorder %v6127_v13, 1  ;;  %vm1130_vm11 = vcmp.eq.s32.totalorder %v6127_v13, 0  ;;  %vm2651_vm12 = vcmp.eq.s32.totalorder %v6127_v13, 3  ;;  %v13816_v22 = vld [vmem:[#allocation38_spill] sm:$0xff] }
0x119b   :  { %v5677_v55 = vmul.f32 0.5, %v5660_v49  ;;  %11108 = vtanh.f32 %v5660_v49  ;;  %10784 = vmatprep.subr.bf16.mxu0 %v10783_v35  ;;  %v10787_v49 = vpack.c.bf16 %v5770_v32, %v5768_v39  ;;  %v1131_v10 = vsel %vm1130_vm11, 1, %v13810_v9  ;;  %v5709_v39 = vld [vmem:[#allocation14 + $0x10] sm:$0xff] }
0x119c   :  { %10786 = vmatpush1.bf16.msra.mxu0 %v10785_v58  ;;  %vm3665_vm13 = vcmp.eq.s32.totalorder %v6127_v13, 5  ;;  %vm2144_vm14 = vcmp.eq.s32.totalorder %v6127_v13, 2  ;;  %vm4679_vm15 = vcmp.eq.s32.totalorder %v6127_v13, 7  ;;  %vm3158_vm1 = vcmp.eq.s32.totalorder %v6127_v13, 4 }
0x119d   :  { %11110 = vtanh.f32 %v5677_v55  ;;  %10788 = vmatprep.subr.bf16.mxu0 %v10787_v49  ;;  %v1638_v55 = vsel %vm1637_vm10, 1, %v13810_v9  ;;  %v2145_v26 = vsel %vm2144_vm14, 1, %v13810_v9  ;;  %v4680_v34 = vsel %vm4679_vm15, 1, %v13810_v9  ;;  %v5712_v49 = vld [vmem:[#allocation14 + $0x28] sm:$0xff] }
0x119e   :  { %11112 = vtanh.f32 %v5661_v23  ;;  %v3666_v23 = vsel %vm3665_vm13, 1, %v13810_v9  ;;  %vm5693_vm2 = vcmp.eq.s32.totalorder %v6127_v13, 9  ;;  %v3159_v4 = vsel %vm3158_vm1, 1, %v13810_v9 }
0x119f   :  { %11114 = vtanh.f32 %v13531_v51  ;;  %v2652_v51 = vsel %vm2651_vm12, 1, %v13810_v9  ;;  %vm4172_vm3 = vcmp.eq.s32.totalorder %v6127_v13, 6  ;;  %v5694_v41 = vsel %vm5693_vm2, 1, %v13810_v9 }
0x11a0   :  { %10790 = vmatpush1.bf16.msra.mxu0 %v10789_v6  ;;  %v4173_v19 = vsel %vm4172_vm3, 1, %v13810_v9  ;;  %vm5186_vm4 = vcmp.eq.s32.totalorder %v6127_v13, 8  ;;  %v13818_v13 = vld [vmem:[#allocation42_spill] sm:$0xff] }
0x11a1   :  { %10792 = vmatprep.subr.bf16.mxu0 %v10791_v61  ;;  %v5187_v30 = vsel %vm5186_vm4, 1, %v13810_v9  ;;  %v10795_v61 = vpack.c.bf16 %v5714_v54, %v5712_v49  ;;  %v13822_v49 = vld [vmem:[#allocation34_spill] sm:$0xff] }
0x11a5   :  { %v11109_v11 = vpop.eup %11108 }
0x11a6   :  { %5684 = vrot.lane.b32.xlu0 %v11109_v11, %s11360_s8  ;;  %v1141_v11 = vpop.permute.xlu0 %1140 }
0x11a7   :  { %v11111_v40 = vpop.eup %11110  ;;  %vm1142_vm5 = vcmp.eq.s32.totalorder %v1141_v11, 1  ;;  %v5724_v11 = vld [vmem:[#allocation14 + $0x88] sm:$0xff] }
0x11a8   :  { %v5679_v28 = vmul.f32 0.5, %v11111_v40  ;;  %v11113_v3 = vpop.eup %11112  ;;  %v1143_v7 = vsel %vm1142_vm5, %v13812_v63, 0.0  ;;  %v5728_v63 = vld [vmem:[#allocation14 + $0xa8] sm:$0xff] }
0x11a9   :  { %v5663_v14 = vmul.f32 0.5, %v11113_v3  ;;  %v11115_v15 = vpop.eup %11114  ;;  %v1650_v38 = vsel %vm1649_vm6, %v13813_v43, %v1143_v7  ;;  %v5730_v7 = vld [vmem:[#allocation14 + $0xb8] sm:$0xff] }
0x11aa   :  { %4182 = vperm.xlu0 %10878, %v4180_v24   ;;  %v13538_v5 = vadd.f32 0.5, %v5679_v28  ;;  %v2155_v40 = vpop.permute.xlu0 %2154  ;;  %v2662_v24 = vpop.permute.xlu1 %2661 }
0x11ab   :  { %v13553_v0 = vadd.f32 0.5, %v5663_v14  ;;  %vm2156_vm0 = vcmp.eq.s32.totalorder %v2155_v40, 1  ;;  %vm2663_vm8 = vcmp.eq.s32.totalorder %v2662_v24, 1 }
0x11ac   :  { %5682 = vrot.lane.b32.xlu1 %v13538_v5, %s11361_s0  ;;  %v2157_v3 = vsel %vm2156_vm0, %v13814_v46, %v1650_v38  ;;  %v13819_v38 = vld [vmem:[#allocation48_spill] sm:$0xff] }
0x11ad   :  { %v2664_v52 = vsel %vm2663_vm8, %v13815_v33, %v2157_v3  ;;  %v5727_v3 = vld [vmem:[#allocation14 + $0xa0] sm:$0xff]  ;;  %vm6085_vm8 = vcmask 7168  }
0x11ae   :  { %5196 = vperm.xlu0 %10878, %v5194_v45   ;;  %v3169_v48 = vpop.permute.xlu0 %3168 }
0x11af   :  { %vm3170_vm7 = vcmp.eq.s32.totalorder %v3169_v48, 1  ;;  %v10805_v48 = vpack.c.bf16 %v5721_v16, %v5719_v31  ;;  %v5948_v31 = vld [vmem:[#allocation17 + $0x18] sm:$0xff] }
0x11b0   :  { %3675 = vperm.xlu1 %10879, %v3673_v18   ;;  %v3171_v35 = vsel %vm3170_vm7, %v13816_v22, %v2664_v52  ;;  %v5734_v52 = vld [vmem:[#allocation14 + $0xd8] sm:$0xff] }
0x11b2   :  { %5686 = vrot.lane.b32.xlu0 %v13538_v5, %s11362_s7 }
0x11b4   :  { %4689 = vperm.xlu1 %10879, %v4687_v27   ;;  %v5707_v27 = vld [vmem:[#allocation14] sm:$0xff] }
0x11b5   :  { %v10793_v47 = vpack.c.bf16 %v5709_v39, %v5707_v27  ;;  %v5736_v27 = vld [vmem:[#allocation14 + $0xe8] sm:$0xff]  ;;  %v5738_v39 = vld [vmem:[#allocation14 + $0xf8] sm:$0xff] }
0x11b6   :  { %5666 = vrot.lane.b32.xlu0 %v13553_v0, %s11361_s0 }
0x11b8   :  { %5703 = vperm.xlu1 %10879, %v5701_v12  }
0x11ba   :  { %1640 = vperm.xlu0 %10878, %v1638_v55  }
0x11bc   :  { %1133 = vperm.xlu1 %10879, %v1131_v10   ;;  %v5711_v10 = vld [vmem:[#allocation14 + $0x20] sm:$0xff] }
0x11be   :  { %2654 = vperm.xlu0 %10878, %v2652_v51   ;;  %v5713_v51 = vld [vmem:[#allocation14 + $0x30] sm:$0xff] }
0x11c0   :  { %5668 = vrot.lane.b32.xlu1 %v11115_v15, %s11360_s8 }
0x11c2   :  { %3668 = vperm.xlu0 %10878, %v3666_v23   ;;  %v5716_v23 = vld [vmem:[#allocation14 + $0x48] sm:$0xff] }
0x11c4   :  { %2147 = vperm.xlu1 %10879, %v2145_v26   ;;  %v5718_v26 = vld [vmem:[#allocation14 + $0x58] sm:$0xff] }
0x11c6   :  { %4682 = vperm.xlu0 %10878, %v4680_v34   ;;  %v10797_v34 = vpack.c.bf16 %v5713_v51, %v5711_v10  ;;  %v13824_v10 = vld [vmem:[#allocation32_spill] sm:$0xff] }
0x11c8   :  { %3161 = vperm.xlu1 %10879, %v3159_v4   ;;  %v10799_v4 = vpack.c.bf16 %v5718_v26, %v5716_v23 }
0x11ca   :  { %5696 = vperm.xlu0 %10878, %v5694_v41   ;;  %v5715_v41 = vld [vmem:[#allocation14 + $0x40] sm:$0xff] }
0x11cc   :  { %4175 = vperm.xlu1 %10879, %v4173_v19   ;;  %v5717_v19 = vld [vmem:[#allocation14 + $0x50] sm:$0xff] }
0x11cd   :  { %v10801_v29 = vpack.c.bf16 %v5717_v19, %v5715_v41 }
0x11d0   :  { %5189 = vperm.xlu1 %10879, %v5187_v30  }
0x11d4   :  { %5670 = vrot.lane.b32.xlu1 %v13553_v0, %s11362_s7 }
0x1218   :  { %v5685_v28 = vpop.permute.xlu0 %5684 }
0x1219   :  { %v5689_v56 = vmul.f32 %v5685_v28, %v13538_v5  ;;  %v13817_v5 = vld [vmem:[#allocation39_spill] sm:$0xff]  ;;  %v10807_v28 = vpack.c.bf16 %v5726_v36, %v5724_v11  ;;  %v5966_v36 = vld [vmem:[#allocation17 + $0xa8] sm:$0xff] }
0x121a   :  { %v5965_v11 = vld [vmem:[#allocation17 + $0xa0] sm:$0xff] }
0x121e   :  { %v5683_v53 = vpop.permute.xlu1 %5682 }
0x121f   :  { %v5688_v9 = vmul.f32 %v5683_v53, %v13496_v44 }
0x1221   :  { %v5690_v45 = vadd.f32 %v5689_v56, %v5688_v9  ;;  %v5723_v9 = vld [vmem:[#allocation14 + $0x80] sm:$0xff]  ;;  %v5725_v56 = vld [vmem:[#allocation14 + $0x90] sm:$0xff] }
0x1222   :  { %v10809_v43 = vpack.c.bf16 %v5725_v56, %v5723_v9  ;;  %v5952_v9 = vld [vmem:[#allocation17 + $0x38] sm:$0xff] }
0x1223   :  { %11116 = vtanh.f32 %v5690_v45 }
0x1229   :  { %v4183_v17 = vpop.permute.xlu0 %4182 }
0x122a   :  { %vm4184_vm10 = vcmp.eq.s32.totalorder %v4183_v17, 1 }
0x122d   :  { %v5197_v18 = vpop.permute.xlu0 %5196  ;;  %v11117_v60 = vpop.eup %11116 }
0x122e   :  { %vm5198_vm12 = vcmp.eq.s32.totalorder %v5197_v18, 1  ;;  %v5729_v18 = vld [vmem:[#allocation14 + $0xb0] sm:$0xff] }
0x122f   :  { %v3676_v44 = vpop.permute.xlu1 %3675 }
0x1230   :  { %vm3677_vm9 = vcmp.eq.s32.totalorder %v3676_v44, 1  ;;  %v13820_v44 = vld [vmem:[#allocation28_spill] sm:$0xff] }
0x1231   :  { %v3678_v50 = vsel %vm3677_vm9, %v13817_v5, %v3171_v35  ;;  %v5687_v62 = vpop.permute.xlu0 %5686  ;;  %v10813_v5 = vpack.c.bf16 %v5729_v18, %v5727_v3  ;;  %v5955_v3 = vld [vmem:[#allocation17 + $0x50] sm:$0xff] }
0x1232   :  { %v4185_v58 = vsel %vm4184_vm10, %v13818_v13, %v3678_v50  ;;  %v5692_v6 = vmul.f32 %v11117_v60, %v5687_v62  ;;  %v13821_v50 = vld [vmem:[#allocation47_spill] sm:$0xff] }
0x1233   :  { %v4690_v14 = vpop.permute.xlu1 %4689  ;;  %v5731_v13 = vld [vmem:[#allocation14 + $0xc0] sm:$0xff] }
0x1234   :  { %vm4691_vm11 = vcmp.eq.s32.totalorder %v4690_v14, 1 }
0x1235   :  { %v4692_v32 = vsel %vm4691_vm11, %v13334_v2, %v4185_v58  ;;  %v5667_v12 = vpop.permute.xlu0 %5666  ;;  %v5733_v58 = vld [vmem:[#allocation14 + $0xd0] sm:$0xff] }
0x1236   :  { %v5199_v55 = vsel %vm5198_vm12, %v13516_v1, %v4692_v32  ;;  %v5722_v1 = vld [vmem:[#allocation14 + $0x78] sm:$0xff]  ;;  %v5672_v53 = vmul.f32 %v5667_v12, %v13473_v8  ;;  %v5732_v8 = vld [vmem:[#allocation14 + $0xc8] sm:$0xff]  ;;  %v13823_v12 = vld [vmem:[#allocation37_spill] sm:$0xff] }
0x1237   :  { %v5704_v57 = vpop.permute.xlu1 %5703  ;;  %v10803_v21 = vpack.c.bf16 %v5722_v1, %v5720_v42  ;;  %v10815_v14 = vpack.c.bf16 %v5734_v52, %v5732_v8  ;;  %v5963_v1 = vld [vmem:[#allocation17 + $0x90] sm:$0xff]  ;;  %v5973_v8 = vld [vmem:[#allocation17 + $0xe0] sm:$0xff]  ;;  %v5974_v52 = vld [vmem:[#allocation17 + $0xe8] sm:$0xff] }
0x1238   :  { %vm5705_vm13 = vcmp.eq.s32.totalorder %v5704_v57, 1 }
0x1239   :  { %v5706_v15 = vsel %vm5705_vm13, %v5692_v6, %v5199_v55  ;;  %v1641_v30 = vpop.permute.xlu0 %1640  ;;  %v10817_v6 = vpack.c.bf16 %v5733_v58, %v5731_v13  ;;  %v5735_v55 = vld [vmem:[#allocation14 + $0xe0] sm:$0xff]  ;;  %v5959_v58 = vld [vmem:[#allocation17 + $0x70] sm:$0xff] }
0x123a   :  { %5836 = vmatmul.mubr.f32.vlgmr.msra.gmra.mrb[78].mxu0 %v5706_v15  ;;  %vm1642_vm1 = vcmp.eq.s32.totalorder %v1641_v30, 1 }
0x123b   :  { %10794 = vmatpush1.bf16.msra.mxu0 %v10793_v47  ;;  %v1134_v2 = vpop.permute.xlu1 %1133  ;;  %5906 = vmatprep.mubr.f32.mxu0 %v13713_v59  ;;  %v10819_v47 = vpack.c.bf16 %v5738_v39, %v5736_v27  ;;  %v5960_v27 = vld [vmem:[#allocation17 + $0x78] sm:$0xff] }
0x123c   :  { %10796 = vmatprep.subr.bf16.mxu0 %v10795_v61  ;;  %vm1135_vm14 = vcmp.eq.s32.totalorder %v1134_v2, 1  ;;  %v5737_v61 = vld [vmem:[#allocation14 + $0xf0] sm:$0xff]  ;;  %v10853_v39 = vpack.c.bf16 %v5960_v27, %v5959_v58 }
0x123d   :  { %v2655_v24 = vpop.permute.xlu0 %2654  ;;  %v1136_v46 = vsel %vm1135_vm14, %v13819_v38, 0.0  ;;  %v10821_v23 = vpack.c.bf16 %v5737_v61, %v5735_v55  ;;  %v13825_v2 = vld [vmem:[#allocation41_spill] sm:$0xff] }
0x123e   :  { %v1643_v22 = vsel %vm1642_vm1, %v13820_v44, %v1136_v46  ;;  %vm2656_vm3 = vcmp.eq.s32.totalorder %v2655_v24, 1  ;;  %v5949_v24 = vld [vmem:[#allocation17 + $0x20] sm:$0xff]  ;;  %v5971_v46 = vld [vmem:[#allocation17 + $0xd0] sm:$0xff] }
0x123f   :  { %10798 = vmatpush1.bf16.msra.mxu0 %v10797_v34  ;;  %v5669_v20 = vpop.permute.xlu1 %5668 }
0x1240   :  { %10800 = vmatprep.subr.bf16.mxu0 %v10799_v4  ;;  %v5673_v40 = vmul.f32 %v5669_v20, %v13553_v0  ;;  %v10811_v0 = vpack.c.bf16 %v5730_v7, %v5728_v63  ;;  %v5964_v20 = vld [vmem:[#allocation17 + $0x98] sm:$0xff]  ;;  %v5969_v63 = vld [vmem:[#allocation17 + $0xc0] sm:$0xff]  ;;  %v5970_v7 = vld [vmem:[#allocation17 + $0xc8] sm:$0xff] }
0x1241   :  { %v3669_v33 = vpop.permute.xlu0 %3668 }
0x1242   :  { %v5674_v45 = vadd.f32 %v5673_v40, %v5672_v53  ;;  %vm3670_vm5 = vcmp.eq.s32.totalorder %v3669_v33, 1  ;;  %v10831_v40 = vpack.c.bf16 %v5966_v36, %v5965_v11  ;;  %v5956_v33 = vld [vmem:[#allocation17 + $0x58] sm:$0xff] }
0x1243   :  { %10802 = vmatpush1.bf16.msra.mxu0 %v10801_v29  ;;  %v2148_v59 = vpop.permute.xlu1 %2147  ;;  %v10827_v29 = vpack.c.bf16 %v5964_v20, %v5963_v1  ;;  %v10845_v44 = vpack.c.bf16 %v5956_v33, %v5955_v3  ;;  %v6129_v36 = vld [vmem:[%s13629_s18] ss:$0 sm:$0xff] }
0x1244   :  { %10804 = vmatprep.subr.bf16.mxu0 %v10803_v21  ;;  %vm2149_vm15 = vcmp.eq.s32.totalorder %v2148_v59, 1  ;;  %11118 = vtanh.f32 %v5674_v45  ;;  %v5947_v21 = vld [vmem:[#allocation17 + $0x10] sm:$0xff]  ;;  %v5950_v59 = vld [vmem:[#allocation17 + $0x28] sm:$0xff]  ;;  %v10839_v45 = vpack.c.bf16 %v5970_v7, %v5969_v63  ;;  %v6130_v7 = vld [vmem:[%s13630_s19] ss:$0 sm:$0xff] }
0x1245   :  { %v2150_v62 = vsel %vm2149_vm15, %v13821_v50, %v1643_v22  ;;  %v4683_v32 = vpop.permute.xlu0 %4682  ;;  %v10829_v16 = vpack.c.bf16 %v5948_v31, %v5947_v21  ;;  %10828 = vmatprep.subr.bf16.mxu1 %v10827_v29  ;;  %v10847_v22 = vpack.c.bf16 %v5974_v52, %v5973_v8  ;;  %v5975_v50 = vld [vmem:[#allocation17 + $0xf0] sm:$0xff] }
0x1246   :  { %v2657_v54 = vsel %vm2656_vm3, %v13822_v49, %v2150_v62  ;;  %vm4684_vm6 = vcmp.eq.s32.totalorder %v4683_v32, 1  ;;  %v5976_v62 = vld [vmem:[#allocation17 + $0xf8] sm:$0xff]  ;;  %v13826_v49 = vld [vmem:[#allocation25_spill] sm:$0xff] }
0x1247   :  { %10806 = vmatpush1.bf16.msra.mxu0 %v10805_v48  ;;  %v3162_v17 = vpop.permute.xlu1 %3161  ;;  %10830 = vmatpush3.bf16.msra.mxu1 %v10829_v16  ;;  %v5967_v48 = vld [vmem:[#allocation17 + $0xb0] sm:$0xff]  ;;  %v10851_v13 = vpack.c.bf16 %v5976_v62, %v5975_v50  ;;  %v5913_v32 = vld [vmem:[%s13627_s16] sm:$0x3] }
0x1248   :  { %10808 = vmatprep.subr.bf16.mxu0 %v10807_v28  ;;  %vm3163_vm2 = vcmp.eq.s32.totalorder %v3162_v17, 1  ;;  %10832 = vmatprep.subr.bf16.mxu1 %v10831_v40  ;;  %v5951_v28 = vld [vmem:[#allocation17 + $0x30] sm:$0xff]  ;;  %v5953_v17 = vld [vmem:[#allocation17 + $0x40] sm:$0xff] }
0x1249   :  { %v3164_v57 = vsel %vm3163_vm2, %v13823_v12, %v2657_v54  ;;  %v5697_v4 = vpop.permute.xlu0 %5696  ;;  %v10837_v56 = vpack.c.bf16 %v5952_v9, %v5951_v28  ;;  %v13827_v54 = vsub.s32 0, %v13826_v49 }
0x124a   :  { %v3671_v51 = vsel %vm3670_vm5, %v13824_v10, %v3164_v57  ;;  %vm5698_vm7 = vcmp.eq.s32.totalorder %v5697_v4, 1 }
0x124b   :  { %10810 = vmatpush1.bf16.msra.mxu0 %v10809_v43  ;;  %v4176_v35 = vpop.permute.xlu1 %4175  ;;  %v5954_v43 = vld [vmem:[#allocation17 + $0x48] sm:$0xff] }
0x124c   :  { %10812 = vmatprep.subr.bf16.mxu0 %v10811_v0  ;;  %vm4177_vm4 = vcmp.eq.s32.totalorder %v4176_v35, 1  ;;  %v10841_v38 = vpack.c.bf16 %v5954_v43, %v5953_v17  ;;  %v5972_v0 = vld [vmem:[#allocation17 + $0xd8] sm:$0xff]  ;;  %v5957_v35 = vld [vmem:[#allocation17 + $0x60] sm:$0xff] }
0x124d   :  { %v4178_v34 = vsel %vm4177_vm4, %v13825_v2, %v3671_v51  ;;  %v10843_v18 = vpack.c.bf16 %v5972_v0, %v5971_v46  ;;  %v6131_v43 = vld [vmem:[#allocation3] ss:$0 sm:$0xff] }
0x124e   :  { %v11119_v26 = vpop.eup %11118  ;;  %v4685_v19 = vsel %vm4684_vm6, %v13301_v25, %v4178_v34  ;;  %v10833_v25 = vpack.c.bf16 %v5950_v59, %v5949_v24 }
0x124f   :  { %10814 = vmatpush1.bf16.msra.mxu0 %v10813_v5  ;;  %v5190_v60 = vpop.permute.xlu1 %5189  ;;  %v5958_v5 = vld [vmem:[#allocation17 + $0x68] sm:$0xff] }
0x1250   :  { %10816 = vmatprep.subr.bf16.mxu0 %v10815_v14  ;;  %vm5191_vm0 = vcmp.eq.s32.totalorder %v5190_v60, 1  ;;  %10834 = vmatpush3.bf16.msra.mxu1 %v10833_v25  ;;  %v10849_v14 = vpack.c.bf16 %v5958_v5, %v5957_v35  ;;  %v5918_v60 = vrot.slane %v5913_v32, %v13827_v54 }
0x1251   :  { %v5192_v30 = vsel %vm5191_vm0, %v13477_v37, %v4685_v19  ;;  %v5968_v37 = vld [vmem:[#allocation17 + $0xb8] sm:$0xff] }
0x1252   :  { %v10835_v53 = vpack.c.bf16 %v5968_v37, %v5967_v48 }
0x1253   :  { %10818 = vmatpush1.bf16.msra.mxu0 %v10817_v6  ;;  %v5671_v15 = vpop.permute.xlu1 %5670  ;;  %v13828_v6 = vsub.s32 1, %v13826_v49 }
0x1254   :  { %10820 = vmatprep.subr.bf16.mxu0 %v10819_v47  ;;  %v5676_v41 = vmul.f32 %v11119_v26, %v5671_v15  ;;  %10836 = vmatprep.subr.bf16.mxu1 %v10835_v53 }
0x1255   :  { %10838 = vmatpush3.bf16.msra.mxu1 %v10837_v56  ;;  %v5922_v12 = vrot.slane %v5913_v32, %v13828_v6 }
0x1256   :  { %v5699_v42 = vsel %vm5698_vm7, %v5676_v41, %v5192_v30  ;;  %10840 = vmatprep.subr.bf16.mxu1 %v10839_v45 }
0x1257   :  { %10822 = vmatpush1.bf16.msra.mxu0 %v10821_v23 }
0x1259   :  { %10842 = vmatpush3.bf16.msra.mxu1 %v10841_v38 }
0x125a   :  { %5907 = vmatmul.mubr.f32.vlgmr.msra.gmra.mrb[78].mxu0 %v5699_v42  ;;  %10844 = vmatprep.subr.bf16.mxu1 %v10843_v18 }
0x125d   :  { %10846 = vmatpush3.bf16.msra.mxu1 %v10845_v44 }
0x125e   :  { %10848 = vmatprep.subr.bf16.mxu1 %v10847_v22 }
0x1261   :  { %10850 = vmatpush3.bf16.msra.mxu1 %v10849_v14 }
0x1262   :  { %10852 = vmatprep.subr.bf16.mxu1 %v10851_v13 }
0x1265   :  { %10854 = vmatpush3.bf16.msra.mxu1 %v10853_v39 }
0x132d   :  { %v5908_v57 = vpop.f32.mrb[78].mxu0 }
0x132e   :  { %v5925_v47 = vadd.f32 %v5918_v60, %v5908_v57  ;;  %v5910_v55 = vpop.f32.mrb[79].mxu0 }
0x132f   :  { %v5926_v61 = vadd.f32 %v5922_v12, %v5910_v55 }
0x1330   :  { %v5929_v10 = vmul.f32 %v5925_v47, %v5925_v47  ;;  %v5927_v21 = vmul.f32 0.5, %v5925_v47 }
0x1331   :  { %v5930_v51 = vmul.f32 %v5926_v61, %v5926_v61  ;;  %v5928_v20 = vmul.f32 0.5, %v5926_v61 }
0x1332   :  { %v5931_v15 = vmul.f32 %v5929_v10, %v5925_v47 }
0x1333   :  { %v5932_v23 = vmul.f32 %v5930_v51, %v5926_v61 }
0x1334   :  { %v5933_v26 = vmul.f32 0.044715, %v5931_v15 }
0x1335   :  { %v5934_v2 = vmul.f32 0.044715, %v5932_v23 }
0x1336   :  { %v5935_v34 = vadd.f32 %v5933_v26, %v5925_v47 }
0x1337   :  { %v5936_v4 = vadd.f32 %v5934_v2, %v5926_v61 }
0x1338   :  { %v5937_v41 = vmul.f32 0.7978846, %v5935_v34 }
0x1339   :  { %v5938_v19 = vmul.f32 0.7978846, %v5936_v4 }
0x133a   :  { %11120 = vtanh.f32 %v5937_v41 }
0x133b   :  { %11122 = vtanh.f32 %v5938_v19 }
0x1344   :  { %v11121_v30 = vpop.eup %11120 }
0x1345   :  { %v11123_v42 = vpop.eup %11122  ;;  %v5941_v1 = vadd.f32 1.0, %v11121_v30 }
0x1346   :  { %v5942_v29 = vadd.f32 1.0, %v11123_v42 }
0x1347   :  { %v5943_v16 = vmul.f32 %v5941_v1, %v5927_v21 }
0x1348   :  { %v5944_v31 = vmul.f32 %v5942_v29, %v5928_v20 }
0x134a   :  { %6048 = vmatprep.mubr.f32.mxu1 %v5944_v31 }
0x134b   :  { %6049 = vmatmul.mubr.f32.vlgmr.msra.gmra.mrb[62].mxu1 %v5943_v16 }
0x141e   :  { %v7184_v11 = vpop.f32.mrb[62].mxu1 }
0x141f   :  { %v7185_v40 = vpop.f32.mrb[63].mxu1 }
0x1420   :  { %v7186_v24 = vadd.f32 %v7185_v40, %v7184_v11 }
0x1422   :  { %v6051_v59 = vadd.f32 %v7186_v24, %v6129_v36 }
0x1424   :  { %v6055_v25 = vmul.f32 %v6051_v59, %v6051_v59  ;;  %v6054_v56 = vmul.f32 0.5, %v6051_v59 }
0x1426   :  { %v6056_v48 = vmul.f32 %v6055_v25, %v6051_v59 }
0x1428   :  { %v6057_v37 = vmul.f32 0.044715, %v6056_v48 }
0x142a   :  { %v6058_v53 = vadd.f32 %v6057_v37, %v6051_v59 }
0x142c   :  { %v6059_v28 = vmul.f32 0.7978846, %v6058_v53 }
0x142e   :  { %11124 = vtanh.f32 %v6059_v28 }
0x1438   :  { %v11125_v9 = vpop.eup %11124 }
0x1439   :  { %v6061_v63 = vadd.f32 1.0, %v11125_v9 }
0x143b   :  { %v6062_v45 = vmul.f32 %v6061_v63, %v6054_v56 }
0x143d   :  { %v6070_v17 = vmul.f32 %v6130_v7, %v6062_v45 }
0x143f   :  { %6071 = vadd.xlane.f32.xlu0 %v6070_v17 }
0x14cc   :  { %v6072_v38 = vpop.xlane.xlu0 %6071 }
0x14cd   :  { %v6080_v46 = vadd.f32 %v6131_v43, %v6072_v38 }
0x14cf   :  { %v6081_v0 = vmul.f32 0.5, %v6080_v46 }
0x14d1   :  { %11126 = vtanh.f32 %v6081_v0 }
0x14db   :  { %v11127_v3 = vpop.eup %11126 }
0x14dc   :  { %v6083_v18 = vmul.f32 0.5, %v11127_v3 }
0x14de   :  { %v6084_v33 = vadd.f32 0.5, %v6083_v18 }
0x14e0   :  { %6086 = vst.msk [vmem:[%s13632_s21] sm:$0xff] %vm6085_vm8, %v6084_v33 }
0x14e1   :  { %6091 = vsyncpa [#allocation5], 1 }
0x14e2   :  { %6092 = vsyncpa [#allocation7], 1 }
0x14e3   :  { %6093 = vsyncpa [#allocation10], 1 }
0x14e4   :  { %6094 = vsyncpa [#allocation13], 1 }
0x14e5   :  { %6095 = vsyncpa [#allocation16], 1 }

</bundles_post_ra>
